<compile_context>
chip_gen: v6e
topology: v6e:2x2x1
jax: 0.10.0
libtpu: 0.0.40
codegen_flags: <defaults>
</compile_context>

<pallas_src>
import functools

import jax
import jax.numpy as jnp
from jax.experimental import pallas as pl
from jax.experimental.pallas import tpu as pltpu

EPS = 1e-5


def _detect_vmem_limit_bytes():
    """Per-chip scoped-VMEM limit: ~3/4 of physical, capped at 100 MiB."""
    default_cap = 64 * 1024 * 1024          # v7x per-TC capacity (smallest)
    try:
        info = pltpu.get_tpu_info()
        cap = int(getattr(info, "vmem_capacity_bytes", default_cap))
    except Exception:
        cap = default_cap
    return int(min(cap * 3 // 4, 100 * 1024 * 1024))


_VMEM_LIMIT = _detect_vmem_limit_bytes()


def _pick_block_batch(N, H, W, C, use_im2col):
    """Images per grid step, sized against the VMEM budget (divides N)."""
    # Rough per-image working set (bytes/elem of H*W*C): double-buffered bf16
    # in/out + f32 matmul result + (im2col only) the 9C bf16 patch buffer.
    bytes_per_elem = 56 if use_im2col else 32
    per_img = max(1, H * W * C * bytes_per_elem)
    b = max(1, min(N, _VMEM_LIMIT // per_img))
    while N % b != 0:
        b -= 1
    return max(b, 1)


def _taps3x3(x):
    """9 shifted taps of a batched NHWC image, zero-filled borders.

    x: (B, H, W, C) value (bf16).  Tap order (dy, dx) row-major matches a
    (kh, kw, cin, cout) -> (9*cin, cout) reshaped weight.
    """
    B, H, W, C = x.shape
    zrow = jnp.zeros((B, 1, W, C), x.dtype)
    zcol = jnp.zeros((B, H, 1, C), x.dtype)
    taps = []
    for dy in (-1, 0, 1):
        if dy == -1:
            xs = jnp.concatenate([zrow, x[:, : H - 1]], axis=1)
        elif dy == 1:
            xs = jnp.concatenate([x[:, 1:], zrow], axis=1)
        else:
            xs = x
        for dx in (-1, 0, 1):
            if dx == -1:
                xt = jnp.concatenate([zcol, xs[:, :, : W - 1, :]], axis=2)
            elif dx == 1:
                xt = jnp.concatenate([xs[:, :, 1:, :], zcol], axis=2)
            else:
                xt = xs
            taps.append(xt)
    return taps


def _conv3x3(x_bf16, w_bf16, use_im2col):
    """3x3 / stride-1 / pad-1 conv; bf16 MXU operands, f32 accumulation.

    x: (B, H, W, Cin) bf16, w: (9*Cin, Cout) bf16 -> (B*H*W, Cout) f32.
    """
    B, H, W, C = x_bf16.shape
    M = B * H * W
    taps = _taps3x3(x_bf16)
    if use_im2col:
        patches = jnp.concatenate([t.reshape(M, C) for t in taps], axis=1)
        return jnp.dot(patches, w_bf16, preferred_element_type=jnp.float32)
    acc = jnp.dot(taps[0].reshape(M, C), w_bf16[0:C, :],
                  preferred_element_type=jnp.float32)
    for t in range(1, 9):
        acc = acc + jnp.dot(taps[t].reshape(M, C),
                            w_bf16[t * C:(t + 1) * C, :],
                            preferred_element_type=jnp.float32)
    return acc


def _store_partial_stats(s_ref, y_f32):
    """Write this block's (sum, sum-of-squares) partial stats: (1, 2, C)."""
    ssum = jnp.sum(y_f32, axis=0, keepdims=True)          # (1, C)
    ssq = jnp.sum(y_f32 * y_f32, axis=0, keepdims=True)   # (1, C)
    C = y_f32.shape[-1]
    s_ref[...] = jnp.concatenate([ssum, ssq], axis=0).reshape(1, 2, C)


# ----------------------------------------------------------------------------
# Kernel 1: conv1 (bf16 taps, f32 accum) + per-block partial stats.
# ----------------------------------------------------------------------------
def conv_stats_kernel(x_ref, w_ref, y_ref, s_ref, *, use_im2col):
    B, H, W, _ = x_ref.shape
    x = x_ref[...]                                   # (B, H, W, Cin) bf16
    w = w_ref[...]                                   # (9*Cin, Cout) bf16
    Cout = w.shape[1]
    y = _conv3x3(x, w, use_im2col)                   # (B*H*W, Cout) f32
    y_ref[...] = y.reshape(B, H, W, Cout).astype(y_ref.dtype)   # bf16 store
    _store_partial_stats(s_ref, y)


# ----------------------------------------------------------------------------
# Kernel 2: bn1 affine (pre-folded scale/shift) + relu + conv2 + partial stats.
# ----------------------------------------------------------------------------
def bn_relu_conv_stats_kernel(y1_ref, sc_ref, sh_ref, w_ref, y2_ref, s_ref,
                              *, use_im2col):
    B, H, W, C = y1_ref.shape
    scale = sc_ref[...].reshape(1, 1, 1, C)          # (1,1,1,C) f32
    shift = sh_ref[...].reshape(1, 1, 1, C)
    y1 = y1_ref[...].astype(jnp.float32)             # (B,H,W,C)
    h = jnp.maximum(y1 * scale + shift, 0.0).astype(jnp.bfloat16)  # cast once
    w = w_ref[...]
    Cout = w.shape[1]
    y2 = _conv3x3(h, w, use_im2col)                  # (B*H*W, Cout) f32
    y2_ref[...] = y2.reshape(B, H, W, Cout).astype(y2_ref.dtype)
    _store_partial_stats(s_ref, y2)


# ----------------------------------------------------------------------------
# Kernel 3: bn2 affine + identity residual + relu.
# ----------------------------------------------------------------------------
def bn_residual_relu_kernel(y2_ref, sc_ref, sh_ref, x_ref, o_ref):
    C = y2_ref.shape[-1]
    scale = sc_ref[...].reshape(1, 1, 1, C)
    shift = sh_ref[...].reshape(1, 1, 1, C)
    y2 = y2_ref[...].astype(jnp.float32)
    res = x_ref[...].astype(jnp.float32)
    o_ref[...] = jnp.maximum(y2 * scale + shift + res, 0.0)


# ----------------------------------------------------------------------------
# Wrapper helpers
# ----------------------------------------------------------------------------
def _fold_bn(stats_partial, gamma, beta, count):
    """Reduce per-block partial sums and fold training-mode BN into scale/shift."""
    s = jnp.sum(stats_partial.astype(jnp.float32), axis=0)   # (2, C)
    mean = s[0] * (1.0 / count)
    var = s[1] * (1.0 / count) - mean * mean                  # biased variance
    scale = gamma.astype(jnp.float32) * jax.lax.rsqrt(var + EPS)
    shift = beta.astype(jnp.float32) - mean * scale
    C = scale.shape[0]
    return scale.reshape(1, C), shift.reshape(1, C)


def prepare_params(params, C):
    """Fold PyTorch (Cout,Cin,kh,kw) weights to im2col (9*Cin,Cout) bf16."""
    w1 = jnp.transpose(params["conv1_w"], (2, 3, 1, 0)).reshape(9 * C, C)
    w2 = jnp.transpose(params["conv2_w"], (2, 3, 1, 0)).reshape(9 * C, C)
    return {
        "w1": w1.astype(jnp.bfloat16),
        "w2": w2.astype(jnp.bfloat16),
        "g1": params["bn1_gamma"].astype(jnp.float32),
        "b1": params["bn1_beta"].astype(jnp.float32),
        "g2": params["bn2_gamma"].astype(jnp.float32),
        "b2": params["bn2_beta"].astype(jnp.float32),
    }


def basic_block_forward_nhwc(x_nhwc, prep):
    """NHWC-native basic_block (down=None, stride=1).  x: (N,H,W,C) bf16."""
    N, H, W, C = x_nhwc.shape
    count = float(N * H * W)
    use_im2col = C < 128                       # fused K=9C only for narrow stages
    B_blk = _pick_block_batch(N, H, W, C, use_im2col)
    num_blocks = N // B_blk

    img_spec = pl.BlockSpec((B_blk, H, W, C), lambda i: (i, 0, 0, 0))
    w_spec = pl.BlockSpec((9 * C, C), lambda i: (0, 0))
    vec_spec = pl.BlockSpec((1, C), lambda i: (0, 0))
    stats_spec = pl.BlockSpec((1, 2, C), lambda i: (i, 0, 0))   # per-block partials

    cparams = pltpu.CompilerParams(
        dimension_semantics=("parallel",),     # no shared accumulator -> parallel
        vmem_limit_bytes=_VMEM_LIMIT)

    # ---- pass 1: conv1 + partial stats1 -----------------------------------
    y1, s1p = pl.pallas_call(
        functools.partial(conv_stats_kernel, use_im2col=use_im2col),
        grid=(num_blocks,),
        in_specs=[img_spec, w_spec],
        out_specs=[img_spec, stats_spec],
        out_shape=[jax.ShapeDtypeStruct((N, H, W, C), jnp.bfloat16),
                   jax.ShapeDtypeStruct((num_blocks, 2, C), jnp.float32)],
        compiler_params=cparams,
    )(x_nhwc, prep["w1"])

    scale1, shift1 = _fold_bn(s1p, prep["g1"], prep["b1"], count)   # tiny XLA op

    # ---- pass 2: bn1 + relu + conv2 + partial stats2 -----------------------
    y2, s2p = pl.pallas_call(
        functools.partial(bn_relu_conv_stats_kernel, use_im2col=use_im2col),
        grid=(num_blocks,),
        in_specs=[img_spec, vec_spec, vec_spec, w_spec],
        out_specs=[img_spec, stats_spec],
        out_shape=[jax.ShapeDtypeStruct((N, H, W, C), jnp.bfloat16),
                   jax.ShapeDtypeStruct((num_blocks, 2, C), jnp.float32)],
        compiler_params=cparams,
    )(y1, scale1, shift1, prep["w2"])

    scale2, shift2 = _fold_bn(s2p, prep["g2"], prep["b2"], count)

    # ---- pass 3: bn2 + identity residual + relu ----------------------------
    out_nhwc = pl.pallas_call(
        bn_residual_relu_kernel,
        grid=(num_blocks,),
        in_specs=[img_spec, vec_spec, vec_spec, img_spec],
        out_specs=img_spec,
        out_shape=jax.ShapeDtypeStruct((N, H, W, C), jnp.float32),
        compiler_params=cparams,
    )(y2, scale2, shift2, x_nhwc)

    return out_nhwc


@jax.jit
def basic_block_forward(x_nchw, params):
    """PyTorch-style NCHW entry point.  For stacked blocks, prefer calling
    basic_block_forward_nhwc directly and keep activations NHWC/bf16 end-to-end
    (the layout transposes here exist only for API compatibility)."""
    N, C, H, W = x_nchw.shape
    x_nhwc = jnp.transpose(x_nchw, (0, 2, 3, 1)).astype(jnp.bfloat16)
    prep = prepare_params(params, C)
    out_nhwc = basic_block_forward_nhwc(x_nhwc, prep)
    return jnp.transpose(out_nhwc, (0, 3, 1, 2))


# ----------------------------------------------------------------------------
# Pure-JAX reference (mirrors the PyTorch forward in training mode, with the
# same bf16-operand / f32-accumulation convs the kernel uses).
# ----------------------------------------------------------------------------
def reference_forward(x_nchw, params):
    def conv(x, w):
        return jax.lax.conv_general_dilated(
            x.astype(jnp.bfloat16), w.astype(jnp.bfloat16),
            window_strides=(1, 1), padding=((1, 1), (1, 1)),
            dimension_numbers=("NCHW", "OIHW", "NCHW"),
            preferred_element_type=jnp.float32)

    def bn(x, g, b):
        mean = jnp.mean(x, axis=(0, 2, 3), keepdims=True)
        var = jnp.mean((x - mean) ** 2, axis=(0, 2, 3), keepdims=True)
        xn = (x - mean) * jax.lax.rsqrt(var + EPS)
        return xn * g.reshape(1, -1, 1, 1) + b.reshape(1, -1, 1, 1)

    xb = x_nchw.astype(jnp.bfloat16)
    y1 = conv(xb, params["conv1_w"])
    h1 = jnp.maximum(bn(y1, params["bn1_gamma"], params["bn1_beta"]), 0.0)
    y2 = conv(h1, params["conv2_w"])
    out = bn(y2, params["bn2_gamma"], params["bn2_beta"]) + xb.astype(jnp.float32)
    return jnp.maximum(out, 0.0)


if __name__ == "__main__":
    # Small, forward-consistent shapes: inplanes = planes = 8, stride = 1.
    N, C, H, W = 2, 8, 16, 16
    key = jax.random.PRNGKey(0)
    k_x, k_w1, k_w2, k_g1, k_b1, k_g2, k_b2 = jax.random.split(key, 7)

    x = jax.random.normal(k_x, (N, C, H, W), jnp.float32)
    params = {
        "conv1_w": 0.1 * jax.random.normal(k_w1, (C, C, 3, 3), jnp.float32),
        "conv2_w": 0.1 * jax.random.normal(k_w2, (C, C, 3, 3), jnp.float32),
        "bn1_gamma": 1.0 + 0.1 * jax.random.normal(k_g1, (C,), jnp.float32),
        "bn1_beta": 0.1 * jax.random.normal(k_b1, (C,), jnp.float32),
        "bn2_gamma": 1.0 + 0.1 * jax.random.normal(k_g2, (C,), jnp.float32),
        "bn2_beta": 0.1 * jax.random.normal(k_b2, (C,), jnp.float32),
    }

    out = jax.block_until_ready(basic_block_forward(x, params))
    ref = jax.block_until_ready(reference_forward(x, params))

    assert out.shape == (N, C, H, W)
    max_err = float(jnp.max(jnp.abs(out - ref)))
    # Tolerance slightly relaxed vs f32 intermediates: y1/y2 are stored bf16
    # between passes (stats accumulation stays f32).
    assert bool(jnp.allclose(out, ref, rtol=2e-2, atol=2e-2)), max_err
    print("KERNEL_OK")
</pallas_src>

<mosaic_0001>
module attributes {stable_mosaic.version = 11 : i64} {
  func.func @conv_stats_kernel(%arg0: i32, %arg1: memref<2x16x16x8xbf16, #tpu.memory_space<vmem>>, %arg2: memref<72x8xbf16, #tpu.memory_space<vmem>>, %arg3: memref<2x16x16x8xbf16, #tpu.memory_space<vmem>>, %arg4: memref<1x2x8xf32, #tpu.memory_space<vmem>>) attributes {dimension_semantics = [#tpu.dimension_semantics<parallel>], iteration_bounds = array<i64: 1>, scalar_prefetch = 0 : i64, scratch_operands = 0 : i64, tpu.core_type = #tpu.core_type<tc>, window_params = [{transform_indices = @transform_0, window_bounds = array<i64: 2, 16, 16, 8>}, {pipeline_mode = #tpu.pipeline_mode<synchronous>, transform_indices = @transform_1, window_bounds = array<i64: 72, 8>}, {transform_indices = @transform_2, window_bounds = array<i64: 2, 16, 16, 8>}, {transform_indices = @transform_3, window_bounds = array<i64: 1, 2, 8>}]} {
    %c0 = arith.constant 0 : index
    %c0_0 = arith.constant 0 : index
    %c0_1 = arith.constant 0 : index
    %c0_2 = arith.constant 0 : index
    %0 = vector.load %arg1[%c0, %c0_0, %c0_1, %c0_2] : memref<2x16x16x8xbf16, #tpu.memory_space<vmem>>, vector<2x16x16x8xbf16>
    %c0_3 = arith.constant 0 : index
    %c0_4 = arith.constant 0 : index
    %1 = vector.load %arg2[%c0_3, %c0_4] : memref<72x8xbf16, #tpu.memory_space<vmem>>, vector<72x8xbf16>
    %cst = arith.constant 0.000000e+00 : bf16
    %2 = vector.broadcast %cst : bf16 to vector<2x1x16x8xbf16>
    %cst_5 = arith.constant 0.000000e+00 : bf16
    %3 = vector.broadcast %cst_5 : bf16 to vector<2x16x1x8xbf16>
    %4 = vector.extract_strided_slice %0 {offsets = [0, 0, 0, 0], sizes = [2, 15, 16, 8], strides = [1, 1, 1, 1]} : vector<2x16x16x8xbf16> to vector<2x15x16x8xbf16>
    %5 = tpu.concatenate %2, %4 in 1 : vector<2x1x16x8xbf16>, vector<2x15x16x8xbf16> -> vector<2x16x16x8xbf16>
    %6 = vector.extract_strided_slice %5 {offsets = [0, 0, 0, 0], sizes = [2, 16, 15, 8], strides = [1, 1, 1, 1]} : vector<2x16x16x8xbf16> to vector<2x16x15x8xbf16>
    %7 = tpu.concatenate %3, %6 in 2 : vector<2x16x1x8xbf16>, vector<2x16x15x8xbf16> -> vector<2x16x16x8xbf16>
    %8 = vector.extract_strided_slice %5 {offsets = [0, 0, 1, 0], sizes = [2, 16, 15, 8], strides = [1, 1, 1, 1]} : vector<2x16x16x8xbf16> to vector<2x16x15x8xbf16>
    %9 = tpu.concatenate %8, %3 in 2 : vector<2x16x15x8xbf16>, vector<2x16x1x8xbf16> -> vector<2x16x16x8xbf16>
    %10 = vector.extract_strided_slice %0 {offsets = [0, 0, 0, 0], sizes = [2, 16, 15, 8], strides = [1, 1, 1, 1]} : vector<2x16x16x8xbf16> to vector<2x16x15x8xbf16>
    %11 = tpu.concatenate %3, %10 in 2 : vector<2x16x1x8xbf16>, vector<2x16x15x8xbf16> -> vector<2x16x16x8xbf16>
    %12 = vector.extract_strided_slice %0 {offsets = [0, 0, 1, 0], sizes = [2, 16, 15, 8], strides = [1, 1, 1, 1]} : vector<2x16x16x8xbf16> to vector<2x16x15x8xbf16>
    %13 = tpu.concatenate %12, %3 in 2 : vector<2x16x15x8xbf16>, vector<2x16x1x8xbf16> -> vector<2x16x16x8xbf16>
    %14 = vector.extract_strided_slice %0 {offsets = [0, 1, 0, 0], sizes = [2, 15, 16, 8], strides = [1, 1, 1, 1]} : vector<2x16x16x8xbf16> to vector<2x15x16x8xbf16>
    %15 = tpu.concatenate %14, %2 in 1 : vector<2x15x16x8xbf16>, vector<2x1x16x8xbf16> -> vector<2x16x16x8xbf16>
    %16 = vector.extract_strided_slice %15 {offsets = [0, 0, 0, 0], sizes = [2, 16, 15, 8], strides = [1, 1, 1, 1]} : vector<2x16x16x8xbf16> to vector<2x16x15x8xbf16>
    %17 = tpu.concatenate %3, %16 in 2 : vector<2x16x1x8xbf16>, vector<2x16x15x8xbf16> -> vector<2x16x16x8xbf16>
    %18 = vector.extract_strided_slice %15 {offsets = [0, 0, 1, 0], sizes = [2, 16, 15, 8], strides = [1, 1, 1, 1]} : vector<2x16x16x8xbf16> to vector<2x16x15x8xbf16>
    %19 = tpu.concatenate %18, %3 in 2 : vector<2x16x15x8xbf16>, vector<2x16x1x8xbf16> -> vector<2x16x16x8xbf16>
    %20 = vector.shape_cast %7 : vector<2x16x16x8xbf16> to vector<512x8xbf16>
    %21 = vector.shape_cast %5 : vector<2x16x16x8xbf16> to vector<512x8xbf16>
    %22 = vector.shape_cast %9 : vector<2x16x16x8xbf16> to vector<512x8xbf16>
    %23 = vector.shape_cast %11 : vector<2x16x16x8xbf16> to vector<512x8xbf16>
    %24 = vector.shape_cast %0 : vector<2x16x16x8xbf16> to vector<512x8xbf16>
    %25 = vector.shape_cast %13 : vector<2x16x16x8xbf16> to vector<512x8xbf16>
    %26 = vector.shape_cast %17 : vector<2x16x16x8xbf16> to vector<512x8xbf16>
    %27 = vector.shape_cast %15 : vector<2x16x16x8xbf16> to vector<512x8xbf16>
    %28 = vector.shape_cast %19 : vector<2x16x16x8xbf16> to vector<512x8xbf16>
    %29 = tpu.concatenate %20, %21, %22, %23, %24, %25, %26, %27, %28 in 1 : vector<512x8xbf16>, vector<512x8xbf16>, vector<512x8xbf16>, vector<512x8xbf16>, vector<512x8xbf16>, vector<512x8xbf16>, vector<512x8xbf16>, vector<512x8xbf16>, vector<512x8xbf16> -> vector<512x72xbf16>
    %cst_6 = arith.constant dense<0.000000e+00> : vector<512x8xf32>
    %30 = tpu.matmul %29, %1, %cst_6 {dimension_numbers = #tpu.dot_dimension_numbers<[1], [0], [0], [1], [0, 0, 1, 1], [], []>} : vector<512x72xbf16>, vector<72x8xbf16>, vector<512x8xf32> -> vector<512x8xf32>
    %31 = vector.shape_cast %30 : vector<512x8xf32> to vector<2x16x16x8xf32>
    %32 = arith.truncf %31 : vector<2x16x16x8xf32> to vector<2x16x16x8xbf16>
    %c0_7 = arith.constant 0 : index
    %c0_8 = arith.constant 0 : index
    %c0_9 = arith.constant 0 : index
    %c0_10 = arith.constant 0 : index
    %33 = vector.load %arg3[%c0_7, %c0_8, %c0_9, %c0_10] : memref<2x16x16x8xbf16, #tpu.memory_space<vmem>>, vector<2x16x16x8xbf16>
    tpu.vector_store %arg3[%c0_7, %c0_8, %c0_9, %c0_10], %32 {strides = array<i32>} : memref<2x16x16x8xbf16, #tpu.memory_space<vmem>>, vector<2x16x16x8xbf16>,
    %cst_11 = arith.constant dense<0.000000e+00> : vector<8xf32>
    %34 = vector.multi_reduction <add>, %30, %cst_11 [0] : vector<512x8xf32> to vector<8xf32>
    %35 = vector.shape_cast %34 : vector<8xf32> to vector<1x8xf32>
    %36 = arith.mulf %30, %30 : vector<512x8xf32>
    %cst_12 = arith.constant dense<0.000000e+00> : vector<8xf32>
    %37 = vector.multi_reduction <add>, %36, %cst_12 [0] : vector<512x8xf32> to vector<8xf32>
    %38 = vector.shape_cast %37 : vector<8xf32> to vector<1x8xf32>
    %39 = tpu.concatenate %35, %38 in 0 : vector<1x8xf32>, vector<1x8xf32> -> vector<2x8xf32>
    %40 = vector.shape_cast %39 : vector<2x8xf32> to vector<1x2x8xf32>
    %c0_13 = arith.constant 0 : index
    %c0_14 = arith.constant 0 : index
    %c0_15 = arith.constant 0 : index
    %41 = vector.load %arg4[%c0_13, %c0_14, %c0_15] : memref<1x2x8xf32, #tpu.memory_space<vmem>>, vector<1x2x8xf32>
    tpu.vector_store %arg4[%c0_13, %c0_14, %c0_15], %40 {strides = array<i32>} : memref<1x2x8xf32, #tpu.memory_space<vmem>>, vector<1x2x8xf32>,
    return
  }
  func.func @transform_0(%arg0: i32) -> (i32, i32, i32, i32) {
    %c0_i32 = arith.constant 0 : i32
    %c0_i32_0 = arith.constant 0 : i32
    %c0_i32_1 = arith.constant 0 : i32
    %c0_i32_2 = arith.constant 0 : i32
    return %arg0, %c0_i32, %c0_i32_0, %c0_i32_1 : i32, i32, i32, i32
  }
  func.func @transform_1(%arg0: i32) -> (i32, i32) {
    %c0_i32 = arith.constant 0 : i32
    %c0_i32_0 = arith.constant 0 : i32
    %c0_i32_1 = arith.constant 0 : i32
    return %c0_i32, %c0_i32_0 : i32, i32
  }
  func.func @transform_2(%arg0: i32) -> (i32, i32, i32, i32) {
    %c0_i32 = arith.constant 0 : i32
    %c0_i32_0 = arith.constant 0 : i32
    %c0_i32_1 = arith.constant 0 : i32
    %c0_i32_2 = arith.constant 0 : i32
    return %arg0, %c0_i32, %c0_i32_0, %c0_i32_1 : i32, i32, i32, i32
  }
  func.func @transform_3(%arg0: i32) -> (i32, i32, i32) {
    %c0_i32 = arith.constant 0 : i32
    %c0_i32_0 = arith.constant 0 : i32
    %c0_i32_1 = arith.constant 0 : i32
    return %arg0, %c0_i32, %c0_i32_0 : i32, i32, i32
  }
}

module attributes {stable_mosaic.version = 11 : i64} {
  func.func @bn_residual_relu_kernel(%arg0: i32, %arg1: memref<2x16x16x8xbf16, #tpu.memory_space<vmem>>, %arg2: memref<1x8xf32, #tpu.memory_space<vmem>>, %arg3: memref<1x8xf32, #tpu.memory_space<vmem>>, %arg4: memref<2x16x16x8xbf16, #tpu.memory_space<vmem>>, %arg5: memref<2x16x16x8xf32, #tpu.memory_space<vmem>>) attributes {dimension_semantics = [#tpu.dimension_semantics<parallel>], iteration_bounds = array<i64: 1>, scalar_prefetch = 0 : i64, scratch_operands = 0 : i64, tpu.core_type = #tpu.core_type<tc>, window_params = [{transform_indices = @transform_0, window_bounds = array<i64: 2, 16, 16, 8>}, {pipeline_mode = #tpu.pipeline_mode<synchronous>, transform_indices = @transform_1, window_bounds = array<i64: 1, 8>}, {pipeline_mode = #tpu.pipeline_mode<synchronous>, transform_indices = @transform_2, window_bounds = array<i64: 1, 8>}, {transform_indices = @transform_3, window_bounds = array<i64: 2, 16, 16, 8>}, {transform_indices = @transform_4, window_bounds = array<i64: 2, 16, 16, 8>}]} {
    %c0 = arith.constant 0 : index
    %c0_0 = arith.constant 0 : index
    %0 = vector.load %arg2[%c0, %c0_0] : memref<1x8xf32, #tpu.memory_space<vmem>>, vector<1x8xf32>
    %1 = vector.shape_cast %0 : vector<1x8xf32> to vector<1x1x1x8xf32>
    %c0_1 = arith.constant 0 : index
    %c0_2 = arith.constant 0 : index
    %2 = vector.load %arg3[%c0_1, %c0_2] : memref<1x8xf32, #tpu.memory_space<vmem>>, vector<1x8xf32>
    %3 = vector.shape_cast %2 : vector<1x8xf32> to vector<1x1x1x8xf32>
    %c0_3 = arith.constant 0 : index
    %c0_4 = arith.constant 0 : index
    %c0_5 = arith.constant 0 : index
    %c0_6 = arith.constant 0 : index
    %4 = vector.load %arg1[%c0_3, %c0_4, %c0_5, %c0_6] : memref<2x16x16x8xbf16, #tpu.memory_space<vmem>>, vector<2x16x16x8xbf16>
    %5 = arith.extf %4 : vector<2x16x16x8xbf16> to vector<2x16x16x8xf32>
    %c0_7 = arith.constant 0 : index
    %c0_8 = arith.constant 0 : index
    %c0_9 = arith.constant 0 : index
    %c0_10 = arith.constant 0 : index
    %6 = vector.load %arg4[%c0_7, %c0_8, %c0_9, %c0_10] : memref<2x16x16x8xbf16, #tpu.memory_space<vmem>>, vector<2x16x16x8xbf16>
    %7 = arith.extf %6 : vector<2x16x16x8xbf16> to vector<2x16x16x8xf32>
    %8 = vector.broadcast %1 : vector<1x1x1x8xf32> to vector<2x16x16x8xf32>
    %9 = arith.mulf %5, %8 : vector<2x16x16x8xf32>
    %10 = vector.broadcast %3 : vector<1x1x1x8xf32> to vector<2x16x16x8xf32>
    %11 = arith.addf %9, %10 : vector<2x16x16x8xf32>
    %12 = arith.addf %11, %7 : vector<2x16x16x8xf32>
    %cst = arith.constant 0.000000e+00 : f32
    %13 = vector.broadcast %cst : f32 to vector<2x16x16x8xf32>
    %14 = arith.maximumf %12, %13 : vector<2x16x16x8xf32>
    %c0_11 = arith.constant 0 : index
    %c0_12 = arith.constant 0 : index
    %c0_13 = arith.constant 0 : index
    %c0_14 = arith.constant 0 : index
    %15 = vector.load %arg5[%c0_11, %c0_12, %c0_13, %c0_14] : memref<2x16x16x8xf32, #tpu.memory_space<vmem>>, vector<2x16x16x8xf32>
    tpu.vector_store %arg5[%c0_11, %c0_12, %c0_13, %c0_14], %14 {strides = array<i32>} : memref<2x16x16x8xf32, #tpu.memory_space<vmem>>, vector<2x16x16x8xf32>,
    return
  }
  func.func @transform_0(%arg0: i32) -> (i32, i32, i32, i32) {
    %c0_i32 = arith.constant 0 : i32
    %c0_i32_0 = arith.constant 0 : i32
    %c0_i32_1 = arith.constant 0 : i32
    %c0_i32_2 = arith.constant 0 : i32
    return %arg0, %c0_i32, %c0_i32_0, %c0_i32_1 : i32, i32, i32, i32
  }
  func.func @transform_1(%arg0: i32) -> (i32, i32) {
    %c0_i32 = arith.constant 0 : i32
    %c0_i32_0 = arith.constant 0 : i32
    %c0_i32_1 = arith.constant 0 : i32
    return %c0_i32, %c0_i32_0 : i32, i32
  }
  func.func @transform_2(%arg0: i32) -> (i32, i32) {
    %c0_i32 = arith.constant 0 : i32
    %c0_i32_0 = arith.constant 0 : i32
    %c0_i32_1 = arith.constant 0 : i32
    return %c0_i32, %c0_i32_0 : i32, i32
  }
  func.func @transform_3(%arg0: i32) -> (i32, i32, i32, i32) {
    %c0_i32 = arith.constant 0 : i32
    %c0_i32_0 = arith.constant 0 : i32
    %c0_i32_1 = arith.constant 0 : i32
    %c0_i32_2 = arith.constant 0 : i32
    return %arg0, %c0_i32, %c0_i32_0, %c0_i32_1 : i32, i32, i32, i32
  }
  func.func @transform_4(%arg0: i32) -> (i32, i32, i32, i32) {
    %c0_i32 = arith.constant 0 : i32
    %c0_i32_0 = arith.constant 0 : i32
    %c0_i32_1 = arith.constant 0 : i32
    %c0_i32_2 = arith.constant 0 : i32
    return %arg0, %c0_i32, %c0_i32_0, %c0_i32_1 : i32, i32, i32, i32
  }
}

module attributes {stable_mosaic.version = 11 : i64} {
  func.func @bn_relu_conv_stats_kernel(%arg0: i32, %arg1: memref<2x16x16x8xbf16, #tpu.memory_space<vmem>>, %arg2: memref<1x8xf32, #tpu.memory_space<vmem>>, %arg3: memref<1x8xf32, #tpu.memory_space<vmem>>, %arg4: memref<72x8xbf16, #tpu.memory_space<vmem>>, %arg5: memref<2x16x16x8xbf16, #tpu.memory_space<vmem>>, %arg6: memref<1x2x8xf32, #tpu.memory_space<vmem>>) attributes {dimension_semantics = [#tpu.dimension_semantics<parallel>], iteration_bounds = array<i64: 1>, scalar_prefetch = 0 : i64, scratch_operands = 0 : i64, tpu.core_type = #tpu.core_type<tc>, window_params = [{transform_indices = @transform_0, window_bounds = array<i64: 2, 16, 16, 8>}, {pipeline_mode = #tpu.pipeline_mode<synchronous>, transform_indices = @transform_1, window_bounds = array<i64: 1, 8>}, {pipeline_mode = #tpu.pipeline_mode<synchronous>, transform_indices = @transform_2, window_bounds = array<i64: 1, 8>}, {pipeline_mode = #tpu.pipeline_mode<synchronous>, transform_indices = @transform_3, window_bounds = array<i64: 72, 8>}, {transform_indices = @transform_4, window_bounds = array<i64: 2, 16, 16, 8>}, {transform_indices = @transform_5, window_bounds = array<i64: 1, 2, 8>}]} {
    %c0 = arith.constant 0 : index
    %c0_0 = arith.constant 0 : index
    %0 = vector.load %arg2[%c0, %c0_0] : memref<1x8xf32, #tpu.memory_space<vmem>>, vector<1x8xf32>
    %1 = vector.shape_cast %0 : vector<1x8xf32> to vector<1x1x1x8xf32>
    %c0_1 = arith.constant 0 : index
    %c0_2 = arith.constant 0 : index
    %2 = vector.load %arg3[%c0_1, %c0_2] : memref<1x8xf32, #tpu.memory_space<vmem>>, vector<1x8xf32>
    %3 = vector.shape_cast %2 : vector<1x8xf32> to vector<1x1x1x8xf32>
    %c0_3 = arith.constant 0 : index
    %c0_4 = arith.constant 0 : index
    %c0_5 = arith.constant 0 : index
    %c0_6 = arith.constant 0 : index
    %4 = vector.load %arg1[%c0_3, %c0_4, %c0_5, %c0_6] : memref<2x16x16x8xbf16, #tpu.memory_space<vmem>>, vector<2x16x16x8xbf16>
    %5 = arith.extf %4 : vector<2x16x16x8xbf16> to vector<2x16x16x8xf32>
    %6 = vector.broadcast %1 : vector<1x1x1x8xf32> to vector<2x16x16x8xf32>
    %7 = arith.mulf %5, %6 : vector<2x16x16x8xf32>
    %8 = vector.broadcast %3 : vector<1x1x1x8xf32> to vector<2x16x16x8xf32>
    %9 = arith.addf %7, %8 : vector<2x16x16x8xf32>
    %cst = arith.constant 0.000000e+00 : f32
    %10 = vector.broadcast %cst : f32 to vector<2x16x16x8xf32>
    %11 = arith.maximumf %9, %10 : vector<2x16x16x8xf32>
    %12 = arith.truncf %11 : vector<2x16x16x8xf32> to vector<2x16x16x8xbf16>
    %c0_7 = arith.constant 0 : index
    %c0_8 = arith.constant 0 : index
    %13 = vector.load %arg4[%c0_7, %c0_8] : memref<72x8xbf16, #tpu.memory_space<vmem>>, vector<72x8xbf16>
    %cst_9 = arith.constant 0.000000e+00 : bf16
    %14 = vector.broadcast %cst_9 : bf16 to vector<2x1x16x8xbf16>
    %cst_10 = arith.constant 0.000000e+00 : bf16
    %15 = vector.broadcast %cst_10 : bf16 to vector<2x16x1x8xbf16>
    %16 = vector.extract_strided_slice %12 {offsets = [0, 0, 0, 0], sizes = [2, 15, 16, 8], strides = [1, 1, 1, 1]} : vector<2x16x16x8xbf16> to vector<2x15x16x8xbf16>
    %17 = tpu.concatenate %14, %16 in 1 : vector<2x1x16x8xbf16>, vector<2x15x16x8xbf16> -> vector<2x16x16x8xbf16>
    %18 = vector.extract_strided_slice %17 {offsets = [0, 0, 0, 0], sizes = [2, 16, 15, 8], strides = [1, 1, 1, 1]} : vector<2x16x16x8xbf16> to vector<2x16x15x8xbf16>
    %19 = tpu.concatenate %15, %18 in 2 : vector<2x16x1x8xbf16>, vector<2x16x15x8xbf16> -> vector<2x16x16x8xbf16>
    %20 = vector.extract_strided_slice %17 {offsets = [0, 0, 1, 0], sizes = [2, 16, 15, 8], strides = [1, 1, 1, 1]} : vector<2x16x16x8xbf16> to vector<2x16x15x8xbf16>
    %21 = tpu.concatenate %20, %15 in 2 : vector<2x16x15x8xbf16>, vector<2x16x1x8xbf16> -> vector<2x16x16x8xbf16>
    %22 = vector.extract_strided_slice %12 {offsets = [0, 0, 0, 0], sizes = [2, 16, 15, 8], strides = [1, 1, 1, 1]} : vector<2x16x16x8xbf16> to vector<2x16x15x8xbf16>
    %23 = tpu.concatenate %15, %22 in 2 : vector<2x16x1x8xbf16>, vector<2x16x15x8xbf16> -> vector<2x16x16x8xbf16>
    %24 = vector.extract_strided_slice %12 {offsets = [0, 0, 1, 0], sizes = [2, 16, 15, 8], strides = [1, 1, 1, 1]} : vector<2x16x16x8xbf16> to vector<2x16x15x8xbf16>
    %25 = tpu.concatenate %24, %15 in 2 : vector<2x16x15x8xbf16>, vector<2x16x1x8xbf16> -> vector<2x16x16x8xbf16>
    %26 = vector.extract_strided_slice %12 {offsets = [0, 1, 0, 0], sizes = [2, 15, 16, 8], strides = [1, 1, 1, 1]} : vector<2x16x16x8xbf16> to vector<2x15x16x8xbf16>
    %27 = tpu.concatenate %26, %14 in 1 : vector<2x15x16x8xbf16>, vector<2x1x16x8xbf16> -> vector<2x16x16x8xbf16>
    %28 = vector.extract_strided_slice %27 {offsets = [0, 0, 0, 0], sizes = [2, 16, 15, 8], strides = [1, 1, 1, 1]} : vector<2x16x16x8xbf16> to vector<2x16x15x8xbf16>
    %29 = tpu.concatenate %15, %28 in 2 : vector<2x16x1x8xbf16>, vector<2x16x15x8xbf16> -> vector<2x16x16x8xbf16>
    %30 = vector.extract_strided_slice %27 {offsets = [0, 0, 1, 0], sizes = [2, 16, 15, 8], strides = [1, 1, 1, 1]} : vector<2x16x16x8xbf16> to vector<2x16x15x8xbf16>
    %31 = tpu.concatenate %30, %15 in 2 : vector<2x16x15x8xbf16>, vector<2x16x1x8xbf16> -> vector<2x16x16x8xbf16>
    %32 = vector.shape_cast %19 : vector<2x16x16x8xbf16> to vector<512x8xbf16>
    %33 = vector.shape_cast %17 : vector<2x16x16x8xbf16> to vector<512x8xbf16>
    %34 = vector.shape_cast %21 : vector<2x16x16x8xbf16> to vector<512x8xbf16>
    %35 = vector.shape_cast %23 : vector<2x16x16x8xbf16> to vector<512x8xbf16>
    %36 = vector.shape_cast %12 : vector<2x16x16x8xbf16> to vector<512x8xbf16>
    %37 = vector.shape_cast %25 : vector<2x16x16x8xbf16> to vector<512x8xbf16>
    %38 = vector.shape_cast %29 : vector<2x16x16x8xbf16> to vector<512x8xbf16>
    %39 = vector.shape_cast %27 : vector<2x16x16x8xbf16> to vector<512x8xbf16>
    %40 = vector.shape_cast %31 : vector<2x16x16x8xbf16> to vector<512x8xbf16>
    %41 = tpu.concatenate %32, %33, %34, %35, %36, %37, %38, %39, %40 in 1 : vector<512x8xbf16>, vector<512x8xbf16>, vector<512x8xbf16>, vector<512x8xbf16>, vector<512x8xbf16>, vector<512x8xbf16>, vector<512x8xbf16>, vector<512x8xbf16>, vector<512x8xbf16> -> vector<512x72xbf16>
    %cst_11 = arith.constant dense<0.000000e+00> : vector<512x8xf32>
    %42 = tpu.matmul %41, %13, %cst_11 {dimension_numbers = #tpu.dot_dimension_numbers<[1], [0], [0], [1], [0, 0, 1, 1], [], []>} : vector<512x72xbf16>, vector<72x8xbf16>, vector<512x8xf32> -> vector<512x8xf32>
    %43 = vector.shape_cast %42 : vector<512x8xf32> to vector<2x16x16x8xf32>
    %44 = arith.truncf %43 : vector<2x16x16x8xf32> to vector<2x16x16x8xbf16>
    %c0_12 = arith.constant 0 : index
    %c0_13 = arith.constant 0 : index
    %c0_14 = arith.constant 0 : index
    %c0_15 = arith.constant 0 : index
    %45 = vector.load %arg5[%c0_12, %c0_13, %c0_14, %c0_15] : memref<2x16x16x8xbf16, #tpu.memory_space<vmem>>, vector<2x16x16x8xbf16>
    tpu.vector_store %arg5[%c0_12, %c0_13, %c0_14, %c0_15], %44 {strides = array<i32>} : memref<2x16x16x8xbf16, #tpu.memory_space<vmem>>, vector<2x16x16x8xbf16>,
    %cst_16 = arith.constant dense<0.000000e+00> : vector<8xf32>
    %46 = vector.multi_reduction <add>, %42, %cst_16 [0] : vector<512x8xf32> to vector<8xf32>
    %47 = vector.shape_cast %46 : vector<8xf32> to vector<1x8xf32>
    %48 = arith.mulf %42, %42 : vector<512x8xf32>
    %cst_17 = arith.constant dense<0.000000e+00> : vector<8xf32>
    %49 = vector.multi_reduction <add>, %48, %cst_17 [0] : vector<512x8xf32> to vector<8xf32>
    %50 = vector.shape_cast %49 : vector<8xf32> to vector<1x8xf32>
    %51 = tpu.concatenate %47, %50 in 0 : vector<1x8xf32>, vector<1x8xf32> -> vector<2x8xf32>
    %52 = vector.shape_cast %51 : vector<2x8xf32> to vector<1x2x8xf32>
    %c0_18 = arith.constant 0 : index
    %c0_19 = arith.constant 0 : index
    %c0_20 = arith.constant 0 : index
    %53 = vector.load %arg6[%c0_18, %c0_19, %c0_20] : memref<1x2x8xf32, #tpu.memory_space<vmem>>, vector<1x2x8xf32>
    tpu.vector_store %arg6[%c0_18, %c0_19, %c0_20], %52 {strides = array<i32>} : memref<1x2x8xf32, #tpu.memory_space<vmem>>, vector<1x2x8xf32>,
    return
  }
  func.func @transform_0(%arg0: i32) -> (i32, i32, i32, i32) {
    %c0_i32 = arith.constant 0 : i32
    %c0_i32_0 = arith.constant 0 : i32
    %c0_i32_1 = arith.constant 0 : i32
    %c0_i32_2 = arith.constant 0 : i32
    return %arg0, %c0_i32, %c0_i32_0, %c0_i32_1 : i32, i32, i32, i32
  }
  func.func @transform_1(%arg0: i32) -> (i32, i32) {
    %c0_i32 = arith.constant 0 : i32
    %c0_i32_0 = arith.constant 0 : i32
    %c0_i32_1 = arith.constant 0 : i32
    return %c0_i32, %c0_i32_0 : i32, i32
  }
  func.func @transform_2(%arg0: i32) -> (i32, i32) {
    %c0_i32 = arith.constant 0 : i32
    %c0_i32_0 = arith.constant 0 : i32
    %c0_i32_1 = arith.constant 0 : i32
    return %c0_i32, %c0_i32_0 : i32, i32
  }
  func.func @transform_3(%arg0: i32) -> (i32, i32) {
    %c0_i32 = arith.constant 0 : i32
    %c0_i32_0 = arith.constant 0 : i32
    %c0_i32_1 = arith.constant 0 : i32
    return %c0_i32, %c0_i32_0 : i32, i32
  }
  func.func @transform_4(%arg0: i32) -> (i32, i32, i32, i32) {
    %c0_i32 = arith.constant 0 : i32
    %c0_i32_0 = arith.constant 0 : i32
    %c0_i32_1 = arith.constant 0 : i32
    %c0_i32_2 = arith.constant 0 : i32
    return %arg0, %c0_i32, %c0_i32_0, %c0_i32_1 : i32, i32, i32, i32
  }
  func.func @transform_5(%arg0: i32) -> (i32, i32, i32) {
    %c0_i32 = arith.constant 0 : i32
    %c0_i32_0 = arith.constant 0 : i32
    %c0_i32_1 = arith.constant 0 : i32
    return %arg0, %c0_i32, %c0_i32_0 : i32, i32, i32
  }
}

</mosaic_0001>

<bundles_post_ra>
// kernel: basic_block_forward.5
= control target key start
LH: loop header
LB: loop body
LE: loop exit
PB: predicated region body
PF: predicated region fallthrough
CT: control target
= control target key end

     0   :  { %vm543_vm0 = vcmask 64512   ;;  %s1543_s0 = inlined_call_operand.vmem [shape: bf16[2,16,16,8], index: 0, kind: input, shape index: {}]   ;;  %s1544_s1 = inlined_call_operand.vmem [shape: f32[1,8], index: 1, kind: input, shape index: {}]   ;;  %s1545_s2 = inlined_call_operand.vmem [shape: f32[1,8], index: 2, kind: input, shape index: {}]   ;;  %s1546_s3 = inlined_call_operand.vmem [shape: bf16[2,16,16,8], index: 3, kind: input, shape index: {}]   ;;  %s1547_s4 = inlined_call_operand.vmem [shape: f32[2,16,16,8], index: 4, kind: output, shape index: {}]  }
   0x1   :  { %v960_v0 = vld [vmem:[%s1544_s1] ss:$0 sm:$0xff]  ;;  %v870_v5 = vld [vmem:[%s1543_s0 + $0x8] sm:$0xff]   ;;  %v871_v12 = vld [vmem:[%s1543_s0 + $0x10] sm:$0xff]  }
   0x2   :  { %v615_v1 = vld [vmem:[%s1543_s0] sm:$0xff]   ;;  %v901_v6 = vld [vmem:[%s1546_s3 + $0x8] sm:$0xff]   ;;  %v620_v10 = vunpack.c.l.bf16 %v870_v5  ;;  %v902_v13 = vld [vmem:[%s1546_s3 + $0x10] sm:$0xff]   ;;  %v621_v16 = vunpack.c.h.bf16 %v870_v5  ;;  %v624_v20 = vunpack.c.l.bf16 %v871_v12  ;;  %v625_v22 = vunpack.c.h.bf16 %v871_v12 }
   0x3   :  { %v616_v2 = vunpack.c.l.bf16 %v615_v1  ;;  %v743_v3 = vld [vmem:[%s1546_s3] sm:$0xff]   ;;  %v617_v4 = vunpack.c.h.bf16 %v615_v1  ;;  %v748_v11 = vunpack.c.l.bf16 %v901_v6  ;;  %v749_v17 = vunpack.c.h.bf16 %v901_v6  ;;  %v872_v18 = vld [vmem:[%s1543_s0 + $0x18] sm:$0xff]   ;;  %v874_v54 = vld [vmem:[%s1543_s0 + $0x28] sm:$0xff]  }
   0x4   :  { %v977_v7 = vld [vmem:[%s1545_s2] ss:$0 sm:$0xff]  ;;  %v744_v8 = vunpack.c.l.bf16 %v743_v3  ;;  %v745_v9 = vunpack.c.h.bf16 %v743_v3  ;;  %v283_v19 = vmul.f32 %v620_v10, %v960_v0  ;;  %v752_v21 = vunpack.c.l.bf16 %v902_v13  ;;  %v903_v23 = vld [vmem:[%s1546_s3 + $0x18] sm:$0xff]   ;;  %v905_v55 = vld [vmem:[%s1546_s3 + $0x28] sm:$0xff]  }
   0x5   :  { %v281_v14 = vmul.f32 %v616_v2, %v960_v0  ;;  %v282_v15 = vmul.f32 %v617_v4, %v960_v0  ;;  %v284_v26 = vmul.f32 %v621_v16, %v960_v0  ;;  %v753_v27 = vunpack.c.h.bf16 %v902_v13  ;;  %v873_v40 = vld [vmem:[%s1543_s0 + $0x20] sm:$0xff]   ;;  %v875_v1 = vld [vmem:[%s1543_s0 + $0x30] sm:$0xff]   ;;  %v876_v16 = vld [vmem:[%s1543_s0 + $0x38] sm:$0xff]  }
   0x6   :  { %v353_v28 = vadd.f32 %v977_v7, %v283_v19  ;;  %v285_v29 = vmul.f32 %v624_v20, %v960_v0  ;;  %v286_v30 = vmul.f32 %v625_v22, %v960_v0  ;;  %v628_v31 = vunpack.c.l.bf16 %v872_v18  ;;  %v904_v45 = vld [vmem:[%s1546_s3 + $0x20] sm:$0xff]   ;;  %v906_v2 = vld [vmem:[%s1546_s3 + $0x30] sm:$0xff]  }
   0x7   :  { %v351_v24 = vadd.f32 %v977_v7, %v281_v14  ;;  %v352_v25 = vadd.f32 %v977_v7, %v282_v15  ;;  %v354_v34 = vadd.f32 %v977_v7, %v284_v26  ;;  %v756_v35 = vunpack.c.l.bf16 %v903_v23 }
   0x8   :  { %v417_v36 = vadd.f32 %v748_v11, %v353_v28  ;;  %v355_v37 = vadd.f32 %v977_v7, %v285_v29  ;;  %v356_v38 = vadd.f32 %v977_v7, %v286_v30  ;;  %v287_v39 = vmul.f32 %v628_v31, %v960_v0 }
   0x9   :  { %v415_v32 = vadd.f32 %v744_v8, %v351_v24  ;;  %v416_v33 = vadd.f32 %v745_v9, %v352_v25  ;;  %v418_v43 = vadd.f32 %v749_v17, %v354_v34  ;;  %v629_v44 = vunpack.c.h.bf16 %v872_v18  ;;  %v877_v34 = vld [vmem:[%s1543_s0 + $0x40] sm:$0xff]  }
   0xa   :  { %v481_v46 = vmax.f32 %v417_v36, 0.0  ;;  %v419_v47 = vadd.f32 %v752_v21, %v355_v37  ;;  %v420_v48 = vadd.f32 %v753_v27, %v356_v38  ;;  %v357_v49 = vadd.f32 %v977_v7, %v287_v39  ;;  %v907_v21 = vld [vmem:[%s1546_s3 + $0x38] sm:$0xff]   ;;  %v908_v39 = vld [vmem:[%s1546_s3 + $0x40] sm:$0xff]  }
   0xb   :  { %v479_v41 = vmax.f32 %v415_v32, 0.0  ;;  %v480_v42 = vmax.f32 %v416_v33, 0.0  ;;  %v482_v50 = vmax.f32 %v418_v43, 0.0  ;;  %v757_v51 = vunpack.c.h.bf16 %v903_v23 }
   0xc   :  { %v288_v52 = vmul.f32 %v629_v44, %v960_v0  ;;  %v632_v53 = vunpack.c.l.bf16 %v873_v40  ;;  %546 = vst.msk [vmem:[%s1547_s4 + $0x10] sm:$0xff] %vm543_vm0, %v481_v46  ;;  %v483_v56 = vmax.f32 %v419_v47, 0.0  ;;  %v484_v57 = vmax.f32 %v420_v48, 0.0  ;;  %v878_v48 = vld [vmem:[%s1543_s0 + $0x48] sm:$0xff]  }
   0xd   :  { %544 = vst.msk [vmem:[%s1547_s4] sm:$0xff] %vm543_vm0, %v479_v41  ;;  %545 = vst.msk [vmem:[%s1547_s4 + $0x8] sm:$0xff] %vm543_vm0, %v480_v42  ;;  %v421_v58 = vadd.f32 %v756_v35, %v357_v49  ;;  %v760_v59 = vunpack.c.l.bf16 %v904_v45  ;;  %v633_v62 = vunpack.c.h.bf16 %v873_v40  ;;  %v761_v63 = vunpack.c.h.bf16 %v904_v45  ;;  %v909_v49 = vld [vmem:[%s1546_s3 + $0x48] sm:$0xff]  }
   0xe   :  { %547 = vst.msk [vmem:[%s1547_s4 + $0x18] sm:$0xff] %vm543_vm0, %v482_v50  ;;  %v358_v60 = vadd.f32 %v977_v7, %v288_v52  ;;  %v289_v61 = vmul.f32 %v632_v53, %v960_v0  ;;  %548 = vst.msk [vmem:[%s1547_s4 + $0x20] sm:$0xff] %vm543_vm0, %v483_v56  ;;  %v636_v4 = vunpack.c.l.bf16 %v874_v54  ;;  %v764_v5 = vunpack.c.l.bf16 %v905_v55 }
   0xf   :  { %549 = vst.msk [vmem:[%s1547_s4 + $0x28] sm:$0xff] %vm543_vm0, %v484_v57  ;;  %v485_v3 = vmax.f32 %v421_v58, 0.0  ;;  %v637_v6 = vunpack.c.h.bf16 %v874_v54  ;;  %v290_v10 = vmul.f32 %v633_v62, %v960_v0  ;;  %v765_v11 = vunpack.c.h.bf16 %v905_v55  ;;  %v879_v58 = vld [vmem:[%s1543_s0 + $0x50] sm:$0xff]  }
  0x10   :  { %v422_v8 = vadd.f32 %v757_v51, %v358_v60  ;;  %v359_v9 = vadd.f32 %v977_v7, %v289_v61  ;;  %v291_v12 = vmul.f32 %v636_v4, %v960_v0  ;;  %v640_v14 = vunpack.c.l.bf16 %v875_v1 }
  0x11   :  { %550 = vst.msk [vmem:[%s1547_s4 + $0x30] sm:$0xff] %vm543_vm0, %v485_v3  ;;  %v292_v13 = vmul.f32 %v637_v6, %v960_v0  ;;  %v768_v15 = vunpack.c.l.bf16 %v906_v2  ;;  %v360_v19 = vadd.f32 %v977_v7, %v290_v10  ;;  %v641_v20 = vunpack.c.h.bf16 %v875_v1  ;;  %v880_v10 = vld [vmem:[%s1543_s0 + $0x58] sm:$0xff]  }
  0x12   :  { %v486_v17 = vmax.f32 %v422_v8, 0.0  ;;  %v423_v18 = vadd.f32 %v760_v59, %v359_v9  ;;  %v361_v22 = vadd.f32 %v977_v7, %v291_v12  ;;  %v293_v24 = vmul.f32 %v640_v14, %v960_v0 }
  0x13   :  { %v362_v23 = vadd.f32 %v977_v7, %v292_v13  ;;  %v769_v25 = vunpack.c.h.bf16 %v906_v2  ;;  %v424_v27 = vadd.f32 %v761_v63, %v360_v19  ;;  %v294_v28 = vmul.f32 %v641_v20, %v960_v0  ;;  %v910_v63 = vld [vmem:[%s1546_s3 + $0x50] sm:$0xff]   ;;  %v911_v19 = vld [vmem:[%s1546_s3 + $0x58] sm:$0xff]  }
  0x14   :  { %551 = vst.msk [vmem:[%s1547_s4 + $0x38] sm:$0xff] %vm543_vm0, %v486_v17  ;;  %v487_v26 = vmax.f32 %v423_v18, 0.0  ;;  %v644_v29 = vunpack.c.l.bf16 %v876_v16  ;;  %v425_v30 = vadd.f32 %v764_v5, %v361_v22  ;;  %v363_v32 = vadd.f32 %v977_v7, %v293_v24 }
  0x15   :  { %v426_v31 = vadd.f32 %v765_v11, %v362_v23  ;;  %v772_v33 = vunpack.c.l.bf16 %v907_v21  ;;  %v488_v35 = vmax.f32 %v424_v27, 0.0  ;;  %v364_v36 = vadd.f32 %v977_v7, %v294_v28  ;;  %v881_v28 = vld [vmem:[%s1543_s0 + $0x60] sm:$0xff]  }
  0x16   :  { %552 = vst.msk [vmem:[%s1547_s4 + $0x40] sm:$0xff] %vm543_vm0, %v487_v26  ;;  %v295_v37 = vmul.f32 %v644_v29, %v960_v0  ;;  %v645_v38 = vunpack.c.h.bf16 %v876_v16  ;;  %v489_v40 = vmax.f32 %v425_v30, 0.0  ;;  %v427_v42 = vadd.f32 %v768_v15, %v363_v32 }
  0x17   :  { %v490_v41 = vmax.f32 %v426_v31, 0.0  ;;  %v773_v43 = vunpack.c.h.bf16 %v907_v21  ;;  %553 = vst.msk [vmem:[%s1547_s4 + $0x48] sm:$0xff] %vm543_vm0, %v488_v35  ;;  %v428_v44 = vadd.f32 %v769_v25, %v364_v36  ;;  %v648_v47 = vunpack.c.l.bf16 %v877_v34 }
  0x18   :  { %v365_v45 = vadd.f32 %v977_v7, %v295_v37  ;;  %v296_v46 = vmul.f32 %v645_v38, %v960_v0  ;;  %554 = vst.msk [vmem:[%s1547_s4 + $0x50] sm:$0xff] %vm543_vm0, %v489_v40  ;;  %v491_v50 = vmax.f32 %v427_v42, 0.0  ;;  %v776_v51 = vunpack.c.l.bf16 %v908_v39  ;;  %v882_v42 = vld [vmem:[%s1543_s0 + $0x68] sm:$0xff]  }
  0x19   :  { %555 = vst.msk [vmem:[%s1547_s4 + $0x58] sm:$0xff] %vm543_vm0, %v490_v41  ;;  %v649_v52 = vunpack.c.h.bf16 %v877_v34  ;;  %v777_v53 = vunpack.c.h.bf16 %v908_v39  ;;  %v492_v54 = vmax.f32 %v428_v44, 0.0  ;;  %v297_v57 = vmul.f32 %v648_v47, %v960_v0 }
  0x1a   :  { %v429_v55 = vadd.f32 %v772_v33, %v365_v45  ;;  %v366_v56 = vadd.f32 %v977_v7, %v296_v46  ;;  %556 = vst.msk [vmem:[%s1547_s4 + $0x60] sm:$0xff] %vm543_vm0, %v491_v50  ;;  %v652_v60 = vunpack.c.l.bf16 %v878_v48  ;;  %v780_v61 = vunpack.c.l.bf16 %v909_v49  ;;  %v912_v33 = vld [vmem:[%s1546_s3 + $0x60] sm:$0xff]  }
  0x1b   :  { %v298_v59 = vmul.f32 %v649_v52, %v960_v0  ;;  %v653_v62 = vunpack.c.h.bf16 %v878_v48  ;;  %557 = vst.msk [vmem:[%s1547_s4 + $0x68] sm:$0xff] %vm543_vm0, %v492_v54  ;;  %v367_v3 = vadd.f32 %v977_v7, %v297_v57  ;;  %v781_v4 = vunpack.c.h.bf16 %v909_v49  ;;  %v883_v52 = vld [vmem:[%s1543_s0 + $0x70] sm:$0xff]  }
  0x1c   :  { %v493_v1 = vmax.f32 %v429_v55, 0.0  ;;  %v430_v2 = vadd.f32 %v773_v43, %v366_v56  ;;  %v299_v6 = vmul.f32 %v652_v60, %v960_v0  ;;  %v656_v9 = vunpack.c.l.bf16 %v879_v58  ;;  %v913_v43 = vld [vmem:[%s1546_s3 + $0x68] sm:$0xff]   ;;  %v914_v57 = vld [vmem:[%s1546_s3 + $0x70] sm:$0xff]  }
  0x1d   :  { %v368_v5 = vadd.f32 %v977_v7, %v298_v59  ;;  %v300_v8 = vmul.f32 %v653_v62, %v960_v0  ;;  %v431_v12 = vadd.f32 %v776_v51, %v367_v3  ;;  %v784_v13 = vunpack.c.l.bf16 %v910_v63  ;;  %v884_v3 = vld [vmem:[%s1543_s0 + $0x78] sm:$0xff]  }
  0x1e   :  { %558 = vst.msk [vmem:[%s1547_s4 + $0x70] sm:$0xff] %vm543_vm0, %v493_v1  ;;  %v494_v11 = vmax.f32 %v430_v2, 0.0  ;;  %v657_v14 = vunpack.c.h.bf16 %v879_v58  ;;  %v369_v16 = vadd.f32 %v977_v7, %v299_v6  ;;  %v301_v18 = vmul.f32 %v656_v9, %v960_v0 }
  0x1f   :  { %v432_v15 = vadd.f32 %v777_v53, %v368_v5  ;;  %v370_v17 = vadd.f32 %v977_v7, %v300_v8  ;;  %v495_v20 = vmax.f32 %v431_v12, 0.0  ;;  %v785_v21 = vunpack.c.h.bf16 %v910_v63 }
  0x20   :  { %559 = vst.msk [vmem:[%s1547_s4 + $0x78] sm:$0xff] %vm543_vm0, %v494_v11  ;;  %v302_v22 = vmul.f32 %v657_v14, %v960_v0  ;;  %v660_v23 = vunpack.c.l.bf16 %v880_v10  ;;  %v433_v25 = vadd.f32 %v780_v61, %v369_v16  ;;  %v371_v27 = vadd.f32 %v977_v7, %v301_v18 }
  0x21   :  { %v496_v24 = vmax.f32 %v432_v15, 0.0  ;;  %v434_v26 = vadd.f32 %v781_v4, %v370_v17  ;;  %560 = vst.msk [vmem:[%s1547_s4 + $0x80] sm:$0xff] %vm543_vm0, %v495_v20  ;;  %v788_v30 = vunpack.c.l.bf16 %v911_v19  ;;  %v661_v32 = vunpack.c.h.bf16 %v880_v10 }
  0x22   :  { %v372_v29 = vadd.f32 %v977_v7, %v302_v22  ;;  %v303_v31 = vmul.f32 %v660_v23, %v960_v0  ;;  %v497_v34 = vmax.f32 %v433_v25, 0.0  ;;  %v435_v36 = vadd.f32 %v784_v13, %v371_v27  ;;  %v915_v13 = vld [vmem:[%s1546_s3 + $0x78] sm:$0xff]   ;;  %v885_v22 = vld [vmem:[%s1543_s0 + $0x80] sm:$0xff]  }
  0x23   :  { %561 = vst.msk [vmem:[%s1547_s4 + $0x88] sm:$0xff] %vm543_vm0, %v496_v24  ;;  %v498_v35 = vmax.f32 %v434_v26, 0.0  ;;  %v789_v37 = vunpack.c.h.bf16 %v911_v19  ;;  %v304_v40 = vmul.f32 %v661_v32, %v960_v0  ;;  %v664_v41 = vunpack.c.l.bf16 %v881_v28  ;;  %v916_v27 = vld [vmem:[%s1546_s3 + $0x80] sm:$0xff]  }
  0x24   :  { %v436_v38 = vadd.f32 %v785_v21, %v372_v29  ;;  %v373_v39 = vadd.f32 %v977_v7, %v303_v31  ;;  %562 = vst.msk [vmem:[%s1547_s4 + $0x90] sm:$0xff] %vm543_vm0, %v497_v34  ;;  %v499_v44 = vmax.f32 %v435_v36, 0.0  ;;  %v792_v45 = vunpack.c.l.bf16 %v912_v33  ;;  %v886_v36 = vld [vmem:[%s1543_s0 + $0x88] sm:$0xff]  }
  0x25   :  { %563 = vst.msk [vmem:[%s1547_s4 + $0x98] sm:$0xff] %vm543_vm0, %v498_v35  ;;  %v665_v46 = vunpack.c.h.bf16 %v881_v28  ;;  %v793_v47 = vunpack.c.h.bf16 %v912_v33  ;;  %v374_v50 = vadd.f32 %v977_v7, %v304_v40  ;;  %v305_v51 = vmul.f32 %v664_v41, %v960_v0 }
  0x26   :  { %v500_v48 = vmax.f32 %v436_v38, 0.0  ;;  %v437_v49 = vadd.f32 %v788_v30, %v373_v39  ;;  %564 = vst.msk [vmem:[%s1547_s4 + $0xa0] sm:$0xff] %vm543_vm0, %v499_v44  ;;  %v668_v54 = vunpack.c.l.bf16 %v882_v42  ;;  %v796_v55 = vunpack.c.l.bf16 %v913_v43 }
  0x27   :  { %v306_v53 = vmul.f32 %v665_v46, %v960_v0  ;;  %v669_v56 = vunpack.c.h.bf16 %v882_v42  ;;  %v438_v59 = vadd.f32 %v789_v37, %v374_v50  ;;  %v375_v60 = vadd.f32 %v977_v7, %v305_v51  ;;  %v917_v37 = vld [vmem:[%s1546_s3 + $0x88] sm:$0xff]   ;;  %v887_v46 = vld [vmem:[%s1543_s0 + $0x90] sm:$0xff]  }
  0x28   :  { %565 = vst.msk [vmem:[%s1547_s4 + $0xa8] sm:$0xff] %vm543_vm0, %v500_v48  ;;  %v501_v58 = vmax.f32 %v437_v49, 0.0  ;;  %v797_v61 = vunpack.c.h.bf16 %v913_v43  ;;  %v307_v63 = vmul.f32 %v668_v54, %v960_v0  ;;  %v672_v2 = vunpack.c.l.bf16 %v883_v52  ;;  %v918_v51 = vld [vmem:[%s1546_s3 + $0x90] sm:$0xff]  }
  0x29   :  { %v376_v62 = vadd.f32 %v977_v7, %v306_v53  ;;  %v308_v1 = vmul.f32 %v669_v56, %v960_v0  ;;  %v502_v4 = vmax.f32 %v438_v59, 0.0  ;;  %v439_v5 = vadd.f32 %v792_v45, %v375_v60  ;;  %v888_v60 = vld [vmem:[%s1543_s0 + $0x98] sm:$0xff]  }
  0x2a   :  { %566 = vst.msk [vmem:[%s1547_s4 + $0xb0] sm:$0xff] %vm543_vm0, %v501_v58  ;;  %v800_v6 = vunpack.c.l.bf16 %v914_v57  ;;  %v673_v8 = vunpack.c.h.bf16 %v883_v52  ;;  %v377_v10 = vadd.f32 %v977_v7, %v307_v63  ;;  %v309_v12 = vmul.f32 %v672_v2, %v960_v0 }
  0x2b   :  { %v440_v9 = vadd.f32 %v793_v47, %v376_v62  ;;  %v378_v11 = vadd.f32 %v977_v7, %v308_v1  ;;  %567 = vst.msk [vmem:[%s1547_s4 + $0xb8] sm:$0xff] %vm543_vm0, %v502_v4  ;;  %v503_v14 = vmax.f32 %v439_v5, 0.0  ;;  %v801_v15 = vunpack.c.h.bf16 %v914_v57 }
  0x2c   :  { %v310_v16 = vmul.f32 %v673_v8, %v960_v0  ;;  %v676_v17 = vunpack.c.l.bf16 %v884_v3  ;;  %v441_v19 = vadd.f32 %v796_v55, %v377_v10  ;;  %v379_v21 = vadd.f32 %v977_v7, %v309_v12 }
  0x2d   :  { %v504_v18 = vmax.f32 %v440_v9, 0.0  ;;  %v442_v20 = vadd.f32 %v797_v61, %v378_v11  ;;  %568 = vst.msk [vmem:[%s1547_s4 + $0xc0] sm:$0xff] %vm543_vm0, %v503_v14  ;;  %v804_v24 = vunpack.c.l.bf16 %v915_v13  ;;  %v677_v26 = vunpack.c.h.bf16 %v884_v3 }
  0x2e   :  { %v380_v23 = vadd.f32 %v977_v7, %v310_v16  ;;  %v311_v25 = vmul.f32 %v676_v17, %v960_v0  ;;  %v505_v28 = vmax.f32 %v441_v19, 0.0  ;;  %v443_v30 = vadd.f32 %v800_v6, %v379_v21  ;;  %v919_v6 = vld [vmem:[%s1546_s3 + $0x98] sm:$0xff]   ;;  %v889_v16 = vld [vmem:[%s1543_s0 + $0xa0] sm:$0xff]  }
  0x2f   :  { %569 = vst.msk [vmem:[%s1547_s4 + $0xc8] sm:$0xff] %vm543_vm0, %v504_v18  ;;  %v506_v29 = vmax.f32 %v442_v20, 0.0  ;;  %v805_v31 = vunpack.c.h.bf16 %v915_v13  ;;  %v312_v34 = vmul.f32 %v677_v26, %v960_v0  ;;  %v680_v35 = vunpack.c.l.bf16 %v885_v22  ;;  %v920_v21 = vld [vmem:[%s1546_s3 + $0xa0] sm:$0xff]  }
  0x30   :  { %v444_v32 = vadd.f32 %v801_v15, %v380_v23  ;;  %v381_v33 = vadd.f32 %v977_v7, %v311_v25  ;;  %570 = vst.msk [vmem:[%s1547_s4 + $0xd0] sm:$0xff] %vm543_vm0, %v505_v28  ;;  %v507_v38 = vmax.f32 %v443_v30, 0.0  ;;  %v808_v39 = vunpack.c.l.bf16 %v916_v27  ;;  %v890_v30 = vld [vmem:[%s1543_s0 + $0xa8] sm:$0xff]  }
  0x31   :  { %571 = vst.msk [vmem:[%s1547_s4 + $0xd8] sm:$0xff] %vm543_vm0, %v506_v29  ;;  %v681_v40 = vunpack.c.h.bf16 %v885_v22  ;;  %v809_v41 = vunpack.c.h.bf16 %v916_v27  ;;  %v382_v44 = vadd.f32 %v977_v7, %v312_v34  ;;  %v313_v45 = vmul.f32 %v680_v35, %v960_v0 }
  0x32   :  { %v508_v42 = vmax.f32 %v444_v32, 0.0  ;;  %v445_v43 = vadd.f32 %v804_v24, %v381_v33  ;;  %572 = vst.msk [vmem:[%s1547_s4 + $0xe0] sm:$0xff] %vm543_vm0, %v507_v38  ;;  %v684_v48 = vunpack.c.l.bf16 %v886_v36  ;;  %v812_v49 = vunpack.c.l.bf16 %v917_v37 }
  0x33   :  { %v314_v47 = vmul.f32 %v681_v40, %v960_v0  ;;  %v685_v50 = vunpack.c.h.bf16 %v886_v36  ;;  %v446_v53 = vadd.f32 %v805_v31, %v382_v44  ;;  %v383_v54 = vadd.f32 %v977_v7, %v313_v45  ;;  %v921_v31 = vld [vmem:[%s1546_s3 + $0xa8] sm:$0xff]   ;;  %v891_v40 = vld [vmem:[%s1543_s0 + $0xb0] sm:$0xff]  }
  0x34   :  { %573 = vst.msk [vmem:[%s1547_s4 + $0xe8] sm:$0xff] %vm543_vm0, %v508_v42  ;;  %v509_v52 = vmax.f32 %v445_v43, 0.0  ;;  %v813_v55 = vunpack.c.h.bf16 %v917_v37  ;;  %v315_v57 = vmul.f32 %v684_v48, %v960_v0  ;;  %v688_v59 = vunpack.c.l.bf16 %v887_v46  ;;  %v922_v45 = vld [vmem:[%s1546_s3 + $0xb0] sm:$0xff]  }
  0x35   :  { %v384_v56 = vadd.f32 %v977_v7, %v314_v47  ;;  %v316_v58 = vmul.f32 %v685_v50, %v960_v0  ;;  %v510_v61 = vmax.f32 %v446_v53, 0.0  ;;  %v447_v62 = vadd.f32 %v808_v39, %v383_v54  ;;  %v892_v54 = vld [vmem:[%s1543_s0 + $0xb8] sm:$0xff]  }
  0x36   :  { %574 = vst.msk [vmem:[%s1547_s4 + $0xf0] sm:$0xff] %vm543_vm0, %v509_v52  ;;  %v816_v63 = vunpack.c.l.bf16 %v918_v51  ;;  %v689_v1 = vunpack.c.h.bf16 %v887_v46  ;;  %v385_v3 = vadd.f32 %v977_v7, %v315_v57  ;;  %v317_v5 = vmul.f32 %v688_v59, %v960_v0 }
  0x37   :  { %v448_v2 = vadd.f32 %v809_v41, %v384_v56  ;;  %v386_v4 = vadd.f32 %v977_v7, %v316_v58  ;;  %575 = vst.msk [vmem:[%s1547_s4 + $0xf8] sm:$0xff] %vm543_vm0, %v510_v61  ;;  %v511_v8 = vmax.f32 %v447_v62, 0.0  ;;  %v817_v9 = vunpack.c.h.bf16 %v918_v51 }
  0x38   :  { %v318_v10 = vmul.f32 %v689_v1, %v960_v0  ;;  %v692_v11 = vunpack.c.l.bf16 %v888_v60  ;;  %v449_v13 = vadd.f32 %v812_v49, %v385_v3  ;;  %v387_v15 = vadd.f32 %v977_v7, %v317_v5 }
  0x39   :  { %v512_v12 = vmax.f32 %v448_v2, 0.0  ;;  %v450_v14 = vadd.f32 %v813_v55, %v386_v4  ;;  %576 = vst.msk [vmem:[%s1547_s4 + $0x100] sm:$0xff] %vm543_vm0, %v511_v8  ;;  %v820_v18 = vunpack.c.l.bf16 %v919_v6  ;;  %v693_v20 = vunpack.c.h.bf16 %v888_v60 }
  0x3a   :  { %v388_v17 = vadd.f32 %v977_v7, %v318_v10  ;;  %v319_v19 = vmul.f32 %v692_v11, %v960_v0  ;;  %v513_v22 = vmax.f32 %v449_v13, 0.0  ;;  %v451_v24 = vadd.f32 %v816_v63, %v387_v15  ;;  %v923_v63 = vld [vmem:[%s1546_s3 + $0xb8] sm:$0xff]   ;;  %v893_v10 = vld [vmem:[%s1543_s0 + $0xc0] sm:$0xff]  }
  0x3b   :  { %577 = vst.msk [vmem:[%s1547_s4 + $0x108] sm:$0xff] %vm543_vm0, %v512_v12  ;;  %v514_v23 = vmax.f32 %v450_v14, 0.0  ;;  %v821_v25 = vunpack.c.h.bf16 %v919_v6  ;;  %v320_v28 = vmul.f32 %v693_v20, %v960_v0  ;;  %v696_v29 = vunpack.c.l.bf16 %v889_v16  ;;  %v924_v15 = vld [vmem:[%s1546_s3 + $0xc0] sm:$0xff]  }
  0x3c   :  { %v452_v26 = vadd.f32 %v817_v9, %v388_v17  ;;  %v389_v27 = vadd.f32 %v977_v7, %v319_v19  ;;  %578 = vst.msk [vmem:[%s1547_s4 + $0x110] sm:$0xff] %vm543_vm0, %v513_v22  ;;  %v515_v32 = vmax.f32 %v451_v24, 0.0  ;;  %v824_v33 = vunpack.c.l.bf16 %v920_v21  ;;  %v894_v24 = vld [vmem:[%s1543_s0 + $0xc8] sm:$0xff]  }
  0x3d   :  { %579 = vst.msk [vmem:[%s1547_s4 + $0x118] sm:$0xff] %vm543_vm0, %v514_v23  ;;  %v697_v34 = vunpack.c.h.bf16 %v889_v16  ;;  %v825_v35 = vunpack.c.h.bf16 %v920_v21  ;;  %v390_v38 = vadd.f32 %v977_v7, %v320_v28  ;;  %v321_v39 = vmul.f32 %v696_v29, %v960_v0 }
  0x3e   :  { %v516_v36 = vmax.f32 %v452_v26, 0.0  ;;  %v453_v37 = vadd.f32 %v820_v18, %v389_v27  ;;  %580 = vst.msk [vmem:[%s1547_s4 + $0x120] sm:$0xff] %vm543_vm0, %v515_v32  ;;  %v700_v42 = vunpack.c.l.bf16 %v890_v30  ;;  %v828_v43 = vunpack.c.l.bf16 %v921_v31 }
  0x3f   :  { %v322_v41 = vmul.f32 %v697_v34, %v960_v0  ;;  %v701_v44 = vunpack.c.h.bf16 %v890_v30  ;;  %v454_v47 = vadd.f32 %v821_v25, %v390_v38  ;;  %v391_v48 = vadd.f32 %v977_v7, %v321_v39  ;;  %v925_v25 = vld [vmem:[%s1546_s3 + $0xc8] sm:$0xff]   ;;  %v895_v34 = vld [vmem:[%s1543_s0 + $0xd0] sm:$0xff]  }
  0x40   :  { %581 = vst.msk [vmem:[%s1547_s4 + $0x128] sm:$0xff] %vm543_vm0, %v516_v36  ;;  %v517_v46 = vmax.f32 %v453_v37, 0.0  ;;  %v829_v49 = vunpack.c.h.bf16 %v921_v31  ;;  %v323_v51 = vmul.f32 %v700_v42, %v960_v0  ;;  %v704_v53 = vunpack.c.l.bf16 %v891_v40  ;;  %v926_v39 = vld [vmem:[%s1546_s3 + $0xd0] sm:$0xff]  }
  0x41   :  { %v392_v50 = vadd.f32 %v977_v7, %v322_v41  ;;  %v324_v52 = vmul.f32 %v701_v44, %v960_v0  ;;  %v518_v55 = vmax.f32 %v454_v47, 0.0  ;;  %v455_v56 = vadd.f32 %v824_v33, %v391_v48  ;;  %v896_v48 = vld [vmem:[%s1543_s0 + $0xd8] sm:$0xff]  }
  0x42   :  { %582 = vst.msk [vmem:[%s1547_s4 + $0x130] sm:$0xff] %vm543_vm0, %v517_v46  ;;  %v832_v57 = vunpack.c.l.bf16 %v922_v45  ;;  %v705_v58 = vunpack.c.h.bf16 %v891_v40  ;;  %v393_v60 = vadd.f32 %v977_v7, %v323_v51  ;;  %v325_v62 = vmul.f32 %v704_v53, %v960_v0 }
  0x43   :  { %v456_v59 = vadd.f32 %v825_v35, %v392_v50  ;;  %v394_v61 = vadd.f32 %v977_v7, %v324_v52  ;;  %583 = vst.msk [vmem:[%s1547_s4 + $0x138] sm:$0xff] %vm543_vm0, %v518_v55  ;;  %v519_v1 = vmax.f32 %v455_v56, 0.0  ;;  %v833_v2 = vunpack.c.h.bf16 %v922_v45 }
  0x44   :  { %v326_v3 = vmul.f32 %v705_v58, %v960_v0  ;;  %v708_v4 = vunpack.c.l.bf16 %v892_v54  ;;  %v457_v6 = vadd.f32 %v828_v43, %v393_v60  ;;  %v395_v9 = vadd.f32 %v977_v7, %v325_v62 }
  0x45   :  { %v520_v5 = vmax.f32 %v456_v59, 0.0  ;;  %v458_v8 = vadd.f32 %v829_v49, %v394_v61  ;;  %584 = vst.msk [vmem:[%s1547_s4 + $0x140] sm:$0xff] %vm543_vm0, %v519_v1  ;;  %v836_v12 = vunpack.c.l.bf16 %v923_v63  ;;  %v709_v14 = vunpack.c.h.bf16 %v892_v54 }
  0x46   :  { %v396_v11 = vadd.f32 %v977_v7, %v326_v3  ;;  %v327_v13 = vmul.f32 %v708_v4, %v960_v0  ;;  %v521_v16 = vmax.f32 %v457_v6, 0.0  ;;  %v459_v18 = vadd.f32 %v832_v57, %v395_v9  ;;  %v927_v57 = vld [vmem:[%s1546_s3 + $0xd8] sm:$0xff]   ;;  %v897_v3 = vld [vmem:[%s1543_s0 + $0xe0] sm:$0xff]  }
  0x47   :  { %585 = vst.msk [vmem:[%s1547_s4 + $0x148] sm:$0xff] %vm543_vm0, %v520_v5  ;;  %v522_v17 = vmax.f32 %v458_v8, 0.0  ;;  %v837_v19 = vunpack.c.h.bf16 %v923_v63  ;;  %v328_v22 = vmul.f32 %v709_v14, %v960_v0  ;;  %v712_v23 = vunpack.c.l.bf16 %v893_v10  ;;  %v928_v9 = vld [vmem:[%s1546_s3 + $0xe0] sm:$0xff]  }
  0x48   :  { %v460_v20 = vadd.f32 %v833_v2, %v396_v11  ;;  %v397_v21 = vadd.f32 %v977_v7, %v327_v13  ;;  %586 = vst.msk [vmem:[%s1547_s4 + $0x150] sm:$0xff] %vm543_vm0, %v521_v16  ;;  %v523_v26 = vmax.f32 %v459_v18, 0.0  ;;  %v840_v27 = vunpack.c.l.bf16 %v924_v15  ;;  %v898_v18 = vld [vmem:[%s1543_s0 + $0xe8] sm:$0xff]  }
  0x49   :  { %587 = vst.msk [vmem:[%s1547_s4 + $0x158] sm:$0xff] %vm543_vm0, %v522_v17  ;;  %v713_v28 = vunpack.c.h.bf16 %v893_v10  ;;  %v841_v29 = vunpack.c.h.bf16 %v924_v15  ;;  %v398_v32 = vadd.f32 %v977_v7, %v328_v22  ;;  %v329_v33 = vmul.f32 %v712_v23, %v960_v0 }
  0x4a   :  { %v524_v30 = vmax.f32 %v460_v20, 0.0  ;;  %v461_v31 = vadd.f32 %v836_v12, %v397_v21  ;;  %588 = vst.msk [vmem:[%s1547_s4 + $0x160] sm:$0xff] %vm543_vm0, %v523_v26  ;;  %v716_v36 = vunpack.c.l.bf16 %v894_v24  ;;  %v844_v37 = vunpack.c.l.bf16 %v925_v25 }
  0x4b   :  { %v330_v35 = vmul.f32 %v713_v28, %v960_v0  ;;  %v717_v38 = vunpack.c.h.bf16 %v894_v24  ;;  %v462_v41 = vadd.f32 %v837_v19, %v398_v32  ;;  %v399_v42 = vadd.f32 %v977_v7, %v329_v33  ;;  %v929_v19 = vld [vmem:[%s1546_s3 + $0xe8] sm:$0xff]   ;;  %v899_v28 = vld [vmem:[%s1543_s0 + $0xf0] sm:$0xff]  }
  0x4c   :  { %589 = vst.msk [vmem:[%s1547_s4 + $0x168] sm:$0xff] %vm543_vm0, %v524_v30  ;;  %v525_v40 = vmax.f32 %v461_v31, 0.0  ;;  %v845_v43 = vunpack.c.h.bf16 %v925_v25  ;;  %v331_v45 = vmul.f32 %v716_v36, %v960_v0  ;;  %v720_v47 = vunpack.c.l.bf16 %v895_v34  ;;  %v930_v33 = vld [vmem:[%s1546_s3 + $0xf0] sm:$0xff]  }
  0x4d   :  { %v400_v44 = vadd.f32 %v977_v7, %v330_v35  ;;  %v332_v46 = vmul.f32 %v717_v38, %v960_v0  ;;  %v526_v49 = vmax.f32 %v462_v41, 0.0  ;;  %v463_v50 = vadd.f32 %v840_v27, %v399_v42  ;;  %v900_v42 = vld [vmem:[%s1543_s0 + $0xf8] sm:$0xff]  }
  0x4e   :  { %590 = vst.msk [vmem:[%s1547_s4 + $0x170] sm:$0xff] %vm543_vm0, %v525_v40  ;;  %v848_v51 = vunpack.c.l.bf16 %v926_v39  ;;  %v721_v52 = vunpack.c.h.bf16 %v895_v34  ;;  %v401_v54 = vadd.f32 %v977_v7, %v331_v45  ;;  %v333_v56 = vmul.f32 %v720_v47, %v960_v0 }
  0x4f   :  { %v464_v53 = vadd.f32 %v841_v29, %v400_v44  ;;  %v402_v55 = vadd.f32 %v977_v7, %v332_v46  ;;  %591 = vst.msk [vmem:[%s1547_s4 + $0x178] sm:$0xff] %vm543_vm0, %v526_v49  ;;  %v527_v58 = vmax.f32 %v463_v50, 0.0  ;;  %v849_v59 = vunpack.c.h.bf16 %v926_v39 }
  0x50   :  { %v334_v60 = vmul.f32 %v721_v52, %v960_v0  ;;  %v724_v61 = vunpack.c.l.bf16 %v896_v48  ;;  %v465_v63 = vadd.f32 %v844_v37, %v401_v54  ;;  %v403_v2 = vadd.f32 %v977_v7, %v333_v56 }
  0x51   :  { %v528_v62 = vmax.f32 %v464_v53, 0.0  ;;  %v466_v1 = vadd.f32 %v845_v43, %v402_v55  ;;  %592 = vst.msk [vmem:[%s1547_s4 + $0x180] sm:$0xff] %vm543_vm0, %v527_v58  ;;  %v852_v5 = vunpack.c.l.bf16 %v927_v57  ;;  %v725_v8 = vunpack.c.h.bf16 %v896_v48 }
  0x52   :  { %v404_v4 = vadd.f32 %v977_v7, %v334_v60  ;;  %v335_v6 = vmul.f32 %v724_v61, %v960_v0  ;;  %v529_v10 = vmax.f32 %v465_v63, 0.0  ;;  %v467_v12 = vadd.f32 %v848_v51, %v403_v2  ;;  %v931_v51 = vld [vmem:[%s1546_s3 + $0xf8] sm:$0xff]  }
  0x53   :  { %593 = vst.msk [vmem:[%s1547_s4 + $0x188] sm:$0xff] %vm543_vm0, %v528_v62  ;;  %v530_v11 = vmax.f32 %v466_v1, 0.0  ;;  %v853_v13 = vunpack.c.h.bf16 %v927_v57  ;;  %v336_v16 = vmul.f32 %v725_v8, %v960_v0  ;;  %v728_v17 = vunpack.c.l.bf16 %v897_v3 }
  0x54   :  { %v468_v14 = vadd.f32 %v849_v59, %v404_v4  ;;  %v405_v15 = vadd.f32 %v977_v7, %v335_v6  ;;  %594 = vst.msk [vmem:[%s1547_s4 + $0x190] sm:$0xff] %vm543_vm0, %v529_v10  ;;  %v531_v20 = vmax.f32 %v467_v12, 0.0  ;;  %v856_v21 = vunpack.c.l.bf16 %v928_v9 }
  0x55   :  { %595 = vst.msk [vmem:[%s1547_s4 + $0x198] sm:$0xff] %vm543_vm0, %v530_v11  ;;  %v729_v22 = vunpack.c.h.bf16 %v897_v3  ;;  %v857_v23 = vunpack.c.h.bf16 %v928_v9  ;;  %v406_v26 = vadd.f32 %v977_v7, %v336_v16  ;;  %v337_v27 = vmul.f32 %v728_v17, %v960_v0 }
  0x56   :  { %v532_v24 = vmax.f32 %v468_v14, 0.0  ;;  %v469_v25 = vadd.f32 %v852_v5, %v405_v15  ;;  %596 = vst.msk [vmem:[%s1547_s4 + $0x1a0] sm:$0xff] %vm543_vm0, %v531_v20  ;;  %v732_v30 = vunpack.c.l.bf16 %v898_v18  ;;  %v860_v31 = vunpack.c.l.bf16 %v929_v19 }
  0x57   :  { %v338_v29 = vmul.f32 %v729_v22, %v960_v0  ;;  %v733_v32 = vunpack.c.h.bf16 %v898_v18  ;;  %v470_v35 = vadd.f32 %v853_v13, %v406_v26  ;;  %v407_v36 = vadd.f32 %v977_v7, %v337_v27 }
  0x58   :  { %597 = vst.msk [vmem:[%s1547_s4 + $0x1a8] sm:$0xff] %vm543_vm0, %v532_v24  ;;  %v533_v34 = vmax.f32 %v469_v25, 0.0  ;;  %v861_v37 = vunpack.c.h.bf16 %v929_v19  ;;  %v339_v39 = vmul.f32 %v732_v30, %v960_v0  ;;  %v736_v41 = vunpack.c.l.bf16 %v899_v28 }
  0x59   :  { %v408_v38 = vadd.f32 %v977_v7, %v338_v29  ;;  %v340_v40 = vmul.f32 %v733_v32, %v960_v0  ;;  %v534_v43 = vmax.f32 %v470_v35, 0.0  ;;  %v471_v44 = vadd.f32 %v856_v21, %v407_v36 }
  0x5a   :  { %598 = vst.msk [vmem:[%s1547_s4 + $0x1b0] sm:$0xff] %vm543_vm0, %v533_v34  ;;  %v864_v45 = vunpack.c.l.bf16 %v930_v33  ;;  %v737_v46 = vunpack.c.h.bf16 %v899_v28  ;;  %v409_v48 = vadd.f32 %v977_v7, %v339_v39  ;;  %v341_v50 = vmul.f32 %v736_v41, %v960_v0 }
  0x5b   :  { %v472_v47 = vadd.f32 %v857_v23, %v408_v38  ;;  %v410_v49 = vadd.f32 %v977_v7, %v340_v40  ;;  %599 = vst.msk [vmem:[%s1547_s4 + $0x1b8] sm:$0xff] %vm543_vm0, %v534_v43  ;;  %v535_v52 = vmax.f32 %v471_v44, 0.0  ;;  %v865_v53 = vunpack.c.h.bf16 %v930_v33 }
  0x5c   :  { %v342_v54 = vmul.f32 %v737_v46, %v960_v0  ;;  %v740_v55 = vunpack.c.l.bf16 %v900_v42  ;;  %v473_v57 = vadd.f32 %v860_v31, %v409_v48  ;;  %v411_v59 = vadd.f32 %v977_v7, %v341_v50 }
  0x5d   :  { %v536_v56 = vmax.f32 %v472_v47, 0.0  ;;  %v474_v58 = vadd.f32 %v861_v37, %v410_v49  ;;  %600 = vst.msk [vmem:[%s1547_s4 + $0x1c0] sm:$0xff] %vm543_vm0, %v535_v52  ;;  %v868_v61 = vunpack.c.l.bf16 %v931_v51  ;;  %v741_v63 = vunpack.c.h.bf16 %v900_v42 }
  0x5e   :  { %v412_v60 = vadd.f32 %v977_v7, %v342_v54  ;;  %v343_v62 = vmul.f32 %v740_v55, %v960_v0  ;;  %v537_v1 = vmax.f32 %v473_v57, 0.0  ;;  %v475_v3 = vadd.f32 %v864_v45, %v411_v59 }
  0x5f   :  { %601 = vst.msk [vmem:[%s1547_s4 + $0x1c8] sm:$0xff] %vm543_vm0, %v536_v56  ;;  %v538_v2 = vmax.f32 %v474_v58, 0.0  ;;  %v869_v6 = vunpack.c.h.bf16 %v931_v51  ;;  %v344_v8 = vmul.f32 %v741_v63, %v960_v0 }
  0x60   :  { %v476_v4 = vadd.f32 %v865_v53, %v412_v60  ;;  %v413_v5 = vadd.f32 %v977_v7, %v343_v62  ;;  %602 = vst.msk [vmem:[%s1547_s4 + $0x1d0] sm:$0xff] %vm543_vm0, %v537_v1  ;;  %v539_v9 = vmax.f32 %v475_v3, 0.0 }
  0x61   :  { %603 = vst.msk [vmem:[%s1547_s4 + $0x1d8] sm:$0xff] %vm543_vm0, %v538_v2  ;;  %v414_v12 = vadd.f32 %v977_v7, %v344_v8 }
  0x62   :  { %v540_v10 = vmax.f32 %v476_v4, 0.0  ;;  %v477_v11 = vadd.f32 %v868_v61, %v413_v5  ;;  %604 = vst.msk [vmem:[%s1547_s4 + $0x1e0] sm:$0xff] %vm543_vm0, %v539_v9 }
  0x63   :  { %v478_v13 = vadd.f32 %v869_v6, %v414_v12 }
  0x64   :  { %605 = vst.msk [vmem:[%s1547_s4 + $0x1e8] sm:$0xff] %vm543_vm0, %v540_v10  ;;  %v541_v0 = vmax.f32 %v477_v11, 0.0 }
  0x65   :  { %v542_v14 = vmax.f32 %v478_v13, 0.0 }
  0x66   :  { %606 = vst.msk [vmem:[%s1547_s4 + $0x1f0] sm:$0xff] %vm543_vm0, %v541_v0 }
  0x67   :  { %607 = vst.msk [vmem:[%s1547_s4 + $0x1f8] sm:$0xff] %vm543_vm0, %v542_v14 }

// kernel: basic_block_forward.3
= control target key start
LH: loop header
LB: loop body
LE: loop exit
PB: predicated region body
PF: predicated region fallthrough
CT: control target
= control target key end

     0   :  { %v5263_v0 = vmov 0   ;;  %s3242_s12 = smov 8   ;;  %vm612_vm0 = vcmask 1047552   ;;  %vm613_vm1 = vsmask.f32 7424  ;;  %s3243_s21 = smov 16   ;;  %s5258_s0 = inlined_call_operand.vmem [shape: bf16[2,16,16,8], index: 0, kind: input, shape index: {}]   ;;  %s5259_s1 = inlined_call_operand.vmem [shape: bf16[72,8], index: 1, kind: input, shape index: {}]   ;;  %s5260_s2 = inlined_call_operand.vmem [shape: bf16[2,16,16,8], index: 2, kind: output, shape index: {0}]   ;;  %s5261_s3 = inlined_call_operand.vmem [shape: f32[1,2,8], index: 3, kind: output, shape index: {1}]  }
   0x1   :  { %698 = vrot.lane.b32.xlu0 %v5263_v0, %s3242_s12  ;;  %v3275_v1 = vld [vmem:[%s5258_s0 + $0x8] sm:$0xff]   ;;  %v3280_v2 = vld [vmem:[%s5258_s0] sm:$0xff]   ;;  %v3287_v3 = vld [vmem:[%s5258_s0 + $0x10] sm:$0xff]   ;;  %vm485_vm3 = vcmask 1040384   ;;  %vm486_vm4 = vsmask.f32 256 }
   0x2   :  { %702 = vrot.lane.b32.xlu1 %v3275_v1, %s3242_s12  ;;  %v3294_v4 = vld [vmem:[%s5258_s0 + $0x18] sm:$0xff]   ;;  %v3301_v5 = vld [vmem:[%s5258_s0 + $0x20] sm:$0xff]   ;;  %v3308_v6 = vld [vmem:[%s5258_s0 + $0x28] sm:$0xff]   ;;  %v5262_v23 = vshll.u32 %v3280_v2, 16  ;;  %vm1903_vm5 = vcmask 1043456   ;;  %s3244_s27 = smov 24  }
   0x3   :  { %v3315_v7 = vld [vmem:[%s5258_s0 + $0x30] sm:$0xff]   ;;  %v3322_v8 = vld [vmem:[%s5258_s0 + $0x38] sm:$0xff]   ;;  %v3329_v9 = vld [vmem:[%s5258_s0 + $0x40] sm:$0xff]   ;;  %v280_v24 = vshrl.u32 %v3308_v6, 16  ;;  %v283_v25 = vshll.u32 %v3308_v6, 16  ;;  %s3245_s30 = smov 32  }
   0x4   :  { %v3336_v10 = vld [vmem:[%s5258_s0 + $0x48] sm:$0xff]   ;;  %v3343_v11 = vld [vmem:[%s5258_s0 + $0x50] sm:$0xff]   ;;  %v3350_v12 = vld [vmem:[%s5258_s0 + $0x58] sm:$0xff]   ;;  %v287_v26 = vshrl.u32 %v3315_v7, 16  ;;  %v290_v28 = vshll.u32 %v3315_v7, 16  ;;  %v294_v29 = vshrl.u32 %v3322_v8, 16 }
   0x5   :  { %700 = vrot.lane.b32.xlu0 %v3280_v2, %s3242_s12  ;;  %v3357_v13 = vld [vmem:[%s5258_s0 + $0x60] sm:$0xff]   ;;  %v3364_v14 = vld [vmem:[%s5258_s0 + $0x68] sm:$0xff]   ;;  %v3371_v15 = vld [vmem:[%s5258_s0 + $0x70] sm:$0xff]   ;;  %v297_v30 = vshll.u32 %v3322_v8, 16  ;;  %v315_v31 = vshrl.u32 %v3343_v11, 16  ;;  %v301_v32 = vshrl.u32 %v3329_v9, 16 }
   0x6   :  { %704 = vrot.lane.b32.xlu1 %v3287_v3, %s3242_s12  ;;  %v3378_v16 = vld [vmem:[%s5258_s0 + $0x80] sm:$0xff]   ;;  %v3385_v17 = vld [vmem:[%s5258_s0 + $0x88] sm:$0xff]   ;;  %v3392_v18 = vld [vmem:[%s5258_s0 + $0x90] sm:$0xff]   ;;  %v304_v33 = vshll.u32 %v3329_v9, 16  ;;  %v308_v34 = vshrl.u32 %v3336_v10, 16  ;;  %v322_v35 = vshrl.u32 %v3350_v12, 16 }
   0x7   :  { %v3207_v19 = vld [vmem:[%s5258_s0 + $0x98] sm:$0xff]   ;;  %v3208_v20 = vld [vmem:[%s5258_s0 + $0xa0] sm:$0xff]   ;;  %v3209_v21 = vld [vmem:[%s5258_s0 + $0xa8] sm:$0xff]   ;;  %v311_v37 = vshll.u32 %v3336_v10, 16  ;;  %v317_v38 = vrot.slane %v315_v31, 7  ;;  %v318_v39 = vshll.u32 %v3343_v11, 16 }
   0x8   :  { %v3210_v22 = vld [vmem:[%s5258_s0 + $0xb0] sm:$0xff]   ;;  %v3211_v27 = vld [vmem:[%s5258_s0 + $0xb8] sm:$0xff]   ;;  %v3212_v36 = vld [vmem:[%s5258_s0 + $0xc0] sm:$0xff]   ;;  %v329_v40 = vshrl.u32 %v3357_v13, 16  ;;  %v324_v41 = vrot.slane %v322_v35, 7  ;;  %v325_v42 = vshll.u32 %v3350_v12, 16 }
   0x9   :  { %706 = vrot.lane.b32.xlu0 %v3294_v4, %s3242_s12  ;;  %v332_v43 = vshll.u32 %v3357_v13, 16  ;;  %v336_v44 = vshrl.u32 %v3364_v14, 16  ;;  %v3213_v45 = vld [vmem:[%s5258_s0 + $0xc8] sm:$0xff]   ;;  %v5267_v47 = vshrl.u32 %v3371_v15, 16  ;;  %v282_v48 = vrot.slane %v280_v24, 7  ;;  %v3214_v54 = vld [vmem:[%s5258_s0 + $0xd0] sm:$0xff]   ;;  %vm3545_vm2 = vmand %vm612_vm0, %vm613_vm1 }
   0xa   :  { %708 = vrot.lane.b32.xlu1 %v3301_v5, %s3242_s12  ;;  %v331_v46 = vrot.slane %v329_v40, 7  ;;  %v289_v49 = vrot.slane %v287_v26, 7  ;;  %v5265_v51 = vshrl.u32 %v3378_v16, 16  ;;  %v296_v52 = vrot.slane %v294_v29, 7  ;;  %v3215_v63 = vld [vmem:[%s5258_s0 + $0xd8] sm:$0xff]   ;;  %vm3720_vm6 = vmand %vm485_vm3, %vm486_vm4  ;;  %s3246_s6 = smov 40  }
   0xb   :  { %v338_v50 = vrot.slane %v336_v44, 7  ;;  %v303_v53 = vrot.slane %v301_v32, 7  ;;  %v345_v55 = vrot.slane %v5267_v47, 7  ;;  %v3468_v56 = vor.u32 %v283_v25, %v282_v48  ;;  %s3248_s7 = smov 56   ;;  %s3249_s8 = smov 64  }
   0xc   :  { %v3472_v57 = vor.u32 %v290_v28, %v289_v49  ;;  %v310_v58 = vrot.slane %v308_v34, 7  ;;  %v352_v59 = vrot.slane %v5265_v51, 7  ;;  %v3480_v60 = vor.u32 %v297_v30, %v296_v52 }
   0xd   :  { %710 = vrot.lane.b32.xlu0 %v3308_v6, %s3242_s12  ;;  %v3484_v61 = vor.u32 %v304_v33, %v303_v53  ;;  %v3488_v62 = vor.u32 %v318_v39, %v317_v38  ;;  %v3508_v38 = vor.u32 %v332_v43, %v331_v46  ;;  %v5271_v49 = vshrl.u32 %v3280_v2, 16 }
   0xe   :  { %712 = vrot.lane.b32.xlu1 %v3315_v7, %s3242_s12  ;;  %v521_v46 = vrot.slane %v5262_v23, 1  ;;  %v5270_v52 = vshll.u32 %v3287_v3, 16  ;;  %v269_v23 = vshll.u32 %v3294_v4, 16  ;;  %v259_v51 = vshrl.u32 %v3287_v3, 16 }
   0xf   :  { %vm1267_vm7 = vcmask 64512   ;;  %vm1361_vm8 = vcmask 130048   ;;  %vm1424_vm9 = vcmask 195584   ;;  %vm1489_vm10 = vcmask 261120  }
  0x10   :  { %vm1554_vm11 = vcmask 326656   ;;  %vm1619_vm12 = vcmask 392192   ;;  %vm1683_vm13 = vcmask 457728   ;;  %vm1747_vm14 = vcmask 523264  }
  0x11   :  { %714 = vrot.lane.b32.xlu0 %v3322_v8, %s3242_s12  ;;  %vm1838_vm15 = vcmask 588800   ;;  %vm2452_vm0 = vcmask 60416   ;;  %vm2849_vm1 = vcmask 58368  }
  0x12   :  { %716 = vrot.lane.b32.xlu1 %v3329_v9, %s3242_s12 }
  0x15   :  { %718 = vrot.lane.b32.xlu0 %v3336_v10, %s3242_s12 }
  0x16   :  { %720 = vrot.lane.b32.xlu1 %v3343_v11, %s3242_s12 }
  0x19   :  { %722 = vrot.lane.b32.xlu0 %v3350_v12, %s3242_s12 }
  0x1a   :  { %724 = vrot.lane.b32.xlu1 %v3357_v13, %s3242_s12 }
  0x1d   :  { %726 = vrot.lane.b32.xlu0 %v3364_v14, %s3242_s12 }
  0x1e   :  { %728 = vrot.lane.b32.xlu1 %v3371_v15, %s3242_s12 }
  0x21   :  { %730 = vrot.lane.b32.xlu0 %v3378_v16, %s3242_s12 }
  0x22   :  { %732 = vrot.lane.b32.xlu1 %v3385_v17, %s3242_s12 }
  0x25   :  { %734 = vrot.lane.b32.xlu0 %v3392_v18, %s3242_s12 }
  0x26   :  { %736 = vrot.lane.b32.xlu1 %v3207_v19, %s3242_s12  ;;  %v339_v19 = vshll.u32 %v3364_v14, 16 }
  0x29   :  { %738 = vrot.lane.b32.xlu0 %v3208_v20, %s3242_s12  ;;  %v5269_v20 = vshll.u32 %v3371_v15, 16 }
  0x2a   :  { %740 = vrot.lane.b32.xlu1 %v3209_v21, %s3242_s12  ;;  %v3498_v21 = vor.u32 %v311_v37, %v310_v58 }
  0x2b   :  { %v3520_v48 = vor.u32 %v5269_v20, %v345_v55  ;;  %v252_v55 = vshrl.u32 %v3275_v1, 16  ;;  %v266_v20 = vshrl.u32 %v3294_v4, 16 }
  0x2d   :  { %742 = vrot.lane.b32.xlu0 %v3210_v22, %s3242_s12  ;;  %v3502_v22 = vor.u32 %v325_v42, %v324_v41  ;;  %v3516_v41 = vor.u32 %v339_v19, %v338_v50  ;;  %v3217_v50 = vld [vmem:[%s5258_s0 + $0xe8] sm:$0xff]  }
  0x2e   :  { %744 = vrot.lane.b32.xlu1 %v3211_v27, %s3242_s12  ;;  %v5266_v27 = vshll.u32 %v3275_v1, 16 }
  0x30   :  { %v523_v58 = vrot.slane %v5266_v27, 1  ;;  %v525_v27 = vrot.slane %v5270_v52, 1 }
  0x31   :  { %746 = vrot.lane.b32.xlu0 %v3212_v36, %s3242_s12  ;;  %v5268_v36 = vshll.u32 %v3378_v16, 16 }
  0x32   :  { %748 = vrot.lane.b32.xlu1 %v3213_v45, %s3242_s12  ;;  %v3216_v45 = vld [vmem:[%s5258_s0 + $0xe0] sm:$0xff]  }
  0x33   :  { %v3528_v53 = vor.u32 %v5268_v36, %v352_v59  ;;  %v3218_v59 = vld [vmem:[%s5258_s0 + $0xf0] sm:$0xff]   ;;  %v524_v36 = vor.u32 %v523_v58, %v252_v55 }
  0x35   :  { %750 = vrot.lane.b32.xlu0 %v3214_v54, %s3242_s12  ;;  %v519_v54 = vrot.slane %v5263_v0, 1  ;;  %v522_v0 = vor.u32 %v521_v46, %v5271_v49  ;;  %v527_v46 = vrot.slane %v269_v23, 1  ;;  %v273_v49 = vshrl.u32 %v3301_v5, 16 }
  0x36   :  { %752 = vrot.lane.b32.xlu1 %v3215_v63, %s3242_s12  ;;  %v3576_v58 = vsel %vm3545_vm2, %v524_v36, 0  ;;  %v533_v36 = vrot.slane %v290_v28, 1 }
  0x37   :  { %v615_v47 = vsel %vm3545_vm2, %v519_v54, 0  ;;  %v3566_v52 = vsel %vm3545_vm2, %v522_v0, 0  ;;  %v531_v0 = vrot.slane %v283_v25, 1 }
  0x38   :  { %v534_v28 = vor.u32 %v533_v36, %v287_v26 }
  0x39   :  { %754 = vrot.lane.b32.xlu0 %v3216_v45, %s3242_s12  ;;  %v276_v45 = vshll.u32 %v3301_v5, 16  ;;  %v532_v25 = vor.u32 %v531_v0, %v280_v24  ;;  %v539_v0 = vrot.slane %v311_v37, 1 }
  0x3a   :  { %756 = vrot.lane.b32.xlu1 %v3217_v50, %s3242_s12  ;;  %v526_v50 = vor.u32 %v525_v27, %v259_v51  ;;  %v3626_v26 = vsel %vm3545_vm2, %v534_v28, 0  ;;  %v5276_v28 = vshll.u32 %v3371_v15, 16 }
  0x3b   :  { %v529_v54 = vrot.slane %v276_v45, 1  ;;  %v3616_v24 = vsel %vm3545_vm2, %v532_v25, 0  ;;  %v540_v36 = vor.u32 %v539_v0, %v308_v34  ;;  %v545_v25 = vrot.slane %v332_v43, 1 }
  0x3c   :  { %v3586_v27 = vsel %vm3545_vm2, %v526_v50, 0  ;;  %v535_v50 = vrot.slane %v297_v30, 1 }
  0x3d   :  { %758 = vrot.lane.b32.xlu0 %v3218_v59, %s3242_s12  ;;  %v528_v59 = vor.u32 %v527_v46, %v266_v20  ;;  %v3660_v43 = vsel %vm3545_vm2, %v540_v36, 0  ;;  %v5279_v36 = vshrl.u32 %v3371_v15, 16 }
  0x3e   :  { %791 = vrot.lane.b32.xlu1 %v615_v47, %s3243_s21  ;;  %v530_v47 = vor.u32 %v529_v54, %v273_v49  ;;  %v536_v30 = vor.u32 %v535_v50, %v294_v29  ;;  %v543_v29 = vrot.slane %v325_v42, 1  ;;  %v547_v42 = vrot.slane %v339_v19, 1 }
  0x3f   :  { %v3596_v46 = vsel %vm3545_vm2, %v528_v59, 0  ;;  %v537_v59 = vrot.slane %v304_v33, 1  ;;  %v546_v50 = vor.u32 %v545_v25, %v329_v40 }
  0x40   :  { %v3606_v54 = vsel %vm3545_vm2, %v530_v47, 0  ;;  %v541_v47 = vrot.slane %v318_v39, 1  ;;  %v3638_v37 = vsel %vm3545_vm2, %v536_v30, 0  ;;  %v544_v34 = vor.u32 %v543_v29, %v322_v35 }
  0x41   :  { %793 = vrot.lane.b32.xlu0 %v3566_v52, %s3243_s21  ;;  %v538_v33 = vor.u32 %v537_v59, %v301_v32  ;;  %v548_v19 = vor.u32 %v547_v42, %v336_v44  ;;  %v549_v35 = vrot.slane %v5276_v28, 1  ;;  %v3682_v40 = vsel %vm3545_vm2, %v546_v50, 0 }
  0x42   :  { %795 = vrot.lane.b32.xlu1 %v3576_v58, %s3243_s21  ;;  %v542_v39 = vor.u32 %v541_v47, %v315_v31  ;;  %v3678_v59 = vsel %vm3545_vm2, %v544_v34, 0  ;;  %v5277_v30 = vshll.u32 %v3378_v16, 16  ;;  %v5278_v44 = vshrl.u32 %v3280_v2, 16  ;;  %v3219_v47 = vld [vmem:[%s5259_s1 + $0x20] ss:$0 sps:$4 sm:$0xff]  }
  0x43   :  { %v3648_v32 = vsel %vm3545_vm2, %v538_v33, 0  ;;  %v3695_v29 = vsel %vm3545_vm2, %v548_v19, 0  ;;  %v550_v25 = vor.u32 %v549_v35, %v5279_v36  ;;  %3178 = vmatprep.subr.msk.bf16.mxu0 %vm1903_vm5, %v3219_v47  ;;  %v1905_v42 = vsel %vm1903_vm5, %v3219_v47, 0  ;;  %3179 = vmatprep.subr.msk.bf16.mxu1 %vm1903_vm5, %v3219_v47  ;;  %v3220_v19 = vld [vmem:[%s5259_s1 + $0x18] sm:$0xff]  }
  0x44   :  { %v3668_v31 = vsel %vm3545_vm2, %v542_v39, 0  ;;  %v551_v0 = vrot.slane %v5277_v30, 1  ;;  %v247_v33 = vrot.slane %v5278_v44, 7  ;;  %v254_v39 = vrot.slane %v252_v55, 7  ;;  %3095 = vmatpush3.bf16.msra.mxu0 %v1905_v42  ;;  %3173 = vmatpush3.bf16.msra.mxu1 %v1905_v42  ;;  %v3223_v42 = vld [vmem:[%s5259_s1] sm:$0xff]  }
  0x45   :  { %797 = vrot.lane.b32.xlu0 %v3586_v27, %s3243_s21  ;;  %v5280_v34 = vshrl.u32 %v3378_v16, 16  ;;  %v3712_v28 = vsel %vm3545_vm2, %v550_v25, 0  ;;  %v5281_v55 = vshll.u32 %v3280_v2, 16  ;;  %3096 = vmatprep.subr.bf16.mxu0 %v3220_v19  ;;  %v3222_v25 = vld [vmem:[%s5259_s1 + $0x8] sm:$0xff]  }
  0x46   :  { %799 = vrot.lane.b32.xlu1 %v3596_v46, %s3243_s21  ;;  %3169 = vmatprep.subr.bf16.mxu1 %v3220_v19 }
  0x47   :  { %v552_v50 = vor.u32 %v551_v0, %v5280_v34  ;;  %v250_v35 = vor.u32 %v5281_v55, %v247_v33  ;;  %v5284_v0 = vshll.u32 %v3275_v1, 16  ;;  %v3221_v33 = vld [vmem:[%s5259_s1 + $0x10] sm:$0xff]   ;;  %v5285_v34 = vshll.u32 %v3287_v3, 16  ;;  %s3247_s1 = smov 48  }
  0x48   :  { %3097 = vmatpush3.bf16.msra.mxu0 %v3220_v19  ;;  %3174 = vmatpush3.bf16.msra.mxu1 %v3220_v19 }
  0x49   :  { %801 = vrot.lane.b32.xlu0 %v3606_v54, %s3243_s21  ;;  %v3726_v30 = vsel %vm3545_vm2, %v552_v50, 0  ;;  %v257_v44 = vor.u32 %v5284_v0, %v254_v39  ;;  %v3737_v47 = vsel %vm3720_vm6, 0, %v250_v35  ;;  %3098 = vmatprep.subr.bf16.mxu0 %v3221_v33  ;;  %v261_v39 = vrot.slane %v259_v51, 7 }
  0x4a   :  { %803 = vrot.lane.b32.xlu1 %v3616_v24, %s3243_s21  ;;  %3170 = vmatprep.subr.bf16.mxu1 %v3221_v33  ;;  %v268_v51 = vrot.slane %v266_v20, 7  ;;  %v275_v0 = vrot.slane %v273_v49, 7 }
  0x4b   :  { %v3743_v36 = vsel %vm3720_vm6, 0, %v257_v44  ;;  %v264_v50 = vor.u32 %v5285_v34, %v261_v39 }
  0x4c   :  { %3099 = vmatpush3.bf16.msra.mxu0 %v3221_v33  ;;  %3175 = vmatpush3.bf16.msra.mxu1 %v3221_v33  ;;  %v271_v19 = vor.u32 %v269_v23, %v268_v51  ;;  %v3860_v51 = vsel %vm3720_vm6, 0, %v3468_v56 }
  0x4d   :  { %805 = vrot.lane.b32.xlu0 %v3626_v26, %s3243_s21  ;;  %3100 = vmatprep.subr.bf16.mxu0 %v3222_v25 }
  0x4e   :  { %807 = vrot.lane.b32.xlu1 %v3638_v37, %s3243_s21  ;;  %3171 = vmatprep.subr.bf16.mxu1 %v3222_v25 }
  0x50   :  { %3101 = vmatpush3.bf16.msra.mxu0 %v3222_v25  ;;  %3176 = vmatpush3.bf16.msra.mxu1 %v3222_v25  ;;  %v278_v25 = vor.u32 %v276_v45, %v275_v0 }
  0x51   :  { %809 = vrot.lane.b32.xlu0 %v3648_v32, %s3243_s21  ;;  %3102 = vmatprep.subr.bf16.mxu0 %v3223_v42 }
  0x52   :  { %811 = vrot.lane.b32.xlu1 %v3660_v43, %s3243_s21  ;;  %3172 = vmatprep.subr.bf16.mxu1 %v3223_v42  ;;  %v3831_v49 = vsel %vm3720_vm6, 0, %v278_v25 }
  0x54   :  { %3103 = vmatpush3.bf16.msra.mxu0 %v3223_v42  ;;  %3177 = vmatpush3.bf16.msra.mxu1 %v3223_v42 }
  0x55   :  { %813 = vrot.lane.b32.xlu0 %v3668_v31, %s3243_s21 }
  0x56   :  { %815 = vrot.lane.b32.xlu1 %v3678_v59, %s3243_s21 }
  0x59   :  { %817 = vrot.lane.b32.xlu0 %v3682_v40, %s3243_s21 }
  0x5a   :  { %819 = vrot.lane.b32.xlu1 %v3695_v29, %s3243_s21 }
  0x5d   :  { %821 = vrot.lane.b32.xlu0 %v3712_v28, %s3243_s21 }
  0x5e   :  { %823 = vrot.lane.b32.xlu1 %v3726_v30, %s3243_s21 }
  0x61   :  { %885 = vrot.lane.b32.xlu0 %v3737_v47, %s3244_s27 }
  0x62   :  { %887 = vrot.lane.b32.xlu1 %v3743_v36, %s3244_s27 }
  0x65   :  { %949 = vrot.lane.b32.xlu0 %v3280_v2, %s3245_s30  ;;  %v3769_v2 = vsel %vm3720_vm6, 0, %v264_v50 }
  0x66   :  { %951 = vrot.lane.b32.xlu1 %v3275_v1, %s3245_s30 }
  0x69   :  { %1015 = vrot.lane.b32.xlu0 %v3566_v52, %s3246_s6 }
  0x6a   :  { %1017 = vrot.lane.b32.xlu1 %v3576_v58, %s3246_s6 }
  0x6d   :  { %1080 = vrot.lane.b32.xlu0 %v3743_v36, %s3247_s1 }
  0x6e   :  { %1082 = vrot.lane.b32.xlu1 %v3769_v2, %s3247_s1 }
  0x71   :  { %1142 = vrot.lane.b32.xlu0 %v3275_v1, %s3248_s7  ;;  %v3795_v1 = vsel %vm3720_vm6, 0, %v271_v19 }
  0x72   :  { %1144 = vrot.lane.b32.xlu1 %v3287_v3, %s3248_s7 }
  0x73   :  { %v3779_v52 = vpop.permute.xlu0 %698 }
  0x74   :  { %v3787_v55 = vpop.permute.xlu1 %702 }
  0x75   :  { %1205 = vrot.lane.b32.xlu0 %v3576_v58, %s3249_s8 }
  0x76   :  { %1207 = vrot.lane.b32.xlu1 %v3586_v27, %s3249_s8 }
  0x77   :  { %v3789_v35 = vpop.permute.xlu0 %700 }
  0x78   :  { %v3799_v20 = vpop.permute.xlu1 %704 }
  0x79   :  { %889 = vrot.lane.b32.xlu0 %v3769_v2, %s3244_s27 }
  0x7a   :  { %891 = vrot.lane.b32.xlu1 %v3795_v1, %s3244_s27 }
  0x7b   :  { %v3801_v23 = vpop.permute.xlu0 %706 }
  0x7c   :  { %v3807_v58 = vpop.permute.xlu1 %708 }
  0x7d   :  { %953 = vrot.lane.b32.xlu0 %v3287_v3, %s3245_s30 }
  0x7e   :  { %955 = vrot.lane.b32.xlu1 %v3294_v4, %s3245_s30 }
  0x7f   :  { %v3811_v44 = vpop.permute.xlu0 %710 }
  0x80   :  { %v3817_v33 = vpop.permute.xlu1 %712 }
  0x81   :  { %1019 = vrot.lane.b32.xlu0 %v3586_v27, %s3246_s6 }
  0x82   :  { %1021 = vrot.lane.b32.xlu1 %v3596_v46, %s3246_s6 }
  0x83   :  { %v3821_v39 = vpop.permute.xlu0 %714 }
  0x84   :  { %v3827_v3 = vpop.permute.xlu1 %716 }
  0x85   :  { %1084 = vrot.lane.b32.xlu0 %v3795_v1, %s3247_s1 }
  0x86   :  { %1086 = vrot.lane.b32.xlu1 %v3831_v49, %s3247_s1 }
  0x87   :  { %v3833_v27 = vpop.permute.xlu0 %718 }
  0x88   :  { %v3839_v45 = vpop.permute.xlu1 %720 }
  0x89   :  { %1146 = vrot.lane.b32.xlu0 %v3294_v4, %s3248_s7  ;;  %5286 = vst [vmem:[#allocation2_spill] sm:$0xff] %v3839_v45 }
  0x8a   :  { %1148 = vrot.lane.b32.xlu1 %v3301_v5, %s3248_s7 }
  0x8b   :  { %v3841_v42 = vpop.permute.xlu0 %722 }
  0x8c   :  { %5287 = vst [vmem:[#allocation3_spill] sm:$0xff] %v3841_v42  ;;  %v3847_v34 = vpop.permute.xlu1 %724 }
  0x8d   :  { %1209 = vrot.lane.b32.xlu0 %v3596_v46, %s3249_s8  ;;  %5288 = vst [vmem:[#allocation4_spill] sm:$0xff] %v3847_v34 }
  0x8e   :  { %1211 = vrot.lane.b32.xlu1 %v3606_v54, %s3249_s8 }
  0x8f   :  { %v3849_v50 = vpop.permute.xlu0 %726 }
  0x90   :  { %5289 = vst [vmem:[#allocation5_spill] sm:$0xff] %v3849_v50  ;;  %v3855_v4 = vpop.permute.xlu1 %728  ;;  %v4003_v50 = vsel %vm3720_vm6, 0, %v3488_v62 }
  0x91   :  { %893 = vrot.lane.b32.xlu0 %v3831_v49, %s3244_s27  ;;  %5290 = vst [vmem:[#allocation6_spill] sm:$0xff] %v3855_v4  ;;  %5312 = vst [vmem:[#allocation28_spill] sm:$0xff] %v4003_v50 }
  0x92   :  { %895 = vrot.lane.b32.xlu1 %v3860_v51, %s3244_s27 }
  0x93   :  { %v3862_v19 = vpop.permute.xlu0 %730 }
  0x94   :  { %5291 = vst [vmem:[#allocation7_spill] sm:$0xff] %v3862_v19  ;;  %v3868_v46 = vpop.permute.xlu1 %732 }
  0x95   :  { %957 = vrot.lane.b32.xlu0 %v3301_v5, %s3245_s30  ;;  %5292 = vst [vmem:[#allocation8_spill] sm:$0xff] %v3868_v46 }
  0x96   :  { %959 = vrot.lane.b32.xlu1 %v3308_v6, %s3245_s30 }
  0x97   :  { %v3870_v0 = vpop.permute.xlu0 %734 }
  0x98   :  { %5293 = vst [vmem:[#allocation9_spill] sm:$0xff] %v3870_v0  ;;  %v3876_v56 = vpop.permute.xlu1 %736  ;;  %v3889_v0 = vsel %vm3720_vm6, 0, %v3472_v57 }
  0x99   :  { %1023 = vrot.lane.b32.xlu0 %v3606_v54, %s3246_s6  ;;  %5294 = vst [vmem:[#allocation10_spill] sm:$0xff] %v3876_v56 }
  0x9a   :  { %1025 = vrot.lane.b32.xlu1 %v3616_v24, %s3246_s6 }
  0x9b   :  { %v3878_v25 = vpop.permute.xlu0 %738 }
  0x9c   :  { %5295 = vst [vmem:[#allocation11_spill] sm:$0xff] %v3878_v25  ;;  %v3884_v5 = vpop.permute.xlu1 %740 }
  0x9d   :  { %1088 = vrot.lane.b32.xlu0 %v3860_v51, %s3247_s1  ;;  %5296 = vst [vmem:[#allocation12_spill] sm:$0xff] %v3884_v5 }
  0x9e   :  { %1090 = vrot.lane.b32.xlu1 %v3889_v0, %s3247_s1 }
  0x9f   :  { %v3891_v46 = vpop.permute.xlu0 %742 }
  0xa0   :  { %5297 = vst [vmem:[#allocation13_spill] sm:$0xff] %v3891_v46  ;;  %v3897_v54 = vpop.permute.xlu1 %744  ;;  %v3974_v46 = vsel %vm3720_vm6, 0, %v3498_v21 }
  0xa1   :  { %1150 = vrot.lane.b32.xlu0 %v3308_v6, %s3248_s7  ;;  %5298 = vst [vmem:[#allocation14_spill] sm:$0xff] %v3897_v54  ;;  %5306 = vst [vmem:[#allocation22_spill] sm:$0xff] %v3974_v46 }
  0xa2   :  { %1152 = vrot.lane.b32.xlu1 %v3315_v7, %s3248_s7 }
  0xa3   :  { %v3899_v25 = vpop.permute.xlu0 %746 }
  0xa4   :  { %5299 = vst [vmem:[#allocation15_spill] sm:$0xff] %v3899_v25  ;;  %v3905_v57 = vpop.permute.xlu1 %748  ;;  %v3918_v25 = vsel %vm3720_vm6, 0, %v3480_v60 }
  0xa5   :  { %1213 = vrot.lane.b32.xlu0 %v3616_v24, %s3249_s8  ;;  %5300 = vst [vmem:[#allocation16_spill] sm:$0xff] %v3905_v57 }
  0xa6   :  { %1215 = vrot.lane.b32.xlu1 %v3626_v26, %s3249_s8 }
  0xa7   :  { %v3907_v5 = vpop.permute.xlu0 %750 }
  0xa8   :  { %5301 = vst [vmem:[#allocation17_spill] sm:$0xff] %v3907_v5  ;;  %v3913_v6 = vpop.permute.xlu1 %752 }
  0xa9   :  { %897 = vrot.lane.b32.xlu0 %v3889_v0, %s3244_s27  ;;  %5302 = vst [vmem:[#allocation18_spill] sm:$0xff] %v3913_v6 }
  0xaa   :  { %899 = vrot.lane.b32.xlu1 %v3918_v25, %s3244_s27 }
  0xab   :  { %v3920_v54 = vpop.permute.xlu0 %754 }
  0xac   :  { %5303 = vst [vmem:[#allocation19_spill] sm:$0xff] %v3920_v54  ;;  %v3926_v24 = vpop.permute.xlu1 %756 }
  0xad   :  { %961 = vrot.lane.b32.xlu0 %v3315_v7, %s3245_s30  ;;  %5304 = vst [vmem:[#allocation20_spill] sm:$0xff] %v3926_v24  ;;  %v3945_v24 = vsel %vm3720_vm6, 0, %v3484_v61 }
  0xae   :  { %963 = vrot.lane.b32.xlu1 %v3322_v8, %s3245_s30 }
  0xaf   :  { %v3928_v5 = vpop.permute.xlu0 %758 }
  0xb0   :  { %5305 = vst [vmem:[#allocation21_spill] sm:$0xff] %v3928_v5  ;;  %v792_v60 = vpop.permute.xlu1 %791 }
  0xb1   :  { %1027 = vrot.lane.b32.xlu0 %v3626_v26, %s3246_s6 }
  0xb2   :  { %1029 = vrot.lane.b32.xlu1 %v3638_v37, %s3246_s6 }
  0xb3   :  { %v3934_v6 = vpop.permute.xlu0 %793 }
  0xb4   :  { %v3940_v7 = vpop.permute.xlu1 %795 }
  0xb5   :  { %1092 = vrot.lane.b32.xlu0 %v3918_v25, %s3247_s1 }
  0xb6   :  { %1094 = vrot.lane.b32.xlu1 %v3945_v24, %s3247_s1 }
  0xb7   :  { %v3947_v5 = vpop.permute.xlu0 %797 }
  0xb8   :  { %v3953_v26 = vpop.permute.xlu1 %799 }
  0xb9   :  { %1154 = vrot.lane.b32.xlu0 %v3322_v8, %s3248_s7 }
  0xba   :  { %1156 = vrot.lane.b32.xlu1 %v3329_v9, %s3248_s7 }
  0xbb   :  { %v3955_v54 = vpop.permute.xlu0 %801 }
  0xbc   :  { %v3961_v61 = vpop.permute.xlu1 %803 }
  0xbd   :  { %1217 = vrot.lane.b32.xlu0 %v3638_v37, %s3249_s8 }
  0xbe   :  { %1219 = vrot.lane.b32.xlu1 %v3648_v32, %s3249_s8 }
  0xbf   :  { %v3963_v57 = vpop.permute.xlu0 %805 }
  0xc0   :  { %v3969_v8 = vpop.permute.xlu1 %807 }
  0xc1   :  { %901 = vrot.lane.b32.xlu0 %v3945_v24, %s3244_s27 }
  0xc2   :  { %903 = vrot.lane.b32.xlu1 %v3974_v46, %s3244_s27 }
  0xc3   :  { %v3976_v56 = vpop.permute.xlu0 %809 }
  0xc4   :  { %v3982_v37 = vpop.permute.xlu1 %811 }
  0xc5   :  { %965 = vrot.lane.b32.xlu0 %v3329_v9, %s3245_s30  ;;  %5307 = vst [vmem:[#allocation23_spill] sm:$0xff] %v3982_v37 }
  0xc6   :  { %967 = vrot.lane.b32.xlu1 %v3336_v10, %s3245_s30 }
  0xc7   :  { %v3984_v19 = vpop.permute.xlu0 %813 }
  0xc8   :  { %5308 = vst [vmem:[#allocation24_spill] sm:$0xff] %v3984_v19  ;;  %v3990_v21 = vpop.permute.xlu1 %815 }
  0xc9   :  { %1031 = vrot.lane.b32.xlu0 %v3648_v32, %s3246_s6  ;;  %5309 = vst [vmem:[#allocation25_spill] sm:$0xff] %v3990_v21  ;;  %v5315_v21 = vmov 0  }
  0xca   :  { %1033 = vrot.lane.b32.xlu1 %v3660_v43, %s3246_s6 }
  0xcb   :  { %v3992_v4 = vpop.permute.xlu0 %817 }
  0xcc   :  { %5310 = vst [vmem:[#allocation26_spill] sm:$0xff] %v3992_v4  ;;  %v3998_v9 = vpop.permute.xlu1 %819 }
  0xcd   :  { %1096 = vrot.lane.b32.xlu0 %v3974_v46, %s3247_s1  ;;  %5311 = vst [vmem:[#allocation27_spill] sm:$0xff] %v3998_v9 }
  0xce   :  { %1098 = vrot.lane.b32.xlu1 %v4003_v50, %s3247_s1 }
  0xcf   :  { %v4005_v34 = vpop.permute.xlu0 %821 }
  0xd0   :  { %5313 = vst [vmem:[#allocation29_spill] sm:$0xff] %v4005_v34  ;;  %v4011_v32 = vpop.permute.xlu1 %823 }
  0xd1   :  { %1158 = vrot.lane.b32.xlu0 %v3336_v10, %s3248_s7  ;;  %5314 = vst [vmem:[#allocation30_spill] sm:$0xff] %v4011_v32  ;;  %v240_v10 = vrot.slane %v5315_v21, 7  ;;  %v4025_v32 = vsel %vm3720_vm6, 0, %v3502_v22 }
  0xd2   :  { %1160 = vrot.lane.b32.xlu1 %v3343_v11, %s3248_s7 }
  0xd3   :  { %v886_v4 = vpop.permute.xlu0 %885  ;;  %v488_v19 = vsel %vm3720_vm6, 0, %v240_v10  ;;  %v1273_v10 = vsel %vm1267_vm7, %v3737_v47, %v3789_v35  ;;  %v4059_v35 = vsel %vm3720_vm6, 0, %v3508_v38 }
  0xd4   :  { %v888_v9 = vpop.permute.xlu1 %887  ;;  %v1270_v22 = vsel %vm1267_vm7, %v488_v19, %v3779_v52 }
  0xd5   :  { %1221 = vrot.lane.b32.xlu0 %v3660_v43, %s3249_s8 }
  0xd6   :  { %1223 = vrot.lane.b32.xlu1 %v3668_v31, %s3249_s8 }
  0xd7   :  { %v950_v62 = vpop.permute.xlu0 %949 }
  0xd8   :  { %v952_v34 = vpop.permute.xlu1 %951 }
  0xd9   :  { %905 = vrot.lane.b32.xlu0 %v4003_v50, %s3244_s27 }
  0xda   :  { %907 = vrot.lane.b32.xlu1 %v4025_v32, %s3244_s27 }
  0xdb   :  { %v1016_v42 = vpop.permute.xlu0 %1015 }
  0xdc   :  { %v1018_v43 = vpop.permute.xlu1 %1017 }
  0xdd   :  { %969 = vrot.lane.b32.xlu0 %v3343_v11, %s3245_s30  ;;  %v4040_v11 = vsel %vm1361_vm8, %v1270_v22, %v792_v60 }
  0xde   :  { %971 = vrot.lane.b32.xlu1 %v3350_v12, %s3245_s30  ;;  %v1426_v37 = vsel %vm1424_vm9, %v4040_v11, %v886_v4 }
  0xdf   :  { %v1081_v50 = vpop.permute.xlu0 %1080  ;;  %v1491_v52 = vsel %vm1489_vm10, %v1426_v37, %v950_v62 }
  0xe0   :  { %v1083_v45 = vpop.permute.xlu1 %1082  ;;  %v1556_v60 = vsel %vm1554_vm11, %v1491_v52, %v1016_v42 }
  0xe1   :  { %1035 = vrot.lane.b32.xlu0 %v3668_v31, %s3246_s6  ;;  %v1365_v31 = vsel %vm1361_vm8, %v1273_v10, %v3934_v6  ;;  %v1621_v6 = vsel %vm1619_vm12, %v1556_v60, %v1081_v50  ;;  %v4086_v10 = vsel %vm3720_vm6, 0, %v3516_v41  ;;  %v1276_v41 = vsel %vm1267_vm7, %v3743_v36, %v3787_v55 }
  0xe2   :  { %1037 = vrot.lane.b32.xlu1 %v3678_v59, %s3246_s6  ;;  %v1428_v19 = vsel %vm1424_vm9, %v1365_v31, %v888_v9 }
  0xe3   :  { %v1143_v46 = vpop.permute.xlu0 %1142  ;;  %v1493_v4 = vsel %vm1489_vm10, %v1428_v19, %v952_v34  ;;  %v4097_v19 = vld [vmem:[%s5258_s0 + $0x78] sm:$0xff]  }
  0xe4   :  { %v1145_v47 = vpop.permute.xlu1 %1144  ;;  %v1558_v37 = vsel %vm1554_vm11, %v1493_v4, %v1018_v43  ;;  %v1685_v9 = vsel %vm1683_vm13, %v1621_v6, %v1143_v46 }
  0xe5   :  { %1100 = vrot.lane.b32.xlu0 %v4025_v32, %s3247_s1  ;;  %v1623_v62 = vsel %vm1619_vm12, %v1558_v37, %v1083_v45 }
  0xe6   :  { %1102 = vrot.lane.b32.xlu1 %v4059_v35, %s3247_s1  ;;  %v1687_v38 = vsel %vm1683_vm13, %v1623_v62, %v1145_v47  ;;  %v1279_v47 = vsel %vm1267_vm7, %v3769_v2, %v3799_v20  ;;  %v4123_v20 = vsel %vm3720_vm6, 0, %v3520_v48  ;;  %v660_v48 = vshll.u32 %v4097_v19, 16 }
  0xe7   :  { %v1206_v42 = vpop.permute.xlu0 %1205  ;;  %v1369_v36 = vsel %vm1361_vm8, %v1279_v47, %v3947_v5 }
  0xe8   :  { %v1749_v22 = vsel %vm1747_vm14, %v1685_v9, %v1206_v42  ;;  %v1208_v34 = vpop.permute.xlu1 %1207 }
  0xe9   :  { %1162 = vrot.lane.b32.xlu0 %v3350_v12, %s3248_s7  ;;  %3104 = vmatprep.mubr.msk.bf16.mxu0 %vm1838_vm15, %v1749_v22  ;;  %v1751_v50 = vsel %vm1747_vm14, %v1687_v38, %v1208_v34 }
  0xea   :  { %1164 = vrot.lane.b32.xlu1 %v3357_v13, %s3248_s7  ;;  %3105 = vmatmul.mubr.msk.bf16.vlgmr.msra.gmra.mxu0 %vm1838_vm15, %v1751_v50 }
  0xeb   :  { %v890_v43 = vpop.permute.xlu0 %889 }
  0xec   :  { %v892_v45 = vpop.permute.xlu1 %891 }
  0xed   :  { %1225 = vrot.lane.b32.xlu0 %v3678_v59, %s3249_s8  ;;  %v1432_v37 = vsel %vm1424_vm9, %v1369_v36, %v892_v45 }
  0xee   :  { %1227 = vrot.lane.b32.xlu1 %v3682_v40, %s3249_s8 }
  0xef   :  { %v954_v46 = vpop.permute.xlu0 %953 }
  0xf0   :  { %v956_v12 = vpop.permute.xlu1 %955 }
  0xf1   :  { %909 = vrot.lane.b32.xlu0 %v4059_v35, %s3244_s27  ;;  %v1497_v9 = vsel %vm1489_vm10, %v1432_v37, %v956_v12 }
  0xf2   :  { %911 = vrot.lane.b32.xlu1 %v4086_v10, %s3244_s27 }
  0xf3   :  { %v1020_v31 = vpop.permute.xlu0 %1019 }
  0xf4   :  { %v1022_v59 = vpop.permute.xlu1 %1021 }
  0xf5   :  { %973 = vrot.lane.b32.xlu0 %v3357_v13, %s3245_s30  ;;  %v1367_v13 = vsel %vm1361_vm8, %v1276_v41, %v3940_v7  ;;  %v1562_v42 = vsel %vm1554_vm11, %v1497_v9, %v1022_v59  ;;  %v1285_v9 = vsel %vm1267_vm7, %v3831_v49, %v3807_v58  ;;  %v357_v49 = vshrl.u32 %v3385_v17, 16 }
  0xf6   :  { %975 = vrot.lane.b32.xlu1 %v3364_v14, %s3245_s30  ;;  %v1430_v4 = vsel %vm1424_vm9, %v1367_v13, %v890_v43 }
  0xf7   :  { %v1085_v52 = vpop.permute.xlu0 %1084  ;;  %v1495_v55 = vsel %vm1489_vm10, %v1430_v4, %v954_v46 }
  0xf8   :  { %v1087_v60 = vpop.permute.xlu1 %1086  ;;  %v1560_v7 = vsel %vm1554_vm11, %v1495_v55, %v1020_v31  ;;  %v2891_v31 = vcombine.low %v5315_v21, %v5315_v21 }
  0xf9   :  { %1039 = vrot.lane.b32.xlu0 %v3682_v40, %s3246_s6  ;;  %v657_v40 = vshrl.u32 %v4097_v19, 16  ;;  %v1625_v5 = vsel %vm1619_vm12, %v1560_v7, %v1085_v52  ;;  %v1627_v38 = vsel %vm1619_vm12, %v1562_v42, %v1087_v60  ;;  %v674_v60 = vrot.slane %v660_v48, 1 }
  0xfa   :  { %1041 = vrot.lane.b32.xlu1 %v3695_v29, %s3246_s6  ;;  %v686_v13 = vshrl.u32 %v2891_v31, 16 }
  0xfb   :  { %v1147_v6 = vpop.permute.xlu0 %1146  ;;  %v659_v50 = vrot.slane %v657_v40, 7  ;;  %v675_v21 = vor.u32 %v674_v60, %v657_v40 }
  0xfc   :  { %v1149_v2 = vpop.permute.xlu1 %1148  ;;  %v1689_v62 = vsel %vm1683_vm13, %v1625_v5, %v1147_v6  ;;  %v688_v6 = vrot.slane %v686_v13, 7 }
  0xfd   :  { %1104 = vrot.lane.b32.xlu0 %v4086_v10, %s3247_s1  ;;  %v1691_v43 = vsel %vm1683_vm13, %v1627_v38, %v1149_v2  ;;  %v662_v59 = vor.u32 %v660_v48, %v659_v50  ;;  %v680_v37 = vsel %vm3545_vm2, %v675_v21, 0  ;;  %v1282_v2 = vsel %vm1267_vm7, %v3795_v1, %v3801_v23 }
  0xfe   :  { %1106 = vrot.lane.b32.xlu1 %v4123_v20, %s3247_s1 }
  0xff   :  { %v1210_v22 = vpop.permute.xlu0 %1209  ;;  %v672_v41 = vsel %vm3720_vm6, 0, %v662_v59 }
 0x100   :  { %v1753_v34 = vsel %vm1747_vm14, %v1689_v62, %v1210_v22  ;;  %v1212_v45 = vpop.permute.xlu1 %1211  ;;  %v1373_v62 = vsel %vm1361_vm8, %v1285_v9, %v3955_v54 }
 0x101   :  { %1166 = vrot.lane.b32.xlu0 %v3364_v14, %s3248_s7  ;;  %3108 = vmatprep.mubr.msk.bf16.mxu0 %vm1838_vm15, %v1753_v34  ;;  %v1755_v46 = vsel %vm1747_vm14, %v1691_v43, %v1212_v45 }
 0x102   :  { %1168 = vrot.lane.b32.xlu1 %v3371_v15, %s3248_s7  ;;  %3109 = vmatmul.mubr.msk.bf16.gmra.mxu0 %vm1838_vm15, %v1755_v46 }
 0x103   :  { %v894_v12 = vpop.permute.xlu0 %893 }
 0x104   :  { %v896_v52 = vpop.permute.xlu1 %895 }
 0x105   :  { %1229 = vrot.lane.b32.xlu0 %v3695_v29, %s3249_s8  ;;  %v689_v29 = vshll.u32 %v2891_v31, 16 }
 0x106   :  { %1231 = vrot.lane.b32.xlu1 %v3712_v28, %s3249_s8 }
 0x107   :  { %v958_v14 = vpop.permute.xlu0 %957  ;;  %v691_v7 = vor.u32 %v689_v29, %v688_v6  ;;  %v694_v23 = vrot.slane %v689_v29, 1  ;;  %v364_v29 = vshrl.u32 %v3392_v18, 16 }
 0x108   :  { %v960_v47 = vpop.permute.xlu1 %959 }
 0x109   :  { %913 = vrot.lane.b32.xlu0 %v4123_v20, %s3244_s27  ;;  %v695_v46 = vor.u32 %v694_v23, %v686_v13 }
 0x10a   :  { %915 = vrot.lane.b32.xlu1 %v672_v41, %s3244_s27 }
 0x10b   :  { %v1024_v4 = vpop.permute.xlu0 %1023  ;;  %v697_v13 = vsel %vm3545_vm2, %v695_v46, 0 }
 0x10c   :  { %v1026_v36 = vpop.permute.xlu1 %1025 }
 0x10d   :  { %977 = vrot.lane.b32.xlu0 %v3371_v15, %s3245_s30  ;;  %v1371_v15 = vsel %vm1361_vm8, %v1282_v2, %v3953_v26  ;;  %v1436_v26 = vsel %vm1424_vm9, %v1373_v62, %v896_v52  ;;  %v359_v52 = vrot.slane %v357_v49, 7  ;;  %v367_v2 = vshll.u32 %v3392_v18, 16 }
 0x10e   :  { %979 = vrot.lane.b32.xlu1 %v4097_v19, %s3245_s30  ;;  %v1434_v5 = vsel %vm1424_vm9, %v1371_v15, %v894_v12  ;;  %v1501_v38 = vsel %vm1489_vm10, %v1436_v26, %v960_v47  ;;  %v3227_v15 = vld [vmem:[%s5258_s0 + $0x88] sm:$0xff]  }
 0x10f   :  { %v1089_v55 = vpop.permute.xlu0 %1088  ;;  %v1499_v1 = vsel %vm1489_vm10, %v1434_v5, %v958_v14  ;;  %v1566_v54 = vsel %vm1554_vm11, %v1501_v38, %v1026_v36  ;;  %v360_v14 = vshll.u32 %v3385_v17, 16  ;;  %v4202_v17 = vsel %vm3720_vm6, 0, %v3528_v53  ;;  %v3226_v53 = vld [vmem:[%s5258_s0 + $0x80] sm:$0xff]  }
 0x110   :  { %v1091_v40 = vpop.permute.xlu1 %1090  ;;  %v1564_v22 = vsel %vm1554_vm11, %v1499_v1, %v1024_v4  ;;  %v1288_v5 = vsel %vm1267_vm7, %v3860_v51, %v3811_v44  ;;  %v1291_v1 = vsel %vm1267_vm7, %v3889_v0, %v3817_v33 }
 0x111   :  { %1043 = vrot.lane.b32.xlu0 %v3712_v28, %s3246_s6  ;;  %v693_v28 = vsel %vm3720_vm6, 0, %v691_v7  ;;  %v1629_v34 = vsel %vm1619_vm12, %v1564_v22, %v1089_v55  ;;  %v1631_v43 = vsel %vm1619_vm12, %v1566_v54, %v1091_v40  ;;  %v553_v21 = vrot.slane %v360_v14, 1 }
 0x112   :  { %1045 = vrot.lane.b32.xlu1 %v680_v37, %s3246_s6  ;;  %v366_v7 = vrot.slane %v364_v29, 7  ;;  %v1375_v18 = vsel %vm1361_vm8, %v1288_v5, %v3961_v61  ;;  %v1377_v44 = vsel %vm1361_vm8, %v1291_v1, %v3963_v57 }
 0x113   :  { %v1151_v42 = vpop.permute.xlu0 %1150  ;;  %v554_v55 = vor.u32 %v553_v21, %v357_v49 }
 0x114   :  { %v1153_v58 = vpop.permute.xlu1 %1152  ;;  %v1693_v50 = vsel %vm1683_vm13, %v1629_v34, %v1151_v42  ;;  %v369_v62 = vor.u32 %v367_v2, %v366_v7 }
 0x115   :  { %1108 = vrot.lane.b32.xlu0 %v672_v41, %s3247_s1  ;;  %v1695_v12 = vsel %vm1683_vm13, %v1631_v43, %v1153_v58  ;;  %v632_v9 = vsel %vm3545_vm2, %v554_v55, 0  ;;  %v4286_v55 = vld [vmem:[%s5258_s0 + $0xa0] sm:$0xff]  }
 0x116   :  { %1110 = vrot.lane.b32.xlu1 %v693_v28, %s3247_s1  ;;  %v4245_v33 = vsel %vm3720_vm6, 0, %v369_v62 }
 0x117   :  { %v1214_v48 = vpop.permute.xlu0 %1213 }
 0x118   :  { %v1757_v45 = vsel %vm1747_vm14, %v1693_v50, %v1214_v48  ;;  %v1216_v59 = vpop.permute.xlu1 %1215 }
 0x119   :  { %1170 = vrot.lane.b32.xlu0 %v4097_v19, %s3248_s7  ;;  %3112 = vmatprep.mubr.msk.bf16.mxu0 %vm1838_vm15, %v1757_v45  ;;  %v1759_v41 = vsel %vm1747_vm14, %v1695_v12, %v1216_v59  ;;  %v362_v19 = vor.u32 %v360_v14, %v359_v52  ;;  %v4261_v45 = vld [vmem:[%s5258_s0 + $0x98] sm:$0xff]   ;;  %v3229_v52 = vld [vmem:[%s5258_s0 + $0x90] sm:$0xff]  }
 0x11a   :  { %1172 = vrot.lane.b32.xlu1 %v2891_v31, %s3248_s7  ;;  %3113 = vmatmul.mubr.msk.bf16.gmra.mxu0 %vm1838_vm15, %v1759_v41  ;;  %v371_v46 = vshrl.u32 %v4261_v45, 16 }
 0x11b   :  { %v898_v60 = vpop.permute.xlu0 %897  ;;  %v4208_v6 = vsel %vm3720_vm6, 0, %v362_v19 }
 0x11c   :  { %v900_v47 = vpop.permute.xlu1 %899  ;;  %v1438_v28 = vsel %vm1424_vm9, %v1375_v18, %v898_v60  ;;  %v373_v60 = vrot.slane %v371_v46, 7 }
 0x11d   :  { %1233 = vrot.lane.b32.xlu0 %v680_v37, %s3249_s8  ;;  %v1440_v26 = vsel %vm1424_vm9, %v1377_v44, %v900_v47 }
 0x11e   :  { %1235 = vrot.lane.b32.xlu1 %v697_v13, %s3249_s8  ;;  %v374_v13 = vshll.u32 %v4261_v45, 16 }
 0x11f   :  { %v962_v4 = vpop.permute.xlu0 %961 }
 0x120   :  { %v964_v31 = vpop.permute.xlu1 %963  ;;  %v1503_v51 = vsel %vm1489_vm10, %v1438_v28, %v962_v4  ;;  %v376_v4 = vor.u32 %v374_v13, %v373_v60 }
 0x121   :  { %917 = vrot.lane.b32.xlu0 %v4202_v17, %s3244_s27  ;;  %v1505_v0 = vsel %vm1489_vm10, %v1440_v26, %v964_v31  ;;  %v557_v31 = vrot.slane %v374_v13, 1 }
 0x122   :  { %919 = vrot.lane.b32.xlu1 %v4208_v6, %s3244_s27 }
 0x123   :  { %v1028_v36 = vpop.permute.xlu0 %1027  ;;  %v558_v7 = vor.u32 %v557_v31, %v371_v46  ;;  %v4356_v31 = vld [vmem:[%s5258_s0 + $0xb0] sm:$0xff]  }
 0x124   :  { %v1030_v37 = vpop.permute.xlu1 %1029  ;;  %v1568_v22 = vsel %vm1554_vm11, %v1503_v51, %v1028_v36  ;;  %v4281_v36 = vsel %vm3720_vm6, 0, %v376_v4 }
 0x125   :  { %981 = vrot.lane.b32.xlu0 %v3226_v53, %s3245_s30  ;;  %v1570_v57 = vsel %vm1554_vm11, %v1505_v0, %v1030_v37  ;;  %v378_v53 = vshrl.u32 %v4286_v55, 16  ;;  %v634_v1 = vsel %vm3545_vm2, %v558_v7, 0  ;;  %v5318_v7 = vld [vmem:[#allocation2_spill] sm:$0xff] }
 0x126   :  { %983 = vrot.lane.b32.xlu1 %v3227_v15, %s3245_s30 }
 0x127   :  { %v1093_v40 = vpop.permute.xlu0 %1092 }
 0x128   :  { %v1095_v42 = vpop.permute.xlu1 %1094  ;;  %v1633_v58 = vsel %vm1619_vm12, %v1568_v22, %v1093_v40 }
 0x129   :  { %1047 = vrot.lane.b32.xlu0 %v3726_v30, %s3246_s6  ;;  %v555_v30 = vrot.slane %v367_v2, 1  ;;  %v1635_v34 = vsel %vm1619_vm12, %v1570_v57, %v1095_v42  ;;  %v1294_v2 = vsel %vm1267_vm7, %v3918_v25, %v3821_v39  ;;  %v1297_v42 = vsel %vm1267_vm7, %v3945_v24, %v3827_v3 }
 0x12a   :  { %1049 = vrot.lane.b32.xlu1 %v632_v9, %s3246_s6  ;;  %v1379_v5 = vsel %vm1361_vm8, %v1294_v2, %v3969_v8  ;;  %v1381_v39 = vsel %vm1361_vm8, %v1297_v42, %v3976_v56 }
 0x12b   :  { %v1155_v23 = vpop.permute.xlu0 %1154  ;;  %v556_v50 = vor.u32 %v555_v30, %v364_v29 }
 0x12c   :  { %v1157_v61 = vpop.permute.xlu1 %1156  ;;  %v1697_v49 = vsel %vm1683_vm13, %v1633_v58, %v1155_v23 }
 0x12d   :  { %1112 = vrot.lane.b32.xlu0 %v4208_v6, %s3247_s1  ;;  %v1699_v48 = vsel %vm1683_vm13, %v1635_v34, %v1157_v61  ;;  %v633_v14 = vsel %vm3545_vm2, %v556_v50, 0  ;;  %v3231_v50 = vld [vmem:[%s5258_s0 + $0xa8] sm:$0xff]  }
 0x12e   :  { %1114 = vrot.lane.b32.xlu1 %v4245_v33, %s3247_s1 }
 0x12f   :  { %v1218_v38 = vpop.permute.xlu0 %1217 }
 0x130   :  { %v1761_v54 = vsel %vm1747_vm14, %v1697_v49, %v1218_v38  ;;  %v1220_v43 = vpop.permute.xlu1 %1219 }
 0x131   :  { %1174 = vrot.lane.b32.xlu0 %v3227_v15, %s3248_s7  ;;  %3116 = vmatprep.mubr.msk.bf16.mxu0 %vm1838_vm15, %v1761_v54  ;;  %v1763_v12 = vsel %vm1747_vm14, %v1699_v48, %v1220_v43  ;;  %v380_v15 = vrot.slane %v378_v53, 7  ;;  %v385_v48 = vshrl.u32 %v3231_v50, 16 }
 0x132   :  { %1176 = vrot.lane.b32.xlu1 %v3229_v52, %s3248_s7  ;;  %3117 = vmatmul.mubr.msk.bf16.gmra.mxu0 %vm1838_vm15, %v1763_v12 }
 0x133   :  { %v902_v59 = vpop.permute.xlu0 %901 }
 0x134   :  { %v904_v41 = vpop.permute.xlu1 %903  ;;  %v1442_v62 = vsel %vm1424_vm9, %v1379_v5, %v902_v59  ;;  %v387_v59 = vrot.slane %v385_v48, 7 }
 0x135   :  { %1237 = vrot.lane.b32.xlu0 %v632_v9, %s3249_s8  ;;  %v1444_v8 = vsel %vm1424_vm9, %v1381_v39, %v904_v41 }
 0x136   :  { %1239 = vrot.lane.b32.xlu1 %v633_v14, %s3249_s8 }
 0x137   :  { %v966_v47 = vpop.permute.xlu0 %965 }
 0x138   :  { %v968_v19 = vpop.permute.xlu1 %967  ;;  %v1507_v25 = vsel %vm1489_vm10, %v1442_v62, %v966_v47  ;;  %v5316_v47 = vld [vmem:[#allocation22_spill] sm:$0xff] }
 0x139   :  { %825 = vrot.lane.b32.xlu0 %v632_v9, %s3243_s21  ;;  %v381_v9 = vshll.u32 %v4286_v55, 16  ;;  %v1509_v23 = vsel %vm1489_vm10, %v1444_v8, %v968_v19  ;;  %v1300_v19 = vsel %vm1267_vm7, %v5316_v47, %v3833_v27  ;;  %v5319_v27 = vld [vmem:[#allocation28_spill] sm:$0xff]  ;;  %v395_v8 = vshll.u32 %v4356_v31, 16 }
 0x13a   :  { %827 = vrot.lane.b32.xlu1 %v633_v14, %s3243_s21  ;;  %v1303_v2 = vsel %vm1267_vm7, %v5319_v27, %v5318_v7  ;;  %v5324_v27 = vld [vmem:[#allocation26_spill] sm:$0xff] }
 0x13b   :  { %v1032_v21 = vpop.permute.xlu0 %1031  ;;  %v383_v24 = vor.u32 %v381_v9, %v380_v15  ;;  %v559_v61 = vrot.slane %v381_v9, 1  ;;  %v5320_v9 = vld [vmem:[#allocation24_spill] sm:$0xff] }
 0x13c   :  { %v1034_v29 = vpop.permute.xlu1 %1033  ;;  %v1572_v28 = vsel %vm1554_vm11, %v1507_v25, %v1032_v21  ;;  %v1385_v5 = vsel %vm1361_vm8, %v1303_v2, %v5320_v9 }
 0x13d   :  { %921 = vrot.lane.b32.xlu0 %v4245_v33, %s3244_s27  ;;  %v1574_v51 = vsel %vm1554_vm11, %v1509_v23, %v1034_v29  ;;  %v4325_v57 = vsel %vm3720_vm6, 0, %v383_v24  ;;  %v560_v34 = vor.u32 %v559_v61, %v378_v53  ;;  %v392_v29 = vshrl.u32 %v4356_v31, 16  ;;  %v5317_v53 = vld [vmem:[#allocation23_spill] sm:$0xff] }
 0x13e   :  { %923 = vrot.lane.b32.xlu1 %v4281_v36, %s3244_s27 }
 0x13f   :  { %v1097_v37 = vpop.permute.xlu0 %1096  ;;  %v635_v46 = vsel %vm3545_vm2, %v560_v34, 0 }
 0x140   :  { %v1099_v40 = vpop.permute.xlu1 %1098  ;;  %v1637_v44 = vsel %vm1619_vm12, %v1572_v28, %v1097_v37  ;;  %v1383_v37 = vsel %vm1361_vm8, %v1300_v19, %v5317_v53  ;;  %v5322_v19 = vld [vmem:[#allocation25_spill] sm:$0xff] }
 0x141   :  { %985 = vrot.lane.b32.xlu0 %v3229_v52, %s3245_s30  ;;  %v1639_v26 = vsel %vm1619_vm12, %v1574_v51, %v1099_v40  ;;  %v388_v52 = vshll.u32 %v3231_v50, 16 }
 0x142   :  { %987 = vrot.lane.b32.xlu1 %v4261_v45, %s3245_s30 }
 0x143   :  { %v1159_v18 = vpop.permute.xlu0 %1158  ;;  %v390_v41 = vor.u32 %v388_v52, %v387_v59  ;;  %v561_v13 = vrot.slane %v388_v52, 1 }
 0x144   :  { %v1161_v3 = vpop.permute.xlu1 %1160  ;;  %v1701_v56 = vsel %vm1683_vm13, %v1637_v44, %v1159_v18 }
 0x145   :  { %1051 = vrot.lane.b32.xlu0 %v633_v14, %s3246_s6  ;;  %v1703_v0 = vsel %vm1683_vm13, %v1639_v26, %v1161_v3  ;;  %v4351_v21 = vsel %vm3720_vm6, 0, %v390_v41  ;;  %v562_v62 = vor.u32 %v561_v13, %v385_v48 }
 0x146   :  { %1053 = vrot.lane.b32.xlu1 %v634_v1, %s3246_s6 }
 0x147   :  { %v1222_v30 = vpop.permute.xlu0 %1221 }
 0x148   :  { %v1765_v22 = vsel %vm1747_vm14, %v1701_v56, %v1222_v30  ;;  %v1224_v58 = vpop.permute.xlu1 %1223 }
 0x149   :  { %1116 = vrot.lane.b32.xlu0 %v4281_v36, %s3247_s1  ;;  %3120 = vmatprep.mubr.msk.bf16.mxu0 %vm1838_vm15, %v1765_v22  ;;  %v1767_v49 = vsel %vm1747_vm14, %v1703_v0, %v1224_v58  ;;  %v563_v58 = vrot.slane %v395_v8, 1 }
 0x14a   :  { %1118 = vrot.lane.b32.xlu1 %v4325_v57, %s3247_s1  ;;  %3121 = vmatmul.mubr.msk.bf16.gmra.mxu0 %vm1838_vm15, %v1767_v49 }
 0x14b   :  { %v906_v38 = vpop.permute.xlu0 %905 }
 0x14c   :  { %v908_v54 = vpop.permute.xlu1 %907  ;;  %v1446_v40 = vsel %vm1424_vm9, %v1383_v37, %v906_v38 }
 0x14d   :  { %1178 = vrot.lane.b32.xlu0 %v4261_v45, %s3248_s7  ;;  %v1448_v18 = vsel %vm1424_vm9, %v1385_v5, %v908_v54  ;;  %v564_v54 = vor.u32 %v563_v58, %v392_v29 }
 0x14e   :  { %1180 = vrot.lane.b32.xlu1 %v4286_v55, %s3248_s7 }
 0x14f   :  { %v970_v43 = vpop.permute.xlu0 %969  ;;  %v637_v59 = vsel %vm3545_vm2, %v564_v54, 0 }
 0x150   :  { %v972_v12 = vpop.permute.xlu1 %971  ;;  %v1511_v42 = vsel %vm1489_vm10, %v1446_v40, %v970_v43  ;;  %v3233_v43 = vld [vmem:[%s5258_s0 + $0xb8] sm:$0xff]  }
 0x151   :  { %1241 = vrot.lane.b32.xlu0 %v634_v1, %s3249_s8  ;;  %v1513_v28 = vsel %vm1489_vm10, %v1448_v18, %v972_v12 }
 0x152   :  { %1243 = vrot.lane.b32.xlu1 %v635_v46, %s3249_s8 }
 0x153   :  { %v1036_v14 = vpop.permute.xlu0 %1035 }
 0x154   :  { %v1038_v45 = vpop.permute.xlu1 %1037  ;;  %v1576_v39 = vsel %vm1554_vm11, %v1511_v42, %v1036_v14  ;;  %v4433_v42 = vld [vmem:[%s5258_s0 + $0xc0] sm:$0xff]  }
 0x155   :  { %829 = vrot.lane.b32.xlu0 %v634_v1, %s3243_s21  ;;  %v394_v1 = vrot.slane %v392_v29, 7  ;;  %v1578_v24 = vsel %vm1554_vm11, %v1513_v28, %v1038_v45  ;;  %v402_v45 = vshll.u32 %v3233_v43, 16  ;;  %v5323_v29 = vld [vmem:[#allocation4_spill] sm:$0xff] }
 0x156   :  { %831 = vrot.lane.b32.xlu1 %v635_v46, %s3243_s21  ;;  %v1309_v53 = vsel %vm1267_vm7, %v4059_v35, %v5323_v29 }
 0x157   :  { %v1101_v60 = vpop.permute.xlu0 %1100  ;;  %v397_v22 = vor.u32 %v395_v8, %v394_v1  ;;  %v1389_v2 = vsel %vm1361_vm8, %v1309_v53, %v5324_v27  ;;  %v565_v40 = vrot.slane %v402_v45, 1  ;;  %v5328_v53 = vld [vmem:[#allocation29_spill] sm:$0xff] }
 0x158   :  { %v1103_v4 = vpop.permute.xlu1 %1102  ;;  %v1641_v3 = vsel %vm1619_vm12, %v1576_v39, %v1101_v60 }
 0x159   :  { %925 = vrot.lane.b32.xlu0 %v4325_v57, %s3244_s27  ;;  %v1643_v51 = vsel %vm1619_vm12, %v1578_v24, %v1103_v4  ;;  %v4394_v38 = vsel %vm3720_vm6, 0, %v397_v22 }
 0x15a   :  { %927 = vrot.lane.b32.xlu1 %v4351_v21, %s3244_s27 }
 0x15b   :  { %v1163_v15 = vpop.permute.xlu0 %1162 }
 0x15c   :  { %v1165_v25 = vpop.permute.xlu1 %1164  ;;  %v1705_v23 = vsel %vm1683_vm13, %v1641_v3, %v1163_v15 }
 0x15d   :  { %989 = vrot.lane.b32.xlu0 %v4286_v55, %s3245_s30  ;;  %v636_v55 = vsel %vm3545_vm2, %v562_v62, 0  ;;  %v1707_v30 = vsel %vm1683_vm13, %v1643_v51, %v1165_v25  ;;  %v406_v62 = vshrl.u32 %v4433_v42, 16 }
 0x15e   :  { %991 = vrot.lane.b32.xlu1 %v3231_v50, %s3245_s30 }
 0x15f   :  { %v1226_v44 = vpop.permute.xlu0 %1225  ;;  %v408_v51 = vrot.slane %v406_v62, 7 }
 0x160   :  { %v1769_v56 = vsel %vm1747_vm14, %v1705_v23, %v1226_v44  ;;  %v1228_v26 = vpop.permute.xlu1 %1227 }
 0x161   :  { %1055 = vrot.lane.b32.xlu0 %v635_v46, %s3246_s6  ;;  %3124 = vmatprep.mubr.msk.bf16.mxu0 %vm1838_vm15, %v1769_v56  ;;  %v1771_v61 = vsel %vm1747_vm14, %v1707_v30, %v1228_v26  ;;  %v399_v46 = vshrl.u32 %v3233_v43, 16  ;;  %v409_v56 = vshll.u32 %v4433_v42, 16 }
 0x162   :  { %1057 = vrot.lane.b32.xlu1 %v636_v55, %s3246_s6  ;;  %3125 = vmatmul.mubr.msk.bf16.gmra.mxu0 %vm1838_vm15, %v1771_v61 }
 0x163   :  { %v910_v0 = vpop.permute.xlu0 %909  ;;  %v401_v14 = vrot.slane %v399_v46, 7  ;;  %v566_v24 = vor.u32 %v565_v40, %v399_v46  ;;  %v3235_v46 = vld [vmem:[%s5258_s0 + $0xc8] sm:$0xff]  }
 0x164   :  { %v912_v49 = vpop.permute.xlu1 %911 }
 0x165   :  { %1120 = vrot.lane.b32.xlu0 %v4351_v21, %s3247_s1  ;;  %v404_v47 = vor.u32 %v402_v45, %v401_v14  ;;  %v1452_v15 = vsel %vm1424_vm9, %v1389_v2, %v912_v49  ;;  %v638_v26 = vsel %vm3545_vm2, %v566_v24, 0  ;;  %v5325_v14 = vld [vmem:[#allocation5_spill] sm:$0xff] }
 0x166   :  { %1122 = vrot.lane.b32.xlu1 %v4394_v38, %s3247_s1  ;;  %v1312_v45 = vsel %vm1267_vm7, %v4086_v10, %v5325_v14 }
 0x167   :  { %v974_v34 = vpop.permute.xlu0 %973  ;;  %v4428_v35 = vsel %vm3720_vm6, 0, %v404_v47  ;;  %v5327_v47 = vld [vmem:[#allocation6_spill] sm:$0xff] }
 0x168   :  { %v976_v48 = vpop.permute.xlu1 %975 }
 0x169   :  { %1182 = vrot.lane.b32.xlu0 %v3231_v50, %s3248_s7  ;;  %v5321_v50 = vld [vmem:[#allocation3_spill] sm:$0xff]  ;;  %v1517_v18 = vsel %vm1489_vm10, %v1452_v15, %v976_v48 }
 0x16a   :  { %1184 = vrot.lane.b32.xlu1 %v4356_v31, %s3248_s7  ;;  %v1306_v60 = vsel %vm1267_vm7, %v4025_v32, %v5321_v50  ;;  %v416_v50 = vshll.u32 %v3235_v46, 16 }
 0x16b   :  { %v1040_v12 = vpop.permute.xlu0 %1039  ;;  %v1387_v4 = vsel %vm1361_vm8, %v1306_v60, %v5322_v19  ;;  %v5326_v60 = vld [vmem:[#allocation27_spill] sm:$0xff]  ;;  %v1315_v19 = vsel %vm1267_vm7, %v4123_v20, %v5327_v47 }
 0x16c   :  { %v1042_v52 = vpop.permute.xlu1 %1041  ;;  %v1450_v37 = vsel %vm1424_vm9, %v1387_v4, %v910_v0  ;;  %v567_v0 = vrot.slane %v409_v56, 1  ;;  %v1393_v10 = vsel %vm1361_vm8, %v1315_v19, %v5328_v53 }
 0x16d   :  { %1245 = vrot.lane.b32.xlu0 %v636_v55, %s3249_s8  ;;  %v1515_v32 = vsel %vm1489_vm10, %v1450_v37, %v974_v34  ;;  %v1582_v25 = vsel %vm1554_vm11, %v1517_v18, %v1042_v52 }
 0x16e   :  { %1247 = vrot.lane.b32.xlu1 %v637_v59, %s3249_s8  ;;  %v1580_v9 = vsel %vm1554_vm11, %v1515_v32, %v1040_v12  ;;  %v568_v54 = vor.u32 %v567_v0, %v406_v62  ;;  %v413_v12 = vshrl.u32 %v3235_v46, 16 }
 0x16f   :  { %v1105_v41 = vpop.permute.xlu0 %1104 }
 0x170   :  { %v1107_v13 = vpop.permute.xlu1 %1106  ;;  %v1645_v39 = vsel %vm1619_vm12, %v1580_v9, %v1105_v41  ;;  %v639_v52 = vsel %vm3545_vm2, %v568_v54, 0  ;;  %v415_v41 = vrot.slane %v413_v12, 7 }
 0x171   :  { %833 = vrot.lane.b32.xlu0 %v636_v55, %s3243_s21  ;;  %v1647_v28 = vsel %vm1619_vm12, %v1582_v25, %v1107_v13  ;;  %v1391_v13 = vsel %vm1361_vm8, %v1312_v45, %v5326_v60 }
 0x172   :  { %835 = vrot.lane.b32.xlu1 %v637_v59, %s3243_s21  ;;  %v418_v32 = vor.u32 %v416_v50, %v415_v41 }
 0x173   :  { %v1167_v7 = vpop.permute.xlu0 %1166 }
 0x174   :  { %v1169_v5 = vpop.permute.xlu1 %1168  ;;  %v1709_v1 = vsel %vm1683_vm13, %v1645_v39, %v1167_v7  ;;  %v569_v39 = vrot.slane %v416_v50, 1 }
 0x175   :  { %929 = vrot.lane.b32.xlu0 %v4394_v38, %s3244_s27  ;;  %v1711_v23 = vsel %vm1683_vm13, %v1647_v28, %v1169_v5  ;;  %v4515_v28 = vld [vmem:[%s5258_s0 + $0xd0] sm:$0xff]  }
 0x176   :  { %931 = vrot.lane.b32.xlu1 %v4428_v35, %s3244_s27 }
 0x177   :  { %v1230_v8 = vpop.permute.xlu0 %1229 }
 0x178   :  { %v1773_v3 = vsel %vm1747_vm14, %v1709_v1, %v1230_v8  ;;  %v1232_v44 = vpop.permute.xlu1 %1231  ;;  %v4510_v8 = vsel %vm3720_vm6, 0, %v418_v32 }
 0x179   :  { %993 = vrot.lane.b32.xlu0 %v4356_v31, %s3245_s30  ;;  %3128 = vmatprep.mubr.msk.bf16.mxu0 %vm1838_vm15, %v1773_v3  ;;  %v1775_v55 = vsel %vm1747_vm14, %v1711_v23, %v1232_v44  ;;  %v411_v31 = vor.u32 %v409_v56, %v408_v51  ;;  %v420_v3 = vshrl.u32 %v4515_v28, 16  ;;  %v570_v44 = vor.u32 %v569_v39, %v413_v12  ;;  %v4543_v12 = vld [vmem:[%s5258_s0 + $0xd8] sm:$0xff]  }
 0x17a   :  { %995 = vrot.lane.b32.xlu1 %v3233_v43, %s3245_s30  ;;  %3129 = vmatmul.mubr.msk.bf16.gmra.mxu0 %vm1838_vm15, %v1775_v55  ;;  %v423_v55 = vshll.u32 %v4515_v28, 16 }
 0x17b   :  { %v914_v30 = vpop.permute.xlu0 %913  ;;  %v4460_v49 = vsel %vm3720_vm6, 0, %v411_v31  ;;  %v422_v56 = vrot.slane %v420_v3, 7 }
 0x17c   :  { %v916_v22 = vpop.permute.xlu1 %915  ;;  %v1454_v4 = vsel %vm1424_vm9, %v1391_v13, %v914_v30  ;;  %v571_v0 = vrot.slane %v423_v55, 1 }
 0x17d   :  { %1059 = vrot.lane.b32.xlu0 %v637_v59, %s3246_s6  ;;  %v1456_v7 = vsel %vm1424_vm9, %v1393_v10, %v916_v22  ;;  %v425_v31 = vor.u32 %v423_v55, %v422_v56 }
 0x17e   :  { %1061 = vrot.lane.b32.xlu1 %v638_v26, %s3246_s6  ;;  %v572_v54 = vor.u32 %v571_v0, %v420_v3 }
 0x17f   :  { %v978_v61 = vpop.permute.xlu0 %977 }
 0x180   :  { %v980_v58 = vpop.permute.xlu1 %979  ;;  %v1519_v37 = vsel %vm1489_vm10, %v1454_v4, %v978_v61  ;;  %v4558_v13 = vsel %vm3545_vm2, %v572_v54, 0  ;;  %v430_v4 = vshll.u32 %v4543_v12, 16 }
 0x181   :  { %1124 = vrot.lane.b32.xlu0 %v4428_v35, %s3247_s1  ;;  %v1521_v20 = vsel %vm1489_vm10, %v1456_v7, %v980_v58  ;;  %v4535_v58 = vsel %vm3720_vm6, 0, %v425_v31 }
 0x182   :  { %1126 = vrot.lane.b32.xlu1 %v4460_v49, %s3247_s1  ;;  %v573_v39 = vrot.slane %v430_v4, 1 }
 0x183   :  { %v1044_v34 = vpop.permute.xlu0 %1043 }
 0x184   :  { %v1046_v48 = vpop.permute.xlu1 %1045  ;;  %v1584_v27 = vsel %vm1554_vm11, %v1519_v37, %v1044_v34 }
 0x185   :  { %1186 = vrot.lane.b32.xlu0 %v3233_v43, %s3248_s7  ;;  %v1586_v15 = vsel %vm1554_vm11, %v1521_v20, %v1046_v48 }
 0x186   :  { %1188 = vrot.lane.b32.xlu1 %v4433_v42, %s3248_s7 }
 0x187   :  { %v1109_v59 = vpop.permute.xlu0 %1108 }
 0x188   :  { %v4476_v43 = vpop.permute.xlu1 %1110  ;;  %v1649_v40 = vsel %vm1619_vm12, %v1584_v27, %v1109_v59  ;;  %v427_v59 = vshrl.u32 %v4543_v12, 16 }
 0x189   :  { %1249 = vrot.lane.b32.xlu0 %v638_v26, %s3249_s8  ;;  %v1651_v62 = vsel %vm1619_vm12, %v1586_v15, %v4476_v43 }
 0x18a   :  { %1251 = vrot.lane.b32.xlu1 %v639_v52, %s3249_s8  ;;  %v429_v19 = vrot.slane %v427_v59, 7 }
 0x18b   :  { %v1171_v29 = vpop.permute.xlu0 %1170 }
 0x18c   :  { %v4491_v2 = vpop.permute.xlu1 %1172  ;;  %v1713_v9 = vsel %vm1683_vm13, %v1649_v40, %v1171_v29  ;;  %v432_v15 = vor.u32 %v430_v4, %v429_v19 }
 0x18d   :  { %837 = vrot.lane.b32.xlu0 %v638_v26, %s3243_s21  ;;  %v1715_v25 = vsel %vm1683_vm13, %v1651_v62, %v4491_v2  ;;  %v640_v26 = vsel %vm3545_vm2, %v570_v44, 0 }
 0x18e   :  { %839 = vrot.lane.b32.xlu1 %v639_v52, %s3243_s21 }
 0x18f   :  { %v1234_v5 = vpop.permute.xlu0 %1233 }
 0x190   :  { %v1777_v18 = vsel %vm1747_vm14, %v1713_v9, %v1234_v5  ;;  %v4506_v1 = vpop.permute.xlu1 %1235 }
 0x191   :  { %933 = vrot.lane.b32.xlu0 %v4460_v49, %s3244_s27  ;;  %3132 = vmatprep.mubr.msk.bf16.mxu0 %vm1838_vm15, %v1777_v18  ;;  %v1779_v24 = vsel %vm1747_vm14, %v1715_v25, %v4506_v1 }
 0x192   :  { %935 = vrot.lane.b32.xlu1 %v4510_v8, %s3244_s27  ;;  %3133 = vmatmul.mubr.msk.bf16.gmra.mxu0 %vm1838_vm15, %v1779_v24  ;;  %v4587_v24 = vsel %vm3720_vm6, 0, %v432_v15 }
 0x193   :  { %v918_v23 = vpop.permute.xlu0 %917 }
 0x194   :  { %v920_v51 = vpop.permute.xlu1 %919  ;;  %v1458_v45 = vsel %vm1424_vm9, %v4040_v11, %v918_v23  ;;  %v4592_v23 = vld [vmem:[%s5258_s0 + $0xe0] sm:$0xff]  }
 0x195   :  { %997 = vrot.lane.b32.xlu0 %v4433_v42, %s3245_s30  ;;  %v434_v44 = vshrl.u32 %v4592_v23, 16 }
 0x196   :  { %999 = vrot.lane.b32.xlu1 %v3235_v46, %s3245_s30 }
 0x197   :  { %v982_v30 = vpop.permute.xlu0 %981 }
 0x198   :  { %v984_v22 = vpop.permute.xlu1 %983  ;;  %v1523_v60 = vsel %vm1489_vm10, %v1458_v45, %v982_v30 }
 0x199   :  { %1063 = vrot.lane.b32.xlu0 %v639_v52, %s3246_s6  ;;  %v5329_v52 = vld [vmem:[#allocation7_spill] sm:$0xff] }
 0x19a   :  { %1065 = vrot.lane.b32.xlu1 %v640_v26, %s3246_s6  ;;  %v1318_v14 = vsel %vm1267_vm7, %v4202_v17, %v5329_v52 }
 0x19b   :  { %v1048_v61 = vpop.permute.xlu0 %1047 }
 0x19c   :  { %v1050_v42 = vpop.permute.xlu1 %1049  ;;  %v1588_v17 = vsel %vm1554_vm11, %v1523_v60, %v1048_v61 }
 0x19d   :  { %1128 = vrot.lane.b32.xlu0 %v4510_v8, %s3247_s1 }
 0x19e   :  { %1130 = vrot.lane.b32.xlu1 %v4535_v58, %s3247_s1 }
 0x19f   :  { %v1113_v34 = vpop.permute.xlu0 %1112 }
 0x1a0   :  { %v1115_v48 = vpop.permute.xlu1 %1114  ;;  %v1653_v53 = vsel %vm1619_vm12, %v1588_v17, %v1113_v34 }
 0x1a1   :  { %1190 = vrot.lane.b32.xlu0 %v3235_v46, %s3248_s7  ;;  %v5330_v46 = vld [vmem:[#allocation30_spill] sm:$0xff] }
 0x1a2   :  { %1192 = vrot.lane.b32.xlu1 %v4515_v28, %s3248_s7  ;;  %v1395_v50 = vsel %vm1361_vm8, %v1318_v14, %v5330_v46 }
 0x1a3   :  { %v1175_v41 = vpop.permute.xlu0 %1174  ;;  %v1460_v47 = vsel %vm1424_vm9, %v1395_v50, %v920_v51 }
 0x1a4   :  { %v1177_v11 = vpop.permute.xlu1 %1176  ;;  %v1525_v29 = vsel %vm1489_vm10, %v1460_v47, %v984_v22  ;;  %v1717_v37 = vsel %vm1683_vm13, %v1653_v53, %v1175_v41  ;;  %v437_v22 = vshll.u32 %v4592_v23, 16 }
 0x1a5   :  { %1253 = vrot.lane.b32.xlu0 %v640_v26, %s3249_s8  ;;  %v1590_v10 = vsel %vm1554_vm11, %v1525_v29, %v1050_v42  ;;  %v436_v42 = vrot.slane %v434_v44, 7 }
 0x1a6   :  { %1255 = vrot.lane.b32.xlu1 %v4558_v13, %s3249_s8  ;;  %v1655_v27 = vsel %vm1619_vm12, %v1590_v10, %v1115_v48 }
 0x1a7   :  { %v1238_v7 = vpop.permute.xlu0 %1237  ;;  %v1719_v20 = vsel %vm1683_vm13, %v1655_v27, %v1177_v11  ;;  %v439_v11 = vor.u32 %v437_v22, %v436_v42 }
 0x1a8   :  { %v1781_v32 = vsel %vm1747_vm14, %v1717_v37, %v1238_v7  ;;  %v1240_v40 = vpop.permute.xlu1 %1239  ;;  %v575_v7 = vrot.slane %v437_v22, 1 }
 0x1a9   :  { %841 = vrot.lane.b32.xlu0 %v640_v26, %s3243_s21  ;;  %3136 = vmatprep.mubr.msk.bf16.mxu1 %vm1838_vm15, %v1781_v32  ;;  %v1783_v9 = vsel %vm1747_vm14, %v1719_v20, %v1240_v40  ;;  %v574_v26 = vor.u32 %v573_v39, %v427_v59  ;;  %v4647_v39 = vld [vmem:[%s5258_s0 + $0xe8] sm:$0xff]  }
 0x1aa   :  { %843 = vrot.lane.b32.xlu1 %v4558_v13, %s3243_s21  ;;  %v3106_v62 = vpop.f32.mrf.mxu0  ;;  %3137 = vmatmul.mubr.msk.bf16.vlgmr.msra.gmra.mxu1 %vm1838_vm15, %v1783_v9  ;;  %v576_v15 = vor.u32 %v575_v7, %v434_v44  ;;  %v5331_v9 = vld [vmem:[#allocation8_spill] sm:$0xff] }
 0x1ab   :  { %v4576_v5 = vpop.permute.xlu0 %825  ;;  %v2995_v18 = vpack.c.bf16 %v3106_v62, %v3106_v62  ;;  %v2652_v59 = vmul.f32 %v3106_v62, %v3106_v62  ;;  %v642_v41 = vsel %vm3545_vm2, %v574_v26, 0 }
 0x1ac   :  { %v4583_v25 = vpop.permute.xlu1 %827  ;;  %v1941_v3 = vpop.f32.mrf.mxu0  ;;  %v4663_v22 = vsel %vm3545_vm2, %v576_v15, 0 }
 0x1ad   :  { %937 = vrot.lane.b32.xlu0 %v4535_v58, %s3244_s27  ;;  %2455 = vst.msk [vmem:[%s5260_s2 + $0x8] sm:$0xf] %vm2452_vm0, %v2995_v18  ;;  %v2993_v51 = vpack.c.bf16 %v1941_v3, %v1941_v3  ;;  %v2650_v31 = vmul.f32 %v1941_v3, %v1941_v3  ;;  %v2517_v34 = vsel %vm1267_vm7, %v1941_v3, 0.0  ;;  %v2717_v29 = vsel %vm1267_vm7, %v2652_v59, 0.0 }
 0x1ae   :  { %939 = vrot.lane.b32.xlu1 %v4587_v24, %s3244_s27  ;;  %v3107_v55 = vpop.f32.mrf.mxu0  ;;  %v441_v3 = vshrl.u32 %v4647_v39, 16 }
 0x1af   :  { %v922_v56 = vpop.permute.xlu0 %921  ;;  %2453 = vst.msk [vmem:[%s5260_s2] sm:$0xf] %vm2452_vm0, %v2993_v51  ;;  %v2996_v30 = vpack.c.bf16 %v3107_v55, %v3107_v55  ;;  %v2714_v46 = vsel %vm1267_vm7, %v2650_v31, 0.0  ;;  %v2653_v50 = vmul.f32 %v3107_v55, %v3107_v55  ;;  %v2522_v19 = vsel %vm1267_vm7, %v3107_v55, 0.0  ;;  %v5332_v55 = vld [vmem:[#allocation9_spill] sm:$0xff] }
 0x1b0   :  { %v924_v61 = vpop.permute.xlu1 %923  ;;  %v1944_v0 = vpop.f32.mrf.mxu0  ;;  %v1324_v44 = vsel %vm1267_vm7, %v4245_v33, %v5332_v55 }
 0x1b1   :  { %1001 = vrot.lane.b32.xlu0 %v4515_v28, %s3245_s30  ;;  %2456 = vst.msk [vmem:[%s5260_s2 + $0xc] sm:$0xf] %vm2452_vm0, %v2996_v30  ;;  %v2994_v54 = vpack.c.bf16 %v1944_v0, %v1944_v0  ;;  %v2518_v48 = vsel %vm1267_vm7, %v1944_v0, 0.0  ;;  %v2651_v14 = vmul.f32 %v1944_v0, %v1944_v0  ;;  %v2520_v28 = vsel %vm1267_vm7, %v3106_v62, 0.0 }
 0x1b2   :  { %v2519_v52 = vadd.f32 %v2518_v48, %v2517_v34  ;;  %1003 = vrot.lane.b32.xlu1 %v4543_v12, %s3245_s30  ;;  %v2719_v27 = vsel %vm1267_vm7, %v2653_v50, 0.0  ;;  %v1321_v62 = vsel %vm1267_vm7, %v4208_v6, %v5331_v9  ;;  %v444_v0 = vshll.u32 %v4647_v39, 16 }
 0x1b3   :  { %v986_v45 = vpop.permute.xlu0 %985  ;;  %2454 = vst.msk [vmem:[%s5260_s2 + $0x4] sm:$0xf] %vm2452_vm0, %v2994_v54  ;;  %v2715_v47 = vsel %vm1267_vm7, %v2651_v14, 0.0  ;;  %v1397_v51 = vsel %vm1361_vm8, %v1321_v62, %v4576_v5 }
 0x1b4   :  { %v2521_v60 = vadd.f32 %v2520_v28, %v2519_v52  ;;  %v988_v17 = vpop.permute.xlu1 %987  ;;  %v2716_v4 = vadd.f32 %v2715_v47, %v2714_v46  ;;  %v1462_v6 = vsel %vm1424_vm9, %v1397_v51, %v922_v56  ;;  %v443_v56 = vrot.slane %v441_v3, 7 }
 0x1b5   :  { %1067 = vrot.lane.b32.xlu0 %v4558_v13, %s3246_s6  ;;  %v4635_v13 = vsel %vm3720_vm6, 0, %v439_v11  ;;  %v1527_v26 = vsel %vm1489_vm10, %v1462_v6, %v986_v45 }
 0x1b6   :  { %1069 = vrot.lane.b32.xlu1 %v642_v41, %s3246_s6  ;;  %v2523_v10 = vadd.f32 %v2522_v19, %v2521_v60  ;;  %v2718_v37 = vadd.f32 %v2717_v29, %v2716_v4  ;;  %v446_v50 = vor.u32 %v444_v0, %v443_v56 }
 0x1b7   :  { %v1052_v53 = vpop.permute.xlu0 %1051 }
 0x1b8   :  { %v1054_v32 = vpop.permute.xlu1 %1053  ;;  %v2720_v20 = vadd.f32 %v2719_v27, %v2718_v37  ;;  %v1592_v31 = vsel %vm1554_vm11, %v1527_v26, %v1052_v53  ;;  %v577_v53 = vrot.slane %v444_v0, 1  ;;  %v4698_v27 = vsel %vm3720_vm6, 0, %v446_v50 }
 0x1b9   :  { %1132 = vrot.lane.b32.xlu0 %v4587_v24, %s3247_s1 }
 0x1ba   :  { %1134 = vrot.lane.b32.xlu1 %v4635_v13, %s3247_s1 }
 0x1bb   :  { %v1117_v40 = vpop.permute.xlu0 %1116 }
 0x1bc   :  { %v1119_v18 = vpop.permute.xlu1 %1118 }
 0x1bd   :  { %1194 = vrot.lane.b32.xlu0 %v4543_v12, %s3248_s7  ;;  %v1399_v12 = vsel %vm1361_vm8, %v1324_v44, %v4583_v25  ;;  %v1657_v25 = vsel %vm1619_vm12, %v1592_v31, %v1117_v40  ;;  %v578_v44 = vor.u32 %v577_v53, %v441_v3 }
 0x1be   :  { %1196 = vrot.lane.b32.xlu1 %v4592_v23, %s3248_s7  ;;  %v1464_v5 = vsel %vm1424_vm9, %v1399_v12, %v924_v61 }
 0x1bf   :  { %v1179_v30 = vpop.permute.xlu0 %1178  ;;  %v1529_v42 = vsel %vm1489_vm10, %v1464_v5, %v988_v17 }
 0x1c0   :  { %v1181_v33 = vpop.permute.xlu1 %1180  ;;  %v1594_v34 = vsel %vm1554_vm11, %v1529_v42, %v1054_v32  ;;  %v1721_v54 = vsel %vm1683_vm13, %v1657_v25, %v1179_v30  ;;  %v4703_v32 = vld [vmem:[%s5258_s0 + $0xf0] sm:$0xff]  }
 0x1c1   :  { %1257 = vrot.lane.b32.xlu0 %v642_v41, %s3249_s8  ;;  %v1659_v59 = vsel %vm1619_vm12, %v1594_v34, %v1119_v18  ;;  %v448_v40 = vshrl.u32 %v4703_v32, 16  ;;  %v451_v31 = vshll.u32 %v4703_v32, 16  ;;  %v644_v34 = vsel %vm3545_vm2, %v578_v44, 0 }
 0x1c2   :  { %1259 = vrot.lane.b32.xlu1 %v4663_v22, %s3249_s8  ;;  %v3110_v61 = vpop.f32.mrf.mxu0  ;;  %v1723_v45 = vsel %vm1683_vm13, %v1659_v59, %v1181_v33 }
 0x1c3   :  { %v1242_v48 = vpop.permute.xlu0 %1241  ;;  %v2999_v14 = vpack.c.bf16 %v3110_v61, %v3110_v61  ;;  %v2656_v62 = vmul.f32 %v3110_v61, %v3110_v61  ;;  %v2528_v6 = vsel %vm1267_vm7, %v3110_v61, 0.0  ;;  %v450_v5 = vrot.slane %v448_v40, 7 }
 0x1c4   :  { %v1785_v52 = vsel %vm1747_vm14, %v1721_v54, %v1242_v48  ;;  %v1244_v28 = vpop.permute.xlu1 %1243  ;;  %v1957_v46 = vpop.f32.mrf.mxu0 }
 0x1c5   :  { %845 = vrot.lane.b32.xlu0 %v642_v41, %s3243_s21  ;;  %3140 = vmatprep.mubr.msk.bf16.mxu1 %vm1838_vm15, %v1785_v52  ;;  %2459 = vst.msk [vmem:[%s5260_s2 + $0x18] sm:$0xf] %vm2452_vm0, %v2999_v14  ;;  %v1787_v60 = vsel %vm1747_vm14, %v1723_v45, %v1244_v28  ;;  %v2997_v47 = vpack.c.bf16 %v1957_v46, %v1957_v46  ;;  %v2524_v17 = vsel %vm1267_vm7, %v1957_v46, 0.0  ;;  %v2725_v0 = vsel %vm1267_vm7, %v2656_v62, 0.0  ;;  %v4735_v45 = vld [vmem:[%s5258_s0 + $0xf8] sm:$0xff]  }
 0x1c6   :  { %v2525_v11 = vadd.f32 %v2524_v17, %v2523_v10  ;;  %v2654_v19 = vmul.f32 %v1957_v46, %v1957_v46  ;;  %847 = vrot.lane.b32.xlu1 %v4663_v22, %s3243_s21  ;;  %v3111_v41 = vpop.f32.mrf.mxu0  ;;  %3141 = vmatmul.mubr.msk.bf16.gmra.mxu1 %vm1838_vm15, %v1787_v60  ;;  %v453_v61 = vor.u32 %v451_v31, %v450_v5  ;;  %v579_v14 = vrot.slane %v451_v31, 1 }
 0x1c7   :  { %v830_v4 = vpop.permute.xlu0 %829  ;;  %2457 = vst.msk [vmem:[%s5260_s2 + $0x10] sm:$0xf] %vm2452_vm0, %v2997_v47  ;;  %v3000_v29 = vpack.c.bf16 %v3111_v41, %v3111_v41  ;;  %v2657_v30 = vmul.f32 %v3111_v41, %v3111_v41  ;;  %v2530_v42 = vsel %vm1267_vm7, %v3111_v41, 0.0  ;;  %v664_v60 = vshrl.u32 %v4735_v45, 16  ;;  %v5333_v47 = vld [vmem:[#allocation10_spill] sm:$0xff]  ;;  %v5334_v41 = vld [vmem:[#allocation11_spill] sm:$0xff] }
 0x1c8   :  { %v2721_v37 = vsel %vm1267_vm7, %v2654_v19, 0.0  ;;  %v832_v10 = vpop.permute.xlu1 %831  ;;  %v1960_v7 = vpop.f32.mrf.mxu0  ;;  %v4741_v46 = vsel %vm3720_vm6, 0, %v453_v61  ;;  %v580_v50 = vor.u32 %v579_v14, %v448_v40  ;;  %v1327_v17 = vsel %vm1267_vm7, %v4281_v36, %v5333_v47 }
 0x1c9   :  { %941 = vrot.lane.b32.xlu0 %v4635_v13, %s3244_s27  ;;  %v2722_v15 = vadd.f32 %v2721_v37, %v2720_v20  ;;  %2460 = vst.msk [vmem:[%s5260_s2 + $0x1c] sm:$0xf] %vm2452_vm0, %v3000_v29  ;;  %v2998_v9 = vpack.c.bf16 %v1960_v7, %v1960_v7  ;;  %v2526_v18 = vsel %vm1267_vm7, %v1960_v7, 0.0  ;;  %v2655_v51 = vmul.f32 %v1960_v7, %v1960_v7 }
 0x1ca   :  { %943 = vrot.lane.b32.xlu1 %v4698_v27, %s3244_s27  ;;  %v2527_v20 = vadd.f32 %v2526_v18, %v2525_v11  ;;  %v1401_v19 = vsel %vm1361_vm8, %v1327_v17, %v830_v4  ;;  %v1330_v29 = vsel %vm1267_vm7, %v4325_v57, %v5334_v41  ;;  %v4760_v36 = vsel %vm3545_vm2, %v580_v50, 0 }
 0x1cb   :  { %v926_v55 = vpop.permute.xlu0 %925  ;;  %2458 = vst.msk [vmem:[%s5260_s2 + $0x14] sm:$0xf] %vm2452_vm0, %v2998_v9  ;;  %v2723_v12 = vsel %vm1267_vm7, %v2655_v51, 0.0  ;;  %v1403_v4 = vsel %vm1361_vm8, %v1330_v29, %v832_v10  ;;  %v667_v57 = vshll.u32 %v4735_v45, 16 }
 0x1cc   :  { %v928_v26 = vpop.permute.xlu1 %927  ;;  %v2529_v33 = vadd.f32 %v2528_v6, %v2527_v20  ;;  %v2724_v56 = vadd.f32 %v2723_v12, %v2722_v15  ;;  %v1466_v53 = vsel %vm1424_vm9, %v1401_v19, %v926_v55 }
 0x1cd   :  { %1005 = vrot.lane.b32.xlu0 %v4592_v23, %s3245_s30  ;;  %v2727_v23 = vsel %vm1267_vm7, %v2657_v30, 0.0  ;;  %v1468_v9 = vsel %vm1424_vm9, %v1403_v4, %v928_v26  ;;  %v676_v47 = vrot.slane %v667_v57, 1 }
 0x1ce   :  { %1007 = vrot.lane.b32.xlu1 %v4647_v39, %s3245_s30  ;;  %v2726_v3 = vadd.f32 %v2725_v0, %v2724_v56  ;;  %v2531_v54 = vadd.f32 %v2530_v42, %v2529_v33 }
 0x1cf   :  { %v990_v25 = vpop.permute.xlu0 %989 }
 0x1d0   :  { %v992_v48 = vpop.permute.xlu1 %991  ;;  %v2728_v59 = vadd.f32 %v2727_v23, %v2726_v3  ;;  %v1531_v40 = vsel %vm1489_vm10, %v1466_v53, %v990_v25 }
 0x1d1   :  { %1071 = vrot.lane.b32.xlu0 %v4663_v22, %s3246_s6  ;;  %v1533_v55 = vsel %vm1489_vm10, %v1468_v9, %v992_v48 }
 0x1d2   :  { %1073 = vrot.lane.b32.xlu1 %v644_v34, %s3246_s6 }
 0x1d3   :  { %v1056_v52 = vpop.permute.xlu0 %1055 }
 0x1d4   :  { %v1058_v28 = vpop.permute.xlu1 %1057  ;;  %v1596_v62 = vsel %vm1554_vm11, %v1531_v40, %v1056_v52 }
 0x1d5   :  { %1136 = vrot.lane.b32.xlu0 %v4698_v27, %s3247_s1  ;;  %v1598_v6 = vsel %vm1554_vm11, %v1533_v55, %v1058_v28 }
 0x1d6   :  { %1138 = vrot.lane.b32.xlu1 %v4741_v46, %s3247_s1 }
 0x1d7   :  { %v1121_v22 = vpop.permute.xlu0 %1120 }
 0x1d8   :  { %v1123_v11 = vpop.permute.xlu1 %1122  ;;  %v1661_v20 = vsel %vm1619_vm12, %v1596_v62, %v1121_v22 }
 0x1d9   :  { %1198 = vrot.lane.b32.xlu0 %v4647_v39, %s3248_s7  ;;  %v666_v39 = vrot.slane %v664_v60, 7  ;;  %v1663_v33 = vsel %vm1619_vm12, %v1598_v6, %v1123_v11 }
 0x1da   :  { %1200 = vrot.lane.b32.xlu1 %v4703_v32, %s3248_s7  ;;  %v3114_v7 = vpop.f32.mrf.mxu0 }
 0x1db   :  { %v1183_v37 = vpop.permute.xlu0 %1182  ;;  %v3003_v15 = vpack.c.bf16 %v3114_v7, %v3114_v7  ;;  %v669_v42 = vor.u32 %v667_v57, %v666_v39  ;;  %v2660_v14 = vmul.f32 %v3114_v7, %v3114_v7  ;;  %v2536_v17 = vsel %vm1267_vm7, %v3114_v7, 0.0 }
 0x1dc   :  { %v1185_v18 = vpop.permute.xlu1 %1184  ;;  %v1973_v51 = vpop.f32.mrf.mxu0  ;;  %v1725_v30 = vsel %vm1683_vm13, %v1661_v20, %v1183_v37  ;;  %v677_v7 = vor.u32 %v676_v47, %v664_v60 }
 0x1dd   :  { %1261 = vrot.lane.b32.xlu0 %v644_v34, %s3249_s8  ;;  %2463 = vst.msk [vmem:[%s5260_s2 + $0x28] sm:$0xf] %vm2452_vm0, %v3003_v15  ;;  %v3001_v10 = vpack.c.bf16 %v1973_v51, %v1973_v51  ;;  %v2532_v44 = vsel %vm1267_vm7, %v1973_v51, 0.0  ;;  %v2658_v26 = vmul.f32 %v1973_v51, %v1973_v51  ;;  %v1727_v25 = vsel %vm1683_vm13, %v1663_v33, %v1185_v18 }
 0x1de   :  { %v2533_v12 = vadd.f32 %v2532_v44, %v2531_v54  ;;  %1263 = vrot.lane.b32.xlu1 %v4760_v36, %s3249_s8  ;;  %v3115_v31 = vpop.f32.mrf.mxu0  ;;  %v2733_v37 = vsel %vm1267_vm7, %v2660_v14, 0.0  ;;  %v681_v18 = vsel %vm3545_vm2, %v677_v7, 0  ;;  %v5335_v44 = vld [vmem:[#allocation12_spill] sm:$0xff] }
 0x1df   :  { %v1246_v5 = vpop.permute.xlu0 %1245  ;;  %2461 = vst.msk [vmem:[%s5260_s2 + $0x20] sm:$0xf] %vm2452_vm0, %v3001_v10  ;;  %v3004_v0 = vpack.c.bf16 %v3115_v31, %v3115_v31  ;;  %v2729_v3 = vsel %vm1267_vm7, %v2658_v26, 0.0  ;;  %v2661_v11 = vmul.f32 %v3115_v31, %v3115_v31  ;;  %v2538_v39 = vsel %vm1267_vm7, %v3115_v31, 0.0 }
 0x1e0   :  { %v1789_v56 = vsel %vm1747_vm14, %v1725_v30, %v1246_v5  ;;  %v1248_v54 = vpop.permute.xlu1 %1247  ;;  %v1976_v23 = vpop.f32.mrf.mxu0  ;;  %v2730_v48 = vadd.f32 %v2729_v3, %v2728_v59  ;;  %v673_v59 = vsel %vm3720_vm6, 0, %v669_v42  ;;  %v1333_v63 = vsel %vm1267_vm7, %v4351_v21, %v5335_v44  ;;  %v5336_v30 = vld [vmem:[#allocation13_spill] sm:$0xff] }
 0x1e1   :  { %849 = vrot.lane.b32.xlu0 %v644_v34, %s3243_s21  ;;  %3144 = vmatprep.mubr.msk.bf16.mxu1 %vm1838_vm15, %v1789_v56  ;;  %2464 = vst.msk [vmem:[%s5260_s2 + $0x2c] sm:$0xf] %vm2452_vm0, %v3004_v0  ;;  %v1791_v61 = vsel %vm1747_vm14, %v1727_v25, %v1248_v54  ;;  %v3002_v52 = vpack.c.bf16 %v1976_v23, %v1976_v23  ;;  %v2534_v28 = vsel %vm1267_vm7, %v1976_v23, 0.0  ;;  %v2735_v15 = vsel %vm1267_vm7, %v2661_v11, 0.0 }
 0x1e2   :  { %v2659_v22 = vmul.f32 %v1976_v23, %v1976_v23  ;;  %851 = vrot.lane.b32.xlu1 %v4760_v36, %s3243_s21  ;;  %3145 = vmatmul.mubr.msk.bf16.gmra.mxu1 %vm1838_vm15, %v1791_v61  ;;  %v2535_v34 = vadd.f32 %v2534_v28, %v2533_v12  ;;  %v1336_v12 = vsel %vm1267_vm7, %v4394_v38, %v5336_v30 }
 0x1e3   :  { %v834_v50 = vpop.permute.xlu0 %833  ;;  %2462 = vst.msk [vmem:[%s5260_s2 + $0x24] sm:$0xf] %vm2452_vm0, %v3002_v52 }
 0x1e4   :  { %v2731_v19 = vsel %vm1267_vm7, %v2659_v22, 0.0  ;;  %v836_v41 = vpop.permute.xlu1 %835  ;;  %v2537_v29 = vadd.f32 %v2536_v17, %v2535_v34  ;;  %v1405_v26 = vsel %vm1361_vm8, %v1333_v63, %v834_v50 }
 0x1e5   :  { %945 = vrot.lane.b32.xlu0 %v4741_v46, %s3244_s27  ;;  %v2732_v53 = vadd.f32 %v2731_v19, %v2730_v48  ;;  %v1407_v21 = vsel %vm1361_vm8, %v1336_v12, %v836_v41 }
 0x1e6   :  { %947 = vrot.lane.b32.xlu1 %v673_v59, %s3244_s27  ;;  %v2539_v40 = vadd.f32 %v2538_v39, %v2537_v29 }
 0x1e7   :  { %v930_v4 = vpop.permute.xlu0 %929  ;;  %v2734_v16 = vadd.f32 %v2733_v37, %v2732_v53 }
 0x1e8   :  { %v932_v57 = vpop.permute.xlu1 %931  ;;  %v1470_v31 = vsel %vm1424_vm9, %v1405_v26, %v930_v4 }
 0x1e9   :  { %1009 = vrot.lane.b32.xlu0 %v4703_v32, %s3245_s30  ;;  %v2736_v9 = vadd.f32 %v2735_v15, %v2734_v16  ;;  %v1472_v38 = vsel %vm1424_vm9, %v1407_v21, %v932_v57 }
 0x1ea   :  { %1011 = vrot.lane.b32.xlu1 %v4735_v45, %s3245_s30 }
 0x1eb   :  { %v994_v62 = vpop.permute.xlu0 %993 }
 0x1ec   :  { %v996_v51 = vpop.permute.xlu1 %995  ;;  %v1535_v25 = vsel %vm1489_vm10, %v1470_v31, %v994_v62 }
 0x1ed   :  { %1075 = vrot.lane.b32.xlu0 %v4760_v36, %s3246_s6  ;;  %v1537_v54 = vsel %vm1489_vm10, %v1472_v38, %v996_v51 }
 0x1ee   :  { %1077 = vrot.lane.b32.xlu1 %v681_v18, %s3246_s6 }
 0x1ef   :  { %v1060_v60 = vpop.permute.xlu0 %1059 }
 0x1f0   :  { %v1062_v55 = vpop.permute.xlu1 %1061  ;;  %v1600_v23 = vsel %vm1554_vm11, %v1535_v25, %v1060_v60  ;;  %v5338_v25 = vld [vmem:[#allocation15_spill] sm:$0xff] }
 0x1f1   :  { %1140 = vrot.lane.b32.xlu0 %v673_v59, %s3247_s1  ;;  %v1602_v14 = vsel %vm1554_vm11, %v1537_v54, %v1062_v55 }
 0x1f2   :  { %1202 = vrot.lane.b32.xlu1 %v4735_v45, %s3248_s7  ;;  %v3118_v20 = vpop.f32.mrf.mxu0 }
 0x1f3   :  { %v1125_v32 = vpop.permute.xlu0 %1124  ;;  %v3007_v10 = vpack.c.bf16 %v3118_v20, %v3118_v20  ;;  %v2664_v34 = vmul.f32 %v3118_v20, %v3118_v20  ;;  %v2544_v53 = vsel %vm1267_vm7, %v3118_v20, 0.0 }
 0x1f4   :  { %v1127_v36 = vpop.permute.xlu1 %1126  ;;  %v1989_v6 = vpop.f32.mrf.mxu0  ;;  %v1665_v28 = vsel %vm1619_vm12, %v1600_v23, %v1125_v32 }
 0x1f5   :  { %1265 = vrot.lane.b32.xlu0 %v681_v18, %s3249_s8  ;;  %2467 = vst.msk [vmem:[%s5260_s2 + $0x38] sm:$0xf] %vm2452_vm0, %v3007_v10  ;;  %v3005_v45 = vpack.c.bf16 %v1989_v6, %v1989_v6  ;;  %v2540_v5 = vsel %vm1267_vm7, %v1989_v6, 0.0  ;;  %v2662_v56 = vmul.f32 %v1989_v6, %v1989_v6  ;;  %v1667_v19 = vsel %vm1619_vm12, %v1602_v14, %v1127_v36 }
 0x1f6   :  { %v2541_v33 = vadd.f32 %v2540_v5, %v2539_v40  ;;  %v3119_v42 = vpop.f32.mrf.mxu0  ;;  %v2741_v57 = vsel %vm1267_vm7, %v2664_v34, 0.0 }
 0x1f7   :  { %v1187_v0 = vpop.permute.xlu0 %1186  ;;  %2465 = vst.msk [vmem:[%s5260_s2 + $0x30] sm:$0xf] %vm2452_vm0, %v3005_v45  ;;  %v3008_v3 = vpack.c.bf16 %v3119_v42, %v3119_v42  ;;  %v2737_v48 = vsel %vm1267_vm7, %v2662_v56, 0.0  ;;  %v2665_v37 = vmul.f32 %v3119_v42, %v3119_v42 }
 0x1f8   :  { %v1189_v61 = vpop.permute.xlu1 %1188  ;;  %v1992_v52 = vpop.f32.mrf.mxu0  ;;  %v2738_v22 = vadd.f32 %v2737_v48, %v2736_v9  ;;  %v1729_v59 = vsel %vm1683_vm13, %v1665_v28, %v1187_v0  ;;  %v2546_v9 = vsel %vm1267_vm7, %v3119_v42, 0.0  ;;  %v5337_v42 = vld [vmem:[#allocation14_spill] sm:$0xff] }
 0x1f9   :  { %2468 = vst.msk [vmem:[%s5260_s2 + $0x3c] sm:$0xf] %vm2452_vm0, %v3008_v3  ;;  %v3006_v50 = vpack.c.bf16 %v1992_v52, %v1992_v52  ;;  %v2542_v47 = vsel %vm1267_vm7, %v1992_v52, 0.0  ;;  %v2663_v17 = vmul.f32 %v1992_v52, %v1992_v52  ;;  %v1731_v39 = vsel %vm1683_vm13, %v1667_v19, %v1189_v61 }
 0x1fa   :  { %v2543_v41 = vadd.f32 %v2542_v47, %v2541_v33  ;;  %v2743_v60 = vsel %vm1267_vm7, %v2665_v37, 0.0  ;;  %v1339_v38 = vsel %vm1267_vm7, %v4428_v35, %v5337_v42  ;;  %v1342_v3 = vsel %vm1267_vm7, %v4460_v49, %v5338_v25 }
 0x1fb   :  { %v1250_v11 = vpop.permute.xlu0 %1249  ;;  %2466 = vst.msk [vmem:[%s5260_s2 + $0x34] sm:$0xf] %vm2452_vm0, %v3006_v50  ;;  %v2739_v4 = vsel %vm1267_vm7, %v2663_v17, 0.0 }
 0x1fc   :  { %v1793_v29 = vsel %vm1747_vm14, %v1729_v59, %v1250_v11  ;;  %v1252_v16 = vpop.permute.xlu1 %1251  ;;  %v2545_v7 = vadd.f32 %v2544_v53, %v2543_v41  ;;  %v2740_v40 = vadd.f32 %v2739_v4, %v2738_v22 }
 0x1fd   :  { %3148 = vmatprep.mubr.msk.bf16.mxu1 %vm1838_vm15, %v1793_v29  ;;  %v1795_v15 = vsel %vm1747_vm14, %v1731_v39, %v1252_v16 }
 0x1fe   :  { %3149 = vmatmul.mubr.msk.bf16.gmra.mxu1 %vm1838_vm15, %v1795_v15  ;;  %v2742_v18 = vadd.f32 %v2741_v57, %v2740_v40  ;;  %v2547_v51 = vadd.f32 %v2546_v9, %v2545_v7 }
 0x1ff   :  { %v838_v62 = vpop.permute.xlu0 %837 }
 0x200   :  { %v840_v55 = vpop.permute.xlu1 %839  ;;  %v2744_v32 = vadd.f32 %v2743_v60, %v2742_v18  ;;  %v1409_v61 = vsel %vm1361_vm8, %v1339_v38, %v838_v62 }
 0x201   :  { %v1411_v52 = vsel %vm1361_vm8, %v1342_v3, %v840_v55 }
 0x203   :  { %v934_v20 = vpop.permute.xlu0 %933 }
 0x204   :  { %v936_v10 = vpop.permute.xlu1 %935  ;;  %v1474_v35 = vsel %vm1424_vm9, %v1409_v61, %v934_v20 }
 0x205   :  { %v1476_v59 = vsel %vm1424_vm9, %v1411_v52, %v936_v10 }
 0x207   :  { %v998_v44 = vpop.permute.xlu0 %997 }
 0x208   :  { %v1000_v63 = vpop.permute.xlu1 %999  ;;  %v1539_v47 = vsel %vm1489_vm10, %v1474_v35, %v998_v44 }
 0x209   :  { %v1541_v37 = vsel %vm1489_vm10, %v1476_v59, %v1000_v63 }
 0x20a   :  { %v3122_v6 = vpop.f32.mrf.mxu0 }
 0x20b   :  { %v1064_v36 = vpop.permute.xlu0 %1063  ;;  %v3011_v30 = vpack.c.bf16 %v3122_v6, %v3122_v6  ;;  %v2668_v22 = vmul.f32 %v3122_v6, %v3122_v6  ;;  %v2552_v19 = vsel %vm1267_vm7, %v3122_v6, 0.0 }
 0x20c   :  { %v1066_v12 = vpop.permute.xlu1 %1065  ;;  %v2005_v26 = vpop.f32.mrf.mxu0  ;;  %v1604_v11 = vsel %vm1554_vm11, %v1539_v47, %v1064_v36 }
 0x20d   :  { %2471 = vst.msk [vmem:[%s5260_s2 + $0x48] sm:$0xf] %vm2452_vm0, %v3011_v30  ;;  %v3009_v45 = vpack.c.bf16 %v2005_v26, %v2005_v26  ;;  %v2548_v5 = vsel %vm1267_vm7, %v2005_v26, 0.0  ;;  %v2666_v31 = vmul.f32 %v2005_v26, %v2005_v26  ;;  %v2749_v7 = vsel %vm1267_vm7, %v2668_v22, 0.0 }
 0x20e   :  { %v2549_v21 = vadd.f32 %v2548_v5, %v2547_v51  ;;  %v3123_v56 = vpop.f32.mrf.mxu0  ;;  %v1606_v40 = vsel %vm1554_vm11, %v1541_v37, %v1066_v12 }
 0x20f   :  { %v1129_v33 = vpop.permute.xlu0 %1128  ;;  %2469 = vst.msk [vmem:[%s5260_s2 + $0x40] sm:$0xf] %vm2452_vm0, %v3009_v45  ;;  %v3012_v0 = vpack.c.bf16 %v3123_v56, %v3123_v56  ;;  %v2745_v54 = vsel %vm1267_vm7, %v2666_v31, 0.0  ;;  %v2669_v41 = vmul.f32 %v3123_v56, %v3123_v56  ;;  %v2554_v15 = vsel %vm1267_vm7, %v3123_v56, 0.0 }
 0x210   :  { %v1131_v23 = vpop.permute.xlu1 %1130  ;;  %v2008_v48 = vpop.f32.mrf.mxu0  ;;  %v2746_v14 = vadd.f32 %v2745_v54, %v2744_v32  ;;  %v1669_v39 = vsel %vm1619_vm12, %v1604_v11, %v1129_v33 }
 0x211   :  { %2472 = vst.msk [vmem:[%s5260_s2 + $0x4c] sm:$0xf] %vm2452_vm0, %v3012_v0  ;;  %v3010_v28 = vpack.c.bf16 %v2008_v48, %v2008_v48  ;;  %v2550_v49 = vsel %vm1267_vm7, %v2008_v48, 0.0  ;;  %v2667_v50 = vmul.f32 %v2008_v48, %v2008_v48  ;;  %v1671_v62 = vsel %vm1619_vm12, %v1606_v40, %v1131_v23 }
 0x212   :  { %v2551_v17 = vadd.f32 %v2550_v49, %v2549_v21  ;;  %v2751_v55 = vsel %vm1267_vm7, %v2669_v41, 0.0  ;;  %v5339_v49 = vld [vmem:[#allocation16_spill] sm:$0xff] }
 0x213   :  { %v1191_v34 = vpop.permute.xlu0 %1190  ;;  %2470 = vst.msk [vmem:[%s5260_s2 + $0x44] sm:$0xf] %vm2452_vm0, %v3010_v28  ;;  %v2747_v29 = vsel %vm1267_vm7, %v2667_v50, 0.0  ;;  %v1345_v50 = vsel %vm1267_vm7, %v4510_v8, %v5339_v49 }
 0x214   :  { %v1193_v53 = vpop.permute.xlu1 %1192  ;;  %v2553_v4 = vadd.f32 %v2552_v19, %v2551_v17  ;;  %v2748_v16 = vadd.f32 %v2747_v29, %v2746_v14  ;;  %v1733_v57 = vsel %vm1683_vm13, %v1669_v39, %v1191_v34  ;;  %v5340_v29 = vld [vmem:[#allocation17_spill] sm:$0xff] }
 0x215   :  { %v1735_v32 = vsel %vm1683_vm13, %v1671_v62, %v1193_v53  ;;  %v1348_v53 = vsel %vm1267_vm7, %v4535_v58, %v5340_v29 }
 0x216   :  { %v2750_v18 = vadd.f32 %v2749_v7, %v2748_v16  ;;  %v2555_v60 = vadd.f32 %v2554_v15, %v2553_v4 }
 0x217   :  { %v1254_v9 = vpop.permute.xlu0 %1253 }
 0x218   :  { %v1797_v51 = vsel %vm1747_vm14, %v1733_v57, %v1254_v9  ;;  %v1256_v20 = vpop.permute.xlu1 %1255  ;;  %v2752_v44 = vadd.f32 %v2751_v55, %v2750_v18 }
 0x219   :  { %3152 = vmatprep.mubr.msk.bf16.mxu1 %vm1838_vm15, %v1797_v51  ;;  %v1799_v10 = vsel %vm1747_vm14, %v1735_v32, %v1256_v20 }
 0x21a   :  { %3153 = vmatmul.mubr.msk.bf16.gmra.mxu1 %vm1838_vm15, %v1799_v10 }
 0x21b   :  { %v842_v63 = vpop.permute.xlu0 %841 }
 0x21c   :  { %v844_v36 = vpop.permute.xlu1 %843  ;;  %v1413_v11 = vsel %vm1361_vm8, %v1345_v50, %v842_v63 }
 0x21d   :  { %v1415_v16 = vsel %vm1361_vm8, %v1348_v53, %v844_v36 }
 0x21f   :  { %v938_v6 = vpop.permute.xlu0 %937 }
 0x220   :  { %v940_v30 = vpop.permute.xlu1 %939  ;;  %v1478_v37 = vsel %vm1424_vm9, %v1413_v11, %v938_v6 }
 0x221   :  { %v1480_v57 = vsel %vm1424_vm9, %v1415_v16, %v940_v30 }
 0x222   :  { %v3126_v26 = vpop.f32.mrf.mxu0 }
 0x223   :  { %v1002_v12 = vpop.permute.xlu0 %1001  ;;  %v3015_v45 = vpack.c.bf16 %v3126_v26, %v3126_v26  ;;  %v2672_v52 = vmul.f32 %v3126_v26, %v3126_v26  ;;  %v2560_v34 = vsel %vm1267_vm7, %v3126_v26, 0.0 }
 0x224   :  { %v1004_v5 = vpop.permute.xlu1 %1003  ;;  %v2021_v21 = vpop.f32.mrf.mxu0  ;;  %v1543_v7 = vsel %vm1489_vm10, %v1478_v37, %v1002_v12 }
 0x225   :  { %2475 = vst.msk [vmem:[%s5260_s2 + $0x58] sm:$0xf] %vm2452_vm0, %v3015_v45  ;;  %v3013_v31 = vpack.c.bf16 %v2021_v21, %v2021_v21  ;;  %v2556_v33 = vsel %vm1267_vm7, %v2021_v21, 0.0  ;;  %v2670_v0 = vmul.f32 %v2021_v21, %v2021_v21  ;;  %v2757_v39 = vsel %vm1267_vm7, %v2672_v52, 0.0 }
 0x226   :  { %v2557_v56 = vadd.f32 %v2556_v33, %v2555_v60  ;;  %v3127_v38 = vpop.f32.mrf.mxu0  ;;  %v1545_v18 = vsel %vm1489_vm10, %v1480_v57, %v1004_v5 }
 0x227   :  { %v1068_v42 = vpop.permute.xlu0 %1067  ;;  %2473 = vst.msk [vmem:[%s5260_s2 + $0x50] sm:$0xf] %vm2452_vm0, %v3013_v31  ;;  %v3016_v25 = vpack.c.bf16 %v3127_v38, %v3127_v38  ;;  %v2753_v3 = vsel %vm1267_vm7, %v2670_v0, 0.0  ;;  %v2673_v59 = vmul.f32 %v3127_v38, %v3127_v38  ;;  %v2562_v8 = vsel %vm1267_vm7, %v3127_v38, 0.0 }
 0x228   :  { %v1070_v54 = vpop.permute.xlu1 %1069  ;;  %v2024_v23 = vpop.f32.mrf.mxu0  ;;  %v2754_v48 = vadd.f32 %v2753_v3, %v2752_v44  ;;  %v1608_v9 = vsel %vm1554_vm11, %v1543_v7, %v1068_v42 }
 0x229   :  { %2476 = vst.msk [vmem:[%s5260_s2 + $0x5c] sm:$0xf] %vm2452_vm0, %v3016_v25  ;;  %v3014_v61 = vpack.c.bf16 %v2024_v23, %v2024_v23  ;;  %v2558_v14 = vsel %vm1267_vm7, %v2024_v23, 0.0  ;;  %v2671_v28 = vmul.f32 %v2024_v23, %v2024_v23  ;;  %v2759_v62 = vsel %vm1267_vm7, %v2673_v59, 0.0 }
 0x22a   :  { %v2559_v22 = vadd.f32 %v2558_v14, %v2557_v56  ;;  %v1610_v55 = vsel %vm1554_vm11, %v1545_v18, %v1070_v54 }
 0x22b   :  { %v1133_v35 = vpop.permute.xlu0 %1132  ;;  %2474 = vst.msk [vmem:[%s5260_s2 + $0x54] sm:$0xf] %vm2452_vm0, %v3014_v61  ;;  %v2755_v47 = vsel %vm1267_vm7, %v2671_v28, 0.0 }
 0x22c   :  { %v1135_v17 = vpop.permute.xlu1 %1134  ;;  %v2561_v19 = vadd.f32 %v2560_v34, %v2559_v22  ;;  %v2756_v41 = vadd.f32 %v2755_v47, %v2754_v48  ;;  %v1673_v51 = vsel %vm1619_vm12, %v1608_v9, %v1133_v35 }
 0x22d   :  { %v1675_v10 = vsel %vm1619_vm12, %v1610_v55, %v1135_v17 }
 0x22e   :  { %v2758_v40 = vadd.f32 %v2757_v39, %v2756_v41  ;;  %v2563_v15 = vadd.f32 %v2562_v8, %v2561_v19  ;;  %v5341_v39 = vld [vmem:[#allocation18_spill] sm:$0xff] }
 0x22f   :  { %v1195_v4 = vpop.permute.xlu0 %1194  ;;  %v1351_v8 = vsel %vm1267_vm7, %v4587_v24, %v5341_v39 }
 0x230   :  { %v1197_v58 = vpop.permute.xlu1 %1196  ;;  %v2760_v60 = vadd.f32 %v2759_v62, %v2758_v40  ;;  %v1737_v32 = vsel %vm1683_vm13, %v1673_v51, %v1195_v4 }
 0x231   :  { %v1739_v63 = vsel %vm1683_vm13, %v1675_v10, %v1197_v58 }
 0x233   :  { %v1258_v20 = vpop.permute.xlu0 %1257 }
 0x234   :  { %v1801_v44 = vsel %vm1747_vm14, %v1737_v32, %v1258_v20  ;;  %v1260_v36 = vpop.permute.xlu1 %1259 }
 0x235   :  { %3156 = vmatprep.mubr.msk.bf16.mxu1 %vm1838_vm15, %v1801_v44  ;;  %v1803_v6 = vsel %vm1747_vm14, %v1739_v63, %v1260_v36 }
 0x236   :  { %3157 = vmatmul.mubr.msk.bf16.gmra.mxu1 %vm1838_vm15, %v1803_v6 }
 0x237   :  { %v846_v30 = vpop.permute.xlu0 %845 }
 0x238   :  { %v848_v12 = vpop.permute.xlu1 %847  ;;  %v1417_v7 = vsel %vm1361_vm8, %v1351_v8, %v846_v30 }
 0x23a   :  { %v3130_v45 = vpop.f32.mrf.mxu0 }
 0x23b   :  { %v942_v26 = vpop.permute.xlu0 %941  ;;  %v3019_v5 = vpack.c.bf16 %v3130_v45, %v3130_v45  ;;  %v2676_v14 = vmul.f32 %v3130_v45, %v3130_v45  ;;  %v2568_v50 = vsel %vm1267_vm7, %v3130_v45, 0.0 }
 0x23c   :  { %v944_v21 = vpop.permute.xlu1 %943  ;;  %v2037_v31 = vpop.f32.mrf.mxu0  ;;  %v1482_v9 = vsel %vm1424_vm9, %v1417_v7, %v942_v26 }
 0x23d   :  { %2479 = vst.msk [vmem:[%s5260_s2 + $0x68] sm:$0xf] %vm2452_vm0, %v3019_v5  ;;  %v3017_v33 = vpack.c.bf16 %v2037_v31, %v2037_v31  ;;  %v2564_v56 = vsel %vm1267_vm7, %v2037_v31, 0.0  ;;  %v2674_v42 = vmul.f32 %v2037_v31, %v2037_v31  ;;  %v2765_v19 = vsel %vm1267_vm7, %v2676_v14, 0.0 }
 0x23e   :  { %v2565_v0 = vadd.f32 %v2564_v56, %v2563_v15  ;;  %v3131_v25 = vpop.f32.mrf.mxu0  ;;  %v5342_v15 = vld [vmem:[#allocation19_spill] sm:$0xff] }
 0x23f   :  { %v1006_v38 = vpop.permute.xlu0 %1005  ;;  %2477 = vst.msk [vmem:[%s5260_s2 + $0x60] sm:$0xf] %vm2452_vm0, %v3017_v33  ;;  %v3020_v3 = vpack.c.bf16 %v3131_v25, %v3131_v25  ;;  %v2761_v54 = vsel %vm1267_vm7, %v2674_v42, 0.0  ;;  %v2677_v34 = vmul.f32 %v3131_v25, %v3131_v25  ;;  %v2570_v41 = vsel %vm1267_vm7, %v3131_v25, 0.0 }
 0x240   :  { %v1008_v23 = vpop.permute.xlu1 %1007  ;;  %v2040_v48 = vpop.f32.mrf.mxu0  ;;  %v2762_v61 = vadd.f32 %v2761_v54, %v2760_v60  ;;  %v1354_v57 = vsel %vm1267_vm7, %v4635_v13, %v5342_v15  ;;  %v1547_v18 = vsel %vm1489_vm10, %v1482_v9, %v1006_v38 }
 0x241   :  { %2480 = vst.msk [vmem:[%s5260_s2 + $0x6c] sm:$0xf] %vm2452_vm0, %v3020_v3  ;;  %v3018_v52 = vpack.c.bf16 %v2040_v48, %v2040_v48  ;;  %v2566_v28 = vsel %vm1267_vm7, %v2040_v48, 0.0  ;;  %v2675_v35 = vmul.f32 %v2040_v48, %v2040_v48  ;;  %v2767_v4 = vsel %vm1267_vm7, %v2677_v34, 0.0 }
 0x242   :  { %v2567_v49 = vadd.f32 %v2566_v28, %v2565_v0  ;;  %v1419_v58 = vsel %vm1361_vm8, %v1354_v57, %v848_v12 }
 0x243   :  { %v1072_v22 = vpop.permute.xlu0 %1071  ;;  %2478 = vst.msk [vmem:[%s5260_s2 + $0x64] sm:$0xf] %vm2452_vm0, %v3018_v52  ;;  %v2763_v59 = vsel %vm1267_vm7, %v2675_v35, 0.0  ;;  %v1484_v51 = vsel %vm1424_vm9, %v1419_v58, %v944_v21 }
 0x244   :  { %v1074_v47 = vpop.permute.xlu1 %1073  ;;  %v2569_v17 = vadd.f32 %v2568_v50, %v2567_v49  ;;  %v2764_v11 = vadd.f32 %v2763_v59, %v2762_v61  ;;  %v1612_v24 = vsel %vm1554_vm11, %v1547_v18, %v1072_v22  ;;  %v1549_v55 = vsel %vm1489_vm10, %v1484_v51, %v1008_v23 }
 0x245   :  { %v1614_v20 = vsel %vm1554_vm11, %v1549_v55, %v1074_v47  ;;  %v5343_v47 = vld [vmem:[#allocation21_spill] sm:$0xff] }
 0x246   :  { %v2766_v53 = vadd.f32 %v2765_v19, %v2764_v11  ;;  %v2571_v37 = vadd.f32 %v2570_v41, %v2569_v17  ;;  %v1360_v17 = vsel %vm1267_vm7, %v4741_v46, %v5343_v47  ;;  %v5344_v41 = vld [vmem:[#allocation20_spill] sm:$0xff] }
 0x247   :  { %v1137_v29 = vpop.permute.xlu0 %1136 }
 0x248   :  { %v1139_v16 = vpop.permute.xlu1 %1138  ;;  %v2768_v40 = vadd.f32 %v2767_v4, %v2766_v53  ;;  %v1677_v32 = vsel %vm1619_vm12, %v1612_v24, %v1137_v29  ;;  %v1357_v29 = vsel %vm1267_vm7, %v4698_v27, %v5344_v41 }
 0x249   :  { %v1679_v44 = vsel %vm1619_vm12, %v1614_v20, %v1139_v16 }
 0x24b   :  { %v1199_v62 = vpop.permute.xlu0 %1198 }
 0x24c   :  { %v1201_v60 = vpop.permute.xlu1 %1200  ;;  %v1741_v13 = vsel %vm1683_vm13, %v1677_v32, %v1199_v62 }
 0x24d   :  { %v1743_v36 = vsel %vm1683_vm13, %v1679_v44, %v1201_v60 }
 0x24f   :  { %v1262_v10 = vpop.permute.xlu0 %1261 }
 0x250   :  { %v1805_v63 = vsel %vm1747_vm14, %v1741_v13, %v1262_v10  ;;  %v1264_v6 = vpop.permute.xlu1 %1263 }
 0x251   :  { %3160 = vmatprep.mubr.msk.bf16.mxu1 %vm1838_vm15, %v1805_v63  ;;  %v1807_v30 = vsel %vm1747_vm14, %v1743_v36, %v1264_v6 }
 0x252   :  { %v3134_v26 = vpop.f32.mrf.mxu0  ;;  %3161 = vmatmul.mubr.msk.bf16.gmra.mxu1 %vm1838_vm15, %v1807_v30 }
 0x253   :  { %v850_v12 = vpop.permute.xlu0 %849  ;;  %v3023_v45 = vpack.c.bf16 %v3134_v26, %v3134_v26  ;;  %v2680_v52 = vmul.f32 %v3134_v26, %v3134_v26  ;;  %v2576_v49 = vsel %vm1267_vm7, %v3134_v26, 0.0 }
 0x254   :  { %v852_v5 = vpop.permute.xlu1 %851  ;;  %v2053_v21 = vpop.f32.mrf.mxu0  ;;  %v1421_v4 = vsel %vm1361_vm8, %v1357_v29, %v850_v12 }
 0x255   :  { %2483 = vst.msk [vmem:[%s5260_s2 + $0x78] sm:$0xf] %vm2452_vm0, %v3023_v45  ;;  %v3021_v31 = vpack.c.bf16 %v2053_v21, %v2053_v21  ;;  %v2572_v33 = vsel %vm1267_vm7, %v2053_v21, 0.0  ;;  %v2678_v0 = vmul.f32 %v2053_v21, %v2053_v21  ;;  %v2773_v53 = vsel %vm1267_vm7, %v2680_v52, 0.0 }
 0x256   :  { %v2573_v56 = vadd.f32 %v2572_v33, %v2571_v37  ;;  %v3135_v38 = vpop.f32.mrf.mxu0  ;;  %v1423_v37 = vsel %vm1361_vm8, %v1360_v17, %v852_v5 }
 0x257   :  { %v946_v42 = vpop.permute.xlu0 %945  ;;  %2481 = vst.msk [vmem:[%s5260_s2 + $0x70] sm:$0xf] %vm2452_vm0, %v3021_v31  ;;  %v3024_v25 = vpack.c.bf16 %v3135_v38, %v3135_v38  ;;  %v2769_v3 = vsel %vm1267_vm7, %v2678_v0, 0.0  ;;  %v2681_v50 = vmul.f32 %v3135_v38, %v3135_v38  ;;  %v2578_v39 = vsel %vm1267_vm7, %v3135_v38, 0.0 }
 0x258   :  { %v948_v54 = vpop.permute.xlu1 %947  ;;  %v2056_v23 = vpop.f32.mrf.mxu0  ;;  %v2770_v48 = vadd.f32 %v2769_v3, %v2768_v40  ;;  %v1486_v46 = vsel %vm1424_vm9, %v1421_v4, %v946_v42 }
 0x259   :  { %2484 = vst.msk [vmem:[%s5260_s2 + $0x7c] sm:$0xf] %vm2452_vm0, %v3024_v25  ;;  %v3022_v61 = vpack.c.bf16 %v2056_v23, %v2056_v23  ;;  %v2574_v14 = vsel %vm1267_vm7, %v2056_v23, 0.0  ;;  %v2679_v28 = vmul.f32 %v2056_v23, %v2056_v23  ;;  %v1488_v16 = vsel %vm1424_vm9, %v1423_v37, %v948_v54 }
 0x25a   :  { %v2575_v22 = vadd.f32 %v2574_v14, %v2573_v56  ;;  %v2775_v15 = vsel %vm1267_vm7, %v2681_v50, 0.0 }
 0x25b   :  { %v1010_v35 = vpop.permute.xlu0 %1009  ;;  %2482 = vst.msk [vmem:[%s5260_s2 + $0x74] sm:$0xf] %vm2452_vm0, %v3022_v61  ;;  %v2771_v34 = vsel %vm1267_vm7, %v2679_v28, 0.0 }
 0x25c   :  { %v1012_v59 = vpop.permute.xlu1 %1011  ;;  %v2577_v11 = vadd.f32 %v2576_v49, %v2575_v22  ;;  %v2772_v19 = vadd.f32 %v2771_v34, %v2770_v48  ;;  %v1551_v9 = vsel %vm1489_vm10, %v1486_v46, %v1010_v35 }
 0x25d   :  { %v1553_v57 = vsel %vm1489_vm10, %v1488_v16, %v1012_v59 }
 0x25e   :  { %v2774_v7 = vadd.f32 %v2773_v53, %v2772_v19  ;;  %v2579_v40 = vadd.f32 %v2578_v39, %v2577_v11 }
 0x25f   :  { %v1076_v8 = vpop.permute.xlu0 %1075 }
 0x260   :  { %v1078_v27 = vpop.permute.xlu1 %1077  ;;  %v2776_v58 = vadd.f32 %v2775_v15, %v2774_v7  ;;  %v1616_v18 = vsel %vm1554_vm11, %v1551_v9, %v1076_v8 }
 0x261   :  { %v1618_v62 = vsel %vm1554_vm11, %v1553_v57, %v1078_v27 }
 0x262   :  { %v1682_v51 = vsel %vm1619_vm12, %v1618_v62, %v4476_v43 }
 0x263   :  { %v1141_v24 = vpop.permute.xlu0 %1140  ;;  %v1746_v20 = vsel %vm1683_vm13, %v1682_v51, %v4491_v2 }
 0x264   :  { %v1681_v60 = vsel %vm1619_vm12, %v1616_v18, %v1141_v24  ;;  %v1203_v55 = vpop.permute.xlu1 %1202  ;;  %v1810_v44 = vsel %vm1747_vm14, %v1746_v20, %v4506_v1 }
 0x265   :  { %v1745_v32 = vsel %vm1683_vm13, %v1681_v60, %v1203_v55 }
 0x267   :  { %v1266_v13 = vpop.permute.xlu0 %1265 }
 0x268   :  { %v1809_v10 = vsel %vm1747_vm14, %v1745_v32, %v1266_v13 }
 0x269   :  { %3164 = vmatprep.mubr.msk.bf16.mxu1 %vm1838_vm15, %v1809_v10 }
 0x26a   :  { %3165 = vmatmul.mubr.msk.bf16.gmra.mxu1 %vm1838_vm15, %v1810_v44  ;;  %v3138_v43 = vpop.f32.mrf.mxu1 }
 0x26b   :  { %v3027_v63 = vpack.c.bf16 %v3138_v43, %v3138_v43  ;;  %v2684_v31 = vmul.f32 %v3138_v43, %v3138_v43  ;;  %v2584_v38 = vsel %vm1267_vm7, %v3138_v43, 0.0 }
 0x26c   :  { %v2069_v36 = vpop.f32.mrf.mxu1 }
 0x26d   :  { %2487 = vst.msk [vmem:[%s5260_s2 + $0x88] sm:$0xf] %vm2452_vm0, %v3027_v63  ;;  %v3025_v6 = vpack.c.bf16 %v2069_v36, %v2069_v36  ;;  %v2580_v2 = vsel %vm1267_vm7, %v2069_v36, 0.0  ;;  %v2682_v30 = vmul.f32 %v2069_v36, %v2069_v36  ;;  %v2781_v48 = vsel %vm1267_vm7, %v2684_v31, 0.0 }
 0x26e   :  { %v2581_v12 = vadd.f32 %v2580_v2, %v2579_v40  ;;  %v3139_v26 = vpop.f32.mrf.mxu1 }
 0x26f   :  { %2485 = vst.msk [vmem:[%s5260_s2 + $0x80] sm:$0xf] %vm2452_vm0, %v3025_v6  ;;  %v2777_v1 = vsel %vm1267_vm7, %v2682_v30, 0.0  ;;  %v3028_v45 = vpack.c.bf16 %v3139_v26, %v3139_v26  ;;  %v2685_v25 = vmul.f32 %v3139_v26, %v3139_v26  ;;  %v2586_v61 = vsel %vm1267_vm7, %v3139_v26, 0.0 }
 0x270   :  { %v2778_v5 = vadd.f32 %v2777_v1, %v2776_v58  ;;  %v2072_v21 = vpop.f32.mrf.mxu1 }
 0x271   :  { %2488 = vst.msk [vmem:[%s5260_s2 + $0x8c] sm:$0xf] %vm2452_vm0, %v3028_v45  ;;  %v3026_v33 = vpack.c.bf16 %v2072_v21, %v2072_v21  ;;  %v2582_v56 = vsel %vm1267_vm7, %v2072_v21, 0.0  ;;  %v2683_v0 = vmul.f32 %v2072_v21, %v2072_v21  ;;  %v2783_v28 = vsel %vm1267_vm7, %v2685_v25, 0.0 }
 0x272   :  { %v2583_v42 = vadd.f32 %v2582_v56, %v2581_v12 }
 0x273   :  { %2486 = vst.msk [vmem:[%s5260_s2 + $0x84] sm:$0xf] %vm2452_vm0, %v3026_v33  ;;  %v2779_v3 = vsel %vm1267_vm7, %v2683_v0, 0.0 }
 0x274   :  { %v2585_v54 = vadd.f32 %v2584_v38, %v2583_v42  ;;  %v2780_v23 = vadd.f32 %v2779_v3, %v2778_v5 }
 0x276   :  { %v2782_v52 = vadd.f32 %v2781_v48, %v2780_v23  ;;  %v2587_v14 = vadd.f32 %v2586_v61, %v2585_v54 }
 0x278   :  { %v2784_v35 = vadd.f32 %v2783_v28, %v2782_v52 }
 0x286   :  { %v3142_v22 = vpop.f32.mrf.mxu1 }
 0x287   :  { %v3031_v49 = vpack.c.bf16 %v3142_v22, %v3142_v22  ;;  %v2688_v37 = vmul.f32 %v3142_v22, %v3142_v22  ;;  %v2592_v7 = vsel %vm1267_vm7, %v3142_v22, 0.0 }
 0x288   :  { %v2085_v50 = vpop.f32.mrf.mxu1 }
 0x289   :  { %2491 = vst.msk [vmem:[%s5260_s2 + $0x98] sm:$0xf] %vm2452_vm0, %v3031_v49  ;;  %v3029_v34 = vpack.c.bf16 %v2085_v50, %v2085_v50  ;;  %v2588_v59 = vsel %vm1267_vm7, %v2085_v50, 0.0  ;;  %v2686_v47 = vmul.f32 %v2085_v50, %v2085_v50  ;;  %v2789_v27 = vsel %vm1267_vm7, %v2688_v37, 0.0 }
 0x28a   :  { %v2589_v17 = vadd.f32 %v2588_v59, %v2587_v14  ;;  %v3143_v11 = vpop.f32.mrf.mxu1 }
 0x28b   :  { %2489 = vst.msk [vmem:[%s5260_s2 + $0x90] sm:$0xf] %vm2452_vm0, %v3029_v34  ;;  %v2785_v19 = vsel %vm1267_vm7, %v2686_v47, 0.0  ;;  %v3032_v41 = vpack.c.bf16 %v3143_v11, %v3143_v11  ;;  %v2689_v40 = vmul.f32 %v3143_v11, %v3143_v11  ;;  %v2594_v9 = vsel %vm1267_vm7, %v3143_v11, 0.0 }
 0x28c   :  { %v2786_v29 = vadd.f32 %v2785_v19, %v2784_v35  ;;  %v2088_v53 = vpop.f32.mrf.mxu1 }
 0x28d   :  { %2492 = vst.msk [vmem:[%s5260_s2 + $0x9c] sm:$0xf] %vm2452_vm0, %v3032_v41  ;;  %v3030_v39 = vpack.c.bf16 %v2088_v53, %v2088_v53  ;;  %v2590_v8 = vsel %vm1267_vm7, %v2088_v53, 0.0  ;;  %v2687_v4 = vmul.f32 %v2088_v53, %v2088_v53  ;;  %v2791_v18 = vsel %vm1267_vm7, %v2689_v40, 0.0 }
 0x28e   :  { %v2591_v16 = vadd.f32 %v2590_v8, %v2589_v17 }
 0x28f   :  { %2490 = vst.msk [vmem:[%s5260_s2 + $0x94] sm:$0xf] %vm2452_vm0, %v3030_v39  ;;  %v2787_v46 = vsel %vm1267_vm7, %v2687_v4, 0.0 }
 0x290   :  { %v2593_v15 = vadd.f32 %v2592_v7, %v2591_v16  ;;  %v2788_v57 = vadd.f32 %v2787_v46, %v2786_v29 }
 0x292   :  { %v2790_v62 = vadd.f32 %v2789_v27, %v2788_v57  ;;  %v2595_v58 = vadd.f32 %v2594_v9, %v2593_v15 }
 0x294   :  { %v2792_v51 = vadd.f32 %v2791_v18, %v2790_v62 }
 0x2a2   :  { %v3146_v24 = vpop.f32.mrf.mxu1 }
 0x2a3   :  { %v3035_v60 = vpack.c.bf16 %v3146_v24, %v3146_v24  ;;  %v2692_v2 = vmul.f32 %v3146_v24, %v3146_v24  ;;  %v2600_v45 = vsel %vm1267_vm7, %v3146_v24, 0.0 }
 0x2a4   :  { %v2101_v55 = vpop.f32.mrf.mxu1 }
 0x2a5   :  { %2495 = vst.msk [vmem:[%s5260_s2 + $0xa8] sm:$0xf] %vm2452_vm0, %v3035_v60  ;;  %v3033_v32 = vpack.c.bf16 %v2101_v55, %v2101_v55  ;;  %v2596_v20 = vsel %vm1267_vm7, %v2101_v55, 0.0  ;;  %v2690_v13 = vmul.f32 %v2101_v55, %v2101_v55  ;;  %v2797_v56 = vsel %vm1267_vm7, %v2692_v2, 0.0 }
 0x2a6   :  { %v2597_v10 = vadd.f32 %v2596_v20, %v2595_v58  ;;  %v3147_v44 = vpop.f32.mrf.mxu1 }
 0x2a7   :  { %2493 = vst.msk [vmem:[%s5260_s2 + $0xa0] sm:$0xf] %vm2452_vm0, %v3033_v32  ;;  %v2793_v43 = vsel %vm1267_vm7, %v2690_v13, 0.0  ;;  %v3036_v63 = vpack.c.bf16 %v3147_v44, %v3147_v44  ;;  %v2693_v5 = vmul.f32 %v3147_v44, %v3147_v44  ;;  %v2602_v0 = vsel %vm1267_vm7, %v3147_v44, 0.0 }
 0x2a8   :  { %v2794_v36 = vadd.f32 %v2793_v43, %v2792_v51  ;;  %v2104_v6 = vpop.f32.mrf.mxu1 }
 0x2a9   :  { %2496 = vst.msk [vmem:[%s5260_s2 + $0xac] sm:$0xf] %vm2452_vm0, %v3036_v63  ;;  %v3034_v30 = vpack.c.bf16 %v2104_v6, %v2104_v6  ;;  %v2598_v12 = vsel %vm1267_vm7, %v2104_v6, 0.0  ;;  %v2691_v26 = vmul.f32 %v2104_v6, %v2104_v6  ;;  %v2799_v25 = vsel %vm1267_vm7, %v2693_v5, 0.0 }
 0x2aa   :  { %v2599_v1 = vadd.f32 %v2598_v12, %v2597_v10 }
 0x2ab   :  { %2494 = vst.msk [vmem:[%s5260_s2 + $0xa4] sm:$0xf] %vm2452_vm0, %v3034_v30  ;;  %v2795_v21 = vsel %vm1267_vm7, %v2691_v26, 0.0 }
 0x2ac   :  { %v2601_v31 = vadd.f32 %v2600_v45, %v2599_v1  ;;  %v2796_v33 = vadd.f32 %v2795_v21, %v2794_v36 }
 0x2ae   :  { %v2798_v42 = vadd.f32 %v2797_v56, %v2796_v33  ;;  %v2603_v38 = vadd.f32 %v2602_v0, %v2601_v31 }
 0x2b0   :  { %v2800_v3 = vadd.f32 %v2799_v25, %v2798_v42 }
 0x2be   :  { %v3150_v54 = vpop.f32.mrf.mxu1 }
 0x2bf   :  { %v3039_v23 = vpack.c.bf16 %v3150_v54, %v3150_v54  ;;  %v2696_v59 = vmul.f32 %v3150_v54, %v3150_v54  ;;  %v2608_v41 = vsel %vm1267_vm7, %v3150_v54, 0.0 }
 0x2c0   :  { %v2117_v48 = vpop.f32.mrf.mxu1 }
 0x2c1   :  { %2499 = vst.msk [vmem:[%s5260_s2 + $0xb8] sm:$0xf] %vm2452_vm0, %v3039_v23  ;;  %v3037_v61 = vpack.c.bf16 %v2117_v48, %v2117_v48  ;;  %v2604_v52 = vsel %vm1267_vm7, %v2117_v48, 0.0  ;;  %v2694_v14 = vmul.f32 %v2117_v48, %v2117_v48  ;;  %v2805_v8 = vsel %vm1267_vm7, %v2696_v59, 0.0 }
 0x2c2   :  { %v2605_v28 = vadd.f32 %v2604_v52, %v2603_v38  ;;  %v3151_v35 = vpop.f32.mrf.mxu1 }
 0x2c3   :  { %2497 = vst.msk [vmem:[%s5260_s2 + $0xb0] sm:$0xf] %vm2452_vm0, %v3037_v61  ;;  %v2801_v22 = vsel %vm1267_vm7, %v2694_v14, 0.0  ;;  %v3040_v49 = vpack.c.bf16 %v3151_v35, %v3151_v35  ;;  %v2697_v29 = vmul.f32 %v3151_v35, %v3151_v35  ;;  %v2610_v4 = vsel %vm1267_vm7, %v3151_v35, 0.0 }
 0x2c4   :  { %v2802_v50 = vadd.f32 %v2801_v22, %v2800_v3  ;;  %v2120_v34 = vpop.f32.mrf.mxu1 }
 0x2c5   :  { %2500 = vst.msk [vmem:[%s5260_s2 + $0xbc] sm:$0xf] %vm2452_vm0, %v3040_v49  ;;  %v3038_v47 = vpack.c.bf16 %v2120_v34, %v2120_v34  ;;  %v2606_v17 = vsel %vm1267_vm7, %v2120_v34, 0.0  ;;  %v2695_v11 = vmul.f32 %v2120_v34, %v2120_v34  ;;  %v2807_v40 = vsel %vm1267_vm7, %v2697_v29, 0.0 }
 0x2c6   :  { %v2607_v19 = vadd.f32 %v2606_v17, %v2605_v28 }
 0x2c7   :  { %2498 = vst.msk [vmem:[%s5260_s2 + $0xb4] sm:$0xf] %vm2452_vm0, %v3038_v47  ;;  %v2803_v53 = vsel %vm1267_vm7, %v2695_v11, 0.0 }
 0x2c8   :  { %v2609_v37 = vadd.f32 %v2608_v41, %v2607_v19  ;;  %v2804_v39 = vadd.f32 %v2803_v53, %v2802_v50 }
 0x2ca   :  { %v2806_v16 = vadd.f32 %v2805_v8, %v2804_v39  ;;  %v2611_v7 = vadd.f32 %v2610_v4, %v2609_v37 }
 0x2cc   :  { %v2808_v46 = vadd.f32 %v2807_v40, %v2806_v16 }
 0x2da   :  { %v3154_v15 = vpop.f32.mrf.mxu1 }
 0x2db   :  { %v3043_v57 = vpack.c.bf16 %v3154_v15, %v3154_v15  ;;  %v2616_v20 = vsel %vm1267_vm7, %v3154_v15, 0.0  ;;  %v2700_v21 = vmul.f32 %v3154_v15, %v3154_v15 }
 0x2dc   :  { %v2133_v27 = vpop.f32.mrf.mxu1 }
 0x2dd   :  { %2503 = vst.msk [vmem:[%s5260_s2 + $0xc8] sm:$0xf] %vm2452_vm0, %v3043_v57  ;;  %v3041_v9 = vpack.c.bf16 %v2133_v27, %v2133_v27  ;;  %v2612_v62 = vsel %vm1267_vm7, %v2133_v27, 0.0  ;;  %v2698_v12 = vmul.f32 %v2133_v27, %v2133_v27  ;;  %v2813_v33 = vsel %vm1267_vm7, %v2700_v21, 0.0 }
 0x2de   :  { %v3155_v58 = vpop.f32.mrf.mxu1  ;;  %v2613_v51 = vadd.f32 %v2612_v62, %v2611_v7 }
 0x2df   :  { %2501 = vst.msk [vmem:[%s5260_s2 + $0xc0] sm:$0xf] %vm2452_vm0, %v3041_v9  ;;  %v3044_v18 = vpack.c.bf16 %v3155_v58, %v3155_v58  ;;  %v2809_v1 = vsel %vm1267_vm7, %v2698_v12, 0.0  ;;  %v2701_v56 = vmul.f32 %v3155_v58, %v3155_v58  ;;  %v2618_v3 = vsel %vm1267_vm7, %v3155_v58, 0.0 }
 0x2e0   :  { %v2136_v24 = vpop.f32.mrf.mxu1  ;;  %v2810_v5 = vadd.f32 %v2809_v1, %v2808_v46 }
 0x2e1   :  { %2504 = vst.msk [vmem:[%s5260_s2 + $0xcc] sm:$0xf] %vm2452_vm0, %v3044_v18  ;;  %v3042_v60 = vpack.c.bf16 %v2136_v24, %v2136_v24  ;;  %v2614_v55 = vsel %vm1267_vm7, %v2136_v24, 0.0  ;;  %v2699_v26 = vmul.f32 %v2136_v24, %v2136_v24  ;;  %v2815_v14 = vsel %vm1267_vm7, %v2701_v56, 0.0 }
 0x2e2   :  { %v2615_v32 = vadd.f32 %v2614_v55, %v2613_v51 }
 0x2e3   :  { %2502 = vst.msk [vmem:[%s5260_s2 + $0xc4] sm:$0xf] %vm2452_vm0, %v3042_v60  ;;  %v2811_v45 = vsel %vm1267_vm7, %v2699_v26, 0.0 }
 0x2e4   :  { %v2617_v13 = vadd.f32 %v2616_v20, %v2615_v32  ;;  %v2812_v31 = vadd.f32 %v2811_v45, %v2810_v5 }
 0x2e6   :  { %v2814_v38 = vadd.f32 %v2813_v33, %v2812_v31  ;;  %v2619_v61 = vadd.f32 %v2618_v3, %v2617_v13 }
 0x2e8   :  { %v2816_v50 = vadd.f32 %v2815_v14, %v2814_v38 }
 0x2f6   :  { %v3158_v10 = vpop.f32.mrf.mxu1 }
 0x2f7   :  { %v3047_v44 = vpack.c.bf16 %v3158_v10, %v3158_v10  ;;  %v2704_v41 = vmul.f32 %v3158_v10, %v3158_v10  ;;  %v2624_v53 = vsel %vm1267_vm7, %v3158_v10, 0.0 }
 0x2f8   :  { %v2149_v43 = vpop.f32.mrf.mxu1 }
 0x2f9   :  { %2507 = vst.msk [vmem:[%s5260_s2 + $0xd8] sm:$0xf] %vm2452_vm0, %v3047_v44  ;;  %v3045_v63 = vpack.c.bf16 %v2149_v43, %v2149_v43  ;;  %v2702_v0 = vmul.f32 %v2149_v43, %v2149_v43  ;;  %v2620_v54 = vsel %vm1267_vm7, %v2149_v43, 0.0  ;;  %v2821_v39 = vsel %vm1267_vm7, %v2704_v41, 0.0 }
 0x2fa   :  { %v3159_v36 = vpop.f32.mrf.mxu1  ;;  %v2621_v49 = vadd.f32 %v2620_v54, %v2619_v61 }
 0x2fb   :  { %2505 = vst.msk [vmem:[%s5260_s2 + $0xd0] sm:$0xf] %vm2452_vm0, %v3045_v63  ;;  %v3048_v6 = vpack.c.bf16 %v3159_v36, %v3159_v36  ;;  %v2817_v28 = vsel %vm1267_vm7, %v2702_v0, 0.0  ;;  %v2705_v8 = vmul.f32 %v3159_v36, %v3159_v36  ;;  %v2626_v7 = vsel %vm1267_vm7, %v3159_v36, 0.0 }
 0x2fc   :  { %v2152_v2 = vpop.f32.mrf.mxu1  ;;  %v2818_v17 = vadd.f32 %v2817_v28, %v2816_v50 }
 0x2fd   :  { %2508 = vst.msk [vmem:[%s5260_s2 + $0xdc] sm:$0xf] %vm2452_vm0, %v3048_v6  ;;  %v3046_v30 = vpack.c.bf16 %v2152_v2, %v2152_v2  ;;  %v2703_v23 = vmul.f32 %v2152_v2, %v2152_v2  ;;  %v2622_v35 = vsel %vm1267_vm7, %v2152_v2, 0.0  ;;  %v2823_v57 = vsel %vm1267_vm7, %v2705_v8, 0.0 }
 0x2fe   :  { %v2623_v11 = vadd.f32 %v2622_v35, %v2621_v49 }
 0x2ff   :  { %2506 = vst.msk [vmem:[%s5260_s2 + $0xd4] sm:$0xf] %vm2452_vm0, %v3046_v30  ;;  %v2819_v59 = vsel %vm1267_vm7, %v2703_v23, 0.0 }
 0x300   :  { %v2820_v29 = vadd.f32 %v2819_v59, %v2818_v17  ;;  %v2625_v37 = vadd.f32 %v2624_v53, %v2623_v11 }
 0x302   :  { %v2822_v16 = vadd.f32 %v2821_v39, %v2820_v29  ;;  %v2627_v15 = vadd.f32 %v2626_v7, %v2625_v37 }
 0x304   :  { %v2824_v58 = vadd.f32 %v2823_v57, %v2822_v16 }
 0x312   :  { %v3162_v42 = vpop.f32.mrf.mxu1 }
 0x313   :  { %v3051_v25 = vpack.c.bf16 %v3162_v42, %v3162_v42  ;;  %v2708_v60 = vmul.f32 %v3162_v42, %v3162_v42  ;;  %v2632_v32 = vsel %vm1267_vm7, %v3162_v42, 0.0 }
 0x314   :  { %v2165_v48 = vpop.f32.mrf.mxu1 }
 0x315   :  { %2511 = vst.msk [vmem:[%s5260_s2 + $0xe8] sm:$0xf] %vm2452_vm0, %v3051_v25  ;;  %v3049_v52 = vpack.c.bf16 %v2165_v48, %v2165_v48  ;;  %v2706_v4 = vmul.f32 %v2165_v48, %v2165_v48  ;;  %v2628_v40 = vsel %vm1267_vm7, %v2165_v48, 0.0  ;;  %v2829_v10 = vsel %vm1267_vm7, %v2708_v60, 0.0 }
 0x316   :  { %v3163_v22 = vpop.f32.mrf.mxu1  ;;  %v2629_v62 = vadd.f32 %v2628_v40, %v2627_v15 }
 0x317   :  { %2509 = vst.msk [vmem:[%s5260_s2 + $0xe0] sm:$0xf] %vm2452_vm0, %v3049_v52  ;;  %v3052_v34 = vpack.c.bf16 %v3163_v22, %v3163_v22  ;;  %v2825_v27 = vsel %vm1267_vm7, %v2706_v4, 0.0  ;;  %v2709_v44 = vmul.f32 %v3163_v22, %v3163_v22  ;;  %v2634_v6 = vsel %vm1267_vm7, %v3163_v22, 0.0 }
 0x318   :  { %v2168_v47 = vpop.f32.mrf.mxu1  ;;  %v2826_v51 = vadd.f32 %v2825_v27, %v2824_v58 }
 0x319   :  { %2512 = vst.msk [vmem:[%s5260_s2 + $0xec] sm:$0xf] %vm2452_vm0, %v3052_v34  ;;  %v3050_v19 = vpack.c.bf16 %v2168_v47, %v2168_v47  ;;  %v2707_v46 = vmul.f32 %v2168_v47, %v2168_v47  ;;  %v2630_v9 = vsel %vm1267_vm7, %v2168_v47, 0.0  ;;  %v2831_v45 = vsel %vm1267_vm7, %v2709_v44, 0.0 }
 0x31a   :  { %v2631_v24 = vadd.f32 %v2630_v9, %v2629_v62 }
 0x31b   :  { %2510 = vst.msk [vmem:[%s5260_s2 + $0xe4] sm:$0xf] %vm2452_vm0, %v3050_v19  ;;  %v2827_v18 = vsel %vm1267_vm7, %v2707_v46, 0.0 }
 0x31c   :  { %v2828_v55 = vadd.f32 %v2827_v18, %v2826_v51  ;;  %v2633_v20 = vadd.f32 %v2632_v32, %v2631_v24 }
 0x31e   :  { %v2830_v63 = vadd.f32 %v2829_v10, %v2828_v55  ;;  %v2635_v26 = vadd.f32 %v2634_v6, %v2633_v20 }
 0x320   :  { %v2832_v33 = vadd.f32 %v2831_v45, %v2830_v63 }
 0x32a   :  { %v3166_v13 = vpop.f32.mrf.mxu1 }
 0x32b   :  { %v3055_v43 = vpack.c.bf16 %v3166_v13, %v3166_v13  ;;  %v2712_v0 = vmul.f32 %v3166_v13, %v3166_v13  ;;  %v2640_v23 = vsel %vm1267_vm7, %v3166_v13, 0.0 }
 0x32c   :  { %v2181_v36 = vpop.f32.mrf.mxu1 }
 0x32d   :  { %2515 = vst.msk [vmem:[%s5260_s2 + $0xf8] sm:$0xf] %vm2452_vm0, %v3055_v43  ;;  %v3053_v2 = vpack.c.bf16 %v2181_v36, %v2181_v36  ;;  %v2636_v30 = vsel %vm1267_vm7, %v2181_v36, 0.0  ;;  %v2710_v12 = vmul.f32 %v2181_v36, %v2181_v36  ;;  %v2837_v28 = vsel %vm1267_vm7, %v2712_v0, 0.0 }
 0x32e   :  { %v3167_v1 = vpop.f32.mrf.mxu1  ;;  %v2637_v31 = vadd.f32 %v2636_v30, %v2635_v26 }
 0x32f   :  { %2513 = vst.msk [vmem:[%s5260_s2 + $0xf0] sm:$0xf] %vm2452_vm0, %v3053_v2  ;;  %v2833_v5 = vsel %vm1267_vm7, %v2710_v12, 0.0  ;;  %v3056_v21 = vpack.c.bf16 %v3167_v1, %v3167_v1  ;;  %v2713_v48 = vmul.f32 %v3167_v1, %v3167_v1  ;;  %v2642_v35 = vsel %vm1267_vm7, %v3167_v1, 0.0 }
 0x330   :  { %v2184_v56 = vpop.f32.mrf.mxu1  ;;  %v2834_v3 = vadd.f32 %v2833_v5, %v2832_v33 }
 0x331   :  { %2516 = vst.msk [vmem:[%s5260_s2 + $0xfc] sm:$0xf] %vm2452_vm0, %v3056_v21  ;;  %v3054_v42 = vpack.c.bf16 %v2184_v56, %v2184_v56  ;;  %v2638_v38 = vsel %vm1267_vm7, %v2184_v56, 0.0  ;;  %v2711_v25 = vmul.f32 %v2184_v56, %v2184_v56  ;;  %v2839_v50 = vsel %vm1267_vm7, %v2713_v48, 0.0 }
 0x332   :  { %v2639_v54 = vadd.f32 %v2638_v38, %v2637_v31 }
 0x333   :  { %2514 = vst.msk [vmem:[%s5260_s2 + $0xf4] sm:$0xf] %vm2452_vm0, %v3054_v42  ;;  %v2835_v61 = vsel %vm1267_vm7, %v2711_v25, 0.0 }
 0x334   :  { %v2641_v52 = vadd.f32 %v2640_v23, %v2639_v54  ;;  %v2836_v14 = vadd.f32 %v2835_v61, %v2834_v3 }
 0x336   :  { %v2643_v22 = vadd.f32 %v2642_v35, %v2641_v52  ;;  %v2838_v49 = vadd.f32 %v2837_v28, %v2836_v14 }
 0x338   :  { %v2644_v34 = vrot.slane %v2643_v22, 4  ;;  %v2840_v59 = vadd.f32 %v2839_v50, %v2838_v49 }
 0x33a   :  { %v2645_v47 = vadd.f32 %v2644_v34, %v2643_v22  ;;  %v2841_v17 = vrot.slane %v2840_v59, 4 }
 0x33c   :  { %v2646_v11 = vrot.slane %v2645_v47, 2  ;;  %v2842_v19 = vadd.f32 %v2841_v17, %v2840_v59 }
 0x33e   :  { %v2647_v41 = vadd.f32 %v2646_v11, %v2645_v47  ;;  %v2843_v29 = vrot.slane %v2842_v19, 2 }
 0x340   :  { %v2648_v53 = vrot.slane %v2647_v41, 1  ;;  %v2844_v37 = vadd.f32 %v2843_v29, %v2842_v19 }
 0x342   :  { %v2845_v39 = vrot.slane %v2844_v37, 1  ;;  %v2649_v8 = vadd.f32 %v2648_v53, %v2647_v41 }
 0x344   :  { %v2846_v4 = vadd.f32 %v2845_v39, %v2844_v37 }
 0x346   :  { %v2848_v16 = vsel %vm485_vm3, %v2649_v8, %v2846_v4 }
 0x347   :  { %2850 = vst.msk [vmem:[%s5261_s3] sm:$0x3] %vm2849_vm1, %v2848_v16 }

// kernel: basic_block_forward.4
= control target key start
LH: loop header
LB: loop body
LE: loop exit
PB: predicated region body
PF: predicated region fallthrough
CT: control target
= control target key end

     0   :  { %v5594_v0 = vmov 0   ;;  %s3491_s18 = smov 8   ;;  %vm770_vm0 = vcmask 1047552   ;;  %vm771_vm1 = vsmask.f32 7424  ;;  %vm643_vm3 = vcmask 1040384   ;;  %s5588_s0 = inlined_call_operand.vmem [shape: bf16[2,16,16,8], index: 0, kind: input, shape index: {}]   ;;  %s5589_s1 = inlined_call_operand.vmem [shape: f32[1,8], index: 1, kind: input, shape index: {}]   ;;  %s5590_s2 = inlined_call_operand.vmem [shape: f32[1,8], index: 2, kind: input, shape index: {}]   ;;  %s5591_s3 = inlined_call_operand.vmem [shape: bf16[72,8], index: 3, kind: input, shape index: {}]   ;;  %s5592_s4 = inlined_call_operand.vmem [shape: bf16[2,16,16,8], index: 4, kind: output, shape index: {0}]   ;;  %s5593_s5 = inlined_call_operand.vmem [shape: f32[1,2,8], index: 5, kind: output, shape index: {1}]  }
   0x1   :  { %861 = vrot.lane.b32.xlu0 %v5594_v0, %s3491_s18  ;;  %v3534_v1 = vld [vmem:[%s5589_s1] ss:$0 sm:$0xff]  ;;  %v3318_v2 = vld [vmem:[%s5588_s0 + $0x8] sm:$0xff]   ;;  %v3319_v6 = vld [vmem:[%s5588_s0 + $0x10] sm:$0xff]   ;;  %vm644_vm4 = vsmask.f32 256 }
   0x2   :  { %v3196_v3 = vunpack.c.l.bf16 %v3318_v2  ;;  %v3197_v4 = vunpack.c.h.bf16 %v3318_v2  ;;  %v3191_v5 = vld [vmem:[%s5588_s0] sm:$0xff]   ;;  %v3320_v7 = vld [vmem:[%s5588_s0 + $0x18] sm:$0xff]   ;;  %v3200_v11 = vunpack.c.l.bf16 %v3319_v6  ;;  %v3201_v12 = vunpack.c.h.bf16 %v3319_v6  ;;  %v3322_v34 = vld [vmem:[%s5588_s0 + $0x28] sm:$0xff]   ;;  %s3493_s10 = smov 24   ;;  %s3494_s11 = smov 32  }
   0x3   :  { %v3551_v8 = vld [vmem:[%s5590_s2] ss:$0 sm:$0xff]  ;;  %v3192_v9 = vunpack.c.l.bf16 %v3191_v5  ;;  %v3193_v10 = vunpack.c.h.bf16 %v3191_v5  ;;  %v3204_v15 = vunpack.c.l.bf16 %v3320_v7  ;;  %v3205_v16 = vunpack.c.h.bf16 %v3320_v7  ;;  %v3323_v39 = vld [vmem:[%s5588_s0 + $0x30] sm:$0xff]   ;;  %v3324_v44 = vld [vmem:[%s5588_s0 + $0x38] sm:$0xff]   ;;  %s3495_s14 = smov 40   ;;  %s3496_s17 = smov 48  }
   0x4   :  { %v158_v13 = vmul.f32 %v3196_v3, %v3534_v1  ;;  %v159_v14 = vmul.f32 %v3197_v4, %v3534_v1  ;;  %v160_v19 = vmul.f32 %v3200_v11, %v3534_v1  ;;  %v161_v20 = vmul.f32 %v3201_v12, %v3534_v1  ;;  %v3321_v29 = vld [vmem:[%s5588_s0 + $0x20] sm:$0xff]   ;;  %vm3872_vm2 = vmand %vm770_vm0, %vm771_vm1  ;;  %s3497_s21 = smov 56   ;;  %s3498_s24 = smov 64  }
   0x5   :  { %v156_v17 = vmul.f32 %v3192_v9, %v3534_v1  ;;  %v157_v18 = vmul.f32 %v3193_v10, %v3534_v1  ;;  %v162_v23 = vmul.f32 %v3204_v15, %v3534_v1  ;;  %v163_v24 = vmul.f32 %v3205_v16, %v3534_v1  ;;  %v3325_v3 = vld [vmem:[%s5588_s0 + $0x40] sm:$0xff]   ;;  %vm4071_vm5 = vmand %vm643_vm3, %vm644_vm4 }
   0x6   :  { %v228_v21 = vadd.f32 %v3551_v8, %v158_v13  ;;  %v229_v22 = vadd.f32 %v3551_v8, %v159_v14  ;;  %v230_v27 = vadd.f32 %v3551_v8, %v160_v19  ;;  %v231_v28 = vadd.f32 %v3551_v8, %v161_v20  ;;  %v3326_v13 = vld [vmem:[%s5588_s0 + $0x48] sm:$0xff]  }
   0x7   :  { %v226_v25 = vadd.f32 %v3551_v8, %v156_v17  ;;  %v227_v26 = vadd.f32 %v3551_v8, %v157_v18  ;;  %v232_v32 = vadd.f32 %v3551_v8, %v162_v23  ;;  %v233_v33 = vadd.f32 %v3551_v8, %v163_v24  ;;  %v3327_v18 = vld [vmem:[%s5588_s0 + $0x50] sm:$0xff]  }
   0x8   :  { %v292_v30 = vmax.f32 %v228_v21, 0.0  ;;  %v293_v31 = vmax.f32 %v229_v22, 0.0  ;;  %v294_v37 = vmax.f32 %v230_v27, 0.0  ;;  %v295_v38 = vmax.f32 %v231_v28, 0.0  ;;  %v3328_v27 = vld [vmem:[%s5588_s0 + $0x58] sm:$0xff]  }
   0x9   :  { %v290_v35 = vmax.f32 %v226_v25, 0.0  ;;  %v291_v36 = vmax.f32 %v227_v26, 0.0  ;;  %v296_v41 = vmax.f32 %v232_v32, 0.0  ;;  %v297_v42 = vmax.f32 %v233_v33, 0.0 }
   0xa   :  { %v3578_v40 = vpack.c.bf16 %v293_v31, %v292_v30  ;;  %v3208_v43 = vunpack.c.l.bf16 %v3321_v29  ;;  %v3585_v46 = vpack.c.bf16 %v295_v38, %v294_v37  ;;  %v3209_v47 = vunpack.c.h.bf16 %v3321_v29 }
   0xb   :  { %v3583_v45 = vpack.c.bf16 %v291_v36, %v290_v35  ;;  %v3212_v48 = vunpack.c.l.bf16 %v3322_v34  ;;  %v3589_v49 = vpack.c.bf16 %v297_v42, %v296_v41  ;;  %v3213_v51 = vunpack.c.h.bf16 %v3322_v34  ;;  %v3329_v41 = vld [vmem:[%s5588_s0 + $0x60] sm:$0xff]  }
   0xc   :  { %865 = vrot.lane.b32.xlu1 %v3578_v40, %s3491_s18  ;;  %v164_v50 = vmul.f32 %v3208_v43, %v3534_v1  ;;  %v3216_v52 = vunpack.c.l.bf16 %v3323_v39  ;;  %v165_v53 = vmul.f32 %v3209_v47, %v3534_v1  ;;  %v3217_v55 = vunpack.c.h.bf16 %v3323_v39 }
   0xd   :  { %863 = vrot.lane.b32.xlu0 %v3583_v45, %s3491_s18  ;;  %v166_v54 = vmul.f32 %v3212_v48, %v3534_v1  ;;  %v3220_v56 = vunpack.c.l.bf16 %v3324_v44  ;;  %v167_v58 = vmul.f32 %v3213_v51, %v3534_v1  ;;  %v3221_v60 = vunpack.c.h.bf16 %v3324_v44 }
   0xe   :  { %v234_v57 = vadd.f32 %v3551_v8, %v164_v50  ;;  %v168_v59 = vmul.f32 %v3216_v52, %v3534_v1  ;;  %v235_v61 = vadd.f32 %v3551_v8, %v165_v53  ;;  %v169_v63 = vmul.f32 %v3217_v55, %v3534_v1 }
   0xf   :  { %v236_v62 = vadd.f32 %v3551_v8, %v166_v54  ;;  %v170_v2 = vmul.f32 %v3220_v56, %v3534_v1  ;;  %v237_v5 = vadd.f32 %v3551_v8, %v167_v58  ;;  %v171_v7 = vmul.f32 %v3221_v60, %v3534_v1 }
  0x10   :  { %867 = vrot.lane.b32.xlu1 %v3585_v46, %s3491_s18  ;;  %v298_v4 = vmax.f32 %v234_v57, 0.0  ;;  %v238_v6 = vadd.f32 %v3551_v8, %v168_v59  ;;  %v299_v9 = vmax.f32 %v235_v61, 0.0  ;;  %v239_v11 = vadd.f32 %v3551_v8, %v169_v63  ;;  %v3330_v57 = vld [vmem:[%s5588_s0 + $0x68] sm:$0xff]  }
  0x11   :  { %869 = vrot.lane.b32.xlu0 %v3589_v49, %s3491_s18  ;;  %v300_v10 = vmax.f32 %v236_v62, 0.0  ;;  %v240_v12 = vadd.f32 %v3551_v8, %v170_v2  ;;  %v301_v14 = vmax.f32 %v237_v5, 0.0  ;;  %v241_v16 = vadd.f32 %v3551_v8, %v171_v7 }
  0x12   :  { %v302_v15 = vmax.f32 %v238_v6, 0.0  ;;  %v3224_v17 = vunpack.c.l.bf16 %v3325_v3  ;;  %v3622_v19 = vpack.c.bf16 %v299_v9, %v298_v4  ;;  %v303_v20 = vmax.f32 %v239_v11, 0.0  ;;  %v3331_v4 = vld [vmem:[%s5588_s0 + $0x70] sm:$0xff]  }
  0x13   :  { %v304_v21 = vmax.f32 %v240_v12, 0.0  ;;  %v3225_v22 = vunpack.c.h.bf16 %v3325_v3  ;;  %v3624_v23 = vpack.c.bf16 %v301_v14, %v300_v10  ;;  %v305_v24 = vmax.f32 %v241_v16, 0.0  ;;  %v3333_v10 = vld [vmem:[%s5588_s0 + $0x80] sm:$0xff]  }
  0x14   :  { %v172_v25 = vmul.f32 %v3224_v17, %v3534_v1  ;;  %v3228_v26 = vunpack.c.l.bf16 %v3326_v13  ;;  %871 = vrot.lane.b32.xlu1 %v3622_v19, %s3491_s18  ;;  %v3632_v28 = vpack.c.bf16 %v303_v20, %v302_v15  ;;  %v3229_v30 = vunpack.c.h.bf16 %v3326_v13  ;;  %v3334_v20 = vld [vmem:[%s5588_s0 + $0x88] sm:$0xff]  }
  0x15   :  { %v173_v29 = vmul.f32 %v3225_v22, %v3534_v1  ;;  %v3232_v31 = vunpack.c.l.bf16 %v3327_v18  ;;  %873 = vrot.lane.b32.xlu0 %v3624_v23, %s3491_s18  ;;  %v3637_v32 = vpack.c.bf16 %v305_v24, %v304_v21  ;;  %v3233_v35 = vunpack.c.h.bf16 %v3327_v18 }
  0x16   :  { %v242_v33 = vadd.f32 %v3551_v8, %v172_v25  ;;  %v174_v34 = vmul.f32 %v3228_v26, %v3534_v1  ;;  %v175_v37 = vmul.f32 %v3229_v30, %v3534_v1  ;;  %v3236_v39 = vunpack.c.l.bf16 %v3328_v27 }
  0x17   :  { %v243_v36 = vadd.f32 %v3551_v8, %v173_v29  ;;  %v176_v38 = vmul.f32 %v3232_v31, %v3534_v1  ;;  %v177_v44 = vmul.f32 %v3233_v35, %v3534_v1  ;;  %v3237_v47 = vunpack.c.h.bf16 %v3328_v27 }
  0x18   :  { %v306_v42 = vmax.f32 %v242_v33, 0.0  ;;  %v244_v43 = vadd.f32 %v3551_v8, %v174_v34  ;;  %875 = vrot.lane.b32.xlu1 %v3632_v28, %s3491_s18  ;;  %v245_v50 = vadd.f32 %v3551_v8, %v175_v37  ;;  %v178_v52 = vmul.f32 %v3236_v39, %v3534_v1 }
  0x19   :  { %v307_v48 = vmax.f32 %v243_v36, 0.0  ;;  %v246_v51 = vadd.f32 %v3551_v8, %v176_v38  ;;  %877 = vrot.lane.b32.xlu0 %v3637_v32, %s3491_s18  ;;  %v247_v54 = vadd.f32 %v3551_v8, %v177_v44  ;;  %v179_v55 = vmul.f32 %v3237_v47, %v3534_v1 }
  0x1a   :  { %v308_v53 = vmax.f32 %v244_v43, 0.0  ;;  %v3240_v56 = vunpack.c.l.bf16 %v3329_v41  ;;  %v309_v59 = vmax.f32 %v245_v50, 0.0  ;;  %v248_v61 = vadd.f32 %v3551_v8, %v178_v52 }
  0x1b   :  { %v3661_v58 = vpack.c.bf16 %v307_v48, %v306_v42  ;;  %v310_v60 = vmax.f32 %v246_v51, 0.0  ;;  %v311_v62 = vmax.f32 %v247_v54, 0.0  ;;  %v249_v63 = vadd.f32 %v3551_v8, %v179_v55  ;;  %v3336_v48 = vld [vmem:[%s5588_s0 + $0x98] sm:$0xff]  }
  0x1c   :  { %v3241_v2 = vunpack.c.h.bf16 %v3329_v41  ;;  %v180_v3 = vmul.f32 %v3240_v56, %v3534_v1  ;;  %v3671_v5 = vpack.c.bf16 %v309_v59, %v308_v53  ;;  %v312_v6 = vmax.f32 %v248_v61, 0.0  ;;  %v3335_v41 = vld [vmem:[%s5588_s0 + $0x90] sm:$0xff]   ;;  %v3337_v59 = vld [vmem:[%s5588_s0 + $0xa0] sm:$0xff]  }
  0x1d   :  { %879 = vrot.lane.b32.xlu1 %v3661_v58, %s3491_s18  ;;  %v3244_v7 = vunpack.c.l.bf16 %v3330_v57  ;;  %v3245_v9 = vunpack.c.h.bf16 %v3330_v57  ;;  %v3676_v11 = vpack.c.bf16 %v311_v62, %v310_v60  ;;  %v313_v12 = vmax.f32 %v249_v63, 0.0 }
  0x1e   :  { %v181_v13 = vmul.f32 %v3241_v2, %v3534_v1  ;;  %v250_v14 = vadd.f32 %v3551_v8, %v180_v3  ;;  %881 = vrot.lane.b32.xlu0 %v3671_v5, %s3491_s18  ;;  %v3248_v17 = vunpack.c.l.bf16 %v3331_v4  ;;  %v3249_v18 = vunpack.c.h.bf16 %v3331_v4 }
  0x1f   :  { %v182_v15 = vmul.f32 %v3244_v7, %v3534_v1  ;;  %v183_v16 = vmul.f32 %v3245_v9, %v3534_v1  ;;  %v3687_v21 = vpack.c.bf16 %v313_v12, %v312_v6  ;;  %v3256_v25 = vunpack.c.l.bf16 %v3333_v10 }
  0x20   :  { %v251_v22 = vadd.f32 %v3551_v8, %v181_v13  ;;  %v314_v24 = vmax.f32 %v250_v14, 0.0  ;;  %v184_v29 = vmul.f32 %v3248_v17, %v3534_v1  ;;  %v185_v30 = vmul.f32 %v3249_v18, %v3534_v1  ;;  %v3338_v13 = vld [vmem:[%s5588_s0 + $0xa8] sm:$0xff]  }
  0x21   :  { %883 = vrot.lane.b32.xlu1 %v3676_v11, %s3491_s18  ;;  %v252_v26 = vadd.f32 %v3551_v8, %v182_v15  ;;  %v253_v27 = vadd.f32 %v3551_v8, %v183_v16  ;;  %v3257_v33 = vunpack.c.h.bf16 %v3333_v10  ;;  %v188_v34 = vmul.f32 %v3256_v25, %v3534_v1  ;;  %v3339_v25 = vld [vmem:[%s5588_s0 + $0xb0] sm:$0xff]  }
  0x22   :  { %v315_v31 = vmax.f32 %v251_v22, 0.0  ;;  %v3260_v35 = vunpack.c.l.bf16 %v3334_v20  ;;  %885 = vrot.lane.b32.xlu0 %v3687_v21, %s3491_s18  ;;  %v254_v38 = vadd.f32 %v3551_v8, %v184_v29  ;;  %v255_v39 = vadd.f32 %v3551_v8, %v185_v30 }
  0x23   :  { %v316_v36 = vmax.f32 %v252_v26, 0.0  ;;  %v317_v37 = vmax.f32 %v253_v27, 0.0  ;;  %v189_v43 = vmul.f32 %v3257_v33, %v3534_v1  ;;  %v258_v44 = vadd.f32 %v3551_v8, %v188_v34 }
  0x24   :  { %v3704_v42 = vpack.c.bf16 %v315_v31, %v314_v24  ;;  %v3261_v47 = vunpack.c.h.bf16 %v3334_v20  ;;  %v318_v51 = vmax.f32 %v254_v38, 0.0  ;;  %v319_v52 = vmax.f32 %v255_v39, 0.0 }
  0x25   :  { %v3711_v50 = vpack.c.bf16 %v317_v37, %v316_v36  ;;  %v190_v53 = vmul.f32 %v3260_v35, %v3534_v1  ;;  %v259_v54 = vadd.f32 %v3551_v8, %v189_v43  ;;  %v322_v55 = vmax.f32 %v258_v44, 0.0 }
  0x26   :  { %887 = vrot.lane.b32.xlu1 %v3704_v42, %s3491_s18  ;;  %v191_v56 = vmul.f32 %v3261_v47, %v3534_v1  ;;  %v3264_v57 = vunpack.c.l.bf16 %v3335_v41  ;;  %v3723_v60 = vpack.c.bf16 %v319_v52, %v318_v51  ;;  %v3265_v62 = vunpack.c.h.bf16 %v3335_v41  ;;  %v3340_v41 = vld [vmem:[%s5588_s0 + $0xb8] sm:$0xff]   ;;  %v3341_v51 = vld [vmem:[%s5588_s0 + $0xc0] sm:$0xff]  }
  0x27   :  { %889 = vrot.lane.b32.xlu0 %v3711_v50, %s3491_s18  ;;  %v260_v61 = vadd.f32 %v3551_v8, %v190_v53  ;;  %v3268_v63 = vunpack.c.l.bf16 %v3336_v48  ;;  %v323_v2 = vmax.f32 %v259_v54, 0.0  ;;  %v3269_v6 = vunpack.c.h.bf16 %v3336_v48 }
  0x28   :  { %v261_v3 = vadd.f32 %v3551_v8, %v191_v56  ;;  %v192_v4 = vmul.f32 %v3264_v57, %v3534_v1  ;;  %v193_v9 = vmul.f32 %v3265_v62, %v3534_v1  ;;  %v3272_v12 = vunpack.c.l.bf16 %v3337_v59 }
  0x29   :  { %v324_v7 = vmax.f32 %v260_v61, 0.0  ;;  %v194_v10 = vmul.f32 %v3268_v63, %v3534_v1  ;;  %v3735_v14 = vpack.c.bf16 %v323_v2, %v322_v55  ;;  %v195_v17 = vmul.f32 %v3269_v6, %v3534_v1 }
  0x2a   :  { %891 = vrot.lane.b32.xlu1 %v3723_v60, %s3491_s18  ;;  %v325_v15 = vmax.f32 %v261_v3, 0.0  ;;  %v262_v16 = vadd.f32 %v3551_v8, %v192_v4  ;;  %v263_v18 = vadd.f32 %v3551_v8, %v193_v9  ;;  %v3273_v22 = vunpack.c.h.bf16 %v3337_v59  ;;  %v3342_v4 = vld [vmem:[%s5588_s0 + $0xc8] sm:$0xff]  }
  0x2b   :  { %v264_v20 = vadd.f32 %v3551_v8, %v194_v10  ;;  %v196_v24 = vmul.f32 %v3272_v12, %v3534_v1  ;;  %893 = vrot.lane.b32.xlu0 %v3735_v14, %s3491_s18  ;;  %v265_v29 = vadd.f32 %v3551_v8, %v195_v17  ;;  %v3276_v30 = vunpack.c.l.bf16 %v3338_v13 }
  0x2c   :  { %v3747_v26 = vpack.c.bf16 %v325_v15, %v324_v7  ;;  %v326_v27 = vmax.f32 %v262_v16, 0.0  ;;  %v327_v31 = vmax.f32 %v263_v18, 0.0  ;;  %v197_v34 = vmul.f32 %v3273_v22, %v3534_v1 }
  0x2d   :  { %v328_v33 = vmax.f32 %v264_v20, 0.0  ;;  %v266_v35 = vadd.f32 %v3551_v8, %v196_v24  ;;  %v329_v36 = vmax.f32 %v265_v29, 0.0  ;;  %v3277_v37 = vunpack.c.h.bf16 %v3338_v13  ;;  %v3343_v24 = vld [vmem:[%s5588_s0 + $0xd0] sm:$0xff]  }
  0x2e   :  { %895 = vrot.lane.b32.xlu1 %v3747_v26, %s3491_s18  ;;  %v198_v38 = vmul.f32 %v3276_v30, %v3534_v1  ;;  %v3280_v39 = vunpack.c.l.bf16 %v3339_v25  ;;  %v3758_v43 = vpack.c.bf16 %v327_v31, %v326_v27  ;;  %v267_v44 = vadd.f32 %v3551_v8, %v197_v34  ;;  %v3344_v31 = vld [vmem:[%s5588_s0 + $0xd8] sm:$0xff]  }
  0x2f   :  { %v330_v47 = vmax.f32 %v266_v35, 0.0  ;;  %v3281_v48 = vunpack.c.h.bf16 %v3339_v25  ;;  %v3764_v52 = vpack.c.bf16 %v329_v36, %v328_v33  ;;  %v199_v53 = vmul.f32 %v3277_v37, %v3534_v1 }
  0x30   :  { %5639 = vst [vmem:[#allocation2_spill] sm:$0xff] %v3758_v43  ;;  %v268_v54 = vadd.f32 %v3551_v8, %v198_v38  ;;  %v200_v55 = vmul.f32 %v3280_v39, %v3534_v1  ;;  %897 = vrot.lane.b32.xlu0 %v3758_v43, %s3491_s18  ;;  %v331_v56 = vmax.f32 %v267_v44, 0.0  ;;  %v3284_v59 = vunpack.c.l.bf16 %v3340_v41  ;;  %v3345_v44 = vld [vmem:[%s5588_s0 + $0xe0] sm:$0xff]  }
  0x31   :  { %5640 = vst [vmem:[#allocation3_spill] sm:$0xff] %v3764_v52  ;;  %v201_v57 = vmul.f32 %v3281_v48, %v3534_v1  ;;  %v3285_v61 = vunpack.c.h.bf16 %v3340_v41  ;;  %v269_v62 = vadd.f32 %v3551_v8, %v199_v53  ;;  %v3288_v3 = vunpack.c.l.bf16 %v3341_v51 }
  0x32   :  { %899 = vrot.lane.b32.xlu1 %v3764_v52, %s3491_s18  ;;  %v332_v63 = vmax.f32 %v268_v54, 0.0  ;;  %v270_v2 = vadd.f32 %v3551_v8, %v200_v55  ;;  %v3779_v6 = vpack.c.bf16 %v331_v56, %v330_v47  ;;  %v202_v9 = vmul.f32 %v3284_v59, %v3534_v1 }
  0x33   :  { %v271_v7 = vadd.f32 %v3551_v8, %v201_v57  ;;  %v203_v10 = vmul.f32 %v3285_v61, %v3534_v1  ;;  %v333_v12 = vmax.f32 %v269_v62, 0.0  ;;  %v3289_v15 = vunpack.c.h.bf16 %v3341_v51 }
  0x34   :  { %5641 = vst [vmem:[#allocation4_spill] sm:$0xff] %v3779_v6  ;;  %v334_v13 = vmax.f32 %v270_v2, 0.0  ;;  %v204_v16 = vmul.f32 %v3288_v3, %v3534_v1  ;;  %901 = vrot.lane.b32.xlu0 %v3779_v6, %s3491_s18  ;;  %v272_v18 = vadd.f32 %v3551_v8, %v202_v9  ;;  %v3292_v22 = vunpack.c.l.bf16 %v3342_v4  ;;  %v3346_v2 = vld [vmem:[%s5588_s0 + $0xe8] sm:$0xff]  }
  0x35   :  { %v335_v17 = vmax.f32 %v271_v7, 0.0  ;;  %v273_v20 = vadd.f32 %v3551_v8, %v203_v10  ;;  %v3792_v25 = vpack.c.bf16 %v333_v12, %v332_v63  ;;  %v205_v27 = vmul.f32 %v3289_v15, %v3534_v1 }
  0x36   :  { %v274_v29 = vadd.f32 %v3551_v8, %v204_v16  ;;  %v3293_v30 = vunpack.c.h.bf16 %v3342_v4  ;;  %v336_v34 = vmax.f32 %v272_v18, 0.0  ;;  %v206_v36 = vmul.f32 %v3292_v22, %v3534_v1  ;;  %v3347_v16 = vld [vmem:[%s5588_s0 + $0xf0] sm:$0xff]  }
  0x37   :  { %5642 = vst [vmem:[#allocation5_spill] sm:$0xff] %v3792_v25  ;;  %v3799_v33 = vpack.c.bf16 %v335_v17, %v334_v13  ;;  %v337_v35 = vmax.f32 %v273_v20, 0.0  ;;  %903 = vrot.lane.b32.xlu1 %v3792_v25, %s3491_s18  ;;  %v275_v37 = vadd.f32 %v3551_v8, %v205_v27  ;;  %v3296_v41 = vunpack.c.l.bf16 %v3343_v24 }
  0x38   :  { %v338_v38 = vmax.f32 %v274_v29, 0.0  ;;  %v207_v39 = vmul.f32 %v3293_v30, %v3534_v1  ;;  %v276_v48 = vadd.f32 %v3551_v8, %v206_v36  ;;  %v3297_v51 = vunpack.c.h.bf16 %v3343_v24 }
  0x39   :  { %5643 = vst [vmem:[#allocation6_spill] sm:$0xff] %v3799_v33  ;;  %905 = vrot.lane.b32.xlu0 %v3799_v33, %s3491_s18  ;;  %v3811_v47 = vpack.c.bf16 %v337_v35, %v336_v34  ;;  %v3300_v53 = vunpack.c.l.bf16 %v3344_v31  ;;  %v339_v54 = vmax.f32 %v275_v37, 0.0  ;;  %v208_v56 = vmul.f32 %v3296_v41, %v3534_v1 }
  0x3a   :  { %v277_v55 = vadd.f32 %v3551_v8, %v207_v39  ;;  %v3301_v57 = vunpack.c.h.bf16 %v3344_v31  ;;  %v340_v59 = vmax.f32 %v276_v48, 0.0  ;;  %v209_v61 = vmul.f32 %v3297_v51, %v3534_v1 }
  0x3b   :  { %5644 = vst [vmem:[#allocation7_spill] sm:$0xff] %v3811_v47  ;;  %v210_v62 = vmul.f32 %v3300_v53, %v3534_v1  ;;  %v3304_v63 = vunpack.c.l.bf16 %v3345_v44  ;;  %907 = vrot.lane.b32.xlu1 %v3811_v47, %s3491_s18  ;;  %v3823_v3 = vpack.c.bf16 %v339_v54, %v338_v38  ;;  %v278_v7 = vadd.f32 %v3551_v8, %v208_v56 }
  0x3c   :  { %v341_v4 = vmax.f32 %v277_v55, 0.0  ;;  %v211_v9 = vmul.f32 %v3301_v57, %v3534_v1  ;;  %v279_v10 = vadd.f32 %v3551_v8, %v209_v61  ;;  %v3305_v13 = vunpack.c.h.bf16 %v3345_v44 }
  0x3d   :  { %5645 = vst [vmem:[#allocation8_spill] sm:$0xff] %v3823_v3  ;;  %v280_v12 = vadd.f32 %v3551_v8, %v210_v62  ;;  %v212_v15 = vmul.f32 %v3304_v63, %v3534_v1  ;;  %909 = vrot.lane.b32.xlu0 %v3823_v3, %s3491_s18  ;;  %v342_v18 = vmax.f32 %v278_v7, 0.0  ;;  %v3308_v22 = vunpack.c.l.bf16 %v3346_v2 }
  0x3e   :  { %v3835_v17 = vpack.c.bf16 %v341_v4, %v340_v59  ;;  %v281_v20 = vadd.f32 %v3551_v8, %v211_v9  ;;  %v343_v24 = vmax.f32 %v279_v10, 0.0  ;;  %v213_v29 = vmul.f32 %v3305_v13, %v3534_v1 }
  0x3f   :  { %v344_v27 = vmax.f32 %v280_v12, 0.0  ;;  %v282_v30 = vadd.f32 %v3551_v8, %v212_v15  ;;  %v3309_v34 = vunpack.c.h.bf16 %v3346_v2  ;;  %v214_v35 = vmul.f32 %v3308_v22, %v3534_v1 }
  0x40   :  { %5646 = vst [vmem:[#allocation9_spill] sm:$0xff] %v3835_v17  ;;  %911 = vrot.lane.b32.xlu1 %v3835_v17, %s3491_s18  ;;  %v345_v31 = vmax.f32 %v281_v20, 0.0  ;;  %v3312_v36 = vunpack.c.l.bf16 %v3347_v16  ;;  %v3843_v37 = vpack.c.bf16 %v343_v24, %v342_v18  ;;  %v283_v38 = vadd.f32 %v3551_v8, %v213_v29 }
  0x41   :  { %v346_v39 = vmax.f32 %v282_v30, 0.0  ;;  %v3313_v41 = vunpack.c.h.bf16 %v3347_v16  ;;  %v215_v48 = vmul.f32 %v3309_v34, %v3534_v1  ;;  %v284_v51 = vadd.f32 %v3551_v8, %v214_v35 }
  0x42   :  { %5647 = vst [vmem:[#allocation10_spill] sm:$0xff] %v3843_v37  ;;  %v3846_v44 = vpack.c.bf16 %v345_v31, %v344_v27  ;;  %v216_v53 = vmul.f32 %v3312_v36, %v3534_v1  ;;  %913 = vrot.lane.b32.xlu0 %v3843_v37, %s3491_s18  ;;  %v347_v54 = vmax.f32 %v283_v38, 0.0  ;;  %v5605_v56 = vshrl.u32 %v3583_v45, 16 }
  0x43   :  { %v217_v55 = vmul.f32 %v3313_v41, %v3534_v1  ;;  %v285_v57 = vadd.f32 %v3551_v8, %v215_v48  ;;  %v348_v59 = vmax.f32 %v284_v51, 0.0  ;;  %v5603_v62 = vshll.u32 %v3583_v45, 16 }
  0x44   :  { %5648 = vst [vmem:[#allocation11_spill] sm:$0xff] %v3846_v44  ;;  %915 = vrot.lane.b32.xlu1 %v3846_v44, %s3491_s18  ;;  %v286_v61 = vadd.f32 %v3551_v8, %v216_v53  ;;  %v3860_v63 = vpack.c.bf16 %v347_v54, %v346_v39  ;;  %v677_v4 = vrot.slane %v5594_v0, 1  ;;  %v5602_v1 = vshll.u32 %v3578_v40, 16 }
  0x45   :  { %v287_v2 = vadd.f32 %v3551_v8, %v217_v55  ;;  %v349_v7 = vmax.f32 %v285_v57, 0.0  ;;  %v679_v10 = vrot.slane %v5603_v62, 1  ;;  %v5604_v12 = vshrl.u32 %v3578_v40, 16 }
  0x46   :  { %5649 = vst [vmem:[#allocation12_spill] sm:$0xff] %v3860_v63  ;;  %v350_v9 = vmax.f32 %v286_v61, 0.0  ;;  %917 = vrot.lane.b32.xlu0 %v3860_v63, %s3491_s18  ;;  %v681_v8 = vrot.slane %v5602_v1, 1  ;;  %v5600_v16 = vshll.u32 %v3585_v46, 16  ;;  %v5601_v22 = vshrl.u32 %v3585_v46, 16 }
  0x47   :  { %v351_v13 = vmax.f32 %v287_v2, 0.0  ;;  %v3879_v18 = vpack.c.bf16 %v349_v7, %v348_v59  ;;  %v680_v20 = vor.u32 %v679_v10, %v5605_v56  ;;  %v5598_v24 = vshll.u32 %v3589_v49, 16 }
  0x48   :  { %v683_v29 = vrot.slane %v5600_v16, 1  ;;  %v5596_v30 = vshll.u32 %v3622_v19, 16  ;;  %v3894_v31 = vsel %vm3872_vm2, %v677_v4, 0  ;;  %v682_v34 = vor.u32 %v681_v8, %v5604_v12 }
  0x49   :  { %5652 = vst [vmem:[#allocation13_spill] sm:$0xff] %v3879_v18  ;;  %v3885_v27 = vpack.c.bf16 %v351_v13, %v350_v9  ;;  %919 = vrot.lane.b32.xlu1 %v3879_v18, %s3491_s18  ;;  %v5599_v35 = vshrl.u32 %v3589_v49, 16  ;;  %v685_v36 = vrot.slane %v5598_v24, 1  ;;  %v5597_v38 = vshrl.u32 %v3622_v19, 16 }
  0x4a   :  { %v5610_v39 = vshll.u32 %v3624_v23, 16  ;;  %v3907_v41 = vsel %vm3872_vm2, %v680_v20, 0  ;;  %v684_v48 = vor.u32 %v683_v29, %v5601_v22  ;;  %v687_v51 = vrot.slane %v5596_v30, 1 }
  0x4b   :  { %5653 = vst [vmem:[#allocation14_spill] sm:$0xff] %v3885_v27  ;;  %921 = vrot.lane.b32.xlu0 %v3885_v27, %s3491_s18  ;;  %v5609_v53 = vshll.u32 %v3632_v28, 16  ;;  %s3492_s18 = smov 16   ;;  %v3918_v54 = vsel %vm3872_vm2, %v682_v34, 0  ;;  %v438_v55 = vshrl.u32 %v3624_v23, 16  ;;  %v686_v57 = vor.u32 %v685_v36, %v5599_v35 }
  0x4c   :  { %v689_v59 = vrot.slane %v5610_v39, 1  ;;  %v445_v61 = vshrl.u32 %v3632_v28, 16  ;;  %v5608_v2 = vshll.u32 %v3637_v32, 16  ;;  %v3931_v4 = vsel %vm3872_vm2, %v684_v48, 0 }
  0x4d   :  { %954 = vrot.lane.b32.xlu1 %v3894_v31, %s3492_s18  ;;  %v688_v7 = vor.u32 %v687_v51, %v5597_v38  ;;  %v691_v9 = vrot.slane %v5609_v53, 1  ;;  %v5607_v10 = vshll.u32 %v3661_v58, 16  ;;  %v5606_v13 = vshll.u32 %v3671_v5, 16 }
  0x4e   :  { %v476_v8 = vshll.u32 %v3676_v11, 16  ;;  %v452_v20 = vshrl.u32 %v3637_v32, 16  ;;  %v3947_v29 = vsel %vm3872_vm2, %v686_v57, 0  ;;  %v690_v34 = vor.u32 %v689_v59, %v438_v55 }
  0x4f   :  { %956 = vrot.lane.b32.xlu0 %v3907_v41, %s3492_s18  ;;  %v693_v36 = vrot.slane %v5608_v2, 1  ;;  %v459_v48 = vshrl.u32 %v3661_v58, 16  ;;  %v3954_v51 = vsel %vm3872_vm2, %v688_v7, 0  ;;  %v692_v0 = vor.u32 %v691_v9, %v445_v61 }
  0x50   :  { %v695_v30 = vrot.slane %v5607_v10, 1  ;;  %v466_v38 = vshrl.u32 %v3671_v5, 16  ;;  %v697_v57 = vrot.slane %v5606_v13, 1  ;;  %v473_v59 = vshrl.u32 %v3676_v11, 16 }
  0x51   :  { %958 = vrot.lane.b32.xlu1 %v3918_v54, %s3492_s18  ;;  %v699_v24 = vrot.slane %v476_v8, 1  ;;  %v483_v35 = vshll.u32 %v3687_v21, 16  ;;  %v490_v7 = vshll.u32 %v3704_v42, 16  ;;  %v3970_v9 = vsel %vm3872_vm2, %v690_v34, 0 }
  0x52   :  { %v694_v16 = vor.u32 %v693_v36, %v452_v20  ;;  %v3974_v22 = vsel %vm3872_vm2, %v692_v0, 0  ;;  %v696_v1 = vor.u32 %v695_v30, %v459_v48  ;;  %v698_v62 = vor.u32 %v697_v57, %v466_v38 }
  0x53   :  { %960 = vrot.lane.b32.xlu0 %v3931_v4, %s3492_s18  ;;  %v700_v12 = vor.u32 %v699_v24, %v473_v59  ;;  %v480_v56 = vshrl.u32 %v3687_v21, 16  ;;  %v701_v13 = vrot.slane %v483_v35, 1  ;;  %v487_v10 = vshrl.u32 %v3704_v42, 16 }
  0x54   :  { %v703_v2 = vrot.slane %v490_v7, 1  ;;  %v497_v34 = vshll.u32 %v3711_v50, 16  ;;  %v3985_v0 = vsel %vm3872_vm2, %v694_v16, 0  ;;  %v475_v30 = vrot.slane %v473_v59, 7 }
  0x55   :  { %962 = vrot.lane.b32.xlu1 %v3947_v29, %s3492_s18  ;;  %v482_v24 = vrot.slane %v480_v56, 7  ;;  %v3989_v36 = vsel %vm3872_vm2, %v696_v1, 0  ;;  %v494_v57 = vshrl.u32 %v3711_v50, 16  ;;  %v501_v53 = vshrl.u32 %v3723_v60, 16 }
  0x56   :  { %v504_v39 = vshll.u32 %v3723_v60, 16  ;;  %v3996_v27 = vsel %vm3872_vm2, %v698_v62, 0  ;;  %v4000_v16 = vsel %vm3872_vm2, %v700_v12, 0  ;;  %v702_v59 = vor.u32 %v701_v13, %v480_v56 }
  0x57   :  { %964 = vrot.lane.b32.xlu0 %v3954_v51, %s3492_s18  ;;  %v489_v18 = vrot.slane %v487_v10, 7  ;;  %v704_v1 = vor.u32 %v703_v2, %v487_v10  ;;  %v496_v63 = vrot.slane %v494_v57, 7  ;;  %v705_v44 = vrot.slane %v497_v34, 1 }
  0x58   :  { %v503_v37 = vrot.slane %v501_v53, 7  ;;  %v508_v17 = vshrl.u32 %v3735_v14, 16  ;;  %v511_v62 = vshll.u32 %v3735_v14, 16  ;;  %v440_v3 = vrot.slane %v438_v55, 7 }
  0x59   :  { %966 = vrot.lane.b32.xlu1 %v3970_v9, %s3492_s18  ;;  %v447_v47 = vrot.slane %v445_v61, 7  ;;  %v707_v12 = vrot.slane %v504_v39, 1  ;;  %v454_v33 = vrot.slane %v452_v20, 7  ;;  %v461_v56 = vrot.slane %v459_v48, 7 }
  0x5a   :  { %v468_v13 = vrot.slane %v466_v38, 7  ;;  %v510_v25 = vrot.slane %v508_v17, 7  ;;  %v5654_v6 = vshll.u32 %v3624_v23, 16  ;;  %v5655_v10 = vshll.u32 %v3632_v28, 16 }
  0x5b   :  { %968 = vrot.lane.b32.xlu0 %v3974_v22, %s3492_s18  ;;  %v4016_v43 = vor.u32 %v476_v8, %v475_v30  ;;  %v5656_v55 = vshll.u32 %v3637_v32, 16  ;;  %v5657_v38 = vshll.u32 %v3661_v58, 16  ;;  %v706_v8 = vor.u32 %v705_v44, %v494_v57 }
  0x5c   :  { %v4010_v2 = vor.u32 %v5654_v6, %v440_v3  ;;  %v4014_v52 = vor.u32 %v5655_v10, %v447_v47  ;;  %v5658_v6 = vshll.u32 %v3671_v5, 16  ;;  %v4036_v47 = vsel %vm3872_vm2, %v702_v59, 0 }
  0x5d   :  { %970 = vrot.lane.b32.xlu1 %v3985_v0, %s3492_s18  ;;  %v4022_v61 = vor.u32 %v5656_v55, %v454_v33  ;;  %v4026_v20 = vor.u32 %v5657_v38, %v461_v56  ;;  %v709_v48 = vrot.slane %v511_v62, 1  ;;  %v4038_v30 = vor.u32 %v483_v35, %v482_v24 }
  0x5e   :  { %v4030_v3 = vor.u32 %v5658_v6, %v468_v13  ;;  %v4042_v33 = vsel %vm3872_vm2, %v704_v1, 0  ;;  %v708_v56 = vor.u32 %v707_v12, %v501_v53  ;;  %v5659_v10 = vshrl.u32 %v3583_v45, 16  ;;  %v3481_v12 = vld [vmem:[%s5591_s3 + $0x20] ss:$0 sps:$4 sm:$0xff]  }
  0x5f   :  { %972 = vrot.lane.b32.xlu0 %v3989_v36, %s3492_s18  ;;  %v4046_v55 = vor.u32 %v490_v7, %v489_v18  ;;  %v4048_v38 = vor.u32 %v497_v34, %v496_v63  ;;  %v4050_v6 = vor.u32 %v504_v39, %v503_v37  ;;  %v4052_v59 = vor.u32 %v511_v62, %v510_v25 }
  0x60   :  { %v405_v13 = vrot.slane %v5659_v10, 7  ;;  %v4060_v44 = vsel %vm3872_vm2, %v706_v8, 0  ;;  %v710_v18 = vor.u32 %v709_v48, %v508_v17  ;;  %v5660_v63 = vshrl.u32 %v3578_v40, 16 }
  0x61   :  { %974 = vrot.lane.b32.xlu1 %v3996_v27, %s3492_s18  ;;  %v4066_v25 = vsel %vm3872_vm2, %v708_v56, 0  ;;  %v5661_v37 = vshll.u32 %v3583_v45, 16  ;;  %v5664_v7 = vshll.u32 %v3578_v40, 16  ;;  %v5665_v1 = vshrl.u32 %v3585_v46, 16 }
  0x62   :  { %v412_v35 = vrot.slane %v5660_v63, 7  ;;  %v4081_v17 = vsel %vm3872_vm2, %v710_v18, 0  ;;  %v5666_v8 = vshll.u32 %v3585_v46, 16  ;;  %vm2067_vm6 = vcmask 1043456  }
  0x63   :  { %976 = vrot.lane.b32.xlu0 %v4000_v16, %s3492_s18  ;;  %v408_v39 = vor.u32 %v5661_v37, %v405_v13  ;;  %v419_v62 = vrot.slane %v5665_v1, 7  ;;  %3470 = vmatprep.subr.msk.bf16.mxu0 %vm2067_vm6, %v3481_v12  ;;  %v2069_v10 = vsel %vm2067_vm6, %v3481_v12, 0  ;;  %v3483_v13 = vld [vmem:[%s5591_s3 + $0x10] sm:$0xff]   ;;  %vm1431_vm7 = vcmask 64512  }
  0x64   :  { %v415_v34 = vor.u32 %v5664_v7, %v412_v35  ;;  %3471 = vmatprep.subr.msk.bf16.mxu1 %vm2067_vm6, %v3481_v12  ;;  %3387 = vmatpush3.bf16.msra.mxu0 %v2069_v10  ;;  %v5667_v35 = vshrl.u32 %v3589_v49, 16  ;;  %vm1525_vm8 = vcmask 130048   ;;  %vm1588_vm9 = vcmask 195584  }
  0x65   :  { %978 = vrot.lane.b32.xlu1 %v4036_v47, %s3492_s18  ;;  %v4087_v24 = vsel %vm4071_vm5, 0, %v408_v39  ;;  %v422_v48 = vor.u32 %v5666_v8, %v419_v62  ;;  %3465 = vmatpush3.bf16.msra.mxu1 %v2069_v10  ;;  %v3484_v39 = vld [vmem:[%s5591_s3 + $0x8] sm:$0xff]   ;;  %v3485_v62 = vld [vmem:[%s5591_s3] sm:$0xff]   ;;  %v5669_v10 = vshrl.u32 %v3622_v19, 16  ;;  %vm1653_vm10 = vcmask 261120  }
  0x66   :  { %v4095_v57 = vsel %vm4071_vm5, 0, %v415_v34  ;;  %v426_v37 = vrot.slane %v5667_v35, 7  ;;  %vm1718_vm11 = vcmask 326656   ;;  %vm1783_vm12 = vcmask 392192  }
  0x67   :  { %980 = vrot.lane.b32.xlu0 %v4042_v33, %s3492_s18  ;;  %vm1847_vm13 = vcmask 457728   ;;  %vm1911_vm14 = vcmask 523264   ;;  %vm2002_vm15 = vcmask 588800   ;;  %vm2616_vm0 = vcmask 60416  }
  0x68   :  { %vm3013_vm1 = vcmask 58368  }
  0x69   :  { %982 = vrot.lane.b32.xlu1 %v4060_v44, %s3492_s18 }
  0x6b   :  { %984 = vrot.lane.b32.xlu0 %v4066_v25, %s3492_s18 }
  0x6d   :  { %986 = vrot.lane.b32.xlu1 %v4081_v17, %s3492_s18 }
  0x6f   :  { %1048 = vrot.lane.b32.xlu0 %v4087_v24, %s3493_s10 }
  0x71   :  { %1050 = vrot.lane.b32.xlu1 %v4095_v57, %s3493_s10 }
  0x73   :  { %1114 = vrot.lane.b32.xlu0 %v3583_v45, %s3494_s11  ;;  %v3482_v45 = vld [vmem:[%s5591_s3 + $0x18] sm:$0xff]   ;;  %v4115_v56 = vpop.permute.xlu0 %861 }
  0x74   :  { %3388 = vmatprep.subr.bf16.mxu0 %v3482_v45  ;;  %3461 = vmatprep.subr.bf16.mxu1 %v3482_v45 }
  0x75   :  { %1116 = vrot.lane.b32.xlu1 %v3578_v40, %s3494_s11  ;;  %3389 = vmatpush3.bf16.msra.mxu0 %v3482_v45 }
  0x76   :  { %3390 = vmatprep.subr.bf16.mxu0 %v3483_v13  ;;  %3466 = vmatpush3.bf16.msra.mxu1 %v3482_v45 }
  0x77   :  { %1180 = vrot.lane.b32.xlu0 %v3907_v41, %s3495_s14  ;;  %v4123_v41 = vsel %vm4071_vm5, 0, %v422_v48  ;;  %3462 = vmatprep.subr.bf16.mxu1 %v3483_v13 }
  0x79   :  { %1182 = vrot.lane.b32.xlu1 %v3918_v54, %s3495_s14  ;;  %3391 = vmatpush3.bf16.msra.mxu0 %v3483_v13 }
  0x7a   :  { %3392 = vmatprep.subr.bf16.mxu0 %v3484_v39  ;;  %3467 = vmatpush3.bf16.msra.mxu1 %v3483_v13  ;;  %v433_v13 = vrot.slane %v5669_v10, 7 }
  0x7b   :  { %1245 = vrot.lane.b32.xlu0 %v4095_v57, %s3496_s17  ;;  %3463 = vmatprep.subr.bf16.mxu1 %v3484_v39 }
  0x7d   :  { %1247 = vrot.lane.b32.xlu1 %v4123_v41, %s3496_s17  ;;  %3393 = vmatpush3.bf16.msra.mxu0 %v3484_v39 }
  0x7e   :  { %v4130_v18 = vpop.permute.xlu1 %865  ;;  %3394 = vmatprep.subr.bf16.mxu0 %v3485_v62  ;;  %3468 = vmatpush3.bf16.msra.mxu1 %v3484_v39 }
  0x7f   :  { %1307 = vrot.lane.b32.xlu0 %v3578_v40, %s3497_s21  ;;  %v4134_v63 = vpop.permute.xlu0 %863  ;;  %v5668_v40 = vshll.u32 %v3589_v49, 16  ;;  %3464 = vmatprep.subr.bf16.mxu1 %v3485_v62 }
  0x81   :  { %1309 = vrot.lane.b32.xlu1 %v3585_v46, %s3497_s21  ;;  %v429_v34 = vor.u32 %v5668_v40, %v426_v37  ;;  %3395 = vmatpush3.bf16.msra.mxu0 %v3485_v62  ;;  %v5670_v37 = vshll.u32 %v3622_v19, 16 }
  0x82   :  { %v4143_v7 = vpop.permute.xlu1 %867  ;;  %3469 = vmatpush3.bf16.msra.mxu1 %v3485_v62 }
  0x83   :  { %1369 = vrot.lane.b32.xlu0 %v3918_v54, %s3498_s24  ;;  %v4149_v1 = vpop.permute.xlu0 %869  ;;  %v4160_v54 = vsel %vm4071_vm5, 0, %v429_v34  ;;  %v436_v39 = vor.u32 %v5670_v37, %v433_v13 }
  0x85   :  { %1371 = vrot.lane.b32.xlu1 %v3931_v4, %s3498_s24  ;;  %v4194_v34 = vsel %vm4071_vm5, 0, %v436_v39  ;;  %v4223_v39 = vsel %vm4071_vm5, 0, %v4010_v2 }
  0x86   :  { %v4162_v12 = vpop.permute.xlu1 %871 }
  0x87   :  { %1052 = vrot.lane.b32.xlu0 %v4123_v41, %s3493_s10  ;;  %v4164_v8 = vpop.permute.xlu0 %873 }
  0x89   :  { %1054 = vrot.lane.b32.xlu1 %v4160_v54, %s3493_s10 }
  0x8a   :  { %v4170_v48 = vpop.permute.xlu1 %875 }
  0x8b   :  { %1118 = vrot.lane.b32.xlu0 %v3585_v46, %s3494_s11  ;;  %v4172_v45 = vpop.permute.xlu0 %877 }
  0x8d   :  { %1120 = vrot.lane.b32.xlu1 %v3589_v49, %s3494_s11 }
  0x8f   :  { %1184 = vrot.lane.b32.xlu0 %v3931_v4, %s3495_s14  ;;  %v4180_v35 = vpop.permute.xlu1 %879 }
  0x90   :  { %v4184_v46 = vpop.permute.xlu0 %881 }
  0x91   :  { %5671 = vst [vmem:[#allocation15_spill] sm:$0xff] %v4184_v46  ;;  %1186 = vrot.lane.b32.xlu1 %v3947_v29, %s3495_s14  ;;  %v1437_v46 = vsel %vm1431_vm7, %v4087_v24, %v4134_v63  ;;  %v3332_v63 = vld [vmem:[%s5588_s0 + $0x78] sm:$0xff]  }
  0x93   :  { %1249 = vrot.lane.b32.xlu0 %v4160_v54, %s3496_s17  ;;  %v4190_v40 = vpop.permute.xlu1 %883 }
  0x94   :  { %5672 = vst [vmem:[#allocation16_spill] sm:$0xff] %v4190_v40  ;;  %v4196_v4 = vpop.permute.xlu0 %885 }
  0x95   :  { %5673 = vst [vmem:[#allocation17_spill] sm:$0xff] %v4196_v4  ;;  %1251 = vrot.lane.b32.xlu1 %v4194_v34, %s3496_s17 }
  0x97   :  { %1311 = vrot.lane.b32.xlu0 %v3589_v49, %s3497_s21 }
  0x98   :  { %v4202_v62 = vpop.permute.xlu1 %887 }
  0x99   :  { %5674 = vst [vmem:[#allocation18_spill] sm:$0xff] %v4202_v62  ;;  %v4204_v10 = vpop.permute.xlu0 %889  ;;  %1313 = vrot.lane.b32.xlu1 %v3622_v19, %s3497_s21  ;;  %v4362_v62 = vsel %vm4071_vm5, 0, %v4016_v43 }
  0x9a   :  { %5675 = vst [vmem:[#allocation19_spill] sm:$0xff] %v4204_v10  ;;  %5698 = vst [vmem:[#allocation42_spill] sm:$0xff] %v4362_v62 }
  0x9b   :  { %1373 = vrot.lane.b32.xlu0 %v3947_v29, %s3498_s24 }
  0x9c   :  { %v4210_v13 = vpop.permute.xlu1 %891 }
  0x9d   :  { %5676 = vst [vmem:[#allocation20_spill] sm:$0xff] %v4210_v13  ;;  %1375 = vrot.lane.b32.xlu1 %v3954_v51, %s3498_s24  ;;  %v4214_v37 = vpop.permute.xlu0 %893 }
  0x9e   :  { %5677 = vst [vmem:[#allocation21_spill] sm:$0xff] %v4214_v37 }
  0x9f   :  { %1056 = vrot.lane.b32.xlu0 %v4194_v34, %s3493_s10 }
  0xa0   :  { %v4218_v49 = vpop.permute.xlu1 %895 }
  0xa1   :  { %5678 = vst [vmem:[#allocation22_spill] sm:$0xff] %v4218_v49  ;;  %1058 = vrot.lane.b32.xlu1 %v4223_v39, %s3493_s10 }
  0xa2   :  { %v4229_v29 = vpop.permute.xlu0 %897 }
  0xa3   :  { %1122 = vrot.lane.b32.xlu0 %v3622_v19, %s3494_s11  ;;  %5679 = vst [vmem:[#allocation23_spill] sm:$0xff] %v4229_v29 }
  0xa4   :  { %v4231_v13 = vpop.permute.xlu1 %899 }
  0xa5   :  { %5680 = vst [vmem:[#allocation24_spill] sm:$0xff] %v4231_v13  ;;  %1124 = vrot.lane.b32.xlu1 %v3624_v23, %s3494_s11  ;;  %v4250_v13 = vsel %vm4071_vm5, 0, %v4014_v52 }
  0xa6   :  { %v4237_v49 = vpop.permute.xlu0 %901 }
  0xa7   :  { %1188 = vrot.lane.b32.xlu0 %v3954_v51, %s3495_s14  ;;  %5681 = vst [vmem:[#allocation25_spill] sm:$0xff] %v4237_v49 }
  0xa9   :  { %1190 = vrot.lane.b32.xlu1 %v3970_v9, %s3495_s14  ;;  %v4241_v2 = vpop.permute.xlu1 %903 }
  0xaa   :  { %5682 = vst [vmem:[#allocation26_spill] sm:$0xff] %v4241_v2 }
  0xab   :  { %1253 = vrot.lane.b32.xlu0 %v4223_v39, %s3496_s17  ;;  %v4245_v19 = vpop.permute.xlu0 %905 }
  0xac   :  { %5683 = vst [vmem:[#allocation27_spill] sm:$0xff] %v4245_v19 }
  0xad   :  { %1255 = vrot.lane.b32.xlu1 %v4250_v13, %s3496_s17  ;;  %v4254_v51 = vpop.permute.xlu1 %907 }
  0xae   :  { %5684 = vst [vmem:[#allocation28_spill] sm:$0xff] %v4254_v51  ;;  %v4333_v51 = vsel %vm4071_vm5, 0, %v4030_v3 }
  0xaf   :  { %1315 = vrot.lane.b32.xlu0 %v3624_v23, %s3497_s21  ;;  %v4258_v49 = vpop.permute.xlu0 %909  ;;  %v4277_v23 = vsel %vm4071_vm5, 0, %v4022_v61  ;;  %5692 = vst [vmem:[#allocation36_spill] sm:$0xff] %v4333_v51 }
  0xb0   :  { %5685 = vst [vmem:[#allocation29_spill] sm:$0xff] %v4258_v49 }
  0xb1   :  { %1317 = vrot.lane.b32.xlu1 %v3632_v28, %s3497_s21 }
  0xb2   :  { %v4262_v2 = vpop.permute.xlu1 %911 }
  0xb3   :  { %5686 = vst [vmem:[#allocation30_spill] sm:$0xff] %v4262_v2  ;;  %1377 = vrot.lane.b32.xlu0 %v3970_v9, %s3498_s24 }
  0xb4   :  { %v4266_v52 = vpop.permute.xlu0 %913 }
  0xb5   :  { %5687 = vst [vmem:[#allocation31_spill] sm:$0xff] %v4266_v52  ;;  %1379 = vrot.lane.b32.xlu1 %v3974_v22, %s3498_s24 }
  0xb6   :  { %v4270_v19 = vpop.permute.xlu1 %915 }
  0xb7   :  { %5688 = vst [vmem:[#allocation32_spill] sm:$0xff] %v4270_v19  ;;  %1060 = vrot.lane.b32.xlu0 %v4250_v13, %s3493_s10 }
  0xb8   :  { %v4279_v49 = vpop.permute.xlu0 %917 }
  0xb9   :  { %5689 = vst [vmem:[#allocation33_spill] sm:$0xff] %v4279_v49  ;;  %1062 = vrot.lane.b32.xlu1 %v4277_v23, %s3493_s10 }
  0xbb   :  { %1126 = vrot.lane.b32.xlu0 %v3632_v28, %s3494_s11  ;;  %v4285_v9 = vpop.permute.xlu1 %919 }
  0xbc   :  { %5690 = vst [vmem:[#allocation34_spill] sm:$0xff] %v4285_v9  ;;  %v4304_v9 = vsel %vm4071_vm5, 0, %v4026_v20 }
  0xbd   :  { %v4287_v52 = vpop.permute.xlu0 %921  ;;  %1128 = vrot.lane.b32.xlu1 %v3637_v32, %s3494_s11 }
  0xbe   :  { %5691 = vst [vmem:[#allocation35_spill] sm:$0xff] %v4287_v52 }
  0xbf   :  { %1192 = vrot.lane.b32.xlu0 %v3974_v22, %s3495_s14  ;;  %v955_v61 = vpop.permute.xlu1 %954 }
  0xc1   :  { %v4293_v19 = vpop.permute.xlu0 %956  ;;  %1194 = vrot.lane.b32.xlu1 %v3985_v0, %s3495_s14 }
  0xc3   :  { %1257 = vrot.lane.b32.xlu0 %v4277_v23, %s3496_s17  ;;  %v4299_v28 = vpop.permute.xlu1 %958 }
  0xc5   :  { %v4306_v52 = vpop.permute.xlu0 %960  ;;  %1259 = vrot.lane.b32.xlu1 %v4304_v9, %s3496_s17 }
  0xc7   :  { %1319 = vrot.lane.b32.xlu0 %v3637_v32, %s3497_s21  ;;  %v4312_v22 = vpop.permute.xlu1 %962 }
  0xc9   :  { %v4314_v49 = vpop.permute.xlu0 %964  ;;  %1321 = vrot.lane.b32.xlu1 %v3661_v58, %s3497_s21 }
  0xcb   :  { %1381 = vrot.lane.b32.xlu0 %v3985_v0, %s3498_s24  ;;  %v4320_v20 = vpop.permute.xlu1 %966 }
  0xcd   :  { %v4322_v2 = vpop.permute.xlu0 %968  ;;  %1383 = vrot.lane.b32.xlu1 %v3989_v36, %s3498_s24 }
  0xcf   :  { %1064 = vrot.lane.b32.xlu0 %v4304_v9, %s3493_s10  ;;  %v4328_v32 = vpop.permute.xlu1 %970 }
  0xd1   :  { %v4335_v29 = vpop.permute.xlu0 %972  ;;  %1066 = vrot.lane.b32.xlu1 %v4333_v51, %s3493_s10 }
  0xd3   :  { %1130 = vrot.lane.b32.xlu0 %v3661_v58, %s3494_s11  ;;  %v4341_v0 = vpop.permute.xlu1 %974 }
  0xd4   :  { %5693 = vst [vmem:[#allocation37_spill] sm:$0xff] %v4341_v0 }
  0xd5   :  { %v4343_v37 = vpop.permute.xlu0 %976  ;;  %1132 = vrot.lane.b32.xlu1 %v3671_v5, %s3494_s11 }
  0xd6   :  { %5694 = vst [vmem:[#allocation38_spill] sm:$0xff] %v4343_v37 }
  0xd7   :  { %1196 = vrot.lane.b32.xlu0 %v3989_v36, %s3495_s14  ;;  %v4349_v3 = vpop.permute.xlu1 %978 }
  0xd8   :  { %5695 = vst [vmem:[#allocation39_spill] sm:$0xff] %v4349_v3 }
  0xd9   :  { %v4351_v10 = vpop.permute.xlu0 %980  ;;  %1198 = vrot.lane.b32.xlu1 %v3996_v27, %s3495_s14 }
  0xda   :  { %5696 = vst [vmem:[#allocation40_spill] sm:$0xff] %v4351_v10 }
  0xdb   :  { %1261 = vrot.lane.b32.xlu0 %v4333_v51, %s3496_s17  ;;  %v4357_v58 = vpop.permute.xlu1 %982 }
  0xdc   :  { %5697 = vst [vmem:[#allocation41_spill] sm:$0xff] %v4357_v58 }
  0xdd   :  { %v4364_v4 = vpop.permute.xlu0 %984  ;;  %1263 = vrot.lane.b32.xlu1 %v4362_v62, %s3496_s17 }
  0xde   :  { %5699 = vst [vmem:[#allocation43_spill] sm:$0xff] %v4364_v4  ;;  %v5701_v4 = vmov 0  }
  0xdf   :  { %1323 = vrot.lane.b32.xlu0 %v3671_v5, %s3497_s21  ;;  %v4370_v36 = vpop.permute.xlu1 %986  ;;  %v398_v3 = vrot.slane %v5701_v4, 7 }
  0xe0   :  { %5700 = vst [vmem:[#allocation44_spill] sm:$0xff] %v4370_v36  ;;  %v4384_v36 = vsel %vm4071_vm5, 0, %v4038_v30 }
  0xe1   :  { %v1049_v10 = vpop.permute.xlu0 %1048  ;;  %1325 = vrot.lane.b32.xlu1 %v3676_v11, %s3497_s21 }
  0xe3   :  { %1385 = vrot.lane.b32.xlu0 %v3996_v27, %s3498_s24  ;;  %v1051_v58 = vpop.permute.xlu1 %1050  ;;  %v4392_v27 = vsel %vm4071_vm5, 0, %v398_v3 }
  0xe4   :  { %v1434_v30 = vsel %vm1431_vm7, %v4392_v27, %v4115_v56 }
  0xe5   :  { %v1115_v43 = vpop.permute.xlu0 %1114  ;;  %1387 = vrot.lane.b32.xlu1 %v4000_v16, %s3498_s24 }
  0xe7   :  { %1068 = vrot.lane.b32.xlu0 %v4362_v62, %s3493_s10  ;;  %v1117_v5 = vpop.permute.xlu1 %1116 }
  0xe9   :  { %v1181_v37 = vpop.permute.xlu0 %1180  ;;  %1070 = vrot.lane.b32.xlu1 %v4384_v36, %s3493_s10 }
  0xeb   :  { %1134 = vrot.lane.b32.xlu0 %v3676_v11, %s3494_s11  ;;  %v1183_v62 = vpop.permute.xlu1 %1182  ;;  %v4402_v11 = vsel %vm1525_vm8, %v1434_v30, %v955_v61 }
  0xec   :  { %v1590_v0 = vsel %vm1588_vm9, %v4402_v11, %v1049_v10 }
  0xed   :  { %v1246_v40 = vpop.permute.xlu0 %1245  ;;  %1136 = vrot.lane.b32.xlu1 %v3687_v21, %s3494_s11  ;;  %v1655_v56 = vsel %vm1653_vm10, %v1590_v0, %v1115_v43 }
  0xee   :  { %v1720_v61 = vsel %vm1718_vm11, %v1655_v56, %v1181_v37  ;;  %v3253_v56 = vunpack.c.h.bf16 %v3332_v63 }
  0xef   :  { %1200 = vrot.lane.b32.xlu0 %v4000_v16, %s3495_s14  ;;  %v1248_v3 = vpop.permute.xlu1 %1247  ;;  %v1529_v16 = vsel %vm1525_vm8, %v1437_v46, %v4293_v19  ;;  %v1785_v30 = vsel %vm1783_vm12, %v1720_v61, %v1246_v40  ;;  %v4425_v46 = vsel %vm4071_vm5, 0, %v4046_v55  ;;  %v3252_v55 = vunpack.c.l.bf16 %v3332_v63 }
  0xf0   :  { %v1592_v10 = vsel %vm1588_vm9, %v1529_v16, %v1051_v58 }
  0xf1   :  { %v1308_v51 = vpop.permute.xlu0 %1307  ;;  %1202 = vrot.lane.b32.xlu1 %v4036_v47, %s3495_s14  ;;  %v1657_v37 = vsel %vm1653_vm10, %v1592_v10, %v1117_v5 }
  0xf2   :  { %v1849_v19 = vsel %vm1847_vm13, %v1785_v30, %v1308_v51  ;;  %v1722_v58 = vsel %vm1718_vm11, %v1657_v37, %v1183_v62 }
  0xf3   :  { %1265 = vrot.lane.b32.xlu0 %v4384_v36, %s3496_s17  ;;  %v1310_v24 = vpop.permute.xlu1 %1309  ;;  %v1787_v43 = vsel %vm1783_vm12, %v1722_v58, %v1248_v3 }
  0xf4   :  { %v1851_v5 = vsel %vm1847_vm13, %v1787_v43, %v1310_v24  ;;  %v3487_v24 = vld [vmem:[%s5590_s2] ss:$0 sm:$0xff] }
  0xf5   :  { %v1370_v0 = vpop.permute.xlu0 %1369  ;;  %1267 = vrot.lane.b32.xlu1 %v4425_v46, %s3496_s17 }
  0xf6   :  { %v1913_v40 = vsel %vm1911_vm14, %v1849_v19, %v1370_v0  ;;  %v4457_v19 = vsel %vm4071_vm5, 0, %v4048_v38 }
  0xf7   :  { %1327 = vrot.lane.b32.xlu0 %v3687_v21, %s3497_s21  ;;  %3396 = vmatprep.mubr.msk.bf16.mxu0 %vm2002_vm15, %v1913_v40  ;;  %v1372_v51 = vpop.permute.xlu1 %1371  ;;  %v3486_v21 = vld [vmem:[%s5589_s1] ss:$0 sm:$0xff] }
  0xf8   :  { %v1915_v16 = vsel %vm1911_vm14, %v1851_v5, %v1372_v51  ;;  %v186_v3 = vmul.f32 %v3486_v21, %v3252_v55  ;;  %v187_v61 = vmul.f32 %v3486_v21, %v3253_v56  ;;  %v1440_v56 = vsel %vm1431_vm7, %v4095_v57, %v4130_v18 }
  0xf9   :  { %v1053_v62 = vpop.permute.xlu0 %1052  ;;  %1329 = vrot.lane.b32.xlu1 %v3704_v42, %s3497_s21  ;;  %3397 = vmatmul.mubr.msk.bf16.vlgmr.msra.gmra.mxu0 %vm2002_vm15, %v1915_v16  ;;  %v1531_v5 = vsel %vm1525_vm8, %v1440_v56, %v4299_v28  ;;  %v1443_v21 = vsel %vm1431_vm7, %v4123_v41, %v4143_v7  ;;  %v4492_v7 = vsel %vm4071_vm5, 0, %v4050_v6 }
  0xfa   :  { %v256_v63 = vadd.f32 %v3487_v24, %v186_v3  ;;  %v1594_v51 = vsel %vm1588_vm9, %v1531_v5, %v1053_v62 }
  0xfb   :  { %1389 = vrot.lane.b32.xlu0 %v4036_v47, %s3498_s24  ;;  %v1055_v10 = vpop.permute.xlu1 %1054  ;;  %v257_v47 = vadd.f32 %v3487_v24, %v187_v61 }
  0xfc   :  { %v320_v58 = vmax.f32 %v256_v63, 0.0 }
  0xfd   :  { %v1119_v30 = vpop.permute.xlu0 %1118  ;;  %1391 = vrot.lane.b32.xlu1 %v4042_v33, %s3498_s24  ;;  %v321_v40 = vmax.f32 %v257_v47, 0.0 }
  0xfe   :  { %v1659_v3 = vsel %vm1653_vm10, %v1594_v51, %v1119_v30 }
  0xff   :  { %1072 = vrot.lane.b32.xlu0 %v4425_v46, %s3493_s10  ;;  %v1121_v37 = vpop.permute.xlu1 %1120  ;;  %v4470_v38 = vpack.c.bf16 %v321_v40, %v320_v58 }
 0x101   :  { %v1185_v0 = vpop.permute.xlu0 %1184  ;;  %1074 = vrot.lane.b32.xlu1 %v4457_v19, %s3493_s10  ;;  %v805_v18 = vshrl.u32 %v4470_v38, 16  ;;  %v808_v47 = vshll.u32 %v4470_v38, 16 }
 0x102   :  { %v1724_v57 = vsel %vm1718_vm11, %v1659_v3, %v1185_v0  ;;  %v1446_v3 = vsel %vm1431_vm7, %v4160_v54, %v4149_v1 }
 0x103   :  { %1138 = vrot.lane.b32.xlu0 %v3704_v42, %s3494_s11  ;;  %v1187_v43 = vpop.permute.xlu1 %1186  ;;  %v807_v6 = vrot.slane %v805_v18, 7  ;;  %v822_v5 = vrot.slane %v808_v47, 1 }
 0x105   :  { %v1250_v55 = vpop.permute.xlu0 %1249  ;;  %1140 = vrot.lane.b32.xlu1 %v3711_v50, %s3494_s11 }
 0x106   :  { %v1789_v62 = vsel %vm1783_vm12, %v1724_v57, %v1250_v55  ;;  %v1535_v57 = vsel %vm1525_vm8, %v1446_v3, %v4312_v22 }
 0x107   :  { %1204 = vrot.lane.b32.xlu0 %v4042_v33, %s3495_s14  ;;  %v1252_v42 = vpop.permute.xlu1 %1251  ;;  %v1533_v33 = vsel %vm1525_vm8, %v1443_v21, %v4306_v52 }
 0x108   :  { %v1596_v28 = vsel %vm1588_vm9, %v1533_v33, %v1055_v10 }
 0x109   :  { %v1312_v16 = vpop.permute.xlu0 %1311  ;;  %1206 = vrot.lane.b32.xlu1 %v4060_v44, %s3495_s14  ;;  %v1661_v61 = vsel %vm1653_vm10, %v1596_v28, %v1121_v37 }
 0x10a   :  { %v1853_v52 = vsel %vm1847_vm13, %v1789_v62, %v1312_v16  ;;  %v1726_v24 = vsel %vm1718_vm11, %v1661_v61, %v1187_v43  ;;  %v1449_v62 = vsel %vm1431_vm7, %v4194_v34, %v4162_v12 }
 0x10b   :  { %1269 = vrot.lane.b32.xlu0 %v4457_v19, %s3496_s17  ;;  %v1314_v41 = vpop.permute.xlu1 %1313  ;;  %v1791_v10 = vsel %vm1783_vm12, %v1726_v24, %v1252_v42 }
 0x10c   :  { %v1855_v37 = vsel %vm1847_vm13, %v1791_v10, %v1314_v41 }
 0x10d   :  { %v1374_v30 = vpop.permute.xlu0 %1373  ;;  %1271 = vrot.lane.b32.xlu1 %v4492_v7, %s3496_s17 }
 0x10e   :  { %v1917_v63 = vsel %vm1911_vm14, %v1853_v52, %v1374_v30  ;;  %v515_v52 = vshrl.u32 %v3747_v26, 16 }
 0x10f   :  { %1331 = vrot.lane.b32.xlu0 %v3711_v50, %s3497_s21  ;;  %3400 = vmatprep.mubr.msk.bf16.mxu0 %vm2002_vm15, %v1917_v63  ;;  %v1376_v0 = vpop.permute.xlu1 %1375  ;;  %v810_v50 = vor.u32 %v808_v47, %v807_v6 }
 0x110   :  { %v1919_v58 = vsel %vm1911_vm14, %v1855_v37, %v1376_v0  ;;  %v517_v47 = vrot.slane %v515_v52, 7  ;;  %v518_v37 = vshll.u32 %v3747_v26, 16 }
 0x111   :  { %v1057_v40 = vpop.permute.xlu0 %1056  ;;  %1333 = vrot.lane.b32.xlu1 %v3723_v60, %s3497_s21  ;;  %3401 = vmatmul.mubr.msk.bf16.gmra.mxu0 %vm2002_vm15, %v1919_v58  ;;  %v820_v56 = vsel %vm4071_vm5, 0, %v810_v50  ;;  %v4565_v50 = vsel %vm4071_vm5, 0, %v4052_v59 }
 0x113   :  { %1393 = vrot.lane.b32.xlu0 %v4060_v44, %s3498_s24  ;;  %v1059_v43 = vpop.permute.xlu1 %1058  ;;  %v823_v44 = vor.u32 %v822_v5, %v805_v18  ;;  %v1598_v18 = vsel %vm1588_vm9, %v1535_v57, %v1057_v40 }
 0x115   :  { %v1123_v55 = vpop.permute.xlu0 %1122  ;;  %1395 = vrot.lane.b32.xlu1 %v4066_v25, %s3498_s24  ;;  %v828_v33 = vsel %vm3872_vm2, %v823_v44, 0 }
 0x116   :  { %v1663_v41 = vsel %vm1653_vm10, %v1598_v18, %v1123_v55 }
 0x117   :  { %1076 = vrot.lane.b32.xlu0 %v4492_v7, %s3493_s10  ;;  %v1125_v42 = vpop.permute.xlu1 %1124 }
 0x119   :  { %v1189_v51 = vpop.permute.xlu0 %1188  ;;  %1078 = vrot.lane.b32.xlu1 %v820_v56, %s3493_s10 }
 0x11a   :  { %v1728_v1 = vsel %vm1718_vm11, %v1663_v41, %v1189_v51 }
 0x11b   :  { %1142 = vrot.lane.b32.xlu0 %v3723_v60, %s3494_s11  ;;  %v1191_v16 = vpop.permute.xlu1 %1190 }
 0x11d   :  { %v1254_v21 = vpop.permute.xlu0 %1253  ;;  %1144 = vrot.lane.b32.xlu1 %v4470_v38, %s3494_s11 }
 0x11e   :  { %v1793_v22 = vsel %vm1783_vm12, %v1728_v1, %v1254_v21  ;;  %v1452_v21 = vsel %vm1431_vm7, %v4223_v39, %v4164_v8 }
 0x11f   :  { %1208 = vrot.lane.b32.xlu0 %v4066_v25, %s3495_s14  ;;  %v1256_v60 = vpop.permute.xlu1 %1255  ;;  %v1537_v25 = vsel %vm1525_vm8, %v1449_v62, %v4314_v49 }
 0x120   :  { %v1600_v54 = vsel %vm1588_vm9, %v1537_v25, %v1059_v43  ;;  %v711_v43 = vrot.slane %v518_v37, 1 }
 0x121   :  { %v1316_v28 = vpop.permute.xlu0 %1315  ;;  %1210 = vrot.lane.b32.xlu1 %v828_v33, %s3495_s14  ;;  %v1665_v12 = vsel %vm1653_vm10, %v1600_v54, %v1125_v42 }
 0x122   :  { %v1857_v34 = vsel %vm1847_vm13, %v1793_v22, %v1316_v28  ;;  %v1730_v24 = vsel %vm1718_vm11, %v1665_v12, %v1191_v16  ;;  %v712_v59 = vor.u32 %v711_v43, %v515_v52  ;;  %v1455_v28 = vsel %vm1431_vm7, %v4250_v13, %v4170_v48 }
 0x123   :  { %1273 = vrot.lane.b32.xlu0 %v820_v56, %s3496_s17  ;;  %v1318_v61 = vpop.permute.xlu1 %1317  ;;  %v1795_v63 = vsel %vm1783_vm12, %v1730_v24, %v1256_v60  ;;  %v5702_v56 = vld [vmem:[#allocation2_spill] sm:$0xff] }
 0x124   :  { %v1859_v10 = vsel %vm1847_vm13, %v1795_v63, %v1318_v61  ;;  %v522_v5 = vshrl.u32 %v5702_v56, 16  ;;  %v525_v44 = vshll.u32 %v5702_v56, 16  ;;  %v790_v3 = vsel %vm3872_vm2, %v712_v59, 0 }
 0x125   :  { %v1378_v30 = vpop.permute.xlu0 %1377  ;;  %1275 = vrot.lane.b32.xlu1 %v4392_v27, %s3496_s17  ;;  %v1458_v59 = vsel %vm1431_vm7, %v4277_v23, %v4172_v45 }
 0x126   :  { %v1921_v49 = vsel %vm1911_vm14, %v1857_v34, %v1378_v30  ;;  %v524_v51 = vrot.slane %v522_v5, 7  ;;  %v5703_v30 = vld [vmem:[#allocation3_spill] sm:$0xff] }
 0x127   :  { %1335 = vrot.lane.b32.xlu0 %v4470_v38, %s3497_s21  ;;  %3404 = vmatprep.mubr.msk.bf16.mxu0 %vm2002_vm15, %v1921_v49  ;;  %v1380_v6 = vpop.permute.xlu1 %1379  ;;  %v520_v38 = vor.u32 %v518_v37, %v517_v47  ;;  %v529_v24 = vshrl.u32 %v5703_v30, 16  ;;  %v532_v47 = vshll.u32 %v5703_v30, 16 }
 0x128   :  { %v1923_v0 = vsel %vm1911_vm14, %v1859_v10, %v1380_v6  ;;  %v527_v57 = vor.u32 %v525_v44, %v524_v51  ;;  %v1543_v51 = vsel %vm1525_vm8, %v1458_v59, %v4328_v32 }
 0x129   :  { %v1061_v58 = vpop.permute.xlu0 %1060  ;;  %1337 = vrot.lane.b32.xlu1 %v5701_v4, %s3497_s21  ;;  %3405 = vmatmul.mubr.msk.bf16.gmra.mxu0 %vm2002_vm15, %v1923_v0  ;;  %v4573_v55 = vsel %vm4071_vm5, 0, %v520_v38  ;;  %v531_v6 = vrot.slane %v529_v24, 7  ;;  %v715_v38 = vrot.slane %v532_v47, 1 }
 0x12a   :  { %v4607_v48 = vsel %vm4071_vm5, 0, %v527_v57 }
 0x12b   :  { %1397 = vrot.lane.b32.xlu0 %v828_v33, %s3498_s24  ;;  %v1063_v27 = vpop.permute.xlu1 %1062 }
 0x12d   :  { %v1127_v40 = vpop.permute.xlu0 %1126  ;;  %1399 = vrot.lane.b32.xlu1 %v3894_v31, %s3498_s24 }
 0x12f   :  { %1080 = vrot.lane.b32.xlu0 %v4565_v50, %s3493_s10  ;;  %v1129_v4 = vpop.permute.xlu1 %1128 }
 0x131   :  { %v1193_v42 = vpop.permute.xlu0 %1192  ;;  %1082 = vrot.lane.b32.xlu1 %v4573_v55, %s3493_s10 }
 0x133   :  { %1146 = vrot.lane.b32.xlu0 %v3735_v14, %s3494_s11  ;;  %v1195_v31 = vpop.permute.xlu1 %1194  ;;  %v1539_v14 = vsel %vm1525_vm8, %v1452_v21, %v4320_v20  ;;  %v713_v20 = vrot.slane %v525_v44, 1 }
 0x134   :  { %v1602_v60 = vsel %vm1588_vm9, %v1539_v14, %v1061_v58  ;;  %v534_v58 = vor.u32 %v532_v47, %v531_v6  ;;  %v5706_v6 = vld [vmem:[#allocation15_spill] sm:$0xff]  ;;  %v5707_v47 = vld [vmem:[#allocation36_spill] sm:$0xff] }
 0x135   :  { %v1258_v16 = vpop.permute.xlu0 %1257  ;;  %1148 = vrot.lane.b32.xlu1 %v3747_v26, %s3494_s11  ;;  %v1667_v8 = vsel %vm1653_vm10, %v1602_v60, %v1127_v40  ;;  %v714_v52 = vor.u32 %v713_v20, %v522_v5 }
 0x136   :  { %v1732_v39 = vsel %vm1718_vm11, %v1667_v8, %v1193_v42  ;;  %v4636_v43 = vsel %vm4071_vm5, 0, %v534_v58  ;;  %v5708_v58 = vld [vmem:[#allocation37_spill] sm:$0xff] }
 0x137   :  { %1212 = vrot.lane.b32.xlu0 %v4081_v17, %s3495_s14  ;;  %v1260_v33 = vpop.permute.xlu1 %1259  ;;  %v1541_v17 = vsel %vm1525_vm8, %v1455_v28, %v4322_v2  ;;  %v1797_v41 = vsel %vm1783_vm12, %v1732_v39, %v1258_v16 }
 0x138   :  { %v1604_v62 = vsel %vm1588_vm9, %v1541_v17, %v1063_v27 }
 0x139   :  { %v1320_v18 = vpop.permute.xlu0 %1319  ;;  %1214 = vrot.lane.b32.xlu1 %v790_v3, %s3495_s14  ;;  %v1669_v13 = vsel %vm1653_vm10, %v1604_v62, %v1129_v4  ;;  %v5704_v4 = vld [vmem:[#allocation4_spill] sm:$0xff] }
 0x13a   :  { %v1861_v1 = vsel %vm1847_vm13, %v1797_v41, %v1320_v18  ;;  %v1734_v54 = vsel %vm1718_vm11, %v1669_v13, %v1195_v31  ;;  %v536_v5 = vshrl.u32 %v5704_v4, 16  ;;  %v716_v31 = vor.u32 %v715_v38, %v529_v24 }
 0x13b   :  { %1277 = vrot.lane.b32.xlu0 %v4573_v55, %s3496_s17  ;;  %v1322_v25 = vpop.permute.xlu1 %1321  ;;  %v1799_v61 = vsel %vm1783_vm12, %v1734_v54, %v1260_v33  ;;  %v539_v21 = vshll.u32 %v5704_v4, 16  ;;  %v1461_v33 = vsel %vm1431_vm7, %v4304_v9, %v4180_v35 }
 0x13c   :  { %v1863_v12 = vsel %vm1847_vm13, %v1799_v61, %v1322_v25  ;;  %v538_v16 = vrot.slane %v536_v5, 7  ;;  %v1545_v23 = vsel %vm1525_vm8, %v1461_v33, %v4335_v29 }
 0x13d   :  { %v1382_v2 = vpop.permute.xlu0 %1381  ;;  %1279 = vrot.lane.b32.xlu1 %v4607_v48, %s3496_s17  ;;  %v717_v20 = vrot.slane %v539_v21, 1 }
 0x13e   :  { %v1925_v22 = vsel %vm1911_vm14, %v1861_v1, %v1382_v2  ;;  %v541_v9 = vor.u32 %v539_v21, %v538_v16 }
 0x13f   :  { %1339 = vrot.lane.b32.xlu0 %v3747_v26, %s3497_s21  ;;  %3408 = vmatprep.mubr.msk.bf16.mxu0 %vm2002_vm15, %v1925_v22  ;;  %v1384_v34 = vpop.permute.xlu1 %1383  ;;  %v791_v26 = vsel %vm3872_vm2, %v714_v52, 0  ;;  %v718_v2 = vor.u32 %v717_v20, %v536_v5  ;;  %v5705_v22 = vld [vmem:[#allocation5_spill] sm:$0xff]  ;;  %v5709_v5 = vld [vmem:[#allocation6_spill] sm:$0xff] }
 0x140   :  { %v1927_v49 = vsel %vm1911_vm14, %v1863_v12, %v1384_v34  ;;  %v4676_v25 = vsel %vm4071_vm5, 0, %v541_v9  ;;  %v543_v61 = vshrl.u32 %v5705_v22, 16 }
 0x141   :  { %v1065_v63 = vpop.permute.xlu0 %1064  ;;  %1341 = vrot.lane.b32.xlu1 %v5702_v56, %s3497_s21  ;;  %3409 = vmatmul.mubr.msk.bf16.gmra.mxu0 %vm2002_vm15, %v1927_v49  ;;  %v793_v12 = vsel %vm3872_vm2, %v718_v2, 0  ;;  %v546_v49 = vshll.u32 %v5705_v22, 16 }
 0x142   :  { %v545_v24 = vrot.slane %v543_v61, 7 }
 0x143   :  { %1401 = vrot.lane.b32.xlu0 %v790_v3, %s3498_s24  ;;  %v1067_v10 = vpop.permute.xlu1 %1066 }
 0x144   :  { %v1608_v57 = vsel %vm1588_vm9, %v1545_v23, %v1067_v10 }
 0x145   :  { %v1131_v37 = vpop.permute.xlu0 %1130  ;;  %1403 = vrot.lane.b32.xlu1 %v791_v26, %s3498_s24 }
 0x147   :  { %988 = vrot.lane.b32.xlu0 %v790_v3, %s3492_s18  ;;  %v1133_v0 = vpop.permute.xlu1 %1132  ;;  %v1606_v3 = vsel %vm1588_vm9, %v1543_v51, %v1065_v63  ;;  %v5710_v51 = vld [vmem:[#allocation16_spill] sm:$0xff] }
 0x148   :  { %v1671_v45 = vsel %vm1653_vm10, %v1606_v3, %v1131_v37  ;;  %v1673_v18 = vsel %vm1653_vm10, %v1608_v57, %v1133_v0  ;;  %v1464_v37 = vsel %vm1431_vm7, %v5707_v47, %v5706_v6  ;;  %v719_v0 = vrot.slane %v546_v49, 1  ;;  %v5712_v3 = vld [vmem:[#allocation38_spill] sm:$0xff]  ;;  %v5715_v47 = vld [vmem:[#allocation39_spill] sm:$0xff] }
 0x149   :  { %v1197_v27 = vpop.permute.xlu0 %1196  ;;  %990 = vrot.lane.b32.xlu1 %v791_v26, %s3492_s18 }
 0x14a   :  { %v1736_v32 = vsel %vm1718_vm11, %v1671_v45, %v1197_v27  ;;  %v1547_v27 = vsel %vm1525_vm8, %v1464_v37, %v5708_v58  ;;  %v720_v45 = vor.u32 %v719_v0, %v543_v61 }
 0x14b   :  { %1084 = vrot.lane.b32.xlu0 %v4607_v48, %s3493_s10  ;;  %v1199_v40 = vpop.permute.xlu1 %1198 }
 0x14c   :  { %v1738_v29 = vsel %vm1718_vm11, %v1673_v18, %v1199_v40 }
 0x14d   :  { %v1262_v42 = vpop.permute.xlu0 %1261  ;;  %1086 = vrot.lane.b32.xlu1 %v4636_v43, %s3493_s10 }
 0x14e   :  { %v1801_v60 = vsel %vm1783_vm12, %v1736_v32, %v1262_v42  ;;  %v550_v42 = vshrl.u32 %v5709_v5, 16 }
 0x14f   :  { %1150 = vrot.lane.b32.xlu0 %v5702_v56, %s3494_s11  ;;  %v1264_v44 = vpop.permute.xlu1 %1263  ;;  %v792_v56 = vsel %vm3872_vm2, %v716_v31, 0 }
 0x150   :  { %v1803_v39 = vsel %vm1783_vm12, %v1738_v29, %v1264_v44  ;;  %v5711_v44 = vld [vmem:[#allocation42_spill] sm:$0xff]  ;;  %v552_v57 = vrot.slane %v550_v42, 7  ;;  %v794_v29 = vsel %vm3872_vm2, %v720_v45, 0 }
 0x151   :  { %v1324_v14 = vpop.permute.xlu0 %1323  ;;  %1152 = vrot.lane.b32.xlu1 %v5703_v30, %s3494_s11  ;;  %v1467_v16 = vsel %vm1431_vm7, %v5711_v44, %v5710_v51  ;;  %v5717_v51 = vld [vmem:[#allocation40_spill] sm:$0xff] }
 0x152   :  { %v1865_v28 = vsel %vm1847_vm13, %v1801_v60, %v1324_v14  ;;  %v1549_v14 = vsel %vm1525_vm8, %v1467_v16, %v5712_v3  ;;  %v553_v60 = vshll.u32 %v5709_v5, 16 }
 0x153   :  { %1216 = vrot.lane.b32.xlu0 %v791_v26, %s3495_s14  ;;  %v1326_v35 = vpop.permute.xlu1 %1325  ;;  %v548_v26 = vor.u32 %v546_v49, %v545_v24 }
 0x154   :  { %v1867_v62 = vsel %vm1847_vm13, %v1803_v39, %v1326_v35  ;;  %v555_v20 = vor.u32 %v553_v60, %v552_v57 }
 0x155   :  { %v1386_v8 = vpop.permute.xlu0 %1385  ;;  %1218 = vrot.lane.b32.xlu1 %v792_v56, %s3495_s14  ;;  %v4703_v40 = vsel %vm4071_vm5, 0, %v548_v26 }
 0x156   :  { %v1929_v17 = vsel %vm1911_vm14, %v1865_v28, %v1386_v8  ;;  %v4740_v2 = vsel %vm4071_vm5, 0, %v555_v20 }
 0x157   :  { %1281 = vrot.lane.b32.xlu0 %v4636_v43, %s3496_s17  ;;  %3412 = vmatprep.mubr.msk.bf16.mxu0 %vm2002_vm15, %v1929_v17  ;;  %v1388_v41 = vpop.permute.xlu1 %1387 }
 0x158   :  { %v1931_v13 = vsel %vm1911_vm14, %v1867_v62, %v1388_v41 }
 0x159   :  { %v1069_v1 = vpop.permute.xlu0 %1068  ;;  %1283 = vrot.lane.b32.xlu1 %v4676_v25, %s3496_s17  ;;  %3413 = vmatmul.mubr.msk.bf16.gmra.mxu0 %vm2002_vm15, %v1931_v13  ;;  %v721_v13 = vrot.slane %v553_v60, 1 }
 0x15a   :  { %v1610_v59 = vsel %vm1588_vm9, %v1547_v27, %v1069_v1 }
 0x15b   :  { %1343 = vrot.lane.b32.xlu0 %v5703_v30, %s3497_s21  ;;  %v1071_v54 = vpop.permute.xlu1 %1070  ;;  %v722_v61 = vor.u32 %v721_v13, %v550_v42  ;;  %v5716_v42 = vld [vmem:[#allocation18_spill] sm:$0xff] }
 0x15c   :  { %v1612_v23 = vsel %vm1588_vm9, %v1549_v14, %v1071_v54 }
 0x15d   :  { %v1135_v52 = vpop.permute.xlu0 %1134  ;;  %1345 = vrot.lane.b32.xlu1 %v5704_v4, %s3497_s21  ;;  %v795_v49 = vsel %vm3872_vm2, %v722_v61, 0 }
 0x15e   :  { %v1675_v21 = vsel %vm1653_vm10, %v1610_v59, %v1135_v52  ;;  %v1473_v59 = vsel %vm1431_vm7, %v4425_v46, %v5716_v42 }
 0x15f   :  { %1405 = vrot.lane.b32.xlu0 %v792_v56, %s3498_s24  ;;  %v1137_v34 = vpop.permute.xlu1 %1136 }
 0x160   :  { %v1677_v35 = vsel %vm1653_vm10, %v1612_v23, %v1137_v34 }
 0x161   :  { %v1201_v63 = vpop.permute.xlu0 %1200  ;;  %1407 = vrot.lane.b32.xlu1 %v793_v12, %s3498_s24 }
 0x162   :  { %v1740_v33 = vsel %vm1718_vm11, %v1675_v21, %v1201_v63 }
 0x163   :  { %992 = vrot.lane.b32.xlu0 %v792_v56, %s3492_s18  ;;  %v1203_v30 = vpop.permute.xlu1 %1202 }
 0x164   :  { %v1742_v28 = vsel %vm1718_vm11, %v1677_v35, %v1203_v30 }
 0x165   :  { %v1266_v10 = vpop.permute.xlu0 %1265  ;;  %994 = vrot.lane.b32.xlu1 %v793_v12, %s3492_s18 }
 0x166   :  { %v1805_v32 = vsel %vm1783_vm12, %v1740_v33, %v1266_v10  ;;  %v5718_v33 = vld [vmem:[#allocation8_spill] sm:$0xff] }
 0x167   :  { %1088 = vrot.lane.b32.xlu0 %v4676_v25, %s3493_s10  ;;  %v1268_v38 = vpop.permute.xlu1 %1267  ;;  %v564_v45 = vshrl.u32 %v5718_v33, 16 }
 0x169   :  { %v1328_v31 = vpop.permute.xlu0 %1327  ;;  %1090 = vrot.lane.b32.xlu1 %v4703_v40, %s3493_s10 }
 0x16a   :  { %v1869_v9 = vsel %vm1847_vm13, %v1805_v32, %v1328_v31 }
 0x16b   :  { %1154 = vrot.lane.b32.xlu0 %v5704_v4, %s3494_s11  ;;  %v1330_v56 = vpop.permute.xlu1 %1329  ;;  %v1807_v4 = vsel %vm1783_vm12, %v1742_v28, %v1268_v38 }
 0x16c   :  { %v1871_v17 = vsel %vm1847_vm13, %v1807_v4, %v1330_v56  ;;  %v567_v4 = vshll.u32 %v5718_v33, 16 }
 0x16d   :  { %v1390_v18 = vpop.permute.xlu0 %1389  ;;  %1156 = vrot.lane.b32.xlu1 %v5705_v22, %s3494_s11 }
 0x16e   :  { %v1933_v8 = vsel %vm1911_vm14, %v1869_v9, %v1390_v18 }
 0x16f   :  { %1220 = vrot.lane.b32.xlu0 %v793_v12, %s3495_s14  ;;  %3416 = vmatprep.mubr.msk.bf16.mxu0 %vm2002_vm15, %v1933_v8  ;;  %v1392_v39 = vpop.permute.xlu1 %1391  ;;  %v5713_v12 = vld [vmem:[#allocation7_spill] sm:$0xff]  ;;  %v566_v8 = vrot.slane %v564_v45, 7 }
 0x170   :  { %v1935_v62 = vsel %vm1911_vm14, %v1871_v17, %v1392_v39  ;;  %v557_v34 = vshrl.u32 %v5713_v12, 16  ;;  %v560_v26 = vshll.u32 %v5713_v12, 16 }
 0x171   :  { %v1073_v41 = vpop.permute.xlu0 %1072  ;;  %1222 = vrot.lane.b32.xlu1 %v794_v29, %s3495_s14  ;;  %3417 = vmatmul.mubr.msk.bf16.gmra.mxu0 %vm2002_vm15, %v1935_v62  ;;  %v569_v20 = vor.u32 %v567_v4, %v566_v8 }
 0x172   :  { %v559_v30 = vrot.slane %v557_v34, 7  ;;  %v723_v16 = vrot.slane %v560_v26, 1 }
 0x173   :  { %1285 = vrot.lane.b32.xlu0 %v4703_v40, %s3496_s17  ;;  %v1075_v1 = vpop.permute.xlu1 %1074 }
 0x174   :  { %v562_v58 = vor.u32 %v560_v26, %v559_v30  ;;  %v724_v9 = vor.u32 %v723_v16, %v557_v34  ;;  %v5719_v34 = vld [vmem:[#allocation9_spill] sm:$0xff] }
 0x175   :  { %v1139_v54 = vpop.permute.xlu0 %1138  ;;  %1287 = vrot.lane.b32.xlu1 %v4740_v2, %s3496_s17 }
 0x176   :  { %v4775_v46 = vsel %vm4071_vm5, 0, %v562_v58  ;;  %v5722_v58 = vld [vmem:[#allocation20_spill] sm:$0xff] }
 0x177   :  { %1347 = vrot.lane.b32.xlu0 %v5705_v22, %s3497_s21  ;;  %v1141_v52 = vpop.permute.xlu1 %1140  ;;  %v5714_v22 = vld [vmem:[#allocation17_spill] sm:$0xff] }
 0x178   :  { %v1470_v6 = vsel %vm1431_vm7, %v4384_v36, %v5714_v22  ;;  %v1553_v36 = vsel %vm1525_vm8, %v1473_v59, %v5717_v51 }
 0x179   :  { %v1205_v24 = vpop.permute.xlu0 %1204  ;;  %1349 = vrot.lane.b32.xlu1 %v5709_v5, %s3497_s21  ;;  %v1551_v37 = vsel %vm1525_vm8, %v1470_v6, %v5715_v47  ;;  %v1616_v21 = vsel %vm1588_vm9, %v1553_v36, %v1075_v1  ;;  %v4802_v1 = vsel %vm4071_vm5, 0, %v569_v20  ;;  %v574_v47 = vshll.u32 %v5719_v34, 16 }
 0x17a   :  { %v1614_v27 = vsel %vm1588_vm9, %v1551_v37, %v1073_v41  ;;  %v1681_v23 = vsel %vm1653_vm10, %v1616_v21, %v1141_v52  ;;  %v725_v41 = vrot.slane %v567_v4, 1 }
 0x17b   :  { %1409 = vrot.lane.b32.xlu0 %v794_v29, %s3498_s24  ;;  %v1207_v63 = vpop.permute.xlu1 %1206  ;;  %v1679_v31 = vsel %vm1653_vm10, %v1614_v27, %v1139_v54 }
 0x17c   :  { %v1744_v44 = vsel %vm1718_vm11, %v1679_v31, %v1205_v24  ;;  %v1746_v57 = vsel %vm1718_vm11, %v1681_v23, %v1207_v63  ;;  %v726_v61 = vor.u32 %v725_v41, %v564_v45  ;;  %v571_v24 = vshrl.u32 %v5719_v34, 16  ;;  %v5720_v63 = vld [vmem:[#allocation19_spill] sm:$0xff] }
 0x17d   :  { %v1270_v10 = vpop.permute.xlu0 %1269  ;;  %1411 = vrot.lane.b32.xlu1 %v795_v49, %s3498_s24  ;;  %v1476_v30 = vsel %vm1431_vm7, %v4457_v19, %v5720_v63  ;;  %v1479_v19 = vsel %vm1431_vm7, %v4492_v7, %v5722_v58  ;;  %v727_v23 = vrot.slane %v574_v47, 1 }
 0x17e   :  { %v1809_v3 = vsel %vm1783_vm12, %v1744_v44, %v1270_v10  ;;  %v797_v26 = vsel %vm3872_vm2, %v726_v61, 0  ;;  %v5721_v10 = vld [vmem:[#allocation41_spill] sm:$0xff]  ;;  %v573_v6 = vrot.slane %v571_v24, 7 }
 0x17f   :  { %996 = vrot.lane.b32.xlu0 %v794_v29, %s3492_s18  ;;  %v1272_v0 = vpop.permute.xlu1 %1271 }
 0x180   :  { %v1811_v35 = vsel %vm1783_vm12, %v1746_v57, %v1272_v0  ;;  %v576_v44 = vor.u32 %v574_v47, %v573_v6  ;;  %v5727_v6 = vld [vmem:[#allocation44_spill] sm:$0xff] }
 0x181   :  { %v1332_v38 = vpop.permute.xlu0 %1331  ;;  %998 = vrot.lane.b32.xlu1 %v795_v49, %s3492_s18 }
 0x182   :  { %v1873_v32 = vsel %vm1847_vm13, %v1809_v3, %v1332_v38  ;;  %v5723_v38 = vld [vmem:[#allocation43_spill] sm:$0xff]  ;;  %v4852_v57 = vsel %vm4071_vm5, 0, %v576_v44 }
 0x183   :  { %1092 = vrot.lane.b32.xlu0 %v4740_v2, %s3493_s10  ;;  %v1334_v14 = vpop.permute.xlu1 %1333  ;;  %v1557_v42 = vsel %vm1525_vm8, %v1479_v19, %v5723_v38 }
 0x184   :  { %v1875_v18 = vsel %vm1847_vm13, %v1811_v35, %v1334_v14 }
 0x185   :  { %v1394_v56 = vpop.permute.xlu0 %1393  ;;  %1094 = vrot.lane.b32.xlu1 %v4775_v46, %s3493_s10 }
 0x186   :  { %v1937_v60 = vsel %vm1911_vm14, %v1873_v32, %v1394_v56 }
 0x187   :  { %1158 = vrot.lane.b32.xlu0 %v5709_v5, %s3494_s11  ;;  %3420 = vmatprep.mubr.msk.bf16.mxu0 %vm2002_vm15, %v1937_v60  ;;  %v1396_v28 = vpop.permute.xlu1 %1395  ;;  %v796_v5 = vsel %vm3872_vm2, %v724_v9, 0  ;;  %v5724_v60 = vld [vmem:[#allocation10_spill] sm:$0xff] }
 0x188   :  { %v1939_v29 = vsel %vm1911_vm14, %v1875_v18, %v1396_v28  ;;  %v578_v35 = vshrl.u32 %v5724_v60, 16  ;;  %v728_v28 = vor.u32 %v727_v23, %v571_v24  ;;  %v5725_v24 = vld [vmem:[#allocation11_spill] sm:$0xff] }
 0x189   :  { %v1077_v17 = vpop.permute.xlu0 %1076  ;;  %1160 = vrot.lane.b32.xlu1 %v5713_v12, %s3494_s11  ;;  %3421 = vmatmul.mubr.msk.bf16.gmra.mxu0 %vm2002_vm15, %v1939_v29  ;;  %v581_v29 = vshll.u32 %v5724_v60, 16  ;;  %v588_v19 = vshll.u32 %v5725_v24, 16 }
 0x18a   :  { %v580_v4 = vrot.slane %v578_v35, 7 }
 0x18b   :  { %1224 = vrot.lane.b32.xlu0 %v795_v49, %s3495_s14  ;;  %v1079_v39 = vpop.permute.xlu1 %1078  ;;  %v731_v23 = vrot.slane %v588_v19, 1 }
 0x18c   :  { %v1620_v31 = vsel %vm1588_vm9, %v1557_v42, %v1079_v39  ;;  %v583_v20 = vor.u32 %v581_v29, %v580_v4 }
 0x18d   :  { %v1143_v62 = vpop.permute.xlu0 %1142  ;;  %1226 = vrot.lane.b32.xlu1 %v796_v5, %s3495_s14 }
 0x18f   :  { %1289 = vrot.lane.b32.xlu0 %v4775_v46, %s3496_s17  ;;  %v1145_v13 = vpop.permute.xlu1 %1144 }
 0x190   :  { %v1685_v7 = vsel %vm1653_vm10, %v1620_v31, %v1145_v13  ;;  %v4873_v13 = vsel %vm4071_vm5, 0, %v583_v20 }
 0x191   :  { %v1209_v54 = vpop.permute.xlu0 %1208  ;;  %1291 = vrot.lane.b32.xlu1 %v4802_v1, %s3496_s17 }
 0x193   :  { %1351 = vrot.lane.b32.xlu0 %v5713_v12, %s3497_s21  ;;  %v1211_v52 = vpop.permute.xlu1 %1210  ;;  %v1555_v12 = vsel %vm1525_vm8, %v1476_v30, %v5721_v10 }
 0x194   :  { %v1618_v37 = vsel %vm1588_vm9, %v1555_v12, %v1077_v17  ;;  %v1750_v3 = vsel %vm1718_vm11, %v1685_v7, %v1211_v52 }
 0x195   :  { %v1274_v49 = vpop.permute.xlu0 %1273  ;;  %1353 = vrot.lane.b32.xlu1 %v5718_v33, %s3497_s21  ;;  %v1683_v27 = vsel %vm1653_vm10, %v1618_v37, %v1143_v62 }
 0x196   :  { %v1748_v59 = vsel %vm1718_vm11, %v1683_v27, %v1209_v54 }
 0x197   :  { %1413 = vrot.lane.b32.xlu0 %v796_v5, %s3498_s24  ;;  %v4819_v22 = vpop.permute.xlu1 %1275  ;;  %v1813_v51 = vsel %vm1783_vm12, %v1748_v59, %v1274_v49  ;;  %v585_v49 = vshrl.u32 %v5725_v24, 16 }
 0x198   :  { %v1815_v45 = vsel %vm1783_vm12, %v1750_v3, %v4819_v22 }
 0x199   :  { %v1336_v0 = vpop.permute.xlu0 %1335  ;;  %1415 = vrot.lane.b32.xlu1 %v797_v26, %s3498_s24  ;;  %v587_v58 = vrot.slane %v585_v49, 7 }
 0x19a   :  { %v1877_v16 = vsel %vm1847_vm13, %v1813_v51, %v1336_v0 }
 0x19b   :  { %1000 = vrot.lane.b32.xlu0 %v796_v5, %s3492_s18  ;;  %v4834_v36 = vpop.permute.xlu1 %1337  ;;  %v798_v5 = vsel %vm3872_vm2, %v728_v28, 0 }
 0x19c   :  { %v1879_v32 = vsel %vm1847_vm13, %v1815_v45, %v4834_v36 }
 0x19d   :  { %v1398_v21 = vpop.permute.xlu0 %1397  ;;  %1002 = vrot.lane.b32.xlu1 %v797_v26, %s3492_s18 }
 0x19e   :  { %v1941_v14 = vsel %vm1911_vm14, %v1877_v16, %v1398_v21  ;;  %v590_v16 = vor.u32 %v588_v19, %v587_v58 }
 0x19f   :  { %1096 = vrot.lane.b32.xlu0 %v4802_v1, %s3493_s10  ;;  %3424 = vmatprep.mubr.msk.bf16.mxu0 %vm2002_vm15, %v1941_v14  ;;  %v4848_v56 = vpop.permute.xlu1 %1399 }
 0x1a0   :  { %v1943_v18 = vsel %vm1911_vm14, %v1879_v32, %v4848_v56 }
 0x1a1   :  { %v1081_v9 = vpop.permute.xlu0 %1080  ;;  %1098 = vrot.lane.b32.xlu1 %v4852_v57, %s3493_s10  ;;  %3425 = vmatmul.mubr.msk.bf16.gmra.mxu0 %vm2002_vm15, %v1943_v18  ;;  %v5728_v18 = vld [vmem:[#allocation12_spill] sm:$0xff] }
 0x1a2   :  { %v1622_v63 = vsel %vm1588_vm9, %v4402_v11, %v1081_v9  ;;  %v4917_v9 = vsel %vm4071_vm5, 0, %v590_v16  ;;  %v592_v28 = vshrl.u32 %v5728_v18, 16  ;;  %v5729_v16 = vld [vmem:[#allocation22_spill] sm:$0xff] }
 0x1a3   :  { %1162 = vrot.lane.b32.xlu0 %v5718_v33, %s3494_s11  ;;  %v1083_v8 = vpop.permute.xlu1 %1082  ;;  %v729_v33 = vrot.slane %v581_v29, 1 }
 0x1a5   :  { %v1147_v17 = vpop.permute.xlu0 %1146  ;;  %1164 = vrot.lane.b32.xlu1 %v5719_v34, %s3494_s11  ;;  %v730_v61 = vor.u32 %v729_v33, %v578_v35 }
 0x1a6   :  { %v1687_v12 = vsel %vm1653_vm10, %v1622_v63, %v1147_v17 }
 0x1a7   :  { %1228 = vrot.lane.b32.xlu0 %v797_v26, %s3495_s14  ;;  %v1149_v39 = vpop.permute.xlu1 %1148  ;;  %v5726_v26 = vld [vmem:[#allocation21_spill] sm:$0xff]  ;;  %v799_v11 = vsel %vm3872_vm2, %v730_v61, 0 }
 0x1a8   :  { %v1482_v10 = vsel %vm1431_vm7, %v4565_v50, %v5726_v26 }
 0x1a9   :  { %v1213_v62 = vpop.permute.xlu0 %1212  ;;  %1230 = vrot.lane.b32.xlu1 %v798_v5, %s3495_s14 }
 0x1aa   :  { %v1752_v47 = vsel %vm1718_vm11, %v1687_v12, %v1213_v62 }
 0x1ab   :  { %1293 = vrot.lane.b32.xlu0 %v4852_v57, %s3496_s17  ;;  %v1215_v41 = vpop.permute.xlu1 %1214 }
 0x1ad   :  { %v1278_v54 = vpop.permute.xlu0 %1277  ;;  %1295 = vrot.lane.b32.xlu1 %v4873_v13, %s3496_s17 }
 0x1ae   :  { %v1817_v0 = vsel %vm1783_vm12, %v1752_v47, %v1278_v54 }
 0x1af   :  { %1355 = vrot.lane.b32.xlu0 %v5719_v34, %s3497_s21  ;;  %v1280_v52 = vpop.permute.xlu1 %1279  ;;  %v1559_v34 = vsel %vm1525_vm8, %v1482_v10, %v5727_v6 }
 0x1b0   :  { %v1624_v37 = vsel %vm1588_vm9, %v1559_v34, %v1083_v8 }
 0x1b1   :  { %v1340_v30 = vpop.permute.xlu0 %1339  ;;  %1357 = vrot.lane.b32.xlu1 %v5724_v60, %s3497_s21  ;;  %v1689_v27 = vsel %vm1653_vm10, %v1624_v37, %v1149_v39  ;;  %v595_v39 = vshll.u32 %v5728_v18, 16 }
 0x1b2   :  { %v1881_v38 = vsel %vm1847_vm13, %v1817_v0, %v1340_v30  ;;  %v1754_v59 = vsel %vm1718_vm11, %v1689_v27, %v1215_v41  ;;  %v594_v41 = vrot.slane %v592_v28, 7 }
 0x1b3   :  { %1417 = vrot.lane.b32.xlu0 %v798_v5, %s3498_s24  ;;  %v1342_v50 = vpop.permute.xlu1 %1341  ;;  %v1819_v51 = vsel %vm1783_vm12, %v1754_v59, %v1280_v52 }
 0x1b4   :  { %v1883_v44 = vsel %vm1847_vm13, %v1819_v51, %v1342_v50  ;;  %v597_v0 = vor.u32 %v595_v39, %v594_v41 }
 0x1b5   :  { %v1402_v42 = vpop.permute.xlu0 %1401  ;;  %1419 = vrot.lane.b32.xlu1 %v799_v11, %s3498_s24 }
 0x1b6   :  { %v1945_v31 = vsel %vm1911_vm14, %v1881_v38, %v1402_v42  ;;  %v733_v42 = vrot.slane %v595_v39, 1  ;;  %v4959_v51 = vsel %vm4071_vm5, 0, %v597_v0 }
 0x1b7   :  { %1004 = vrot.lane.b32.xlu0 %v798_v5, %s3492_s18  ;;  %3428 = vmatprep.mubr.msk.bf16.mxu1 %vm2002_vm15, %v1945_v31  ;;  %v1404_v7 = vpop.permute.xlu1 %1403  ;;  %v732_v5 = vor.u32 %v731_v23, %v585_v49 }
 0x1b8   :  { %v1947_v21 = vsel %vm1911_vm14, %v1883_v44, %v1404_v7 }
 0x1b9   :  { %v4907_v3 = vpop.permute.xlu0 %988  ;;  %1006 = vrot.lane.b32.xlu1 %v799_v11, %s3492_s18  ;;  %v3398_v14 = vpop.f32.mrf.mxu0  ;;  %3429 = vmatmul.mubr.msk.bf16.vlgmr.msra.gmra.mxu1 %vm2002_vm15, %v1947_v21  ;;  %v800_v10 = vsel %vm3872_vm2, %v732_v5, 0  ;;  %v1485_v21 = vsel %vm1431_vm7, %v4573_v55, %v5729_v16  ;;  %v5731_v5 = vld [vmem:[#allocation23_spill] sm:$0xff]  ;;  %v3348_v55 = vld [vmem:[%s5588_s0 + $0xf8] sm:$0xff]  }
 0x1ba   :  { %v3128_v45 = vpack.c.bf16 %v3398_v14, %v3398_v14  ;;  %v2684_v26 = vsel %vm1431_vm7, %v3398_v14, 0.0  ;;  %v1488_v39 = vsel %vm1431_vm7, %v4607_v48, %v5731_v5 }
 0x1bb   :  { %1100 = vrot.lane.b32.xlu0 %v4873_v13, %s3493_s10  ;;  %v4913_v32 = vpop.permute.xlu1 %990  ;;  %v2105_v35 = vpop.f32.mrf.mxu0 }
 0x1bc   :  { %2619 = vst.msk [vmem:[%s5592_s4 + $0x8] sm:$0xf] %vm2616_vm0, %v3128_v45  ;;  %v3126_v4 = vpack.c.bf16 %v2105_v35, %v2105_v35  ;;  %v2814_v20 = vmul.f32 %v2105_v35, %v2105_v35  ;;  %v2681_v54 = vsel %vm1431_vm7, %v2105_v35, 0.0  ;;  %v5730_v45 = vld [vmem:[#allocation13_spill] sm:$0xff]  ;;  %v1561_v35 = vsel %vm1525_vm8, %v1485_v21, %v4907_v3  ;;  %v5732_v21 = vld [vmem:[#allocation14_spill] sm:$0xff] }
 0x1bd   :  { %v1085_v8 = vpop.permute.xlu0 %1084  ;;  %1102 = vrot.lane.b32.xlu1 %v4917_v9, %s3493_s10  ;;  %v3399_v29 = vpop.f32.mrf.mxu0  ;;  %v599_v23 = vshrl.u32 %v5730_v45, 16 }
 0x1be   :  { %2617 = vst.msk [vmem:[%s5592_s4] sm:$0xf] %vm2616_vm0, %v3126_v4  ;;  %v3129_v17 = vpack.c.bf16 %v3399_v29, %v3399_v29  ;;  %v2878_v12 = vsel %vm1431_vm7, %v2814_v20, 0.0  ;;  %v2817_v6 = vmul.f32 %v3399_v29, %v3399_v29  ;;  %v2686_v50 = vsel %vm1431_vm7, %v3399_v29, 0.0 }
 0x1bf   :  { %1166 = vrot.lane.b32.xlu0 %v5724_v60, %s3494_s11  ;;  %v1087_v62 = vpop.permute.xlu1 %1086  ;;  %v2108_v33 = vpop.f32.mrf.mxu0  ;;  %v2816_v60 = vmul.f32 %v3398_v14, %v3398_v14  ;;  %v734_v14 = vor.u32 %v733_v42, %v592_v28  ;;  %v1626_v29 = vsel %vm1588_vm9, %v1561_v35, %v1085_v8  ;;  %v601_v48 = vrot.slane %v599_v23, 7 }
 0x1c0   :  { %2620 = vst.msk [vmem:[%s5592_s4 + $0xc] sm:$0xf] %vm2616_vm0, %v3129_v17  ;;  %v3127_v52 = vpack.c.bf16 %v2108_v33, %v2108_v33  ;;  %v2682_v63 = vsel %vm1431_vm7, %v2108_v33, 0.0  ;;  %v2815_v49 = vmul.f32 %v2108_v33, %v2108_v33  ;;  %v2883_v59 = vsel %vm1431_vm7, %v2817_v6, 0.0 }
 0x1c1   :  { %v1151_v61 = vpop.permute.xlu0 %1150  ;;  %v2683_v30 = vadd.f32 %v2682_v63, %v2681_v54  ;;  %1168 = vrot.lane.b32.xlu1 %v5725_v24, %s3494_s11  ;;  %v2881_v27 = vsel %vm1431_vm7, %v2816_v60, 0.0  ;;  %v4987_v28 = vsel %vm3872_vm2, %v734_v14, 0  ;;  %v602_v8 = vshll.u32 %v5730_v45, 16 }
 0x1c2   :  { %2618 = vst.msk [vmem:[%s5592_s4 + $0x4] sm:$0xf] %vm2616_vm0, %v3127_v52  ;;  %v2879_v47 = vsel %vm1431_vm7, %v2815_v49, 0.0  ;;  %v1691_v20 = vsel %vm1653_vm10, %v1626_v29, %v1151_v61  ;;  %v3316_v63 = vunpack.c.l.bf16 %v3348_v55 }
 0x1c3   :  { %1232 = vrot.lane.b32.xlu0 %v799_v11, %s3495_s14  ;;  %v2685_v34 = vadd.f32 %v2684_v26, %v2683_v30  ;;  %v1153_v37 = vpop.permute.xlu1 %1152  ;;  %v2880_v58 = vadd.f32 %v2879_v47, %v2878_v12  ;;  %v3317_v26 = vunpack.c.h.bf16 %v3348_v55  ;;  %v604_v6 = vor.u32 %v602_v8, %v601_v48 }
 0x1c4   :  { %v735_v16 = vrot.slane %v602_v8, 1 }
 0x1c5   :  { %v1217_v19 = vpop.permute.xlu0 %1216  ;;  %1234 = vrot.lane.b32.xlu1 %v800_v10, %s3495_s14  ;;  %v2687_v11 = vadd.f32 %v2686_v50, %v2685_v34  ;;  %v2882_v38 = vadd.f32 %v2881_v27, %v2880_v58  ;;  %v5030_v29 = vsel %vm4071_vm5, 0, %v604_v6 }
 0x1c6   :  { %v1756_v3 = vsel %vm1718_vm11, %v1691_v20, %v1217_v19  ;;  %v3488_v19 = vld [vmem:[%s5589_s1] ss:$0 sm:$0xff] }
 0x1c7   :  { %1297 = vrot.lane.b32.xlu0 %v4917_v9, %s3496_s17  ;;  %v1219_v31 = vpop.permute.xlu1 %1218  ;;  %v2884_v7 = vadd.f32 %v2883_v59, %v2882_v38  ;;  %v218_v27 = vmul.f32 %v3488_v19, %v3316_v63  ;;  %v3489_v20 = vld [vmem:[%s5590_s2] ss:$0 sm:$0xff]  ;;  %v609_v63 = vshll.u32 %v5732_v21, 16 }
 0x1c9   :  { %v1282_v44 = vpop.permute.xlu0 %1281  ;;  %1299 = vrot.lane.b32.xlu1 %v4959_v51, %s3496_s17  ;;  %v288_v55 = vadd.f32 %v3489_v20, %v218_v27 }
 0x1ca   :  { %v1821_v41 = vsel %vm1783_vm12, %v1756_v3, %v1282_v44 }
 0x1cb   :  { %1359 = vrot.lane.b32.xlu0 %v5725_v24, %s3497_s21  ;;  %v1284_v4 = vpop.permute.xlu1 %1283  ;;  %v1563_v24 = vsel %vm1525_vm8, %v1488_v39, %v4913_v32 }
 0x1cc   :  { %v1628_v33 = vsel %vm1588_vm9, %v1563_v24, %v1087_v62 }
 0x1cd   :  { %v1344_v17 = vpop.permute.xlu0 %1343  ;;  %1361 = vrot.lane.b32.xlu1 %v5728_v18, %s3497_s21  ;;  %v1693_v32 = vsel %vm1653_vm10, %v1628_v33, %v1153_v37  ;;  %v736_v33 = vor.u32 %v735_v16, %v599_v23 }
 0x1ce   :  { %v1885_v61 = vsel %vm1847_vm13, %v1821_v41, %v1344_v17  ;;  %v1758_v60 = vsel %vm1718_vm11, %v1693_v32, %v1219_v31  ;;  %v219_v31 = vmul.f32 %v3488_v19, %v3317_v26  ;;  %v737_v19 = vrot.slane %v609_v63, 1 }
 0x1cf   :  { %1421 = vrot.lane.b32.xlu0 %v800_v10, %s3498_s24  ;;  %v1346_v54 = vpop.permute.xlu1 %1345  ;;  %v1823_v62 = vsel %vm1783_vm12, %v1758_v60, %v1284_v4  ;;  %v802_v6 = vsel %vm3872_vm2, %v736_v33, 0 }
 0x1d0   :  { %v1887_v34 = vsel %vm1847_vm13, %v1823_v62, %v1346_v54 }
 0x1d1   :  { %v1406_v52 = vpop.permute.xlu0 %1405  ;;  %1423 = vrot.lane.b32.xlu1 %v4987_v28, %s3498_s24  ;;  %v3402_v49 = vpop.f32.mrf.mxu0 }
 0x1d2   :  { %v1949_v30 = vsel %vm1911_vm14, %v1885_v61, %v1406_v52  ;;  %v3132_v12 = vpack.c.bf16 %v3402_v49, %v3402_v49  ;;  %v2820_v24 = vmul.f32 %v3402_v49, %v3402_v49  ;;  %v2692_v41 = vsel %vm1431_vm7, %v3402_v49, 0.0 }
 0x1d3   :  { %1008 = vrot.lane.b32.xlu0 %v800_v10, %s3492_s18  ;;  %3432 = vmatprep.mubr.msk.bf16.mxu1 %vm2002_vm15, %v1949_v30  ;;  %v1408_v47 = vpop.permute.xlu1 %1407  ;;  %v2121_v37 = vpop.f32.mrf.mxu0 }
 0x1d4   :  { %2623 = vst.msk [vmem:[%s5592_s4 + $0x18] sm:$0xf] %vm2616_vm0, %v3132_v12  ;;  %v1951_v0 = vsel %vm1911_vm14, %v1887_v34, %v1408_v47  ;;  %v3130_v58 = vpack.c.bf16 %v2121_v37, %v2121_v37  ;;  %v2688_v10 = vsel %vm1431_vm7, %v2121_v37, 0.0  ;;  %v2818_v42 = vmul.f32 %v2121_v37, %v2121_v37 }
 0x1d5   :  { %v5009_v50 = vpop.permute.xlu0 %992  ;;  %v2689_v38 = vadd.f32 %v2688_v10, %v2687_v11  ;;  %1010 = vrot.lane.b32.xlu1 %v4987_v28, %s3492_s18  ;;  %v3403_v59 = vpop.f32.mrf.mxu0  ;;  %3433 = vmatmul.mubr.msk.bf16.gmra.mxu1 %vm2002_vm15, %v1951_v0  ;;  %v606_v11 = vshrl.u32 %v5732_v21, 16  ;;  %v2889_v62 = vsel %vm1431_vm7, %v2820_v24, 0.0 }
 0x1d6   :  { %2621 = vst.msk [vmem:[%s5592_s4 + $0x10] sm:$0xf] %vm2616_vm0, %v3130_v58  ;;  %v3133_v44 = vpack.c.bf16 %v3403_v59, %v3403_v59  ;;  %v2885_v14 = vsel %vm1431_vm7, %v2818_v42, 0.0  ;;  %v2821_v54 = vmul.f32 %v3403_v59, %v3403_v59  ;;  %v2694_v12 = vsel %vm1431_vm7, %v3403_v59, 0.0 }
 0x1d7   :  { %1104 = vrot.lane.b32.xlu0 %v4959_v51, %s3493_s10  ;;  %v5026_v35 = vpop.permute.xlu1 %994  ;;  %v2124_v4 = vpop.f32.mrf.mxu0  ;;  %v2886_v17 = vadd.f32 %v2885_v14, %v2884_v7  ;;  %v289_v7 = vadd.f32 %v3489_v20, %v219_v31  ;;  %v608_v52 = vrot.slane %v606_v11, 7  ;;  %v738_v59 = vor.u32 %v737_v19, %v606_v11  ;;  %v5734_v20 = vld [vmem:[#allocation25_spill] sm:$0xff] }
 0x1d8   :  { %2624 = vst.msk [vmem:[%s5592_s4 + $0x1c] sm:$0xf] %vm2616_vm0, %v3133_v44  ;;  %v3131_v39 = vpack.c.bf16 %v2124_v4, %v2124_v4  ;;  %v2690_v3 = vsel %vm1431_vm7, %v2124_v4, 0.0  ;;  %v2819_v48 = vmul.f32 %v2124_v4, %v2124_v4  ;;  %v2891_v47 = vsel %vm1431_vm7, %v2821_v54, 0.0  ;;  %v5733_v44 = vld [vmem:[#allocation24_spill] sm:$0xff] }
 0x1d9   :  { %v1089_v5 = vpop.permute.xlu0 %1088  ;;  %1106 = vrot.lane.b32.xlu1 %v5030_v29, %s3493_s10  ;;  %v2691_v8 = vadd.f32 %v2690_v3, %v2689_v38  ;;  %v353_v23 = vmax.f32 %v289_v7, 0.0  ;;  %v611_v0 = vor.u32 %v609_v63, %v608_v52  ;;  %v1491_v16 = vsel %vm1431_vm7, %v4636_v43, %v5733_v44 }
 0x1da   :  { %2622 = vst.msk [vmem:[%s5592_s4 + $0x14] sm:$0xf] %vm2616_vm0, %v3131_v39  ;;  %v2887_v32 = vsel %vm1431_vm7, %v2819_v48, 0.0  ;;  %v1565_v14 = vsel %vm1525_vm8, %v1491_v16, %v5009_v50  ;;  %v1494_v11 = vsel %vm1431_vm7, %v4676_v25, %v5734_v20 }
 0x1db   :  { %1170 = vrot.lane.b32.xlu0 %v5728_v18, %s3494_s11  ;;  %v1091_v61 = vpop.permute.xlu1 %1090  ;;  %v2693_v60 = vadd.f32 %v2692_v41, %v2691_v8  ;;  %v2888_v30 = vadd.f32 %v2887_v32, %v2886_v17  ;;  %v352_v18 = vmax.f32 %v288_v55, 0.0  ;;  %v1630_v17 = vsel %vm1588_vm9, %v1565_v14, %v1089_v5 }
 0x1dc   :  { %v1567_v5 = vsel %vm1525_vm8, %v1494_v11, %v5026_v35 }
 0x1dd   :  { %v1155_v26 = vpop.permute.xlu0 %1154  ;;  %1172 = vrot.lane.b32.xlu1 %v5730_v45, %s3494_s11  ;;  %v2890_v49 = vadd.f32 %v2889_v62, %v2888_v30  ;;  %v2695_v34 = vadd.f32 %v2694_v12, %v2693_v60  ;;  %v5063_v27 = vpack.c.bf16 %v353_v23, %v352_v18  ;;  %v1632_v48 = vsel %vm1588_vm9, %v1567_v5, %v1091_v61 }
 0x1de   :  { %v1695_v55 = vsel %vm1653_vm10, %v1630_v17, %v1155_v26 }
 0x1df   :  { %1236 = vrot.lane.b32.xlu0 %v4987_v28, %s3495_s14  ;;  %v1157_v37 = vpop.permute.xlu1 %1156  ;;  %v2892_v10 = vadd.f32 %v2891_v47, %v2890_v49  ;;  %v5069_v28 = vsel %vm4071_vm5, 0, %v611_v0  ;;  %v812_v31 = vshrl.u32 %v5063_v27, 16  ;;  %v815_v3 = vshll.u32 %v5063_v27, 16 }
 0x1e0   :  { %v1697_v41 = vsel %vm1653_vm10, %v1632_v48, %v1157_v37 }
 0x1e1   :  { %v1221_v58 = vpop.permute.xlu0 %1220  ;;  %1238 = vrot.lane.b32.xlu1 %v802_v6, %s3495_s14  ;;  %v814_v50 = vrot.slane %v812_v31, 7  ;;  %v824_v44 = vrot.slane %v815_v3, 1 }
 0x1e2   :  { %v1760_v24 = vsel %vm1718_vm11, %v1695_v55, %v1221_v58 }
 0x1e3   :  { %1301 = vrot.lane.b32.xlu0 %v5030_v29, %s3496_s17  ;;  %v1223_v38 = vpop.permute.xlu1 %1222  ;;  %v817_v18 = vor.u32 %v815_v3, %v814_v50  ;;  %v825_v53 = vor.u32 %v824_v44, %v812_v31 }
 0x1e4   :  { %v1762_v63 = vsel %vm1718_vm11, %v1697_v41, %v1223_v38 }
 0x1e5   :  { %v1286_v42 = vpop.permute.xlu0 %1285  ;;  %1303 = vrot.lane.b32.xlu1 %v5069_v28, %s3496_s17 }
 0x1e6   :  { %v1825_v7 = vsel %vm1783_vm12, %v1760_v24, %v1286_v42 }
 0x1e7   :  { %1363 = vrot.lane.b32.xlu0 %v5730_v45, %s3497_s21  ;;  %v1288_v4 = vpop.permute.xlu1 %1287  ;;  %v5090_v45 = vsel %vm3872_vm2, %v738_v59, 0  ;;  %v821_v59 = vsel %vm4071_vm5, 0, %v817_v18 }
 0x1e8   :  { %v1827_v62 = vsel %vm1783_vm12, %v1762_v63, %v1288_v4  ;;  %v5736_v63 = vld [vmem:[#allocation27_spill] sm:$0xff] }
 0x1e9   :  { %v1348_v39 = vpop.permute.xlu0 %1347  ;;  %1365 = vrot.lane.b32.xlu1 %v5732_v21, %s3497_s21  ;;  %v3406_v43 = vpop.f32.mrf.mxu0 }
 0x1ea   :  { %v3136_v25 = vpack.c.bf16 %v3406_v43, %v3406_v43  ;;  %v1889_v54 = vsel %vm1847_vm13, %v1825_v7, %v1348_v39  ;;  %v2824_v19 = vmul.f32 %v3406_v43, %v3406_v43  ;;  %v2700_v16 = vsel %vm1431_vm7, %v3406_v43, 0.0 }
 0x1eb   :  { %1425 = vrot.lane.b32.xlu0 %v802_v6, %s3498_s24  ;;  %v1350_v8 = vpop.permute.xlu1 %1349  ;;  %v2137_v33 = vpop.f32.mrf.mxu0  ;;  %v829_v7 = vsel %vm3872_vm2, %v825_v53, 0 }
 0x1ec   :  { %2627 = vst.msk [vmem:[%s5592_s4 + $0x28] sm:$0xf] %vm2616_vm0, %v3136_v25  ;;  %v3134_v32 = vpack.c.bf16 %v2137_v33, %v2137_v33  ;;  %v2696_v52 = vsel %vm1431_vm7, %v2137_v33, 0.0  ;;  %v2822_v30 = vmul.f32 %v2137_v33, %v2137_v33  ;;  %v1891_v23 = vsel %vm1847_vm13, %v1827_v62, %v1350_v8 }
 0x1ed   :  { %v1410_v35 = vpop.permute.xlu0 %1409  ;;  %v2697_v60 = vadd.f32 %v2696_v52, %v2695_v34  ;;  %1427 = vrot.lane.b32.xlu1 %v5090_v45, %s3498_s24  ;;  %v3407_v26 = vpop.f32.mrf.mxu0  ;;  %v2897_v55 = vsel %vm1431_vm7, %v2824_v19, 0.0 }
 0x1ee   :  { %v1953_v61 = vsel %vm1911_vm14, %v1889_v54, %v1410_v35  ;;  %2625 = vst.msk [vmem:[%s5592_s4 + $0x20] sm:$0xf] %vm2616_vm0, %v3134_v32  ;;  %v3137_v12 = vpack.c.bf16 %v3407_v26, %v3407_v26  ;;  %v2893_v49 = vsel %vm1431_vm7, %v2822_v30, 0.0  ;;  %v2825_v14 = vmul.f32 %v3407_v26, %v3407_v26  ;;  %v5735_v54 = vld [vmem:[#allocation26_spill] sm:$0xff] }
 0x1ef   :  { %1012 = vrot.lane.b32.xlu0 %v802_v6, %s3492_s18  ;;  %3436 = vmatprep.mubr.msk.bf16.mxu1 %vm2002_vm15, %v1953_v61  ;;  %v1412_v34 = vpop.permute.xlu1 %1411  ;;  %v2140_v47 = vpop.f32.mrf.mxu0  ;;  %v2894_v37 = vadd.f32 %v2893_v49, %v2892_v10  ;;  %v2702_v50 = vsel %vm1431_vm7, %v3407_v26, 0.0  ;;  %v1497_v35 = vsel %vm1431_vm7, %v4703_v40, %v5735_v54  ;;  %v1500_v61 = vsel %vm1431_vm7, %v4740_v2, %v5736_v63 }
 0x1f0   :  { %2628 = vst.msk [vmem:[%s5592_s4 + $0x2c] sm:$0xf] %vm2616_vm0, %v3137_v12  ;;  %v1955_v0 = vsel %vm1911_vm14, %v1891_v23, %v1412_v34  ;;  %v3135_v6 = vpack.c.bf16 %v2140_v47, %v2140_v47  ;;  %v2698_v38 = vsel %vm1431_vm7, %v2140_v47, 0.0  ;;  %v2823_v42 = vmul.f32 %v2140_v47, %v2140_v47 }
 0x1f1   :  { %v997_v58 = vpop.permute.xlu0 %996  ;;  %1014 = vrot.lane.b32.xlu1 %v5090_v45, %s3492_s18  ;;  %3437 = vmatmul.mubr.msk.bf16.gmra.mxu1 %vm2002_vm15, %v1955_v0  ;;  %v2699_v10 = vadd.f32 %v2698_v38, %v2697_v60  ;;  %v2899_v24 = vsel %vm1431_vm7, %v2825_v14, 0.0 }
 0x1f2   :  { %2626 = vst.msk [vmem:[%s5592_s4 + $0x24] sm:$0xf] %vm2616_vm0, %v3135_v6  ;;  %v2895_v4 = vsel %vm1431_vm7, %v2823_v42, 0.0  ;;  %v1569_v15 = vsel %vm1525_vm8, %v1497_v35, %v997_v58 }
 0x1f3   :  { %1108 = vrot.lane.b32.xlu0 %v5069_v28, %s3493_s10  ;;  %v999_v17 = vpop.permute.xlu1 %998  ;;  %v2701_v39 = vadd.f32 %v2700_v16, %v2699_v10  ;;  %v2896_v20 = vadd.f32 %v2895_v4, %v2894_v37 }
 0x1f4   :  { %v1571_v26 = vsel %vm1525_vm8, %v1500_v61, %v999_v17 }
 0x1f5   :  { %v1093_v11 = vpop.permute.xlu0 %1092  ;;  %1110 = vrot.lane.b32.xlu1 %v821_v59, %s3493_s10  ;;  %v2898_v5 = vadd.f32 %v2897_v55, %v2896_v20  ;;  %v2703_v43 = vadd.f32 %v2702_v50, %v2701_v39 }
 0x1f6   :  { %v1634_v60 = vsel %vm1588_vm9, %v1569_v15, %v1093_v11 }
 0x1f7   :  { %1174 = vrot.lane.b32.xlu0 %v5732_v21, %s3494_s11  ;;  %v1095_v25 = vpop.permute.xlu1 %1094  ;;  %v2900_v48 = vadd.f32 %v2899_v24, %v2898_v5 }
 0x1f8   :  { %v1636_v2 = vsel %vm1588_vm9, %v1571_v26, %v1095_v25 }
 0x1f9   :  { %v1159_v3 = vpop.permute.xlu0 %1158  ;;  %1176 = vrot.lane.b32.xlu1 %v5063_v27, %s3494_s11 }
 0x1fa   :  { %v1699_v62 = vsel %vm1653_vm10, %v1634_v60, %v1159_v3 }
 0x1fb   :  { %1240 = vrot.lane.b32.xlu0 %v5090_v45, %s3495_s14  ;;  %v1161_v8 = vpop.permute.xlu1 %1160 }
 0x1fc   :  { %v1701_v47 = vsel %vm1653_vm10, %v1636_v2, %v1161_v8  ;;  %v5738_v2 = vld [vmem:[#allocation29_spill] sm:$0xff] }
 0x1fd   :  { %v1225_v21 = vpop.permute.xlu0 %1224  ;;  %1242 = vrot.lane.b32.xlu1 %v829_v7, %s3495_s14 }
 0x1fe   :  { %v1764_v49 = vsel %vm1718_vm11, %v1699_v62, %v1225_v21 }
 0x1ff   :  { %1305 = vrot.lane.b32.xlu0 %v821_v59, %s3496_s17  ;;  %v1227_v31 = vpop.permute.xlu1 %1226 }
 0x200   :  { %v1766_v19 = vsel %vm1718_vm11, %v1701_v47, %v1227_v31 }
 0x201   :  { %v1290_v33 = vpop.permute.xlu0 %1289  ;;  %1367 = vrot.lane.b32.xlu1 %v5063_v27, %s3497_s21  ;;  %v3410_v41 = vpop.f32.mrf.mxu0 }
 0x202   :  { %v3140_v45 = vpack.c.bf16 %v3410_v41, %v3410_v41  ;;  %v1829_v37 = vsel %vm1783_vm12, %v1764_v49, %v1290_v33  ;;  %v2828_v44 = vmul.f32 %v3410_v41, %v3410_v41  ;;  %v2708_v20 = vsel %vm1431_vm7, %v3410_v41, 0.0 }
 0x203   :  { %1429 = vrot.lane.b32.xlu0 %v829_v7, %s3498_s24  ;;  %v1292_v32 = vpop.permute.xlu1 %1291  ;;  %v2153_v52 = vpop.f32.mrf.mxu0  ;;  %v1506_v49 = vsel %vm1431_vm7, %v4802_v1, %v5738_v2 }
 0x204   :  { %2631 = vst.msk [vmem:[%s5592_s4 + $0x38] sm:$0xf] %vm2616_vm0, %v3140_v45  ;;  %v3138_v40 = vpack.c.bf16 %v2153_v52, %v2153_v52  ;;  %v2704_v30 = vsel %vm1431_vm7, %v2153_v52, 0.0  ;;  %v2826_v18 = vmul.f32 %v2153_v52, %v2153_v52  ;;  %v1831_v17 = vsel %vm1783_vm12, %v1766_v19, %v1292_v32 }
 0x205   :  { %v1352_v27 = vpop.permute.xlu0 %1351  ;;  %v2705_v12 = vadd.f32 %v2704_v30, %v2703_v43  ;;  %v3411_v23 = vpop.f32.mrf.mxu0  ;;  %v2905_v3 = vsel %vm1431_vm7, %v2828_v44, 0.0 }
 0x206   :  { %2629 = vst.msk [vmem:[%s5592_s4 + $0x30] sm:$0xf] %vm2616_vm0, %v3138_v40  ;;  %v3141_v34 = vpack.c.bf16 %v3411_v23, %v3411_v23  ;;  %v2901_v0 = vsel %vm1431_vm7, %v2826_v18, 0.0  ;;  %v1893_v38 = vsel %vm1847_vm13, %v1829_v37, %v1352_v27  ;;  %v2829_v11 = vmul.f32 %v3411_v23, %v3411_v23 }
 0x207   :  { %v1354_v58 = vpop.permute.xlu1 %1353  ;;  %v2156_v6 = vpop.f32.mrf.mxu0  ;;  %v2902_v42 = vadd.f32 %v2901_v0, %v2900_v48  ;;  %v2710_v48 = vsel %vm1431_vm7, %v3411_v23, 0.0 }
 0x208   :  { %2632 = vst.msk [vmem:[%s5592_s4 + $0x3c] sm:$0xf] %vm2616_vm0, %v3141_v34  ;;  %v3139_v59 = vpack.c.bf16 %v2156_v6, %v2156_v6  ;;  %v2706_v14 = vsel %vm1431_vm7, %v2156_v6, 0.0  ;;  %v2827_v4 = vmul.f32 %v2156_v6, %v2156_v6  ;;  %v1895_v55 = vsel %vm1847_vm13, %v1831_v17, %v1354_v58 }
 0x209   :  { %v1414_v10 = vpop.permute.xlu0 %1413  ;;  %v2707_v39 = vadd.f32 %v2706_v14, %v2705_v12  ;;  %v2907_v21 = vsel %vm1431_vm7, %v2829_v11, 0.0  ;;  %v5737_v12 = vld [vmem:[#allocation28_spill] sm:$0xff] }
 0x20a   :  { %v1957_v16 = vsel %vm1911_vm14, %v1893_v38, %v1414_v10  ;;  %2630 = vst.msk [vmem:[%s5592_s4 + $0x34] sm:$0xf] %vm2616_vm0, %v3139_v59  ;;  %v2903_v50 = vsel %vm1431_vm7, %v2827_v4, 0.0  ;;  %v1503_v18 = vsel %vm1431_vm7, %v4775_v46, %v5737_v12 }
 0x20b   :  { %3440 = vmatprep.mubr.msk.bf16.mxu1 %vm2002_vm15, %v1957_v16  ;;  %v1416_v5 = vpop.permute.xlu1 %1415  ;;  %v2709_v53 = vadd.f32 %v2708_v20, %v2707_v39  ;;  %v2904_v43 = vadd.f32 %v2903_v50, %v2902_v42 }
 0x20c   :  { %v1959_v24 = vsel %vm1911_vm14, %v1895_v55, %v1416_v5 }
 0x20d   :  { %v1001_v25 = vpop.permute.xlu0 %1000  ;;  %3441 = vmatmul.mubr.msk.bf16.gmra.mxu1 %vm2002_vm15, %v1959_v24  ;;  %v2906_v7 = vadd.f32 %v2905_v3, %v2904_v43  ;;  %v2711_v8 = vadd.f32 %v2710_v48, %v2709_v53 }
 0x20e   :  { %v1573_v34 = vsel %vm1525_vm8, %v1503_v18, %v1001_v25 }
 0x20f   :  { %v1003_v31 = vpop.permute.xlu1 %1002  ;;  %v2908_v41 = vadd.f32 %v2907_v21, %v2906_v7 }
 0x210   :  { %v1575_v58 = vsel %vm1525_vm8, %v1506_v49, %v1003_v31 }
 0x211   :  { %v1097_v33 = vpop.permute.xlu0 %1096 }
 0x212   :  { %v1638_v46 = vsel %vm1588_vm9, %v1573_v34, %v1097_v33 }
 0x213   :  { %v1099_v54 = vpop.permute.xlu1 %1098 }
 0x214   :  { %v1640_v44 = vsel %vm1588_vm9, %v1575_v58, %v1099_v54 }
 0x215   :  { %v1163_v35 = vpop.permute.xlu0 %1162 }
 0x216   :  { %v1703_v1 = vsel %vm1653_vm10, %v1638_v46, %v1163_v35 }
 0x217   :  { %v1165_v45 = vpop.permute.xlu1 %1164 }
 0x218   :  { %v1705_v55 = vsel %vm1653_vm10, %v1640_v44, %v1165_v45 }
 0x219   :  { %v1229_v15 = vpop.permute.xlu0 %1228  ;;  %v3414_v32 = vpop.f32.mrf.mxu0 }
 0x21a   :  { %v3144_v52 = vpack.c.bf16 %v3414_v32, %v3414_v32  ;;  %v2832_v42 = vmul.f32 %v3414_v32, %v3414_v32  ;;  %v1768_v16 = vsel %vm1718_vm11, %v1703_v1, %v1229_v15  ;;  %v2716_v4 = vsel %vm1431_vm7, %v3414_v32, 0.0 }
 0x21b   :  { %v1231_v63 = vpop.permute.xlu1 %1230  ;;  %v2169_v61 = vpop.f32.mrf.mxu0 }
 0x21c   :  { %2635 = vst.msk [vmem:[%s5592_s4 + $0x48] sm:$0xf] %vm2616_vm0, %v3144_v52  ;;  %v3142_v27 = vpack.c.bf16 %v2169_v61, %v2169_v61  ;;  %v2712_v40 = vsel %vm1431_vm7, %v2169_v61, 0.0  ;;  %v2830_v26 = vmul.f32 %v2169_v61, %v2169_v61  ;;  %v2913_v24 = vsel %vm1431_vm7, %v2832_v42, 0.0 }
 0x21d   :  { %v1294_v60 = vpop.permute.xlu0 %1293  ;;  %v2713_v30 = vadd.f32 %v2712_v40, %v2711_v8  ;;  %v3415_v62 = vpop.f32.mrf.mxu0  ;;  %v1770_v25 = vsel %vm1718_vm11, %v1705_v55, %v1231_v63 }
 0x21e   :  { %2633 = vst.msk [vmem:[%s5592_s4 + $0x40] sm:$0xf] %vm2616_vm0, %v3142_v27  ;;  %v3145_v23 = vpack.c.bf16 %v3415_v62, %v3415_v62  ;;  %v2909_v47 = vsel %vm1431_vm7, %v2830_v26, 0.0  ;;  %v1833_v17 = vsel %vm1783_vm12, %v1768_v16, %v1294_v60  ;;  %v2833_v39 = vmul.f32 %v3415_v62, %v3415_v62 }
 0x21f   :  { %v1296_v37 = vpop.permute.xlu1 %1295  ;;  %v2172_v0 = vpop.f32.mrf.mxu0  ;;  %v2910_v6 = vadd.f32 %v2909_v47, %v2908_v41  ;;  %v2718_v3 = vsel %vm1431_vm7, %v3415_v62, 0.0 }
 0x220   :  { %2636 = vst.msk [vmem:[%s5592_s4 + $0x4c] sm:$0xf] %vm2616_vm0, %v3145_v23  ;;  %v3143_v38 = vpack.c.bf16 %v2172_v0, %v2172_v0  ;;  %v2714_v10 = vsel %vm1431_vm7, %v2172_v0, 0.0  ;;  %v2831_v59 = vmul.f32 %v2172_v0, %v2172_v0  ;;  %v1835_v7 = vsel %vm1783_vm12, %v1770_v25, %v1296_v37 }
 0x221   :  { %v1356_v19 = vpop.permute.xlu0 %1355  ;;  %v2715_v14 = vadd.f32 %v2714_v10, %v2713_v30  ;;  %v2915_v31 = vsel %vm1431_vm7, %v2833_v39, 0.0 }
 0x222   :  { %2634 = vst.msk [vmem:[%s5592_s4 + $0x44] sm:$0xf] %vm2616_vm0, %v3143_v38  ;;  %v2911_v20 = vsel %vm1431_vm7, %v2831_v59, 0.0  ;;  %v1897_v50 = vsel %vm1847_vm13, %v1833_v17, %v1356_v19  ;;  %v5739_v38 = vld [vmem:[#allocation30_spill] sm:$0xff] }
 0x223   :  { %v1358_v11 = vpop.permute.xlu1 %1357  ;;  %v2717_v5 = vadd.f32 %v2716_v4, %v2715_v14  ;;  %v2912_v53 = vadd.f32 %v2911_v20, %v2910_v6  ;;  %v1509_v1 = vsel %vm1431_vm7, %v4852_v57, %v5739_v38  ;;  %v5740_v57 = vld [vmem:[#allocation31_spill] sm:$0xff] }
 0x224   :  { %v1899_v33 = vsel %vm1847_vm13, %v1835_v7, %v1358_v11  ;;  %v1512_v11 = vsel %vm1431_vm7, %v4873_v13, %v5740_v57 }
 0x225   :  { %v1418_v43 = vpop.permute.xlu0 %1417  ;;  %v2914_v8 = vadd.f32 %v2913_v24, %v2912_v53  ;;  %v2719_v21 = vadd.f32 %v2718_v3, %v2717_v5 }
 0x226   :  { %v1961_v48 = vsel %vm1911_vm14, %v1897_v50, %v1418_v43 }
 0x227   :  { %3444 = vmatprep.mubr.msk.bf16.mxu1 %vm2002_vm15, %v1961_v48  ;;  %v1420_v41 = vpop.permute.xlu1 %1419  ;;  %v2916_v45 = vadd.f32 %v2915_v31, %v2914_v8 }
 0x228   :  { %v1963_v54 = vsel %vm1911_vm14, %v1899_v33, %v1420_v41 }
 0x229   :  { %v1005_v35 = vpop.permute.xlu0 %1004  ;;  %3445 = vmatmul.mubr.msk.bf16.gmra.mxu1 %vm2002_vm15, %v1963_v54 }
 0x22a   :  { %v1577_v10 = vsel %vm1525_vm8, %v1509_v1, %v1005_v35 }
 0x22b   :  { %v1007_v15 = vpop.permute.xlu1 %1006 }
 0x22c   :  { %v1579_v53 = vsel %vm1525_vm8, %v1512_v11, %v1007_v15 }
 0x22d   :  { %v1101_v32 = vpop.permute.xlu0 %1100 }
 0x22e   :  { %v1642_v4 = vsel %vm1588_vm9, %v1577_v10, %v1101_v32 }
 0x22f   :  { %v1103_v52 = vpop.permute.xlu1 %1102 }
 0x230   :  { %v1644_v3 = vsel %vm1588_vm9, %v1579_v53, %v1103_v52 }
 0x231   :  { %v1167_v63 = vpop.permute.xlu0 %1166  ;;  %v3418_v61 = vpop.f32.mrf.mxu0 }
 0x232   :  { %v3148_v60 = vpack.c.bf16 %v3418_v61, %v3418_v61  ;;  %v2836_v46 = vmul.f32 %v3418_v61, %v3418_v61  ;;  %v2724_v59 = vsel %vm1431_vm7, %v3418_v61, 0.0  ;;  %v1707_v55 = vsel %vm1653_vm10, %v1642_v4, %v1167_v63 }
 0x233   :  { %v1169_v27 = vpop.permute.xlu1 %1168  ;;  %v2185_v40 = vpop.f32.mrf.mxu0 }
 0x234   :  { %2639 = vst.msk [vmem:[%s5592_s4 + $0x58] sm:$0xf] %vm2616_vm0, %v3148_v60  ;;  %v3146_v26 = vpack.c.bf16 %v2185_v40, %v2185_v40  ;;  %v2720_v62 = vsel %vm1431_vm7, %v2185_v40, 0.0  ;;  %v2834_v18 = vmul.f32 %v2185_v40, %v2185_v40  ;;  %v2921_v50 = vsel %vm1431_vm7, %v2836_v46, 0.0 }
 0x235   :  { %v1233_v30 = vpop.permute.xlu0 %1232  ;;  %v2721_v12 = vadd.f32 %v2720_v62, %v2719_v21  ;;  %v3419_v23 = vpop.f32.mrf.mxu0  ;;  %v1709_v13 = vsel %vm1653_vm10, %v1644_v3, %v1169_v27  ;;  %v5742_v3 = vld [vmem:[#allocation33_spill] sm:$0xff] }
 0x236   :  { %2637 = vst.msk [vmem:[%s5592_s4 + $0x50] sm:$0xf] %vm2616_vm0, %v3146_v26  ;;  %v3149_v2 = vpack.c.bf16 %v3419_v23, %v3419_v23  ;;  %v2917_v49 = vsel %vm1431_vm7, %v2834_v18, 0.0  ;;  %v2837_v44 = vmul.f32 %v3419_v23, %v3419_v23  ;;  %v2726_v5 = vsel %vm1431_vm7, %v3419_v23, 0.0 }
 0x237   :  { %v1235_v34 = vpop.permute.xlu1 %1234  ;;  %v2188_v47 = vpop.f32.mrf.mxu0  ;;  %v2918_v37 = vadd.f32 %v2917_v49, %v2916_v45  ;;  %v1772_v43 = vsel %vm1718_vm11, %v1707_v55, %v1233_v30 }
 0x238   :  { %2640 = vst.msk [vmem:[%s5592_s4 + $0x5c] sm:$0xf] %vm2616_vm0, %v3149_v2  ;;  %v3147_v58 = vpack.c.bf16 %v2188_v47, %v2188_v47  ;;  %v2722_v6 = vsel %vm1431_vm7, %v2188_v47, 0.0  ;;  %v2835_v19 = vmul.f32 %v2188_v47, %v2188_v47  ;;  %v2923_v48 = vsel %vm1431_vm7, %v2837_v44, 0.0 }
 0x239   :  { %v1298_v0 = vpop.permute.xlu0 %1297  ;;  %v2723_v42 = vadd.f32 %v2722_v6, %v2721_v12  ;;  %v1774_v41 = vsel %vm1718_vm11, %v1709_v13, %v1235_v34 }
 0x23a   :  { %2638 = vst.msk [vmem:[%s5592_s4 + $0x54] sm:$0xf] %vm2616_vm0, %v3147_v58  ;;  %v2919_v16 = vsel %vm1431_vm7, %v2835_v19, 0.0  ;;  %v1837_v7 = vsel %vm1783_vm12, %v1772_v43, %v1298_v0 }
 0x23b   :  { %v1300_v14 = vpop.permute.xlu1 %1299  ;;  %v2725_v17 = vadd.f32 %v2724_v59, %v2723_v42  ;;  %v2920_v39 = vadd.f32 %v2919_v16, %v2918_v37 }
 0x23c   :  { %v1839_v35 = vsel %vm1783_vm12, %v1774_v41, %v1300_v14 }
 0x23d   :  { %v1360_v20 = vpop.permute.xlu0 %1359  ;;  %v2922_v24 = vadd.f32 %v2921_v50, %v2920_v39  ;;  %v2727_v25 = vadd.f32 %v2726_v5, %v2725_v17 }
 0x23e   :  { %v1901_v21 = vsel %vm1847_vm13, %v1837_v7, %v1360_v20  ;;  %v5741_v20 = vld [vmem:[#allocation32_spill] sm:$0xff] }
 0x23f   :  { %v1362_v8 = vpop.permute.xlu1 %1361  ;;  %v2924_v33 = vadd.f32 %v2923_v48, %v2922_v24  ;;  %v1515_v57 = vsel %vm1431_vm7, %v4917_v9, %v5741_v20  ;;  %v1518_v48 = vsel %vm1431_vm7, %v4959_v51, %v5742_v3 }
 0x240   :  { %v1903_v45 = vsel %vm1847_vm13, %v1839_v35, %v1362_v8 }
 0x241   :  { %v1422_v31 = vpop.permute.xlu0 %1421 }
 0x242   :  { %v1965_v54 = vsel %vm1911_vm14, %v1901_v21, %v1422_v31 }
 0x243   :  { %3448 = vmatprep.mubr.msk.bf16.mxu1 %vm2002_vm15, %v1965_v54  ;;  %v1424_v15 = vpop.permute.xlu1 %1423 }
 0x244   :  { %v1967_v32 = vsel %vm1911_vm14, %v1903_v45, %v1424_v15 }
 0x245   :  { %v1009_v52 = vpop.permute.xlu0 %1008  ;;  %3449 = vmatmul.mubr.msk.bf16.gmra.mxu1 %vm2002_vm15, %v1967_v32 }
 0x246   :  { %v1581_v50 = vsel %vm1525_vm8, %v1515_v57, %v1009_v52 }
 0x247   :  { %v1011_v63 = vpop.permute.xlu1 %1010 }
 0x248   :  { %v1583_v8 = vsel %vm1525_vm8, %v1518_v48, %v1011_v63 }
 0x249   :  { %v1105_v61 = vpop.permute.xlu0 %1104  ;;  %v3422_v60 = vpop.f32.mrf.mxu0 }
 0x24a   :  { %v3152_v27 = vpack.c.bf16 %v3422_v60, %v3422_v60  ;;  %v2840_v6 = vmul.f32 %v3422_v60, %v3422_v60  ;;  %v2732_v42 = vsel %vm1431_vm7, %v3422_v60, 0.0  ;;  %v1646_v43 = vsel %vm1588_vm9, %v1581_v50, %v1105_v61 }
 0x24b   :  { %v1107_v40 = vpop.permute.xlu1 %1106  ;;  %v2201_v30 = vpop.f32.mrf.mxu0 }
 0x24c   :  { %2643 = vst.msk [vmem:[%s5592_s4 + $0x68] sm:$0xf] %vm2616_vm0, %v3152_v27  ;;  %v3150_v62 = vpack.c.bf16 %v2201_v30, %v2201_v30  ;;  %v2728_v12 = vsel %vm1431_vm7, %v2201_v30, 0.0  ;;  %v2838_v23 = vmul.f32 %v2201_v30, %v2201_v30  ;;  %v2929_v17 = vsel %vm1431_vm7, %v2840_v6, 0.0 }
 0x24d   :  { %v1171_v26 = vpop.permute.xlu0 %1170  ;;  %v2729_v18 = vadd.f32 %v2728_v12, %v2727_v25  ;;  %v3423_v2 = vpop.f32.mrf.mxu0  ;;  %v1648_v13 = vsel %vm1588_vm9, %v1583_v8, %v1107_v40 }
 0x24e   :  { %2641 = vst.msk [vmem:[%s5592_s4 + $0x60] sm:$0xf] %vm2616_vm0, %v3150_v62  ;;  %v3153_v49 = vpack.c.bf16 %v3423_v2, %v3423_v2  ;;  %v2925_v34 = vsel %vm1431_vm7, %v2838_v23, 0.0  ;;  %v2841_v10 = vmul.f32 %v3423_v2, %v3423_v2  ;;  %v2734_v39 = vsel %vm1431_vm7, %v3423_v2, 0.0 }
 0x24f   :  { %v1173_v47 = vpop.permute.xlu1 %1172  ;;  %v2204_v37 = vpop.f32.mrf.mxu0  ;;  %v2926_v0 = vadd.f32 %v2925_v34, %v2924_v33  ;;  %v1711_v7 = vsel %vm1653_vm10, %v1646_v43, %v1171_v26 }
 0x250   :  { %2644 = vst.msk [vmem:[%s5592_s4 + $0x6c] sm:$0xf] %vm2616_vm0, %v3153_v49  ;;  %v3151_v46 = vpack.c.bf16 %v2204_v37, %v2204_v37  ;;  %v2730_v19 = vsel %vm1431_vm7, %v2204_v37, 0.0  ;;  %v2839_v38 = vmul.f32 %v2204_v37, %v2204_v37  ;;  %v2931_v5 = vsel %vm1431_vm7, %v2841_v10, 0.0 }
 0x251   :  { %v1237_v58 = vpop.permute.xlu0 %1236  ;;  %v2731_v1 = vadd.f32 %v2730_v19, %v2729_v18  ;;  %v1713_v33 = vsel %vm1653_vm10, %v1648_v13, %v1173_v47 }
 0x252   :  { %2642 = vst.msk [vmem:[%s5592_s4 + $0x64] sm:$0xf] %vm2616_vm0, %v3151_v46  ;;  %v2927_v59 = vsel %vm1431_vm7, %v2839_v38, 0.0  ;;  %v1776_v9 = vsel %vm1718_vm11, %v1711_v7, %v1237_v58 }
 0x253   :  { %v1239_v44 = vpop.permute.xlu1 %1238  ;;  %v2733_v16 = vadd.f32 %v2732_v42, %v2731_v1  ;;  %v2928_v14 = vadd.f32 %v2927_v59, %v2926_v0 }
 0x254   :  { %v1778_v35 = vsel %vm1718_vm11, %v1713_v33, %v1239_v44  ;;  %v5743_v44 = vld [vmem:[#allocation35_spill] sm:$0xff] }
 0x255   :  { %v1302_v4 = vpop.permute.xlu0 %1301  ;;  %v2930_v11 = vadd.f32 %v2929_v17, %v2928_v14  ;;  %v2735_v55 = vadd.f32 %v2734_v39, %v2733_v16  ;;  %v1524_v16 = vsel %vm1431_vm7, %v5069_v28, %v5743_v44 }
 0x256   :  { %v1841_v21 = vsel %vm1783_vm12, %v1776_v9, %v1302_v4 }
 0x257   :  { %v1304_v53 = vpop.permute.xlu1 %1303  ;;  %v2932_v25 = vadd.f32 %v2931_v5, %v2930_v11  ;;  %v5744_v11 = vld [vmem:[#allocation34_spill] sm:$0xff] }
 0x258   :  { %v1843_v45 = vsel %vm1783_vm12, %v1778_v35, %v1304_v53 }
 0x259   :  { %v1364_v24 = vpop.permute.xlu0 %1363 }
 0x25a   :  { %v1905_v41 = vsel %vm1847_vm13, %v1841_v21, %v1364_v24 }
 0x25b   :  { %v1366_v31 = vpop.permute.xlu1 %1365 }
 0x25c   :  { %v1907_v15 = vsel %vm1847_vm13, %v1843_v45, %v1366_v31 }
 0x25d   :  { %v1426_v54 = vpop.permute.xlu0 %1425 }
 0x25e   :  { %v1969_v51 = vsel %vm1911_vm14, %v1905_v41, %v1426_v54 }
 0x25f   :  { %3452 = vmatprep.mubr.msk.bf16.mxu1 %vm2002_vm15, %v1969_v51  ;;  %v1428_v32 = vpop.permute.xlu1 %1427 }
 0x260   :  { %v1971_v52 = vsel %vm1911_vm14, %v1907_v15, %v1428_v32 }
 0x261   :  { %v1013_v63 = vpop.permute.xlu0 %1012  ;;  %v3426_v61 = vpop.f32.mrf.mxu0  ;;  %3453 = vmatmul.mubr.msk.bf16.gmra.mxu1 %vm2002_vm15, %v1971_v52 }
 0x262   :  { %v3156_v60 = vpack.c.bf16 %v3426_v61, %v3426_v61  ;;  %v2844_v46 = vmul.f32 %v3426_v61, %v3426_v61  ;;  %v2740_v1 = vsel %vm1431_vm7, %v3426_v61, 0.0 }
 0x263   :  { %v1015_v27 = vpop.permute.xlu1 %1014  ;;  %v2217_v40 = vpop.f32.mrf.mxu0 }
 0x264   :  { %2647 = vst.msk [vmem:[%s5592_s4 + $0x78] sm:$0xf] %vm2616_vm0, %v3156_v60  ;;  %v3154_v26 = vpack.c.bf16 %v2217_v40, %v2217_v40  ;;  %v2736_v62 = vsel %vm1431_vm7, %v2217_v40, 0.0  ;;  %v2842_v18 = vmul.f32 %v2217_v40, %v2217_v40  ;;  %v2937_v39 = vsel %vm1431_vm7, %v2844_v46, 0.0 }
 0x265   :  { %v1109_v30 = vpop.permute.xlu0 %1108  ;;  %v2737_v12 = vadd.f32 %v2736_v62, %v2735_v55  ;;  %v3427_v23 = vpop.f32.mrf.mxu0  ;;  %v1587_v20 = vsel %vm1525_vm8, %v1524_v16, %v1015_v27  ;;  %v1521_v55 = vsel %vm1431_vm7, %v5030_v29, %v5744_v11 }
 0x266   :  { %2645 = vst.msk [vmem:[%s5592_s4 + $0x70] sm:$0xf] %vm2616_vm0, %v3154_v26  ;;  %v3157_v2 = vpack.c.bf16 %v3427_v23, %v3427_v23  ;;  %v2933_v49 = vsel %vm1431_vm7, %v2842_v18, 0.0  ;;  %v2845_v42 = vmul.f32 %v3427_v23, %v3427_v23  ;;  %v2742_v57 = vsel %vm1431_vm7, %v3427_v23, 0.0 }
 0x267   :  { %v1111_v34 = vpop.permute.xlu1 %1110  ;;  %v2220_v47 = vpop.f32.mrf.mxu0  ;;  %v2934_v37 = vadd.f32 %v2933_v49, %v2932_v25  ;;  %v1585_v43 = vsel %vm1525_vm8, %v1521_v55, %v1013_v63 }
 0x268   :  { %2648 = vst.msk [vmem:[%s5592_s4 + $0x7c] sm:$0xf] %vm2616_vm0, %v3157_v2  ;;  %v3155_v58 = vpack.c.bf16 %v2220_v47, %v2220_v47  ;;  %v2738_v6 = vsel %vm1431_vm7, %v2220_v47, 0.0  ;;  %v2843_v19 = vmul.f32 %v2220_v47, %v2220_v47  ;;  %v1652_v50 = vsel %vm1588_vm9, %v1587_v20, %v1111_v34 }
 0x269   :  { %v1175_v0 = vpop.permute.xlu0 %1174  ;;  %v2739_v38 = vadd.f32 %v2738_v6, %v2737_v12  ;;  %v2939_v28 = vsel %vm1431_vm7, %v2845_v42, 0.0  ;;  %v1650_v3 = vsel %vm1588_vm9, %v1585_v43, %v1109_v30 }
 0x26a   :  { %2646 = vst.msk [vmem:[%s5592_s4 + $0x74] sm:$0xf] %vm2616_vm0, %v3155_v58  ;;  %v2935_v10 = vsel %vm1431_vm7, %v2843_v19, 0.0  ;;  %v1715_v9 = vsel %vm1653_vm10, %v1650_v3, %v1175_v0 }
 0x26b   :  { %v1177_v59 = vpop.permute.xlu1 %1176  ;;  %v2741_v14 = vadd.f32 %v2740_v1, %v2739_v38  ;;  %v2936_v4 = vadd.f32 %v2935_v10, %v2934_v37 }
 0x26c   :  { %v1717_v24 = vsel %vm1653_vm10, %v1652_v50, %v1177_v59 }
 0x26d   :  { %v1241_v17 = vpop.permute.xlu0 %1240  ;;  %v2938_v5 = vadd.f32 %v2937_v39, %v2936_v4  ;;  %v2743_v53 = vadd.f32 %v2742_v57, %v2741_v14 }
 0x26e   :  { %v1780_v13 = vsel %vm1718_vm11, %v1715_v9, %v1241_v17 }
 0x26f   :  { %v1243_v25 = vpop.permute.xlu1 %1242  ;;  %v2940_v8 = vadd.f32 %v2939_v28, %v2938_v5 }
 0x270   :  { %v1782_v48 = vsel %vm1718_vm11, %v1717_v24, %v1243_v25 }
 0x271   :  { %v1306_v7 = vpop.permute.xlu0 %1305  ;;  %v1846_v29 = vsel %vm1783_vm12, %v1782_v48, %v4819_v22 }
 0x272   :  { %v1845_v21 = vsel %vm1783_vm12, %v1780_v13, %v1306_v7  ;;  %v1910_v33 = vsel %vm1847_vm13, %v1846_v29, %v4834_v36 }
 0x273   :  { %v1368_v31 = vpop.permute.xlu1 %1367  ;;  %v1974_v51 = vsel %vm1911_vm14, %v1910_v33, %v4848_v56 }
 0x274   :  { %v1909_v41 = vsel %vm1847_vm13, %v1845_v21, %v1368_v31 }
 0x275   :  { %v1430_v54 = vpop.permute.xlu0 %1429 }
 0x276   :  { %v1973_v35 = vsel %vm1911_vm14, %v1909_v41, %v1430_v54 }
 0x277   :  { %3456 = vmatprep.mubr.msk.bf16.mxu1 %vm2002_vm15, %v1973_v35 }
 0x278   :  { %3457 = vmatmul.mubr.msk.bf16.gmra.mxu1 %vm2002_vm15, %v1974_v51 }
 0x279   :  { %v3430_v22 = vpop.f32.mrf.mxu1 }
 0x27a   :  { %v3160_v45 = vpack.c.bf16 %v3430_v22, %v3430_v22  ;;  %v2848_v30 = vmul.f32 %v3430_v22, %v3430_v22  ;;  %v2748_v23 = vsel %vm1431_vm7, %v3430_v22, 0.0 }
 0x27b   :  { %v2233_v15 = vpop.f32.mrf.mxu1 }
 0x27c   :  { %2651 = vst.msk [vmem:[%s5592_s4 + $0x88] sm:$0xf] %vm2616_vm0, %v3160_v45  ;;  %v3158_v36 = vpack.c.bf16 %v2233_v15, %v2233_v15  ;;  %v2744_v32 = vsel %vm1431_vm7, %v2233_v15, 0.0  ;;  %v2846_v52 = vmul.f32 %v2233_v15, %v2233_v15  ;;  %v2945_v37 = vsel %vm1431_vm7, %v2848_v30, 0.0 }
 0x27d   :  { %v2745_v63 = vadd.f32 %v2744_v32, %v2743_v53  ;;  %v3431_v61 = vpop.f32.mrf.mxu1 }
 0x27e   :  { %2649 = vst.msk [vmem:[%s5592_s4 + $0x80] sm:$0xf] %vm2616_vm0, %v3158_v36  ;;  %v2941_v56 = vsel %vm1431_vm7, %v2846_v52, 0.0  ;;  %v3161_v60 = vpack.c.bf16 %v3431_v61, %v3431_v61  ;;  %v2849_v2 = vmul.f32 %v3431_v61, %v3431_v61  ;;  %v2750_v0 = vsel %vm1431_vm7, %v3431_v61, 0.0 }
 0x27f   :  { %v2942_v27 = vadd.f32 %v2941_v56, %v2940_v8  ;;  %v2236_v40 = vpop.f32.mrf.mxu1 }
 0x280   :  { %2652 = vst.msk [vmem:[%s5592_s4 + $0x8c] sm:$0xf] %vm2616_vm0, %v3161_v60  ;;  %v3159_v26 = vpack.c.bf16 %v2236_v40, %v2236_v40  ;;  %v2746_v62 = vsel %vm1431_vm7, %v2236_v40, 0.0  ;;  %v2847_v12 = vmul.f32 %v2236_v40, %v2236_v40  ;;  %v2947_v6 = vsel %vm1431_vm7, %v2849_v2, 0.0 }
 0x281   :  { %v2747_v18 = vadd.f32 %v2746_v62, %v2745_v63 }
 0x282   :  { %2650 = vst.msk [vmem:[%s5592_s4 + $0x84] sm:$0xf] %vm2616_vm0, %v3159_v26  ;;  %v2943_v49 = vsel %vm1431_vm7, %v2847_v12, 0.0 }
 0x283   :  { %v2749_v34 = vadd.f32 %v2748_v23, %v2747_v18  ;;  %v2944_v47 = vadd.f32 %v2943_v49, %v2942_v27 }
 0x285   :  { %v2946_v58 = vadd.f32 %v2945_v37, %v2944_v47  ;;  %v2751_v46 = vadd.f32 %v2750_v0, %v2749_v34 }
 0x287   :  { %v2948_v19 = vadd.f32 %v2947_v6, %v2946_v58 }
 0x295   :  { %v3434_v38 = vpop.f32.mrf.mxu1 }
 0x296   :  { %v3164_v1 = vpack.c.bf16 %v3434_v38, %v3434_v38  ;;  %v2852_v57 = vmul.f32 %v3434_v38, %v3434_v38  ;;  %v2756_v53 = vsel %vm1431_vm7, %v3434_v38, 0.0 }
 0x297   :  { %v2249_v42 = vpop.f32.mrf.mxu1 }
 0x298   :  { %2655 = vst.msk [vmem:[%s5592_s4 + $0x98] sm:$0xf] %vm2616_vm0, %v3164_v1  ;;  %v3162_v10 = vpack.c.bf16 %v2249_v42, %v2249_v42  ;;  %v2752_v59 = vsel %vm1431_vm7, %v2249_v42, 0.0  ;;  %v2850_v44 = vmul.f32 %v2249_v42, %v2249_v42  ;;  %v2953_v3 = vsel %vm1431_vm7, %v2852_v57, 0.0 }
 0x299   :  { %v2753_v16 = vadd.f32 %v2752_v59, %v2751_v46  ;;  %v3435_v14 = vpop.f32.mrf.mxu1 }
 0x29a   :  { %2653 = vst.msk [vmem:[%s5592_s4 + $0x90] sm:$0xf] %vm2616_vm0, %v3162_v10  ;;  %v2949_v4 = vsel %vm1431_vm7, %v2850_v44, 0.0  ;;  %v3165_v17 = vpack.c.bf16 %v3435_v14, %v3435_v14  ;;  %v2853_v43 = vmul.f32 %v3435_v14, %v3435_v14  ;;  %v2758_v48 = vsel %vm1431_vm7, %v3435_v14, 0.0 }
 0x29b   :  { %v2950_v39 = vadd.f32 %v2949_v4, %v2948_v19  ;;  %v2252_v20 = vpop.f32.mrf.mxu1 }
 0x29c   :  { %2656 = vst.msk [vmem:[%s5592_s4 + $0x9c] sm:$0xf] %vm2616_vm0, %v3165_v17  ;;  %v3163_v11 = vpack.c.bf16 %v2252_v20, %v2252_v20  ;;  %v2754_v55 = vsel %vm1431_vm7, %v2252_v20, 0.0  ;;  %v2851_v50 = vmul.f32 %v2252_v20, %v2252_v20  ;;  %v2955_v9 = vsel %vm1431_vm7, %v2853_v43, 0.0 }
 0x29d   :  { %v2755_v5 = vadd.f32 %v2754_v55, %v2753_v16 }
 0x29e   :  { %2654 = vst.msk [vmem:[%s5592_s4 + $0x94] sm:$0xf] %vm2616_vm0, %v3163_v11  ;;  %v2951_v28 = vsel %vm1431_vm7, %v2851_v50, 0.0 }
 0x29f   :  { %v2757_v24 = vadd.f32 %v2756_v53, %v2755_v5  ;;  %v2952_v25 = vadd.f32 %v2951_v28, %v2950_v39 }
 0x2a1   :  { %v2954_v7 = vadd.f32 %v2953_v3, %v2952_v25  ;;  %v2759_v8 = vadd.f32 %v2758_v48, %v2757_v24 }
 0x2a3   :  { %v2956_v29 = vadd.f32 %v2955_v9, %v2954_v7 }
 0x2b1   :  { %v3438_v13 = vpop.f32.mrf.mxu1 }
 0x2b2   :  { %v3168_v21 = vpack.c.bf16 %v3438_v13, %v3438_v13  ;;  %v2856_v32 = vmul.f32 %v3438_v13, %v3438_v13  ;;  %v2764_v60 = vsel %vm1431_vm7, %v3438_v13, 0.0 }
 0x2b3   :  { %v2265_v31 = vpop.f32.mrf.mxu1 }
 0x2b4   :  { %2659 = vst.msk [vmem:[%s5592_s4 + $0xa8] sm:$0xf] %vm2616_vm0, %v3168_v21  ;;  %v3166_v33 = vpack.c.bf16 %v2265_v31, %v2265_v31  ;;  %v2760_v41 = vsel %vm1431_vm7, %v2265_v31, 0.0  ;;  %v2854_v54 = vmul.f32 %v2265_v31, %v2265_v31  ;;  %v2961_v62 = vsel %vm1431_vm7, %v2856_v32, 0.0 }
 0x2b5   :  { %v2761_v35 = vadd.f32 %v2760_v41, %v2759_v8  ;;  %v3439_v51 = vpop.f32.mrf.mxu1 }
 0x2b6   :  { %2657 = vst.msk [vmem:[%s5592_s4 + $0xa0] sm:$0xf] %vm2616_vm0, %v3166_v33  ;;  %v2957_v22 = vsel %vm1431_vm7, %v2854_v54, 0.0  ;;  %v3169_v45 = vpack.c.bf16 %v3439_v51, %v3439_v51  ;;  %v2857_v27 = vmul.f32 %v3439_v51, %v3439_v51  ;;  %v2766_v12 = vsel %vm1431_vm7, %v3439_v51, 0.0 }
 0x2b7   :  { %v2958_v15 = vadd.f32 %v2957_v22, %v2956_v29  ;;  %v2268_v36 = vpop.f32.mrf.mxu1 }
 0x2b8   :  { %2660 = vst.msk [vmem:[%s5592_s4 + $0xac] sm:$0xf] %vm2616_vm0, %v3169_v45  ;;  %v3167_v52 = vpack.c.bf16 %v2268_v36, %v2268_v36  ;;  %v2762_v63 = vsel %vm1431_vm7, %v2268_v36, 0.0  ;;  %v2855_v61 = vmul.f32 %v2268_v36, %v2268_v36  ;;  %v2963_v2 = vsel %vm1431_vm7, %v2857_v27, 0.0 }
 0x2b9   :  { %v2763_v56 = vadd.f32 %v2762_v63, %v2761_v35 }
 0x2ba   :  { %2658 = vst.msk [vmem:[%s5592_s4 + $0xa4] sm:$0xf] %vm2616_vm0, %v3167_v52  ;;  %v2959_v40 = vsel %vm1431_vm7, %v2855_v61, 0.0 }
 0x2bb   :  { %v2765_v30 = vadd.f32 %v2764_v60, %v2763_v56  ;;  %v2960_v26 = vadd.f32 %v2959_v40, %v2958_v15 }
 0x2bd   :  { %v2962_v18 = vadd.f32 %v2961_v62, %v2960_v26  ;;  %v2767_v23 = vadd.f32 %v2766_v12, %v2765_v30 }
 0x2bf   :  { %v2964_v49 = vadd.f32 %v2963_v2, %v2962_v18 }
 0x2cd   :  { %v3442_v34 = vpop.f32.mrf.mxu1 }
 0x2ce   :  { %v3172_v47 = vpack.c.bf16 %v3442_v34, %v3442_v34  ;;  %v2860_v59 = vmul.f32 %v3442_v34, %v3442_v34  ;;  %v2772_v17 = vsel %vm1431_vm7, %v3442_v34, 0.0 }
 0x2cf   :  { %v2281_v37 = vpop.f32.mrf.mxu1 }
 0x2d0   :  { %2663 = vst.msk [vmem:[%s5592_s4 + $0xb8] sm:$0xf] %vm2616_vm0, %v3172_v47  ;;  %v3170_v0 = vpack.c.bf16 %v2281_v37, %v2281_v37  ;;  %v2768_v58 = vsel %vm1431_vm7, %v2281_v37, 0.0  ;;  %v2858_v46 = vmul.f32 %v2281_v37, %v2281_v37  ;;  %v2969_v55 = vsel %vm1431_vm7, %v2860_v59, 0.0 }
 0x2d1   :  { %v2769_v6 = vadd.f32 %v2768_v58, %v2767_v23  ;;  %v3443_v19 = vpop.f32.mrf.mxu1 }
 0x2d2   :  { %2661 = vst.msk [vmem:[%s5592_s4 + $0xb0] sm:$0xf] %vm2616_vm0, %v3170_v0  ;;  %v2965_v38 = vsel %vm1431_vm7, %v2858_v46, 0.0  ;;  %v3173_v1 = vpack.c.bf16 %v3443_v19, %v3443_v19  ;;  %v2861_v39 = vmul.f32 %v3443_v19, %v3443_v19  ;;  %v2774_v50 = vsel %vm1431_vm7, %v3443_v19, 0.0 }
 0x2d3   :  { %v2966_v42 = vadd.f32 %v2965_v38, %v2964_v49  ;;  %v2284_v10 = vpop.f32.mrf.mxu1 }
 0x2d4   :  { %2664 = vst.msk [vmem:[%s5592_s4 + $0xbc] sm:$0xf] %vm2616_vm0, %v3173_v1  ;;  %v3171_v44 = vpack.c.bf16 %v2284_v10, %v2284_v10  ;;  %v2770_v16 = vsel %vm1431_vm7, %v2284_v10, 0.0  ;;  %v2859_v14 = vmul.f32 %v2284_v10, %v2284_v10  ;;  %v2971_v43 = vsel %vm1431_vm7, %v2861_v39, 0.0 }
 0x2d5   :  { %v2771_v4 = vadd.f32 %v2770_v16, %v2769_v6 }
 0x2d6   :  { %2662 = vst.msk [vmem:[%s5592_s4 + $0xb4] sm:$0xf] %vm2616_vm0, %v3171_v44  ;;  %v2967_v20 = vsel %vm1431_vm7, %v2859_v14, 0.0 }
 0x2d7   :  { %v2773_v57 = vadd.f32 %v2772_v17, %v2771_v4  ;;  %v2968_v11 = vadd.f32 %v2967_v20, %v2966_v42 }
 0x2d9   :  { %v2970_v5 = vadd.f32 %v2969_v55, %v2968_v11  ;;  %v2775_v53 = vadd.f32 %v2774_v50, %v2773_v57 }
 0x2db   :  { %v2972_v28 = vadd.f32 %v2971_v43, %v2970_v5 }
 0x2e9   :  { %v3446_v24 = vpop.f32.mrf.mxu1 }
 0x2ea   :  { %v3176_v25 = vpack.c.bf16 %v3446_v24, %v3446_v24  ;;  %v2780_v41 = vsel %vm1431_vm7, %v3446_v24, 0.0  ;;  %v2864_v40 = vmul.f32 %v3446_v24, %v3446_v24 }
 0x2eb   :  { %v2297_v3 = vpop.f32.mrf.mxu1 }
 0x2ec   :  { %2667 = vst.msk [vmem:[%s5592_s4 + $0xc8] sm:$0xf] %vm2616_vm0, %v3176_v25  ;;  %v3174_v48 = vpack.c.bf16 %v2297_v3, %v2297_v3  ;;  %v2776_v7 = vsel %vm1431_vm7, %v2297_v3, 0.0  ;;  %v2862_v63 = vmul.f32 %v2297_v3, %v2297_v3  ;;  %v2977_v26 = vsel %vm1431_vm7, %v2864_v40, 0.0 }
 0x2ed   :  { %v3447_v8 = vpop.f32.mrf.mxu1  ;;  %v2777_v29 = vadd.f32 %v2776_v7, %v2775_v53 }
 0x2ee   :  { %2665 = vst.msk [vmem:[%s5592_s4 + $0xc0] sm:$0xf] %vm2616_vm0, %v3174_v48  ;;  %v3177_v9 = vpack.c.bf16 %v3447_v8, %v3447_v8  ;;  %v2973_v56 = vsel %vm1431_vm7, %v2862_v63, 0.0  ;;  %v2865_v62 = vmul.f32 %v3447_v8, %v3447_v8  ;;  %v2782_v2 = vsel %vm1431_vm7, %v3447_v8, 0.0 }
 0x2ef   :  { %v2300_v13 = vpop.f32.mrf.mxu1  ;;  %v2974_v27 = vadd.f32 %v2973_v56, %v2972_v28 }
 0x2f0   :  { %2668 = vst.msk [vmem:[%s5592_s4 + $0xcc] sm:$0xf] %vm2616_vm0, %v3177_v9  ;;  %v3175_v21 = vpack.c.bf16 %v2300_v13, %v2300_v13  ;;  %v2778_v31 = vsel %vm1431_vm7, %v2300_v13, 0.0  ;;  %v2863_v61 = vmul.f32 %v2300_v13, %v2300_v13  ;;  %v2979_v58 = vsel %vm1431_vm7, %v2865_v62, 0.0 }
 0x2f1   :  { %v2779_v33 = vadd.f32 %v2778_v31, %v2777_v29 }
 0x2f2   :  { %2666 = vst.msk [vmem:[%s5592_s4 + $0xc4] sm:$0xf] %vm2616_vm0, %v3175_v21  ;;  %v2975_v60 = vsel %vm1431_vm7, %v2863_v61, 0.0 }
 0x2f3   :  { %v2781_v54 = vadd.f32 %v2780_v41, %v2779_v33  ;;  %v2976_v30 = vadd.f32 %v2975_v60, %v2974_v27 }
 0x2f5   :  { %v2978_v18 = vadd.f32 %v2977_v26, %v2976_v30  ;;  %v2783_v37 = vadd.f32 %v2782_v2, %v2781_v54 }
 0x2f7   :  { %v2980_v1 = vadd.f32 %v2979_v58, %v2978_v18 }
 0x305   :  { %v3450_v35 = vpop.f32.mrf.mxu1 }
 0x306   :  { %v3180_v51 = vpack.c.bf16 %v3450_v35, %v3450_v35  ;;  %v2868_v4 = vmul.f32 %v3450_v35, %v3450_v35  ;;  %v2788_v20 = vsel %vm1431_vm7, %v3450_v35, 0.0 }
 0x307   :  { %v2313_v22 = vpop.f32.mrf.mxu1 }
 0x308   :  { %2671 = vst.msk [vmem:[%s5592_s4 + $0xd8] sm:$0xf] %vm2616_vm0, %v3180_v51  ;;  %v3178_v45 = vpack.c.bf16 %v2313_v22, %v2313_v22  ;;  %v2866_v12 = vmul.f32 %v2313_v22, %v2313_v22  ;;  %v2784_v49 = vsel %vm1431_vm7, %v2313_v22, 0.0  ;;  %v2985_v11 = vsel %vm1431_vm7, %v2868_v4, 0.0 }
 0x309   :  { %v3451_v15 = vpop.f32.mrf.mxu1  ;;  %v2785_v38 = vadd.f32 %v2784_v49, %v2783_v37 }
 0x30a   :  { %2669 = vst.msk [vmem:[%s5592_s4 + $0xd0] sm:$0xf] %vm2616_vm0, %v3178_v45  ;;  %v3181_v36 = vpack.c.bf16 %v3451_v15, %v3451_v15  ;;  %v2981_v46 = vsel %vm1431_vm7, %v2866_v12, 0.0  ;;  %v2869_v55 = vmul.f32 %v3451_v15, %v3451_v15  ;;  %v2790_v53 = vsel %vm1431_vm7, %v3451_v15, 0.0 }
 0x30b   :  { %v2316_v32 = vpop.f32.mrf.mxu1  ;;  %v2982_v44 = vadd.f32 %v2981_v46, %v2980_v1 }
 0x30c   :  { %2672 = vst.msk [vmem:[%s5592_s4 + $0xdc] sm:$0xf] %vm2616_vm0, %v3181_v36  ;;  %v3179_v52 = vpack.c.bf16 %v2316_v32, %v2316_v32  ;;  %v2867_v34 = vmul.f32 %v2316_v32, %v2316_v32  ;;  %v2786_v6 = vsel %vm1431_vm7, %v2316_v32, 0.0  ;;  %v2987_v25 = vsel %vm1431_vm7, %v2869_v55, 0.0 }
 0x30d   :  { %v2787_v16 = vadd.f32 %v2786_v6, %v2785_v38 }
 0x30e   :  { %2670 = vst.msk [vmem:[%s5592_s4 + $0xd4] sm:$0xf] %vm2616_vm0, %v3179_v52  ;;  %v2983_v10 = vsel %vm1431_vm7, %v2867_v34, 0.0 }
 0x30f   :  { %v2984_v39 = vadd.f32 %v2983_v10, %v2982_v44  ;;  %v2789_v57 = vadd.f32 %v2788_v20, %v2787_v16 }
 0x311   :  { %v2986_v5 = vadd.f32 %v2985_v11, %v2984_v39  ;;  %v2791_v24 = vadd.f32 %v2790_v53, %v2789_v57 }
 0x313   :  { %v2988_v8 = vadd.f32 %v2987_v25, %v2986_v5 }
 0x321   :  { %v3454_v23 = vpop.f32.mrf.mxu1 }
 0x322   :  { %v3184_v47 = vpack.c.bf16 %v3454_v23, %v3454_v23  ;;  %v2872_v21 = vmul.f32 %v3454_v23, %v3454_v23  ;;  %v2796_v33 = vsel %vm1431_vm7, %v3454_v23, 0.0 }
 0x323   :  { %v2329_v0 = vpop.f32.mrf.mxu1 }
 0x324   :  { %2675 = vst.msk [vmem:[%s5592_s4 + $0xe8] sm:$0xf] %vm2616_vm0, %v3184_v47  ;;  %v3182_v19 = vpack.c.bf16 %v2329_v0, %v2329_v0  ;;  %v2870_v50 = vmul.f32 %v2329_v0, %v2329_v0  ;;  %v2792_v43 = vsel %vm1431_vm7, %v2329_v0, 0.0  ;;  %v2993_v35 = vsel %vm1431_vm7, %v2872_v21, 0.0 }
 0x325   :  { %v3455_v42 = vpop.f32.mrf.mxu1  ;;  %v2793_v7 = vadd.f32 %v2792_v43, %v2791_v24 }
 0x326   :  { %2673 = vst.msk [vmem:[%s5592_s4 + $0xe0] sm:$0xf] %vm2616_vm0, %v3182_v19  ;;  %v3185_v59 = vpack.c.bf16 %v3455_v42, %v3455_v42  ;;  %v2989_v3 = vsel %vm1431_vm7, %v2870_v50, 0.0  ;;  %v2873_v51 = vmul.f32 %v3455_v42, %v3455_v42  ;;  %v2798_v36 = vsel %vm1431_vm7, %v3455_v42, 0.0 }
 0x327   :  { %v2332_v14 = vpop.f32.mrf.mxu1  ;;  %v2990_v29 = vadd.f32 %v2989_v3, %v2988_v8 }
 0x328   :  { %2676 = vst.msk [vmem:[%s5592_s4 + $0xec] sm:$0xf] %vm2616_vm0, %v3185_v59  ;;  %v3183_v17 = vpack.c.bf16 %v2332_v14, %v2332_v14  ;;  %v2871_v28 = vmul.f32 %v2332_v14, %v2332_v14  ;;  %v2794_v48 = vsel %vm1431_vm7, %v2332_v14, 0.0  ;;  %v2995_v60 = vsel %vm1431_vm7, %v2873_v51, 0.0 }
 0x329   :  { %v2795_v13 = vadd.f32 %v2794_v48, %v2793_v7 }
 0x32a   :  { %2674 = vst.msk [vmem:[%s5592_s4 + $0xe4] sm:$0xf] %vm2616_vm0, %v3183_v17  ;;  %v2991_v9 = vsel %vm1431_vm7, %v2871_v28, 0.0 }
 0x32b   :  { %v2992_v31 = vadd.f32 %v2991_v9, %v2990_v29  ;;  %v2797_v41 = vadd.f32 %v2796_v33, %v2795_v13 }
 0x32d   :  { %v2994_v45 = vadd.f32 %v2993_v35, %v2992_v31  ;;  %v2799_v61 = vadd.f32 %v2798_v36, %v2797_v41 }
 0x32f   :  { %v2996_v26 = vadd.f32 %v2995_v60, %v2994_v45 }
 0x338   :  { %v3458_v54 = vpop.f32.mrf.mxu1 }
 0x339   :  { %v3188_v22 = vpack.c.bf16 %v3458_v54, %v3458_v54  ;;  %v2876_v12 = vmul.f32 %v3458_v54, %v3458_v54  ;;  %v2804_v47 = vsel %vm1431_vm7, %v3458_v54, 0.0 }
 0x33a   :  { %v2345_v15 = vpop.f32.mrf.mxu1 }
 0x33b   :  { %2679 = vst.msk [vmem:[%s5592_s4 + $0xf8] sm:$0xf] %vm2616_vm0, %v3188_v22  ;;  %v3186_v32 = vpack.c.bf16 %v2345_v15, %v2345_v15  ;;  %v2800_v52 = vsel %vm1431_vm7, %v2345_v15, 0.0  ;;  %v2874_v63 = vmul.f32 %v2345_v15, %v2345_v15  ;;  %v3001_v6 = vsel %vm1431_vm7, %v2876_v12, 0.0 }
 0x33c   :  { %v3459_v56 = vpop.f32.mrf.mxu1  ;;  %v2801_v30 = vadd.f32 %v2800_v52, %v2799_v61 }
 0x33d   :  { %2677 = vst.msk [vmem:[%s5592_s4 + $0xf0] sm:$0xf] %vm2616_vm0, %v3186_v32  ;;  %v2997_v27 = vsel %vm1431_vm7, %v2874_v63, 0.0  ;;  %v3189_v40 = vpack.c.bf16 %v3459_v56, %v3459_v56  ;;  %v2877_v37 = vmul.f32 %v3459_v56, %v3459_v56  ;;  %v2806_v19 = vsel %vm1431_vm7, %v3459_v56, 0.0 }
 0x33e   :  { %v2348_v62 = vpop.f32.mrf.mxu1  ;;  %v2998_v49 = vadd.f32 %v2997_v27, %v2996_v26 }
 0x33f   :  { %2680 = vst.msk [vmem:[%s5592_s4 + $0xfc] sm:$0xf] %vm2616_vm0, %v3189_v40  ;;  %v3187_v18 = vpack.c.bf16 %v2348_v62, %v2348_v62  ;;  %v2802_v23 = vsel %vm1431_vm7, %v2348_v62, 0.0  ;;  %v2875_v2 = vmul.f32 %v2348_v62, %v2348_v62  ;;  %v3003_v42 = vsel %vm1431_vm7, %v2877_v37, 0.0 }
 0x340   :  { %v2803_v34 = vadd.f32 %v2802_v23, %v2801_v30 }
 0x341   :  { %2678 = vst.msk [vmem:[%s5592_s4 + $0xf4] sm:$0xf] %vm2616_vm0, %v3187_v18  ;;  %v2999_v0 = vsel %vm1431_vm7, %v2875_v2, 0.0 }
 0x342   :  { %v2805_v58 = vadd.f32 %v2804_v47, %v2803_v34  ;;  %v3000_v46 = vadd.f32 %v2999_v0, %v2998_v49 }
 0x344   :  { %v2807_v38 = vadd.f32 %v2806_v19, %v2805_v58  ;;  %v3002_v1 = vadd.f32 %v3001_v6, %v3000_v46 }
 0x346   :  { %v2808_v10 = vrot.slane %v2807_v38, 4  ;;  %v3004_v59 = vadd.f32 %v3003_v42, %v3002_v1 }
 0x348   :  { %v2809_v44 = vadd.f32 %v2808_v10, %v2807_v38  ;;  %v3005_v16 = vrot.slane %v3004_v59, 4 }
 0x34a   :  { %v2810_v14 = vrot.slane %v2809_v44, 2  ;;  %v3006_v4 = vadd.f32 %v3005_v16, %v3004_v59 }
 0x34c   :  { %v2811_v17 = vadd.f32 %v2810_v14, %v2809_v44  ;;  %v3007_v39 = vrot.slane %v3006_v4, 2 }
 0x34e   :  { %v2812_v20 = vrot.slane %v2811_v17, 1  ;;  %v3008_v57 = vadd.f32 %v3007_v39, %v3006_v4 }
 0x350   :  { %v3009_v11 = vrot.slane %v3008_v57, 1  ;;  %v2813_v55 = vadd.f32 %v2812_v20, %v2811_v17 }
 0x352   :  { %v3010_v50 = vadd.f32 %v3009_v11, %v3008_v57 }
 0x354   :  { %v3012_v5 = vsel %vm643_vm3, %v2813_v55, %v3010_v50 }
 0x355   :  { %3014 = vst.msk [vmem:[%s5593_s5] sm:$0x3] %vm3013_vm1, %v3012_v5 }

</bundles_post_ra>
